<compile_context>
chip_gen: v7x
topology: tpu7x:2x2x1
jax: 0.10.0
libtpu: 0.0.40
codegen_flags: <defaults>
</compile_context>

<pallas_src>
import numpy as np
import jax
import jax.numpy as jnp
from jax import lax
from jax.experimental import pallas as pl
from jax.experimental.pallas import tpu as pltpu

# ---- static model dims (cfg) ----
B, SLEN = 2, 8                     # batch, sequence length
C_IN, IMG_H, IMG_W = 3, 16, 16     # cfg.in_channels, image size
HW = IMG_H * IMG_W                 # 256 (lane axis)
F_BACKBONE = 64                    # synthetic backbone_out
HID = 32                           # cfg.hidden_dim
N_CLASSES = 3                      # cfg.n_classes
OUT_PAD = 128                      # lane-dense padded head width
GEM_P = 3.0
GEM_EPS = 1e-6

assert (SLEN * B) % 8 == 0, "feature-stage group accumulation assumes 8-aligned frame count"


# ------------------------------------------------------------------
# Single fused kernel: normalization -> backbone -> GeM -> mask -> BiLSTM -> head
# ------------------------------------------------------------------
def _net_fused_kernel(x_ref, mask_ref, wct_ref, bc_ref,
                      wih_ref, brnn_ref, whhf_ref, whhb_ref,
                      wh_ref, bh_ref, o_ref):
    n_frames = SLEN * B
    n_el = float(C_IN * HW)
    G = 4 * HID

    # ---- hoisted broadcasts / constants (JAX does not CSE broadcast_in_dim in loops) ----
    wct = wct_ref[...]                                                   # (F, C)
    w_b = [jnp.broadcast_to(wct[:, c:c + 1], (F_BACKBONE, HW)) for c in range(C_IN)]
    bias_fh = jnp.broadcast_to(bc_ref[...], (F_BACKBONE, HW))            # (F, HW)
    pool_mat = jnp.full((8, HW), 1.0 / HW, dtype=jnp.float32)            # GeM mean folded in
    row_iota = lax.broadcasted_iota(jnp.int32, (8, F_BACKBONE), 0)       # (8, F)
    onehot = [(row_iota == j).astype(jnp.float32) for j in range(8)]     # row selectors

    # ---------------- feature stage: per-frame, statically unrolled ----------------
    n_groups = n_frames // 8
    group_acc = [jnp.zeros((8, F_BACKBONE), jnp.float32) for _ in range(n_groups)]
    for n in range(n_frames):
        xf = x_ref[n].astype(jnp.float32)                                # (C, HW), dense lanes
        # single-pass mean + unbiased variance (matches torch .std(); eps added to std)
        s = jnp.sum(xf)
        ss = jnp.sum(xf * xf)
        mean = s / n_el
        var = jnp.maximum((ss - s * mean) / (n_el - 1.0), 0.0)
        xn = jnp.clip((xf - mean) / (jnp.sqrt(var) + 1e-4), -20.0, 20.0)

        # synthetic 1x1-conv backbone as C_IN VPU FMAs (keeps MXU free) + ReLU
        y = w_b[0] * xn[0:1, :]
        for c in range(1, C_IN):
            y = y + w_b[c] * xn[c:c + 1, :]
        y = jnp.maximum(y + bias_fh, 0.0)                                # (F, HW)

        # GeM p=3: clamp(min=eps), cube via multiplies, spatial mean via small MXU matmul
        yc = jnp.maximum(y, GEM_EPS)
        y3 = yc * (yc * yc)
        pooled8 = lax.dot_general(pool_mat, y3, (((1,), (1,)), ((), ())),
                                  preferred_element_type=jnp.float32)    # (8, F), rows equal
        g, j = divmod(n, 8)
        group_acc[g] = group_acc[g] + onehot[j] * pooled8                # aligned placement

    pooled = jnp.concatenate(group_acc, axis=0)                          # (N, F), time-major
    feats = jnp.exp(jnp.log(pooled) * (1.0 / GEM_P))                     # cube root (pooled only)
    feats = feats * mask_ref[...]                                        # masked scatter -> x_hidden

    # ---------------- BiLSTM: fwd+bwd input projections in ONE matmul ----------------
    xg = jnp.dot(feats, wih_ref[...], preferred_element_type=jnp.float32) + brnn_ref[...]
    whh_f = whhf_ref[...]
    whh_b = whhb_ref[...]

    def cell(gates, c):
        # PyTorch gate order: i, f, g, o
        i = jax.nn.sigmoid(gates[:, 0 * HID:1 * HID])
        f = jax.nn.sigmoid(gates[:, 1 * HID:2 * HID])
        gg = jnp.tanh(gates[:, 2 * HID:3 * HID])
        o = jax.nn.sigmoid(gates[:, 3 * HID:4 * HID])
        c2 = f * c + i * gg
        return o * jnp.tanh(c2), c2

    zeros_bh = jnp.zeros((B, HID), jnp.float32)
    h_f, c_f, h_b, c_b = zeros_bh, zeros_bh, zeros_bh, zeros_bh
    h_fwd = [None] * SLEN
    h_bwd = [None] * SLEN
    for k in range(SLEN):                      # merged fwd/bwd recurrence, fully unrolled
        tf, tb = k, SLEN - 1 - k
        gf = xg[tf * B:(tf + 1) * B, 0:G] + jnp.dot(
            h_f, whh_f, preferred_element_type=jnp.float32)
        gb = xg[tb * B:(tb + 1) * B, G:2 * G] + jnp.dot(
            h_b, whh_b, preferred_element_type=jnp.float32)
        h_f, c_f = cell(gf, c_f)
        h_b, c_b = cell(gb, c_b)
        h_fwd[tf] = h_f
        h_bwd[tb] = h_b

    # register-resident (N, 2H) hidden sequence, time-major -> head matmul directly
    hcat = jnp.concatenate(
        [jnp.concatenate([h_fwd[t], h_bwd[t]], axis=1) for t in range(SLEN)], axis=0)

    # ---------------- head (lane-dense padded output, unmasked full-width store) ------
    logits = jnp.dot(hcat, wh_ref[...], preferred_element_type=jnp.float32) + bh_ref[...]
    o_ref[...] = logits.astype(o_ref.dtype)


@jax.jit
def _forward_core(x, mask_f, params):
    """x: (B, SLEN, C, H, W), mask_f: (B, SLEN) float -> logits (B, SLEN, n_classes)."""
    n = SLEN * B
    # time-major frame ordering (row n = t*B + b): contiguous row blocks per LSTM step
    x_tm = jnp.transpose(x.reshape(B, SLEN, C_IN, HW), (1, 0, 2, 3)).reshape(n, C_IN, HW)
    mask_tm = jnp.transpose(mask_f).reshape(n, 1)

    # pad the head to 128 output lanes (lane-dense store); wrapper slices back
    wh_pad = jnp.zeros((2 * HID, OUT_PAD), jnp.float32).at[:, :N_CLASSES].set(
        params['w_head'].astype(jnp.float32))
    bh_pad = jnp.zeros((1, OUT_PAD), jnp.float32).at[:, :N_CLASSES].set(
        params['b_head'].astype(jnp.float32))

    logits_pad = pl.pallas_call(
        _net_fused_kernel,
        out_shape=jax.ShapeDtypeStruct((n, OUT_PAD), jnp.float32),
        grid_spec=pltpu.PrefetchScalarGridSpec(
            num_scalar_prefetch=0,
            grid=(1,),
            in_specs=[
                pl.BlockSpec((n, C_IN, HW), lambda i: (0, 0, 0)),
                pl.BlockSpec((n, 1), lambda i: (0, 0)),
                pl.BlockSpec((F_BACKBONE, C_IN), lambda i: (0, 0)),
                pl.BlockSpec((F_BACKBONE, 1), lambda i: (0, 0)),
                pl.BlockSpec((F_BACKBONE, 8 * HID), lambda i: (0, 0)),
                pl.BlockSpec((1, 8 * HID), lambda i: (0, 0)),
                pl.BlockSpec((HID, 4 * HID), lambda i: (0, 0)),
                pl.BlockSpec((HID, 4 * HID), lambda i: (0, 0)),
                pl.BlockSpec((2 * HID, OUT_PAD), lambda i: (0, 0)),
                pl.BlockSpec((1, OUT_PAD), lambda i: (0, 0)),
            ],
            out_specs=pl.BlockSpec((n, OUT_PAD), lambda i: (0, 0)),
        ),
        compiler_params=pltpu.CompilerParams(dimension_semantics=("arbitrary",)),
    )(x_tm, mask_tm, params['wct'], params['bc'], params['wih'], params['b_rnn'],
      params['whh_f'], params['whh_b'], wh_pad, bh_pad)

    logits_tm = logits_pad[:, :N_CLASSES]
    return jnp.transpose(logits_tm.reshape(SLEN, B, N_CLASSES), (1, 0, 2))


# ------------------------------------------------------------------
# Full Net.forward (losses / eval gathers in plain JAX; the kernel path is static-shaped)
# ------------------------------------------------------------------
def net_forward(batch, params, training=False):
    x = batch['input']                              # (b, slen, C, H, W)
    mask_np = np.asarray(batch['mask'])             # (b, slen)
    b, slen = x.shape[:2]
    mask_f = jnp.asarray(mask_np, jnp.float32)

    logits = _forward_core(x, mask_f, params)       # (b, slen, n_classes)

    outputs = {}
    if 'target' in batch:
        y = batch['target'][:, :, [0, 1, 2, 2]]
        y_mask = batch['target_mask'][:, :, [0, 1, 2, 2]]
        logits2 = logits[:, :, [0, 1, 2, 2]]

        wt = (jnp.max(y_mask, axis=2).sum(axis=1) / 20.0)[:, None]   # (b, 1)
        loss_xy = jnp.abs(logits2 - y)                               # L1, reduction='none'
        m = (y_mask == 1).astype(jnp.float32)
        outputs['loss_l1'] = jnp.sum(loss_xy * m) / jnp.sum(m)
        loss_xy_wt = loss_xy * jnp.broadcast_to(wt, (b, slen))[:, :, None]
        outputs['loss'] = jnp.sum(loss_xy_wt * m) / jnp.sum(m)

        ym_np = np.asarray(y_mask)
        if ym_np[:, :, 2:].sum() == 0:
            y = y.at[:, :, 2:].set(y[:, :, :2])
            y_mask = y_mask.at[:, :, 2:].set(y_mask[:, :, :2])
            logits2 = logits2.at[:, :, 2:].set(logits2[:, :, :2])
        elif ym_np[:, :, :2].sum() == 0:
            y = y.at[:, :, :2].set(y[:, :, 2:])
            y_mask = y_mask.at[:, :, :2].set(y_mask[:, :, 2:])
            logits2 = logits2.at[:, :, :2].set(logits2[:, :, 2:])

        loss_xy2 = jnp.abs(logits2 - y)
        m_nfn = (y_mask[:, :, :2] == 1).astype(jnp.float32)
        m_scs = (y_mask[:, :, 2:] == 1).astype(jnp.float32)
        outputs['loss_l1_nfn'] = jnp.sum(loss_xy2[:, :, :2] * m_nfn) / jnp.sum(m_nfn)
        outputs['loss_l1_scs'] = jnp.sum(loss_xy2[:, :, 2:] * m_scs) / jnp.sum(m_scs)

    if not training:
        # variable-length boolean-mask selection is inherent to the spec; done on host
        # (outside the static-shaped jitted kernel path, so it never forces a recompile).
        idx = np.nonzero(mask_np.reshape(-1) == 1)[0]
        series_ids = jnp.repeat(batch['series_id'][:, None], slen, axis=1)
        outputs['series_id'] = series_ids.reshape(-1)[idx]
        outputs['instance_number'] = batch['instance_numbers'].reshape(-1)[idx]
        outputs['logits'] = logits.reshape(b * slen, -1)[idx]
    return outputs


if __name__ == "__main__":
    key = jax.random.PRNGKey(0)
    ks = jax.random.split(key, 12)

    # deterministic example batch
    x_in = jax.random.normal(ks[0], (B, SLEN, C_IN, IMG_H, IMG_W), jnp.float32) * 40.0 + 120.0
    mask = np.ones((B, SLEN), dtype=np.int32)
    mask[0, 6:] = 0
    mask[1, 5:] = 0
    target = jax.random.normal(ks[1], (B, SLEN, N_CLASSES), jnp.float32)
    target_mask = (jax.random.uniform(ks[2], (B, SLEN, N_CLASSES)) > 0.3).astype(jnp.float32)
    series_id = jnp.arange(B, dtype=jnp.int32) + 100
    instance_numbers = jnp.arange(B * SLEN, dtype=jnp.int32).reshape(B, SLEN)

    # deterministic synthetic parameters (not a checkpoint)
    params = dict(
        wct=jax.random.normal(ks[3], (F_BACKBONE, C_IN), jnp.float32) * 0.2,     # 1x1 conv (F,C)
        bc=jax.random.normal(ks[4], (F_BACKBONE, 1), jnp.float32) * 0.05,
        wih=jax.random.normal(ks[5], (F_BACKBONE, 8 * HID), jnp.float32) * 0.08,  # [fwd|bwd] W_ih
        b_rnn=jax.random.normal(ks[6], (1, 8 * HID), jnp.float32) * 0.02,         # b_ih+b_hh, both dirs
        whh_f=jax.random.normal(ks[7], (HID, 4 * HID), jnp.float32) * 0.08,
        whh_b=jax.random.normal(ks[8], (HID, 4 * HID), jnp.float32) * 0.08,
        w_head=jax.random.normal(ks[9], (2 * HID, N_CLASSES), jnp.float32) * 0.08,
        b_head=jax.random.normal(ks[10], (1, N_CLASSES), jnp.float32) * 0.02,
    )

    batch = dict(input=x_in, mask=mask, target=target, target_mask=target_mask,
                 series_id=series_id, instance_numbers=instance_numbers)

    outputs = net_forward(batch, params, training=False)
    jax.block_until_ready(outputs['logits'])
    jax.block_until_ready(outputs['loss'])
    jax.block_until_ready(outputs['loss_l1'])
    print("KERNEL_OK")
</pallas_src>

<mosaic_0001>
module attributes {stable_mosaic.version = 11 : i64} {
  func.func @_net_fused_kernel(%arg0: i32, %arg1: memref<16x3x256xf32, #tpu.memory_space<vmem>>, %arg2: memref<16x1xf32, #tpu.memory_space<vmem>>, %arg3: memref<64x3xf32, #tpu.memory_space<vmem>>, %arg4: memref<64x1xf32, #tpu.memory_space<vmem>>, %arg5: memref<64x256xf32, #tpu.memory_space<vmem>>, %arg6: memref<1x256xf32, #tpu.memory_space<vmem>>, %arg7: memref<32x128xf32, #tpu.memory_space<vmem>>, %arg8: memref<32x128xf32, #tpu.memory_space<vmem>>, %arg9: memref<64x128xf32, #tpu.memory_space<vmem>>, %arg10: memref<1x128xf32, #tpu.memory_space<vmem>>, %arg11: memref<16x128xf32, #tpu.memory_space<vmem>>) attributes {dimension_semantics = [#tpu.dimension_semantics<arbitrary>], iteration_bounds = array<i64: 1>, scalar_prefetch = 0 : i64, scratch_operands = 0 : i64, tpu.core_type = #tpu.core_type<tc>, window_params = [{pipeline_mode = #tpu.pipeline_mode<synchronous>, transform_indices = @transform_0, window_bounds = array<i64: 16, 3, 256>}, {pipeline_mode = #tpu.pipeline_mode<synchronous>, transform_indices = @transform_1, window_bounds = array<i64: 16, 1>}, {pipeline_mode = #tpu.pipeline_mode<synchronous>, transform_indices = @transform_2, window_bounds = array<i64: 64, 3>}, {pipeline_mode = #tpu.pipeline_mode<synchronous>, transform_indices = @transform_3, window_bounds = array<i64: 64, 1>}, {pipeline_mode = #tpu.pipeline_mode<synchronous>, transform_indices = @transform_4, window_bounds = array<i64: 64, 256>}, {pipeline_mode = #tpu.pipeline_mode<synchronous>, transform_indices = @transform_5, window_bounds = array<i64: 1, 256>}, {pipeline_mode = #tpu.pipeline_mode<synchronous>, transform_indices = @transform_6, window_bounds = array<i64: 32, 128>}, {pipeline_mode = #tpu.pipeline_mode<synchronous>, transform_indices = @transform_7, window_bounds = array<i64: 32, 128>}, {pipeline_mode = #tpu.pipeline_mode<synchronous>, transform_indices = @transform_8, window_bounds = array<i64: 64, 128>}, {pipeline_mode = #tpu.pipeline_mode<synchronous>, transform_indices = @transform_9, window_bounds = array<i64: 1, 128>}, {pipeline_mode = #tpu.pipeline_mode<synchronous>, transform_indices = @transform_10, window_bounds = array<i64: 16, 128>}]} {
    %c0 = arith.constant 0 : index
    %c0_0 = arith.constant 0 : index
    %0 = vector.load %arg3[%c0, %c0_0] : memref<64x3xf32, #tpu.memory_space<vmem>>, vector<64x3xf32>
    %1 = vector.extract_strided_slice %0 {offsets = [0, 0], sizes = [64, 1], strides = [1, 1]} : vector<64x3xf32> to vector<64x1xf32>
    %2 = vector.shape_cast %1 : vector<64x1xf32> to vector<64x1xf32>
    %3 = vector.broadcast %2 : vector<64x1xf32> to vector<64x256xf32>
    %4 = vector.extract_strided_slice %0 {offsets = [0, 1], sizes = [64, 1], strides = [1, 1]} : vector<64x3xf32> to vector<64x1xf32>
    %5 = vector.shape_cast %4 : vector<64x1xf32> to vector<64x1xf32>
    %6 = vector.broadcast %5 : vector<64x1xf32> to vector<64x256xf32>
    %7 = vector.extract_strided_slice %0 {offsets = [0, 2], sizes = [64, 1], strides = [1, 1]} : vector<64x3xf32> to vector<64x1xf32>
    %8 = vector.shape_cast %7 : vector<64x1xf32> to vector<64x1xf32>
    %9 = vector.broadcast %8 : vector<64x1xf32> to vector<64x256xf32>
    %c0_1 = arith.constant 0 : index
    %c0_2 = arith.constant 0 : index
    %10 = vector.load %arg4[%c0_1, %c0_2] : memref<64x1xf32, #tpu.memory_space<vmem>>, vector<64x1xf32>
    %11 = vector.shape_cast %10 : vector<64x1xf32> to vector<64x1xf32>
    %12 = vector.broadcast %11 : vector<64x1xf32> to vector<64x256xf32>
    %cst = arith.constant 3.906250e-03 : f32
    %13 = vector.broadcast %cst : f32 to vector<8x256xf32>
    %14 = tpu.iota {dimensions = array<i32: 0>} : vector<8x64xi32>
    %c0_i32 = arith.constant 0 : i32
    %15 = vector.broadcast %c0_i32 : i32 to vector<8x64xi32>
    %16 = arith.cmpi eq, %14, %15 : vector<8x64xi32>
    %17 = arith.extui %16 : vector<8x64xi1> to vector<8x64xi32>
    %18 = arith.sitofp %17 : vector<8x64xi32> to vector<8x64xf32>
    %c1_i32 = arith.constant 1 : i32
    %19 = vector.broadcast %c1_i32 : i32 to vector<8x64xi32>
    %20 = arith.cmpi eq, %14, %19 : vector<8x64xi32>
    %21 = arith.extui %20 : vector<8x64xi1> to vector<8x64xi32>
    %22 = arith.sitofp %21 : vector<8x64xi32> to vector<8x64xf32>
    %c2_i32 = arith.constant 2 : i32
    %23 = vector.broadcast %c2_i32 : i32 to vector<8x64xi32>
    %24 = arith.cmpi eq, %14, %23 : vector<8x64xi32>
    %25 = arith.extui %24 : vector<8x64xi1> to vector<8x64xi32>
    %26 = arith.sitofp %25 : vector<8x64xi32> to vector<8x64xf32>
    %c3_i32 = arith.constant 3 : i32
    %27 = vector.broadcast %c3_i32 : i32 to vector<8x64xi32>
    %28 = arith.cmpi eq, %14, %27 : vector<8x64xi32>
    %29 = arith.extui %28 : vector<8x64xi1> to vector<8x64xi32>
    %30 = arith.sitofp %29 : vector<8x64xi32> to vector<8x64xf32>
    %c4_i32 = arith.constant 4 : i32
    %31 = vector.broadcast %c4_i32 : i32 to vector<8x64xi32>
    %32 = arith.cmpi eq, %14, %31 : vector<8x64xi32>
    %33 = arith.extui %32 : vector<8x64xi1> to vector<8x64xi32>
    %34 = arith.sitofp %33 : vector<8x64xi32> to vector<8x64xf32>
    %c5_i32 = arith.constant 5 : i32
    %35 = vector.broadcast %c5_i32 : i32 to vector<8x64xi32>
    %36 = arith.cmpi eq, %14, %35 : vector<8x64xi32>
    %37 = arith.extui %36 : vector<8x64xi1> to vector<8x64xi32>
    %38 = arith.sitofp %37 : vector<8x64xi32> to vector<8x64xf32>
    %c6_i32 = arith.constant 6 : i32
    %39 = vector.broadcast %c6_i32 : i32 to vector<8x64xi32>
    %40 = arith.cmpi eq, %14, %39 : vector<8x64xi32>
    %41 = arith.extui %40 : vector<8x64xi1> to vector<8x64xi32>
    %42 = arith.sitofp %41 : vector<8x64xi32> to vector<8x64xf32>
    %c7_i32 = arith.constant 7 : i32
    %43 = vector.broadcast %c7_i32 : i32 to vector<8x64xi32>
    %44 = arith.cmpi eq, %14, %43 : vector<8x64xi32>
    %45 = arith.extui %44 : vector<8x64xi1> to vector<8x64xi32>
    %46 = arith.sitofp %45 : vector<8x64xi32> to vector<8x64xf32>
    %cst_3 = arith.constant 0.000000e+00 : f32
    %47 = vector.broadcast %cst_3 : f32 to vector<8x64xf32>
    %cst_4 = arith.constant 0.000000e+00 : f32
    %48 = vector.broadcast %cst_4 : f32 to vector<8x64xf32>
    %c0_5 = arith.constant 0 : index
    %c0_6 = arith.constant 0 : index
    %c0_7 = arith.constant 0 : index
    %49 = vector.load %arg1[%c0_5, %c0_6, %c0_7] : memref<16x3x256xf32, #tpu.memory_space<vmem>>, vector<1x3x256xf32>
    %50 = vector.shape_cast %49 : vector<1x3x256xf32> to vector<3x256xf32>
    %51 = vector.shape_cast %50 : vector<3x256xf32> to vector<1x3x256xf32>
    %cst_8 = arith.constant dense<0.000000e+00> : vector<1xf32>
    %52 = vector.multi_reduction <add>, %51, %cst_8 [1, 2] : vector<1x3x256xf32> to vector<1xf32>
    %53 = vector.shape_cast %52 : vector<1xf32> to vector<1x1x1xf32>
    %54 = vector.extract %53[0, 0, 0] : f32 from vector<1x1x1xf32>
    %55 = arith.mulf %50, %50 : vector<3x256xf32>
    %56 = vector.shape_cast %55 : vector<3x256xf32> to vector<1x3x256xf32>
    %cst_9 = arith.constant dense<0.000000e+00> : vector<1xf32>
    %57 = vector.multi_reduction <add>, %56, %cst_9 [1, 2] : vector<1x3x256xf32> to vector<1xf32>
    %58 = vector.shape_cast %57 : vector<1xf32> to vector<1x1x1xf32>
    %59 = vector.extract %58[0, 0, 0] : f32 from vector<1x1x1xf32>
    %cst_10 = arith.constant 7.680000e+02 : f32
    %60 = arith.divf %54, %cst_10 : f32
    %61 = arith.mulf %54, %60 : f32
    %62 = arith.subf %59, %61 : f32
    %cst_11 = arith.constant 7.670000e+02 : f32
    %63 = arith.divf %62, %cst_11 : f32
    %cst_12 = arith.constant 0.000000e+00 : f32
    %64 = arith.maximumf %63, %cst_12 : f32
    %65 = vector.broadcast %60 : f32 to vector<3x256xf32>
    %66 = arith.subf %50, %65 : vector<3x256xf32>
    %67 = math.sqrt %64 : f32
    %cst_13 = arith.constant 9.99999974E-5 : f32
    %68 = arith.addf %67, %cst_13 : f32
    %69 = vector.broadcast %68 : f32 to vector<3x256xf32>
    %70 = arith.divf %66, %69 : vector<3x256xf32>
    %cst_14 = arith.constant -2.000000e+01 : f32
    %cst_15 = arith.constant 2.000000e+01 : f32
    %71 = vector.broadcast %cst_14 : f32 to vector<3x256xf32>
    %72 = arith.maximumf %71, %70 : vector<3x256xf32>
    %73 = vector.broadcast %cst_15 : f32 to vector<3x256xf32>
    %74 = arith.minimumf %73, %72 : vector<3x256xf32>
    %75 = vector.extract_strided_slice %74 {offsets = [0, 0], sizes = [1, 256], strides = [1, 1]} : vector<3x256xf32> to vector<1x256xf32>
    %76 = vector.broadcast %75 : vector<1x256xf32> to vector<64x256xf32>
    %77 = arith.mulf %3, %76 : vector<64x256xf32>
    %78 = vector.extract_strided_slice %74 {offsets = [1, 0], sizes = [1, 256], strides = [1, 1]} : vector<3x256xf32> to vector<1x256xf32>
    %79 = vector.broadcast %78 : vector<1x256xf32> to vector<64x256xf32>
    %80 = arith.mulf %6, %79 : vector<64x256xf32>
    %81 = arith.addf %77, %80 : vector<64x256xf32>
    %82 = vector.extract_strided_slice %74 {offsets = [2, 0], sizes = [1, 256], strides = [1, 1]} : vector<3x256xf32> to vector<1x256xf32>
    %83 = vector.broadcast %82 : vector<1x256xf32> to vector<64x256xf32>
    %84 = arith.mulf %9, %83 : vector<64x256xf32>
    %85 = arith.addf %81, %84 : vector<64x256xf32>
    %86 = arith.addf %85, %12 : vector<64x256xf32>
    %cst_16 = arith.constant 0.000000e+00 : f32
    %87 = vector.broadcast %cst_16 : f32 to vector<64x256xf32>
    %88 = arith.maximumf %86, %87 : vector<64x256xf32>
    %cst_17 = arith.constant 9.99999997E-7 : f32
    %89 = vector.broadcast %cst_17 : f32 to vector<64x256xf32>
    %90 = arith.maximumf %88, %89 : vector<64x256xf32>
    %91 = arith.mulf %90, %90 : vector<64x256xf32>
    %92 = arith.mulf %90, %91 : vector<64x256xf32>
    %cst_18 = arith.constant dense<0.000000e+00> : vector<8x64xf32>
    %93 = tpu.matmul %13, %92, %cst_18 {dimension_numbers = #tpu.dot_dimension_numbers<[1], [1], [0], [0], [0, 0, 1, 0], [], []>} : vector<8x256xf32>, vector<64x256xf32>, vector<8x64xf32> -> vector<8x64xf32>
    %94 = arith.mulf %18, %93 : vector<8x64xf32>
    %95 = arith.addf %47, %94 : vector<8x64xf32>
    %c1 = arith.constant 1 : index
    %c0_19 = arith.constant 0 : index
    %c0_20 = arith.constant 0 : index
    %96 = vector.load %arg1[%c1, %c0_19, %c0_20] : memref<16x3x256xf32, #tpu.memory_space<vmem>>, vector<1x3x256xf32>
    %97 = vector.shape_cast %96 : vector<1x3x256xf32> to vector<3x256xf32>
    %98 = vector.shape_cast %97 : vector<3x256xf32> to vector<1x3x256xf32>
    %cst_21 = arith.constant dense<0.000000e+00> : vector<1xf32>
    %99 = vector.multi_reduction <add>, %98, %cst_21 [1, 2] : vector<1x3x256xf32> to vector<1xf32>
    %100 = vector.shape_cast %99 : vector<1xf32> to vector<1x1x1xf32>
    %101 = vector.extract %100[0, 0, 0] : f32 from vector<1x1x1xf32>
    %102 = arith.mulf %97, %97 : vector<3x256xf32>
    %103 = vector.shape_cast %102 : vector<3x256xf32> to vector<1x3x256xf32>
    %cst_22 = arith.constant dense<0.000000e+00> : vector<1xf32>
    %104 = vector.multi_reduction <add>, %103, %cst_22 [1, 2] : vector<1x3x256xf32> to vector<1xf32>
    %105 = vector.shape_cast %104 : vector<1xf32> to vector<1x1x1xf32>
    %106 = vector.extract %105[0, 0, 0] : f32 from vector<1x1x1xf32>
    %cst_23 = arith.constant 7.680000e+02 : f32
    %107 = arith.divf %101, %cst_23 : f32
    %108 = arith.mulf %101, %107 : f32
    %109 = arith.subf %106, %108 : f32
    %cst_24 = arith.constant 7.670000e+02 : f32
    %110 = arith.divf %109, %cst_24 : f32
    %cst_25 = arith.constant 0.000000e+00 : f32
    %111 = arith.maximumf %110, %cst_25 : f32
    %112 = vector.broadcast %107 : f32 to vector<3x256xf32>
    %113 = arith.subf %97, %112 : vector<3x256xf32>
    %114 = math.sqrt %111 : f32
    %cst_26 = arith.constant 9.99999974E-5 : f32
    %115 = arith.addf %114, %cst_26 : f32
    %116 = vector.broadcast %115 : f32 to vector<3x256xf32>
    %117 = arith.divf %113, %116 : vector<3x256xf32>
    %cst_27 = arith.constant -2.000000e+01 : f32
    %cst_28 = arith.constant 2.000000e+01 : f32
    %118 = vector.broadcast %cst_27 : f32 to vector<3x256xf32>
    %119 = arith.maximumf %118, %117 : vector<3x256xf32>
    %120 = vector.broadcast %cst_28 : f32 to vector<3x256xf32>
    %121 = arith.minimumf %120, %119 : vector<3x256xf32>
    %122 = vector.extract_strided_slice %121 {offsets = [0, 0], sizes = [1, 256], strides = [1, 1]} : vector<3x256xf32> to vector<1x256xf32>
    %123 = vector.broadcast %122 : vector<1x256xf32> to vector<64x256xf32>
    %124 = arith.mulf %3, %123 : vector<64x256xf32>
    %125 = vector.extract_strided_slice %121 {offsets = [1, 0], sizes = [1, 256], strides = [1, 1]} : vector<3x256xf32> to vector<1x256xf32>
    %126 = vector.broadcast %125 : vector<1x256xf32> to vector<64x256xf32>
    %127 = arith.mulf %6, %126 : vector<64x256xf32>
    %128 = arith.addf %124, %127 : vector<64x256xf32>
    %129 = vector.extract_strided_slice %121 {offsets = [2, 0], sizes = [1, 256], strides = [1, 1]} : vector<3x256xf32> to vector<1x256xf32>
    %130 = vector.broadcast %129 : vector<1x256xf32> to vector<64x256xf32>
    %131 = arith.mulf %9, %130 : vector<64x256xf32>
    %132 = arith.addf %128, %131 : vector<64x256xf32>
    %133 = arith.addf %132, %12 : vector<64x256xf32>
    %cst_29 = arith.constant 0.000000e+00 : f32
    %134 = vector.broadcast %cst_29 : f32 to vector<64x256xf32>
    %135 = arith.maximumf %133, %134 : vector<64x256xf32>
    %cst_30 = arith.constant 9.99999997E-7 : f32
    %136 = vector.broadcast %cst_30 : f32 to vector<64x256xf32>
    %137 = arith.maximumf %135, %136 : vector<64x256xf32>
    %138 = arith.mulf %137, %137 : vector<64x256xf32>
    %139 = arith.mulf %137, %138 : vector<64x256xf32>
    %cst_31 = arith.constant dense<0.000000e+00> : vector<8x64xf32>
    %140 = tpu.matmul %13, %139, %cst_31 {dimension_numbers = #tpu.dot_dimension_numbers<[1], [1], [0], [0], [0, 0, 1, 0], [], []>} : vector<8x256xf32>, vector<64x256xf32>, vector<8x64xf32> -> vector<8x64xf32>
    %141 = arith.mulf %22, %140 : vector<8x64xf32>
    %142 = arith.addf %95, %141 : vector<8x64xf32>
    %c2 = arith.constant 2 : index
    %c0_32 = arith.constant 0 : index
    %c0_33 = arith.constant 0 : index
    %143 = vector.load %arg1[%c2, %c0_32, %c0_33] : memref<16x3x256xf32, #tpu.memory_space<vmem>>, vector<1x3x256xf32>
    %144 = vector.shape_cast %143 : vector<1x3x256xf32> to vector<3x256xf32>
    %145 = vector.shape_cast %144 : vector<3x256xf32> to vector<1x3x256xf32>
    %cst_34 = arith.constant dense<0.000000e+00> : vector<1xf32>
    %146 = vector.multi_reduction <add>, %145, %cst_34 [1, 2] : vector<1x3x256xf32> to vector<1xf32>
    %147 = vector.shape_cast %146 : vector<1xf32> to vector<1x1x1xf32>
    %148 = vector.extract %147[0, 0, 0] : f32 from vector<1x1x1xf32>
    %149 = arith.mulf %144, %144 : vector<3x256xf32>
    %150 = vector.shape_cast %149 : vector<3x256xf32> to vector<1x3x256xf32>
    %cst_35 = arith.constant dense<0.000000e+00> : vector<1xf32>
    %151 = vector.multi_reduction <add>, %150, %cst_35 [1, 2] : vector<1x3x256xf32> to vector<1xf32>
    %152 = vector.shape_cast %151 : vector<1xf32> to vector<1x1x1xf32>
    %153 = vector.extract %152[0, 0, 0] : f32 from vector<1x1x1xf32>
    %cst_36 = arith.constant 7.680000e+02 : f32
    %154 = arith.divf %148, %cst_36 : f32
    %155 = arith.mulf %148, %154 : f32
    %156 = arith.subf %153, %155 : f32
    %cst_37 = arith.constant 7.670000e+02 : f32
    %157 = arith.divf %156, %cst_37 : f32
    %cst_38 = arith.constant 0.000000e+00 : f32
    %158 = arith.maximumf %157, %cst_38 : f32
    %159 = vector.broadcast %154 : f32 to vector<3x256xf32>
    %160 = arith.subf %144, %159 : vector<3x256xf32>
    %161 = math.sqrt %158 : f32
    %cst_39 = arith.constant 9.99999974E-5 : f32
    %162 = arith.addf %161, %cst_39 : f32
    %163 = vector.broadcast %162 : f32 to vector<3x256xf32>
    %164 = arith.divf %160, %163 : vector<3x256xf32>
    %cst_40 = arith.constant -2.000000e+01 : f32
    %cst_41 = arith.constant 2.000000e+01 : f32
    %165 = vector.broadcast %cst_40 : f32 to vector<3x256xf32>
    %166 = arith.maximumf %165, %164 : vector<3x256xf32>
    %167 = vector.broadcast %cst_41 : f32 to vector<3x256xf32>
    %168 = arith.minimumf %167, %166 : vector<3x256xf32>
    %169 = vector.extract_strided_slice %168 {offsets = [0, 0], sizes = [1, 256], strides = [1, 1]} : vector<3x256xf32> to vector<1x256xf32>
    %170 = vector.broadcast %169 : vector<1x256xf32> to vector<64x256xf32>
    %171 = arith.mulf %3, %170 : vector<64x256xf32>
    %172 = vector.extract_strided_slice %168 {offsets = [1, 0], sizes = [1, 256], strides = [1, 1]} : vector<3x256xf32> to vector<1x256xf32>
    %173 = vector.broadcast %172 : vector<1x256xf32> to vector<64x256xf32>
    %174 = arith.mulf %6, %173 : vector<64x256xf32>
    %175 = arith.addf %171, %174 : vector<64x256xf32>
    %176 = vector.extract_strided_slice %168 {offsets = [2, 0], sizes = [1, 256], strides = [1, 1]} : vector<3x256xf32> to vector<1x256xf32>
    %177 = vector.broadcast %176 : vector<1x256xf32> to vector<64x256xf32>
    %178 = arith.mulf %9, %177 : vector<64x256xf32>
    %179 = arith.addf %175, %178 : vector<64x256xf32>
    %180 = arith.addf %179, %12 : vector<64x256xf32>
    %cst_42 = arith.constant 0.000000e+00 : f32
    %181 = vector.broadcast %cst_42 : f32 to vector<64x256xf32>
    %182 = arith.maximumf %180, %181 : vector<64x256xf32>
    %cst_43 = arith.constant 9.99999997E-7 : f32
    %183 = vector.broadcast %cst_43 : f32 to vector<64x256xf32>
    %184 = arith.maximumf %182, %183 : vector<64x256xf32>
    %185 = arith.mulf %184, %184 : vector<64x256xf32>
    %186 = arith.mulf %184, %185 : vector<64x256xf32>
    %cst_44 = arith.constant dense<0.000000e+00> : vector<8x64xf32>
    %187 = tpu.matmul %13, %186, %cst_44 {dimension_numbers = #tpu.dot_dimension_numbers<[1], [1], [0], [0], [0, 0, 1, 0], [], []>} : vector<8x256xf32>, vector<64x256xf32>, vector<8x64xf32> -> vector<8x64xf32>
    %188 = arith.mulf %26, %187 : vector<8x64xf32>
    %189 = arith.addf %142, %188 : vector<8x64xf32>
    %c3 = arith.constant 3 : index
    %c0_45 = arith.constant 0 : index
    %c0_46 = arith.constant 0 : index
    %190 = vector.load %arg1[%c3, %c0_45, %c0_46] : memref<16x3x256xf32, #tpu.memory_space<vmem>>, vector<1x3x256xf32>
    %191 = vector.shape_cast %190 : vector<1x3x256xf32> to vector<3x256xf32>
    %192 = vector.shape_cast %191 : vector<3x256xf32> to vector<1x3x256xf32>
    %cst_47 = arith.constant dense<0.000000e+00> : vector<1xf32>
    %193 = vector.multi_reduction <add>, %192, %cst_47 [1, 2] : vector<1x3x256xf32> to vector<1xf32>
    %194 = vector.shape_cast %193 : vector<1xf32> to vector<1x1x1xf32>
    %195 = vector.extract %194[0, 0, 0] : f32 from vector<1x1x1xf32>
    %196 = arith.mulf %191, %191 : vector<3x256xf32>
    %197 = vector.shape_cast %196 : vector<3x256xf32> to vector<1x3x256xf32>
    %cst_48 = arith.constant dense<0.000000e+00> : vector<1xf32>
    %198 = vector.multi_reduction <add>, %197, %cst_48 [1, 2] : vector<1x3x256xf32> to vector<1xf32>
    %199 = vector.shape_cast %198 : vector<1xf32> to vector<1x1x1xf32>
    %200 = vector.extract %199[0, 0, 0] : f32 from vector<1x1x1xf32>
    %cst_49 = arith.constant 7.680000e+02 : f32
    %201 = arith.divf %195, %cst_49 : f32
    %202 = arith.mulf %195, %201 : f32
    %203 = arith.subf %200, %202 : f32
    %cst_50 = arith.constant 7.670000e+02 : f32
    %204 = arith.divf %203, %cst_50 : f32
    %cst_51 = arith.constant 0.000000e+00 : f32
    %205 = arith.maximumf %204, %cst_51 : f32
    %206 = vector.broadcast %201 : f32 to vector<3x256xf32>
    %207 = arith.subf %191, %206 : vector<3x256xf32>
    %208 = math.sqrt %205 : f32
    %cst_52 = arith.constant 9.99999974E-5 : f32
    %209 = arith.addf %208, %cst_52 : f32
    %210 = vector.broadcast %209 : f32 to vector<3x256xf32>
    %211 = arith.divf %207, %210 : vector<3x256xf32>
    %cst_53 = arith.constant -2.000000e+01 : f32
    %cst_54 = arith.constant 2.000000e+01 : f32
    %212 = vector.broadcast %cst_53 : f32 to vector<3x256xf32>
    %213 = arith.maximumf %212, %211 : vector<3x256xf32>
    %214 = vector.broadcast %cst_54 : f32 to vector<3x256xf32>
    %215 = arith.minimumf %214, %213 : vector<3x256xf32>
    %216 = vector.extract_strided_slice %215 {offsets = [0, 0], sizes = [1, 256], strides = [1, 1]} : vector<3x256xf32> to vector<1x256xf32>
    %217 = vector.broadcast %216 : vector<1x256xf32> to vector<64x256xf32>
    %218 = arith.mulf %3, %217 : vector<64x256xf32>
    %219 = vector.extract_strided_slice %215 {offsets = [1, 0], sizes = [1, 256], strides = [1, 1]} : vector<3x256xf32> to vector<1x256xf32>
    %220 = vector.broadcast %219 : vector<1x256xf32> to vector<64x256xf32>
    %221 = arith.mulf %6, %220 : vector<64x256xf32>
    %222 = arith.addf %218, %221 : vector<64x256xf32>
    %223 = vector.extract_strided_slice %215 {offsets = [2, 0], sizes = [1, 256], strides = [1, 1]} : vector<3x256xf32> to vector<1x256xf32>
    %224 = vector.broadcast %223 : vector<1x256xf32> to vector<64x256xf32>
    %225 = arith.mulf %9, %224 : vector<64x256xf32>
    %226 = arith.addf %222, %225 : vector<64x256xf32>
    %227 = arith.addf %226, %12 : vector<64x256xf32>
    %cst_55 = arith.constant 0.000000e+00 : f32
    %228 = vector.broadcast %cst_55 : f32 to vector<64x256xf32>
    %229 = arith.maximumf %227, %228 : vector<64x256xf32>
    %cst_56 = arith.constant 9.99999997E-7 : f32
    %230 = vector.broadcast %cst_56 : f32 to vector<64x256xf32>
    %231 = arith.maximumf %229, %230 : vector<64x256xf32>
    %232 = arith.mulf %231, %231 : vector<64x256xf32>
    %233 = arith.mulf %231, %232 : vector<64x256xf32>
    %cst_57 = arith.constant dense<0.000000e+00> : vector<8x64xf32>
    %234 = tpu.matmul %13, %233, %cst_57 {dimension_numbers = #tpu.dot_dimension_numbers<[1], [1], [0], [0], [0, 0, 1, 0], [], []>} : vector<8x256xf32>, vector<64x256xf32>, vector<8x64xf32> -> vector<8x64xf32>
    %235 = arith.mulf %30, %234 : vector<8x64xf32>
    %236 = arith.addf %189, %235 : vector<8x64xf32>
    %c4 = arith.constant 4 : index
    %c0_58 = arith.constant 0 : index
    %c0_59 = arith.constant 0 : index
    %237 = vector.load %arg1[%c4, %c0_58, %c0_59] : memref<16x3x256xf32, #tpu.memory_space<vmem>>, vector<1x3x256xf32>
    %238 = vector.shape_cast %237 : vector<1x3x256xf32> to vector<3x256xf32>
    %239 = vector.shape_cast %238 : vector<3x256xf32> to vector<1x3x256xf32>
    %cst_60 = arith.constant dense<0.000000e+00> : vector<1xf32>
    %240 = vector.multi_reduction <add>, %239, %cst_60 [1, 2] : vector<1x3x256xf32> to vector<1xf32>
    %241 = vector.shape_cast %240 : vector<1xf32> to vector<1x1x1xf32>
    %242 = vector.extract %241[0, 0, 0] : f32 from vector<1x1x1xf32>
    %243 = arith.mulf %238, %238 : vector<3x256xf32>
    %244 = vector.shape_cast %243 : vector<3x256xf32> to vector<1x3x256xf32>
    %cst_61 = arith.constant dense<0.000000e+00> : vector<1xf32>
    %245 = vector.multi_reduction <add>, %244, %cst_61 [1, 2] : vector<1x3x256xf32> to vector<1xf32>
    %246 = vector.shape_cast %245 : vector<1xf32> to vector<1x1x1xf32>
    %247 = vector.extract %246[0, 0, 0] : f32 from vector<1x1x1xf32>
    %cst_62 = arith.constant 7.680000e+02 : f32
    %248 = arith.divf %242, %cst_62 : f32
    %249 = arith.mulf %242, %248 : f32
    %250 = arith.subf %247, %249 : f32
    %cst_63 = arith.constant 7.670000e+02 : f32
    %251 = arith.divf %250, %cst_63 : f32
    %cst_64 = arith.constant 0.000000e+00 : f32
    %252 = arith.maximumf %251, %cst_64 : f32
    %253 = vector.broadcast %248 : f32 to vector<3x256xf32>
    %254 = arith.subf %238, %253 : vector<3x256xf32>
    %255 = math.sqrt %252 : f32
    %cst_65 = arith.constant 9.99999974E-5 : f32
    %256 = arith.addf %255, %cst_65 : f32
    %257 = vector.broadcast %256 : f32 to vector<3x256xf32>
    %258 = arith.divf %254, %257 : vector<3x256xf32>
    %cst_66 = arith.constant -2.000000e+01 : f32
    %cst_67 = arith.constant 2.000000e+01 : f32
    %259 = vector.broadcast %cst_66 : f32 to vector<3x256xf32>
    %260 = arith.maximumf %259, %258 : vector<3x256xf32>
    %261 = vector.broadcast %cst_67 : f32 to vector<3x256xf32>
    %262 = arith.minimumf %261, %260 : vector<3x256xf32>
    %263 = vector.extract_strided_slice %262 {offsets = [0, 0], sizes = [1, 256], strides = [1, 1]} : vector<3x256xf32> to vector<1x256xf32>
    %264 = vector.broadcast %263 : vector<1x256xf32> to vector<64x256xf32>
    %265 = arith.mulf %3, %264 : vector<64x256xf32>
    %266 = vector.extract_strided_slice %262 {offsets = [1, 0], sizes = [1, 256], strides = [1, 1]} : vector<3x256xf32> to vector<1x256xf32>
    %267 = vector.broadcast %266 : vector<1x256xf32> to vector<64x256xf32>
    %268 = arith.mulf %6, %267 : vector<64x256xf32>
    %269 = arith.addf %265, %268 : vector<64x256xf32>
    %270 = vector.extract_strided_slice %262 {offsets = [2, 0], sizes = [1, 256], strides = [1, 1]} : vector<3x256xf32> to vector<1x256xf32>
    %271 = vector.broadcast %270 : vector<1x256xf32> to vector<64x256xf32>
    %272 = arith.mulf %9, %271 : vector<64x256xf32>
    %273 = arith.addf %269, %272 : vector<64x256xf32>
    %274 = arith.addf %273, %12 : vector<64x256xf32>
    %cst_68 = arith.constant 0.000000e+00 : f32
    %275 = vector.broadcast %cst_68 : f32 to vector<64x256xf32>
    %276 = arith.maximumf %274, %275 : vector<64x256xf32>
    %cst_69 = arith.constant 9.99999997E-7 : f32
    %277 = vector.broadcast %cst_69 : f32 to vector<64x256xf32>
    %278 = arith.maximumf %276, %277 : vector<64x256xf32>
    %279 = arith.mulf %278, %278 : vector<64x256xf32>
    %280 = arith.mulf %278, %279 : vector<64x256xf32>
    %cst_70 = arith.constant dense<0.000000e+00> : vector<8x64xf32>
    %281 = tpu.matmul %13, %280, %cst_70 {dimension_numbers = #tpu.dot_dimension_numbers<[1], [1], [0], [0], [0, 0, 1, 0], [], []>} : vector<8x256xf32>, vector<64x256xf32>, vector<8x64xf32> -> vector<8x64xf32>
    %282 = arith.mulf %34, %281 : vector<8x64xf32>
    %283 = arith.addf %236, %282 : vector<8x64xf32>
    %c5 = arith.constant 5 : index
    %c0_71 = arith.constant 0 : index
    %c0_72 = arith.constant 0 : index
    %284 = vector.load %arg1[%c5, %c0_71, %c0_72] : memref<16x3x256xf32, #tpu.memory_space<vmem>>, vector<1x3x256xf32>
    %285 = vector.shape_cast %284 : vector<1x3x256xf32> to vector<3x256xf32>
    %286 = vector.shape_cast %285 : vector<3x256xf32> to vector<1x3x256xf32>
    %cst_73 = arith.constant dense<0.000000e+00> : vector<1xf32>
    %287 = vector.multi_reduction <add>, %286, %cst_73 [1, 2] : vector<1x3x256xf32> to vector<1xf32>
    %288 = vector.shape_cast %287 : vector<1xf32> to vector<1x1x1xf32>
    %289 = vector.extract %288[0, 0, 0] : f32 from vector<1x1x1xf32>
    %290 = arith.mulf %285, %285 : vector<3x256xf32>
    %291 = vector.shape_cast %290 : vector<3x256xf32> to vector<1x3x256xf32>
    %cst_74 = arith.constant dense<0.000000e+00> : vector<1xf32>
    %292 = vector.multi_reduction <add>, %291, %cst_74 [1, 2] : vector<1x3x256xf32> to vector<1xf32>
    %293 = vector.shape_cast %292 : vector<1xf32> to vector<1x1x1xf32>
    %294 = vector.extract %293[0, 0, 0] : f32 from vector<1x1x1xf32>
    %cst_75 = arith.constant 7.680000e+02 : f32
    %295 = arith.divf %289, %cst_75 : f32
    %296 = arith.mulf %289, %295 : f32
    %297 = arith.subf %294, %296 : f32
    %cst_76 = arith.constant 7.670000e+02 : f32
    %298 = arith.divf %297, %cst_76 : f32
    %cst_77 = arith.constant 0.000000e+00 : f32
    %299 = arith.maximumf %298, %cst_77 : f32
    %300 = vector.broadcast %295 : f32 to vector<3x256xf32>
    %301 = arith.subf %285, %300 : vector<3x256xf32>
    %302 = math.sqrt %299 : f32
    %cst_78 = arith.constant 9.99999974E-5 : f32
    %303 = arith.addf %302, %cst_78 : f32
    %304 = vector.broadcast %303 : f32 to vector<3x256xf32>
    %305 = arith.divf %301, %304 : vector<3x256xf32>
    %cst_79 = arith.constant -2.000000e+01 : f32
    %cst_80 = arith.constant 2.000000e+01 : f32
    %306 = vector.broadcast %cst_79 : f32 to vector<3x256xf32>
    %307 = arith.maximumf %306, %305 : vector<3x256xf32>
    %308 = vector.broadcast %cst_80 : f32 to vector<3x256xf32>
    %309 = arith.minimumf %308, %307 : vector<3x256xf32>
    %310 = vector.extract_strided_slice %309 {offsets = [0, 0], sizes = [1, 256], strides = [1, 1]} : vector<3x256xf32> to vector<1x256xf32>
    %311 = vector.broadcast %310 : vector<1x256xf32> to vector<64x256xf32>
    %312 = arith.mulf %3, %311 : vector<64x256xf32>
    %313 = vector.extract_strided_slice %309 {offsets = [1, 0], sizes = [1, 256], strides = [1, 1]} : vector<3x256xf32> to vector<1x256xf32>
    %314 = vector.broadcast %313 : vector<1x256xf32> to vector<64x256xf32>
    %315 = arith.mulf %6, %314 : vector<64x256xf32>
    %316 = arith.addf %312, %315 : vector<64x256xf32>
    %317 = vector.extract_strided_slice %309 {offsets = [2, 0], sizes = [1, 256], strides = [1, 1]} : vector<3x256xf32> to vector<1x256xf32>
    %318 = vector.broadcast %317 : vector<1x256xf32> to vector<64x256xf32>
    %319 = arith.mulf %9, %318 : vector<64x256xf32>
    %320 = arith.addf %316, %319 : vector<64x256xf32>
    %321 = arith.addf %320, %12 : vector<64x256xf32>
    %cst_81 = arith.constant 0.000000e+00 : f32
    %322 = vector.broadcast %cst_81 : f32 to vector<64x256xf32>
    %323 = arith.maximumf %321, %322 : vector<64x256xf32>
    %cst_82 = arith.constant 9.99999997E-7 : f32
    %324 = vector.broadcast %cst_82 : f32 to vector<64x256xf32>
    %325 = arith.maximumf %323, %324 : vector<64x256xf32>
    %326 = arith.mulf %325, %325 : vector<64x256xf32>
    %327 = arith.mulf %325, %326 : vector<64x256xf32>
    %cst_83 = arith.constant dense<0.000000e+00> : vector<8x64xf32>
    %328 = tpu.matmul %13, %327, %cst_83 {dimension_numbers = #tpu.dot_dimension_numbers<[1], [1], [0], [0], [0, 0, 1, 0], [], []>} : vector<8x256xf32>, vector<64x256xf32>, vector<8x64xf32> -> vector<8x64xf32>
    %329 = arith.mulf %38, %328 : vector<8x64xf32>
    %330 = arith.addf %283, %329 : vector<8x64xf32>
    %c6 = arith.constant 6 : index
    %c0_84 = arith.constant 0 : index
    %c0_85 = arith.constant 0 : index
    %331 = vector.load %arg1[%c6, %c0_84, %c0_85] : memref<16x3x256xf32, #tpu.memory_space<vmem>>, vector<1x3x256xf32>
    %332 = vector.shape_cast %331 : vector<1x3x256xf32> to vector<3x256xf32>
    %333 = vector.shape_cast %332 : vector<3x256xf32> to vector<1x3x256xf32>
    %cst_86 = arith.constant dense<0.000000e+00> : vector<1xf32>
    %334 = vector.multi_reduction <add>, %333, %cst_86 [1, 2] : vector<1x3x256xf32> to vector<1xf32>
    %335 = vector.shape_cast %334 : vector<1xf32> to vector<1x1x1xf32>
    %336 = vector.extract %335[0, 0, 0] : f32 from vector<1x1x1xf32>
    %337 = arith.mulf %332, %332 : vector<3x256xf32>
    %338 = vector.shape_cast %337 : vector<3x256xf32> to vector<1x3x256xf32>
    %cst_87 = arith.constant dense<0.000000e+00> : vector<1xf32>
    %339 = vector.multi_reduction <add>, %338, %cst_87 [1, 2] : vector<1x3x256xf32> to vector<1xf32>
    %340 = vector.shape_cast %339 : vector<1xf32> to vector<1x1x1xf32>
    %341 = vector.extract %340[0, 0, 0] : f32 from vector<1x1x1xf32>
    %cst_88 = arith.constant 7.680000e+02 : f32
    %342 = arith.divf %336, %cst_88 : f32
    %343 = arith.mulf %336, %342 : f32
    %344 = arith.subf %341, %343 : f32
    %cst_89 = arith.constant 7.670000e+02 : f32
    %345 = arith.divf %344, %cst_89 : f32
    %cst_90 = arith.constant 0.000000e+00 : f32
    %346 = arith.maximumf %345, %cst_90 : f32
    %347 = vector.broadcast %342 : f32 to vector<3x256xf32>
    %348 = arith.subf %332, %347 : vector<3x256xf32>
    %349 = math.sqrt %346 : f32
    %cst_91 = arith.constant 9.99999974E-5 : f32
    %350 = arith.addf %349, %cst_91 : f32
    %351 = vector.broadcast %350 : f32 to vector<3x256xf32>
    %352 = arith.divf %348, %351 : vector<3x256xf32>
    %cst_92 = arith.constant -2.000000e+01 : f32
    %cst_93 = arith.constant 2.000000e+01 : f32
    %353 = vector.broadcast %cst_92 : f32 to vector<3x256xf32>
    %354 = arith.maximumf %353, %352 : vector<3x256xf32>
    %355 = vector.broadcast %cst_93 : f32 to vector<3x256xf32>
    %356 = arith.minimumf %355, %354 : vector<3x256xf32>
    %357 = vector.extract_strided_slice %356 {offsets = [0, 0], sizes = [1, 256], strides = [1, 1]} : vector<3x256xf32> to vector<1x256xf32>
    %358 = vector.broadcast %357 : vector<1x256xf32> to vector<64x256xf32>
    %359 = arith.mulf %3, %358 : vector<64x256xf32>
    %360 = vector.extract_strided_slice %356 {offsets = [1, 0], sizes = [1, 256], strides = [1, 1]} : vector<3x256xf32> to vector<1x256xf32>
    %361 = vector.broadcast %360 : vector<1x256xf32> to vector<64x256xf32>
    %362 = arith.mulf %6, %361 : vector<64x256xf32>
    %363 = arith.addf %359, %362 : vector<64x256xf32>
    %364 = vector.extract_strided_slice %356 {offsets = [2, 0], sizes = [1, 256], strides = [1, 1]} : vector<3x256xf32> to vector<1x256xf32>
    %365 = vector.broadcast %364 : vector<1x256xf32> to vector<64x256xf32>
    %366 = arith.mulf %9, %365 : vector<64x256xf32>
    %367 = arith.addf %363, %366 : vector<64x256xf32>
    %368 = arith.addf %367, %12 : vector<64x256xf32>
    %cst_94 = arith.constant 0.000000e+00 : f32
    %369 = vector.broadcast %cst_94 : f32 to vector<64x256xf32>
    %370 = arith.maximumf %368, %369 : vector<64x256xf32>
    %cst_95 = arith.constant 9.99999997E-7 : f32
    %371 = vector.broadcast %cst_95 : f32 to vector<64x256xf32>
    %372 = arith.maximumf %370, %371 : vector<64x256xf32>
    %373 = arith.mulf %372, %372 : vector<64x256xf32>
    %374 = arith.mulf %372, %373 : vector<64x256xf32>
    %cst_96 = arith.constant dense<0.000000e+00> : vector<8x64xf32>
    %375 = tpu.matmul %13, %374, %cst_96 {dimension_numbers = #tpu.dot_dimension_numbers<[1], [1], [0], [0], [0, 0, 1, 0], [], []>} : vector<8x256xf32>, vector<64x256xf32>, vector<8x64xf32> -> vector<8x64xf32>
    %376 = arith.mulf %42, %375 : vector<8x64xf32>
    %377 = arith.addf %330, %376 : vector<8x64xf32>
    %c7 = arith.constant 7 : index
    %c0_97 = arith.constant 0 : index
    %c0_98 = arith.constant 0 : index
    %378 = vector.load %arg1[%c7, %c0_97, %c0_98] : memref<16x3x256xf32, #tpu.memory_space<vmem>>, vector<1x3x256xf32>
    %379 = vector.shape_cast %378 : vector<1x3x256xf32> to vector<3x256xf32>
    %380 = vector.shape_cast %379 : vector<3x256xf32> to vector<1x3x256xf32>
    %cst_99 = arith.constant dense<0.000000e+00> : vector<1xf32>
    %381 = vector.multi_reduction <add>, %380, %cst_99 [1, 2] : vector<1x3x256xf32> to vector<1xf32>
    %382 = vector.shape_cast %381 : vector<1xf32> to vector<1x1x1xf32>
    %383 = vector.extract %382[0, 0, 0] : f32 from vector<1x1x1xf32>
    %384 = arith.mulf %379, %379 : vector<3x256xf32>
    %385 = vector.shape_cast %384 : vector<3x256xf32> to vector<1x3x256xf32>
    %cst_100 = arith.constant dense<0.000000e+00> : vector<1xf32>
    %386 = vector.multi_reduction <add>, %385, %cst_100 [1, 2] : vector<1x3x256xf32> to vector<1xf32>
    %387 = vector.shape_cast %386 : vector<1xf32> to vector<1x1x1xf32>
    %388 = vector.extract %387[0, 0, 0] : f32 from vector<1x1x1xf32>
    %cst_101 = arith.constant 7.680000e+02 : f32
    %389 = arith.divf %383, %cst_101 : f32
    %390 = arith.mulf %383, %389 : f32
    %391 = arith.subf %388, %390 : f32
    %cst_102 = arith.constant 7.670000e+02 : f32
    %392 = arith.divf %391, %cst_102 : f32
    %cst_103 = arith.constant 0.000000e+00 : f32
    %393 = arith.maximumf %392, %cst_103 : f32
    %394 = vector.broadcast %389 : f32 to vector<3x256xf32>
    %395 = arith.subf %379, %394 : vector<3x256xf32>
    %396 = math.sqrt %393 : f32
    %cst_104 = arith.constant 9.99999974E-5 : f32
    %397 = arith.addf %396, %cst_104 : f32
    %398 = vector.broadcast %397 : f32 to vector<3x256xf32>
    %399 = arith.divf %395, %398 : vector<3x256xf32>
    %cst_105 = arith.constant -2.000000e+01 : f32
    %cst_106 = arith.constant 2.000000e+01 : f32
    %400 = vector.broadcast %cst_105 : f32 to vector<3x256xf32>
    %401 = arith.maximumf %400, %399 : vector<3x256xf32>
    %402 = vector.broadcast %cst_106 : f32 to vector<3x256xf32>
    %403 = arith.minimumf %402, %401 : vector<3x256xf32>
    %404 = vector.extract_strided_slice %403 {offsets = [0, 0], sizes = [1, 256], strides = [1, 1]} : vector<3x256xf32> to vector<1x256xf32>
    %405 = vector.broadcast %404 : vector<1x256xf32> to vector<64x256xf32>
    %406 = arith.mulf %3, %405 : vector<64x256xf32>
    %407 = vector.extract_strided_slice %403 {offsets = [1, 0], sizes = [1, 256], strides = [1, 1]} : vector<3x256xf32> to vector<1x256xf32>
    %408 = vector.broadcast %407 : vector<1x256xf32> to vector<64x256xf32>
    %409 = arith.mulf %6, %408 : vector<64x256xf32>
    %410 = arith.addf %406, %409 : vector<64x256xf32>
    %411 = vector.extract_strided_slice %403 {offsets = [2, 0], sizes = [1, 256], strides = [1, 1]} : vector<3x256xf32> to vector<1x256xf32>
    %412 = vector.broadcast %411 : vector<1x256xf32> to vector<64x256xf32>
    %413 = arith.mulf %9, %412 : vector<64x256xf32>
    %414 = arith.addf %410, %413 : vector<64x256xf32>
    %415 = arith.addf %414, %12 : vector<64x256xf32>
    %cst_107 = arith.constant 0.000000e+00 : f32
    %416 = vector.broadcast %cst_107 : f32 to vector<64x256xf32>
    %417 = arith.maximumf %415, %416 : vector<64x256xf32>
    %cst_108 = arith.constant 9.99999997E-7 : f32
    %418 = vector.broadcast %cst_108 : f32 to vector<64x256xf32>
    %419 = arith.maximumf %417, %418 : vector<64x256xf32>
    %420 = arith.mulf %419, %419 : vector<64x256xf32>
    %421 = arith.mulf %419, %420 : vector<64x256xf32>
    %cst_109 = arith.constant dense<0.000000e+00> : vector<8x64xf32>
    %422 = tpu.matmul %13, %421, %cst_109 {dimension_numbers = #tpu.dot_dimension_numbers<[1], [1], [0], [0], [0, 0, 1, 0], [], []>} : vector<8x256xf32>, vector<64x256xf32>, vector<8x64xf32> -> vector<8x64xf32>
    %423 = arith.mulf %46, %422 : vector<8x64xf32>
    %424 = arith.addf %377, %423 : vector<8x64xf32>
    %c8 = arith.constant 8 : index
    %c0_110 = arith.constant 0 : index
    %c0_111 = arith.constant 0 : index
    %425 = vector.load %arg1[%c8, %c0_110, %c0_111] : memref<16x3x256xf32, #tpu.memory_space<vmem>>, vector<1x3x256xf32>
    %426 = vector.shape_cast %425 : vector<1x3x256xf32> to vector<3x256xf32>
    %427 = vector.shape_cast %426 : vector<3x256xf32> to vector<1x3x256xf32>
    %cst_112 = arith.constant dense<0.000000e+00> : vector<1xf32>
    %428 = vector.multi_reduction <add>, %427, %cst_112 [1, 2] : vector<1x3x256xf32> to vector<1xf32>
    %429 = vector.shape_cast %428 : vector<1xf32> to vector<1x1x1xf32>
    %430 = vector.extract %429[0, 0, 0] : f32 from vector<1x1x1xf32>
    %431 = arith.mulf %426, %426 : vector<3x256xf32>
    %432 = vector.shape_cast %431 : vector<3x256xf32> to vector<1x3x256xf32>
    %cst_113 = arith.constant dense<0.000000e+00> : vector<1xf32>
    %433 = vector.multi_reduction <add>, %432, %cst_113 [1, 2] : vector<1x3x256xf32> to vector<1xf32>
    %434 = vector.shape_cast %433 : vector<1xf32> to vector<1x1x1xf32>
    %435 = vector.extract %434[0, 0, 0] : f32 from vector<1x1x1xf32>
    %cst_114 = arith.constant 7.680000e+02 : f32
    %436 = arith.divf %430, %cst_114 : f32
    %437 = arith.mulf %430, %436 : f32
    %438 = arith.subf %435, %437 : f32
    %cst_115 = arith.constant 7.670000e+02 : f32
    %439 = arith.divf %438, %cst_115 : f32
    %cst_116 = arith.constant 0.000000e+00 : f32
    %440 = arith.maximumf %439, %cst_116 : f32
    %441 = vector.broadcast %436 : f32 to vector<3x256xf32>
    %442 = arith.subf %426, %441 : vector<3x256xf32>
    %443 = math.sqrt %440 : f32
    %cst_117 = arith.constant 9.99999974E-5 : f32
    %444 = arith.addf %443, %cst_117 : f32
    %445 = vector.broadcast %444 : f32 to vector<3x256xf32>
    %446 = arith.divf %442, %445 : vector<3x256xf32>
    %cst_118 = arith.constant -2.000000e+01 : f32
    %cst_119 = arith.constant 2.000000e+01 : f32
    %447 = vector.broadcast %cst_118 : f32 to vector<3x256xf32>
    %448 = arith.maximumf %447, %446 : vector<3x256xf32>
    %449 = vector.broadcast %cst_119 : f32 to vector<3x256xf32>
    %450 = arith.minimumf %449, %448 : vector<3x256xf32>
    %451 = vector.extract_strided_slice %450 {offsets = [0, 0], sizes = [1, 256], strides = [1, 1]} : vector<3x256xf32> to vector<1x256xf32>
    %452 = vector.broadcast %451 : vector<1x256xf32> to vector<64x256xf32>
    %453 = arith.mulf %3, %452 : vector<64x256xf32>
    %454 = vector.extract_strided_slice %450 {offsets = [1, 0], sizes = [1, 256], strides = [1, 1]} : vector<3x256xf32> to vector<1x256xf32>
    %455 = vector.broadcast %454 : vector<1x256xf32> to vector<64x256xf32>
    %456 = arith.mulf %6, %455 : vector<64x256xf32>
    %457 = arith.addf %453, %456 : vector<64x256xf32>
    %458 = vector.extract_strided_slice %450 {offsets = [2, 0], sizes = [1, 256], strides = [1, 1]} : vector<3x256xf32> to vector<1x256xf32>
    %459 = vector.broadcast %458 : vector<1x256xf32> to vector<64x256xf32>
    %460 = arith.mulf %9, %459 : vector<64x256xf32>
    %461 = arith.addf %457, %460 : vector<64x256xf32>
    %462 = arith.addf %461, %12 : vector<64x256xf32>
    %cst_120 = arith.constant 0.000000e+00 : f32
    %463 = vector.broadcast %cst_120 : f32 to vector<64x256xf32>
    %464 = arith.maximumf %462, %463 : vector<64x256xf32>
    %cst_121 = arith.constant 9.99999997E-7 : f32
    %465 = vector.broadcast %cst_121 : f32 to vector<64x256xf32>
    %466 = arith.maximumf %464, %465 : vector<64x256xf32>
    %467 = arith.mulf %466, %466 : vector<64x256xf32>
    %468 = arith.mulf %466, %467 : vector<64x256xf32>
    %cst_122 = arith.constant dense<0.000000e+00> : vector<8x64xf32>
    %469 = tpu.matmul %13, %468, %cst_122 {dimension_numbers = #tpu.dot_dimension_numbers<[1], [1], [0], [0], [0, 0, 1, 0], [], []>} : vector<8x256xf32>, vector<64x256xf32>, vector<8x64xf32> -> vector<8x64xf32>
    %470 = arith.mulf %18, %469 : vector<8x64xf32>
    %471 = arith.addf %48, %470 : vector<8x64xf32>
    %c9 = arith.constant 9 : index
    %c0_123 = arith.constant 0 : index
    %c0_124 = arith.constant 0 : index
    %472 = vector.load %arg1[%c9, %c0_123, %c0_124] : memref<16x3x256xf32, #tpu.memory_space<vmem>>, vector<1x3x256xf32>
    %473 = vector.shape_cast %472 : vector<1x3x256xf32> to vector<3x256xf32>
    %474 = vector.shape_cast %473 : vector<3x256xf32> to vector<1x3x256xf32>
    %cst_125 = arith.constant dense<0.000000e+00> : vector<1xf32>
    %475 = vector.multi_reduction <add>, %474, %cst_125 [1, 2] : vector<1x3x256xf32> to vector<1xf32>
    %476 = vector.shape_cast %475 : vector<1xf32> to vector<1x1x1xf32>
    %477 = vector.extract %476[0, 0, 0] : f32 from vector<1x1x1xf32>
    %478 = arith.mulf %473, %473 : vector<3x256xf32>
    %479 = vector.shape_cast %478 : vector<3x256xf32> to vector<1x3x256xf32>
    %cst_126 = arith.constant dense<0.000000e+00> : vector<1xf32>
    %480 = vector.multi_reduction <add>, %479, %cst_126 [1, 2] : vector<1x3x256xf32> to vector<1xf32>
    %481 = vector.shape_cast %480 : vector<1xf32> to vector<1x1x1xf32>
    %482 = vector.extract %481[0, 0, 0] : f32 from vector<1x1x1xf32>
    %cst_127 = arith.constant 7.680000e+02 : f32
    %483 = arith.divf %477, %cst_127 : f32
    %484 = arith.mulf %477, %483 : f32
    %485 = arith.subf %482, %484 : f32
    %cst_128 = arith.constant 7.670000e+02 : f32
    %486 = arith.divf %485, %cst_128 : f32
    %cst_129 = arith.constant 0.000000e+00 : f32
    %487 = arith.maximumf %486, %cst_129 : f32
    %488 = vector.broadcast %483 : f32 to vector<3x256xf32>
    %489 = arith.subf %473, %488 : vector<3x256xf32>
    %490 = math.sqrt %487 : f32
    %cst_130 = arith.constant 9.99999974E-5 : f32
    %491 = arith.addf %490, %cst_130 : f32
    %492 = vector.broadcast %491 : f32 to vector<3x256xf32>
    %493 = arith.divf %489, %492 : vector<3x256xf32>
    %cst_131 = arith.constant -2.000000e+01 : f32
    %cst_132 = arith.constant 2.000000e+01 : f32
    %494 = vector.broadcast %cst_131 : f32 to vector<3x256xf32>
    %495 = arith.maximumf %494, %493 : vector<3x256xf32>
    %496 = vector.broadcast %cst_132 : f32 to vector<3x256xf32>
    %497 = arith.minimumf %496, %495 : vector<3x256xf32>
    %498 = vector.extract_strided_slice %497 {offsets = [0, 0], sizes = [1, 256], strides = [1, 1]} : vector<3x256xf32> to vector<1x256xf32>
    %499 = vector.broadcast %498 : vector<1x256xf32> to vector<64x256xf32>
    %500 = arith.mulf %3, %499 : vector<64x256xf32>
    %501 = vector.extract_strided_slice %497 {offsets = [1, 0], sizes = [1, 256], strides = [1, 1]} : vector<3x256xf32> to vector<1x256xf32>
    %502 = vector.broadcast %501 : vector<1x256xf32> to vector<64x256xf32>
    %503 = arith.mulf %6, %502 : vector<64x256xf32>
    %504 = arith.addf %500, %503 : vector<64x256xf32>
    %505 = vector.extract_strided_slice %497 {offsets = [2, 0], sizes = [1, 256], strides = [1, 1]} : vector<3x256xf32> to vector<1x256xf32>
    %506 = vector.broadcast %505 : vector<1x256xf32> to vector<64x256xf32>
    %507 = arith.mulf %9, %506 : vector<64x256xf32>
    %508 = arith.addf %504, %507 : vector<64x256xf32>
    %509 = arith.addf %508, %12 : vector<64x256xf32>
    %cst_133 = arith.constant 0.000000e+00 : f32
    %510 = vector.broadcast %cst_133 : f32 to vector<64x256xf32>
    %511 = arith.maximumf %509, %510 : vector<64x256xf32>
    %cst_134 = arith.constant 9.99999997E-7 : f32
    %512 = vector.broadcast %cst_134 : f32 to vector<64x256xf32>
    %513 = arith.maximumf %511, %512 : vector<64x256xf32>
    %514 = arith.mulf %513, %513 : vector<64x256xf32>
    %515 = arith.mulf %513, %514 : vector<64x256xf32>
    %cst_135 = arith.constant dense<0.000000e+00> : vector<8x64xf32>
    %516 = tpu.matmul %13, %515, %cst_135 {dimension_numbers = #tpu.dot_dimension_numbers<[1], [1], [0], [0], [0, 0, 1, 0], [], []>} : vector<8x256xf32>, vector<64x256xf32>, vector<8x64xf32> -> vector<8x64xf32>
    %517 = arith.mulf %22, %516 : vector<8x64xf32>
    %518 = arith.addf %471, %517 : vector<8x64xf32>
    %c10 = arith.constant 10 : index
    %c0_136 = arith.constant 0 : index
    %c0_137 = arith.constant 0 : index
    %519 = vector.load %arg1[%c10, %c0_136, %c0_137] : memref<16x3x256xf32, #tpu.memory_space<vmem>>, vector<1x3x256xf32>
    %520 = vector.shape_cast %519 : vector<1x3x256xf32> to vector<3x256xf32>
    %521 = vector.shape_cast %520 : vector<3x256xf32> to vector<1x3x256xf32>
    %cst_138 = arith.constant dense<0.000000e+00> : vector<1xf32>
    %522 = vector.multi_reduction <add>, %521, %cst_138 [1, 2] : vector<1x3x256xf32> to vector<1xf32>
    %523 = vector.shape_cast %522 : vector<1xf32> to vector<1x1x1xf32>
    %524 = vector.extract %523[0, 0, 0] : f32 from vector<1x1x1xf32>
    %525 = arith.mulf %520, %520 : vector<3x256xf32>
    %526 = vector.shape_cast %525 : vector<3x256xf32> to vector<1x3x256xf32>
    %cst_139 = arith.constant dense<0.000000e+00> : vector<1xf32>
    %527 = vector.multi_reduction <add>, %526, %cst_139 [1, 2] : vector<1x3x256xf32> to vector<1xf32>
    %528 = vector.shape_cast %527 : vector<1xf32> to vector<1x1x1xf32>
    %529 = vector.extract %528[0, 0, 0] : f32 from vector<1x1x1xf32>
    %cst_140 = arith.constant 7.680000e+02 : f32
    %530 = arith.divf %524, %cst_140 : f32
    %531 = arith.mulf %524, %530 : f32
    %532 = arith.subf %529, %531 : f32
    %cst_141 = arith.constant 7.670000e+02 : f32
    %533 = arith.divf %532, %cst_141 : f32
    %cst_142 = arith.constant 0.000000e+00 : f32
    %534 = arith.maximumf %533, %cst_142 : f32
    %535 = vector.broadcast %530 : f32 to vector<3x256xf32>
    %536 = arith.subf %520, %535 : vector<3x256xf32>
    %537 = math.sqrt %534 : f32
    %cst_143 = arith.constant 9.99999974E-5 : f32
    %538 = arith.addf %537, %cst_143 : f32
    %539 = vector.broadcast %538 : f32 to vector<3x256xf32>
    %540 = arith.divf %536, %539 : vector<3x256xf32>
    %cst_144 = arith.constant -2.000000e+01 : f32
    %cst_145 = arith.constant 2.000000e+01 : f32
    %541 = vector.broadcast %cst_144 : f32 to vector<3x256xf32>
    %542 = arith.maximumf %541, %540 : vector<3x256xf32>
    %543 = vector.broadcast %cst_145 : f32 to vector<3x256xf32>
    %544 = arith.minimumf %543, %542 : vector<3x256xf32>
    %545 = vector.extract_strided_slice %544 {offsets = [0, 0], sizes = [1, 256], strides = [1, 1]} : vector<3x256xf32> to vector<1x256xf32>
    %546 = vector.broadcast %545 : vector<1x256xf32> to vector<64x256xf32>
    %547 = arith.mulf %3, %546 : vector<64x256xf32>
    %548 = vector.extract_strided_slice %544 {offsets = [1, 0], sizes = [1, 256], strides = [1, 1]} : vector<3x256xf32> to vector<1x256xf32>
    %549 = vector.broadcast %548 : vector<1x256xf32> to vector<64x256xf32>
    %550 = arith.mulf %6, %549 : vector<64x256xf32>
    %551 = arith.addf %547, %550 : vector<64x256xf32>
    %552 = vector.extract_strided_slice %544 {offsets = [2, 0], sizes = [1, 256], strides = [1, 1]} : vector<3x256xf32> to vector<1x256xf32>
    %553 = vector.broadcast %552 : vector<1x256xf32> to vector<64x256xf32>
    %554 = arith.mulf %9, %553 : vector<64x256xf32>
    %555 = arith.addf %551, %554 : vector<64x256xf32>
    %556 = arith.addf %555, %12 : vector<64x256xf32>
    %cst_146 = arith.constant 0.000000e+00 : f32
    %557 = vector.broadcast %cst_146 : f32 to vector<64x256xf32>
    %558 = arith.maximumf %556, %557 : vector<64x256xf32>
    %cst_147 = arith.constant 9.99999997E-7 : f32
    %559 = vector.broadcast %cst_147 : f32 to vector<64x256xf32>
    %560 = arith.maximumf %558, %559 : vector<64x256xf32>
    %561 = arith.mulf %560, %560 : vector<64x256xf32>
    %562 = arith.mulf %560, %561 : vector<64x256xf32>
    %cst_148 = arith.constant dense<0.000000e+00> : vector<8x64xf32>
    %563 = tpu.matmul %13, %562, %cst_148 {dimension_numbers = #tpu.dot_dimension_numbers<[1], [1], [0], [0], [0, 0, 1, 0], [], []>} : vector<8x256xf32>, vector<64x256xf32>, vector<8x64xf32> -> vector<8x64xf32>
    %564 = arith.mulf %26, %563 : vector<8x64xf32>
    %565 = arith.addf %518, %564 : vector<8x64xf32>
    %c11 = arith.constant 11 : index
    %c0_149 = arith.constant 0 : index
    %c0_150 = arith.constant 0 : index
    %566 = vector.load %arg1[%c11, %c0_149, %c0_150] : memref<16x3x256xf32, #tpu.memory_space<vmem>>, vector<1x3x256xf32>
    %567 = vector.shape_cast %566 : vector<1x3x256xf32> to vector<3x256xf32>
    %568 = vector.shape_cast %567 : vector<3x256xf32> to vector<1x3x256xf32>
    %cst_151 = arith.constant dense<0.000000e+00> : vector<1xf32>
    %569 = vector.multi_reduction <add>, %568, %cst_151 [1, 2] : vector<1x3x256xf32> to vector<1xf32>
    %570 = vector.shape_cast %569 : vector<1xf32> to vector<1x1x1xf32>
    %571 = vector.extract %570[0, 0, 0] : f32 from vector<1x1x1xf32>
    %572 = arith.mulf %567, %567 : vector<3x256xf32>
    %573 = vector.shape_cast %572 : vector<3x256xf32> to vector<1x3x256xf32>
    %cst_152 = arith.constant dense<0.000000e+00> : vector<1xf32>
    %574 = vector.multi_reduction <add>, %573, %cst_152 [1, 2] : vector<1x3x256xf32> to vector<1xf32>
    %575 = vector.shape_cast %574 : vector<1xf32> to vector<1x1x1xf32>
    %576 = vector.extract %575[0, 0, 0] : f32 from vector<1x1x1xf32>
    %cst_153 = arith.constant 7.680000e+02 : f32
    %577 = arith.divf %571, %cst_153 : f32
    %578 = arith.mulf %571, %577 : f32
    %579 = arith.subf %576, %578 : f32
    %cst_154 = arith.constant 7.670000e+02 : f32
    %580 = arith.divf %579, %cst_154 : f32
    %cst_155 = arith.constant 0.000000e+00 : f32
    %581 = arith.maximumf %580, %cst_155 : f32
    %582 = vector.broadcast %577 : f32 to vector<3x256xf32>
    %583 = arith.subf %567, %582 : vector<3x256xf32>
    %584 = math.sqrt %581 : f32
    %cst_156 = arith.constant 9.99999974E-5 : f32
    %585 = arith.addf %584, %cst_156 : f32
    %586 = vector.broadcast %585 : f32 to vector<3x256xf32>
    %587 = arith.divf %583, %586 : vector<3x256xf32>
    %cst_157 = arith.constant -2.000000e+01 : f32
    %cst_158 = arith.constant 2.000000e+01 : f32
    %588 = vector.broadcast %cst_157 : f32 to vector<3x256xf32>
    %589 = arith.maximumf %588, %587 : vector<3x256xf32>
    %590 = vector.broadcast %cst_158 : f32 to vector<3x256xf32>
    %591 = arith.minimumf %590, %589 : vector<3x256xf32>
    %592 = vector.extract_strided_slice %591 {offsets = [0, 0], sizes = [1, 256], strides = [1, 1]} : vector<3x256xf32> to vector<1x256xf32>
    %593 = vector.broadcast %592 : vector<1x256xf32> to vector<64x256xf32>
    %594 = arith.mulf %3, %593 : vector<64x256xf32>
    %595 = vector.extract_strided_slice %591 {offsets = [1, 0], sizes = [1, 256], strides = [1, 1]} : vector<3x256xf32> to vector<1x256xf32>
    %596 = vector.broadcast %595 : vector<1x256xf32> to vector<64x256xf32>
    %597 = arith.mulf %6, %596 : vector<64x256xf32>
    %598 = arith.addf %594, %597 : vector<64x256xf32>
    %599 = vector.extract_strided_slice %591 {offsets = [2, 0], sizes = [1, 256], strides = [1, 1]} : vector<3x256xf32> to vector<1x256xf32>
    %600 = vector.broadcast %599 : vector<1x256xf32> to vector<64x256xf32>
    %601 = arith.mulf %9, %600 : vector<64x256xf32>
    %602 = arith.addf %598, %601 : vector<64x256xf32>
    %603 = arith.addf %602, %12 : vector<64x256xf32>
    %cst_159 = arith.constant 0.000000e+00 : f32
    %604 = vector.broadcast %cst_159 : f32 to vector<64x256xf32>
    %605 = arith.maximumf %603, %604 : vector<64x256xf32>
    %cst_160 = arith.constant 9.99999997E-7 : f32
    %606 = vector.broadcast %cst_160 : f32 to vector<64x256xf32>
    %607 = arith.maximumf %605, %606 : vector<64x256xf32>
    %608 = arith.mulf %607, %607 : vector<64x256xf32>
    %609 = arith.mulf %607, %608 : vector<64x256xf32>
    %cst_161 = arith.constant dense<0.000000e+00> : vector<8x64xf32>
    %610 = tpu.matmul %13, %609, %cst_161 {dimension_numbers = #tpu.dot_dimension_numbers<[1], [1], [0], [0], [0, 0, 1, 0], [], []>} : vector<8x256xf32>, vector<64x256xf32>, vector<8x64xf32> -> vector<8x64xf32>
    %611 = arith.mulf %30, %610 : vector<8x64xf32>
    %612 = arith.addf %565, %611 : vector<8x64xf32>
    %c12 = arith.constant 12 : index
    %c0_162 = arith.constant 0 : index
    %c0_163 = arith.constant 0 : index
    %613 = vector.load %arg1[%c12, %c0_162, %c0_163] : memref<16x3x256xf32, #tpu.memory_space<vmem>>, vector<1x3x256xf32>
    %614 = vector.shape_cast %613 : vector<1x3x256xf32> to vector<3x256xf32>
    %615 = vector.shape_cast %614 : vector<3x256xf32> to vector<1x3x256xf32>
    %cst_164 = arith.constant dense<0.000000e+00> : vector<1xf32>
    %616 = vector.multi_reduction <add>, %615, %cst_164 [1, 2] : vector<1x3x256xf32> to vector<1xf32>
    %617 = vector.shape_cast %616 : vector<1xf32> to vector<1x1x1xf32>
    %618 = vector.extract %617[0, 0, 0] : f32 from vector<1x1x1xf32>
    %619 = arith.mulf %614, %614 : vector<3x256xf32>
    %620 = vector.shape_cast %619 : vector<3x256xf32> to vector<1x3x256xf32>
    %cst_165 = arith.constant dense<0.000000e+00> : vector<1xf32>
    %621 = vector.multi_reduction <add>, %620, %cst_165 [1, 2] : vector<1x3x256xf32> to vector<1xf32>
    %622 = vector.shape_cast %621 : vector<1xf32> to vector<1x1x1xf32>
    %623 = vector.extract %622[0, 0, 0] : f32 from vector<1x1x1xf32>
    %cst_166 = arith.constant 7.680000e+02 : f32
    %624 = arith.divf %618, %cst_166 : f32
    %625 = arith.mulf %618, %624 : f32
    %626 = arith.subf %623, %625 : f32
    %cst_167 = arith.constant 7.670000e+02 : f32
    %627 = arith.divf %626, %cst_167 : f32
    %cst_168 = arith.constant 0.000000e+00 : f32
    %628 = arith.maximumf %627, %cst_168 : f32
    %629 = vector.broadcast %624 : f32 to vector<3x256xf32>
    %630 = arith.subf %614, %629 : vector<3x256xf32>
    %631 = math.sqrt %628 : f32
    %cst_169 = arith.constant 9.99999974E-5 : f32
    %632 = arith.addf %631, %cst_169 : f32
    %633 = vector.broadcast %632 : f32 to vector<3x256xf32>
    %634 = arith.divf %630, %633 : vector<3x256xf32>
    %cst_170 = arith.constant -2.000000e+01 : f32
    %cst_171 = arith.constant 2.000000e+01 : f32
    %635 = vector.broadcast %cst_170 : f32 to vector<3x256xf32>
    %636 = arith.maximumf %635, %634 : vector<3x256xf32>
    %637 = vector.broadcast %cst_171 : f32 to vector<3x256xf32>
    %638 = arith.minimumf %637, %636 : vector<3x256xf32>
    %639 = vector.extract_strided_slice %638 {offsets = [0, 0], sizes = [1, 256], strides = [1, 1]} : vector<3x256xf32> to vector<1x256xf32>
    %640 = vector.broadcast %639 : vector<1x256xf32> to vector<64x256xf32>
    %641 = arith.mulf %3, %640 : vector<64x256xf32>
    %642 = vector.extract_strided_slice %638 {offsets = [1, 0], sizes = [1, 256], strides = [1, 1]} : vector<3x256xf32> to vector<1x256xf32>
    %643 = vector.broadcast %642 : vector<1x256xf32> to vector<64x256xf32>
    %644 = arith.mulf %6, %643 : vector<64x256xf32>
    %645 = arith.addf %641, %644 : vector<64x256xf32>
    %646 = vector.extract_strided_slice %638 {offsets = [2, 0], sizes = [1, 256], strides = [1, 1]} : vector<3x256xf32> to vector<1x256xf32>
    %647 = vector.broadcast %646 : vector<1x256xf32> to vector<64x256xf32>
    %648 = arith.mulf %9, %647 : vector<64x256xf32>
    %649 = arith.addf %645, %648 : vector<64x256xf32>
    %650 = arith.addf %649, %12 : vector<64x256xf32>
    %cst_172 = arith.constant 0.000000e+00 : f32
    %651 = vector.broadcast %cst_172 : f32 to vector<64x256xf32>
    %652 = arith.maximumf %650, %651 : vector<64x256xf32>
    %cst_173 = arith.constant 9.99999997E-7 : f32
    %653 = vector.broadcast %cst_173 : f32 to vector<64x256xf32>
    %654 = arith.maximumf %652, %653 : vector<64x256xf32>
    %655 = arith.mulf %654, %654 : vector<64x256xf32>
    %656 = arith.mulf %654, %655 : vector<64x256xf32>
    %cst_174 = arith.constant dense<0.000000e+00> : vector<8x64xf32>
    %657 = tpu.matmul %13, %656, %cst_174 {dimension_numbers = #tpu.dot_dimension_numbers<[1], [1], [0], [0], [0, 0, 1, 0], [], []>} : vector<8x256xf32>, vector<64x256xf32>, vector<8x64xf32> -> vector<8x64xf32>
    %658 = arith.mulf %34, %657 : vector<8x64xf32>
    %659 = arith.addf %612, %658 : vector<8x64xf32>
    %c13 = arith.constant 13 : index
    %c0_175 = arith.constant 0 : index
    %c0_176 = arith.constant 0 : index
    %660 = vector.load %arg1[%c13, %c0_175, %c0_176] : memref<16x3x256xf32, #tpu.memory_space<vmem>>, vector<1x3x256xf32>
    %661 = vector.shape_cast %660 : vector<1x3x256xf32> to vector<3x256xf32>
    %662 = vector.shape_cast %661 : vector<3x256xf32> to vector<1x3x256xf32>
    %cst_177 = arith.constant dense<0.000000e+00> : vector<1xf32>
    %663 = vector.multi_reduction <add>, %662, %cst_177 [1, 2] : vector<1x3x256xf32> to vector<1xf32>
    %664 = vector.shape_cast %663 : vector<1xf32> to vector<1x1x1xf32>
    %665 = vector.extract %664[0, 0, 0] : f32 from vector<1x1x1xf32>
    %666 = arith.mulf %661, %661 : vector<3x256xf32>
    %667 = vector.shape_cast %666 : vector<3x256xf32> to vector<1x3x256xf32>
    %cst_178 = arith.constant dense<0.000000e+00> : vector<1xf32>
    %668 = vector.multi_reduction <add>, %667, %cst_178 [1, 2] : vector<1x3x256xf32> to vector<1xf32>
    %669 = vector.shape_cast %668 : vector<1xf32> to vector<1x1x1xf32>
    %670 = vector.extract %669[0, 0, 0] : f32 from vector<1x1x1xf32>
    %cst_179 = arith.constant 7.680000e+02 : f32
    %671 = arith.divf %665, %cst_179 : f32
    %672 = arith.mulf %665, %671 : f32
    %673 = arith.subf %670, %672 : f32
    %cst_180 = arith.constant 7.670000e+02 : f32
    %674 = arith.divf %673, %cst_180 : f32
    %cst_181 = arith.constant 0.000000e+00 : f32
    %675 = arith.maximumf %674, %cst_181 : f32
    %676 = vector.broadcast %671 : f32 to vector<3x256xf32>
    %677 = arith.subf %661, %676 : vector<3x256xf32>
    %678 = math.sqrt %675 : f32
    %cst_182 = arith.constant 9.99999974E-5 : f32
    %679 = arith.addf %678, %cst_182 : f32
    %680 = vector.broadcast %679 : f32 to vector<3x256xf32>
    %681 = arith.divf %677, %680 : vector<3x256xf32>
    %cst_183 = arith.constant -2.000000e+01 : f32
    %cst_184 = arith.constant 2.000000e+01 : f32
    %682 = vector.broadcast %cst_183 : f32 to vector<3x256xf32>
    %683 = arith.maximumf %682, %681 : vector<3x256xf32>
    %684 = vector.broadcast %cst_184 : f32 to vector<3x256xf32>
    %685 = arith.minimumf %684, %683 : vector<3x256xf32>
    %686 = vector.extract_strided_slice %685 {offsets = [0, 0], sizes = [1, 256], strides = [1, 1]} : vector<3x256xf32> to vector<1x256xf32>
    %687 = vector.broadcast %686 : vector<1x256xf32> to vector<64x256xf32>
    %688 = arith.mulf %3, %687 : vector<64x256xf32>
    %689 = vector.extract_strided_slice %685 {offsets = [1, 0], sizes = [1, 256], strides = [1, 1]} : vector<3x256xf32> to vector<1x256xf32>
    %690 = vector.broadcast %689 : vector<1x256xf32> to vector<64x256xf32>
    %691 = arith.mulf %6, %690 : vector<64x256xf32>
    %692 = arith.addf %688, %691 : vector<64x256xf32>
    %693 = vector.extract_strided_slice %685 {offsets = [2, 0], sizes = [1, 256], strides = [1, 1]} : vector<3x256xf32> to vector<1x256xf32>
    %694 = vector.broadcast %693 : vector<1x256xf32> to vector<64x256xf32>
    %695 = arith.mulf %9, %694 : vector<64x256xf32>
    %696 = arith.addf %692, %695 : vector<64x256xf32>
    %697 = arith.addf %696, %12 : vector<64x256xf32>
    %cst_185 = arith.constant 0.000000e+00 : f32
    %698 = vector.broadcast %cst_185 : f32 to vector<64x256xf32>
    %699 = arith.maximumf %697, %698 : vector<64x256xf32>
    %cst_186 = arith.constant 9.99999997E-7 : f32
    %700 = vector.broadcast %cst_186 : f32 to vector<64x256xf32>
    %701 = arith.maximumf %699, %700 : vector<64x256xf32>
    %702 = arith.mulf %701, %701 : vector<64x256xf32>
    %703 = arith.mulf %701, %702 : vector<64x256xf32>
    %cst_187 = arith.constant dense<0.000000e+00> : vector<8x64xf32>
    %704 = tpu.matmul %13, %703, %cst_187 {dimension_numbers = #tpu.dot_dimension_numbers<[1], [1], [0], [0], [0, 0, 1, 0], [], []>} : vector<8x256xf32>, vector<64x256xf32>, vector<8x64xf32> -> vector<8x64xf32>
    %705 = arith.mulf %38, %704 : vector<8x64xf32>
    %706 = arith.addf %659, %705 : vector<8x64xf32>
    %c14 = arith.constant 14 : index
    %c0_188 = arith.constant 0 : index
    %c0_189 = arith.constant 0 : index
    %707 = vector.load %arg1[%c14, %c0_188, %c0_189] : memref<16x3x256xf32, #tpu.memory_space<vmem>>, vector<1x3x256xf32>
    %708 = vector.shape_cast %707 : vector<1x3x256xf32> to vector<3x256xf32>
    %709 = vector.shape_cast %708 : vector<3x256xf32> to vector<1x3x256xf32>
    %cst_190 = arith.constant dense<0.000000e+00> : vector<1xf32>
    %710 = vector.multi_reduction <add>, %709, %cst_190 [1, 2] : vector<1x3x256xf32> to vector<1xf32>
    %711 = vector.shape_cast %710 : vector<1xf32> to vector<1x1x1xf32>
    %712 = vector.extract %711[0, 0, 0] : f32 from vector<1x1x1xf32>
    %713 = arith.mulf %708, %708 : vector<3x256xf32>
    %714 = vector.shape_cast %713 : vector<3x256xf32> to vector<1x3x256xf32>
    %cst_191 = arith.constant dense<0.000000e+00> : vector<1xf32>
    %715 = vector.multi_reduction <add>, %714, %cst_191 [1, 2] : vector<1x3x256xf32> to vector<1xf32>
    %716 = vector.shape_cast %715 : vector<1xf32> to vector<1x1x1xf32>
    %717 = vector.extract %716[0, 0, 0] : f32 from vector<1x1x1xf32>
    %cst_192 = arith.constant 7.680000e+02 : f32
    %718 = arith.divf %712, %cst_192 : f32
    %719 = arith.mulf %712, %718 : f32
    %720 = arith.subf %717, %719 : f32
    %cst_193 = arith.constant 7.670000e+02 : f32
    %721 = arith.divf %720, %cst_193 : f32
    %cst_194 = arith.constant 0.000000e+00 : f32
    %722 = arith.maximumf %721, %cst_194 : f32
    %723 = vector.broadcast %718 : f32 to vector<3x256xf32>
    %724 = arith.subf %708, %723 : vector<3x256xf32>
    %725 = math.sqrt %722 : f32
    %cst_195 = arith.constant 9.99999974E-5 : f32
    %726 = arith.addf %725, %cst_195 : f32
    %727 = vector.broadcast %726 : f32 to vector<3x256xf32>
    %728 = arith.divf %724, %727 : vector<3x256xf32>
    %cst_196 = arith.constant -2.000000e+01 : f32
    %cst_197 = arith.constant 2.000000e+01 : f32
    %729 = vector.broadcast %cst_196 : f32 to vector<3x256xf32>
    %730 = arith.maximumf %729, %728 : vector<3x256xf32>
    %731 = vector.broadcast %cst_197 : f32 to vector<3x256xf32>
    %732 = arith.minimumf %731, %730 : vector<3x256xf32>
    %733 = vector.extract_strided_slice %732 {offsets = [0, 0], sizes = [1, 256], strides = [1, 1]} : vector<3x256xf32> to vector<1x256xf32>
    %734 = vector.broadcast %733 : vector<1x256xf32> to vector<64x256xf32>
    %735 = arith.mulf %3, %734 : vector<64x256xf32>
    %736 = vector.extract_strided_slice %732 {offsets = [1, 0], sizes = [1, 256], strides = [1, 1]} : vector<3x256xf32> to vector<1x256xf32>
    %737 = vector.broadcast %736 : vector<1x256xf32> to vector<64x256xf32>
    %738 = arith.mulf %6, %737 : vector<64x256xf32>
    %739 = arith.addf %735, %738 : vector<64x256xf32>
    %740 = vector.extract_strided_slice %732 {offsets = [2, 0], sizes = [1, 256], strides = [1, 1]} : vector<3x256xf32> to vector<1x256xf32>
    %741 = vector.broadcast %740 : vector<1x256xf32> to vector<64x256xf32>
    %742 = arith.mulf %9, %741 : vector<64x256xf32>
    %743 = arith.addf %739, %742 : vector<64x256xf32>
    %744 = arith.addf %743, %12 : vector<64x256xf32>
    %cst_198 = arith.constant 0.000000e+00 : f32
    %745 = vector.broadcast %cst_198 : f32 to vector<64x256xf32>
    %746 = arith.maximumf %744, %745 : vector<64x256xf32>
    %cst_199 = arith.constant 9.99999997E-7 : f32
    %747 = vector.broadcast %cst_199 : f32 to vector<64x256xf32>
    %748 = arith.maximumf %746, %747 : vector<64x256xf32>
    %749 = arith.mulf %748, %748 : vector<64x256xf32>
    %750 = arith.mulf %748, %749 : vector<64x256xf32>
    %cst_200 = arith.constant dense<0.000000e+00> : vector<8x64xf32>
    %751 = tpu.matmul %13, %750, %cst_200 {dimension_numbers = #tpu.dot_dimension_numbers<[1], [1], [0], [0], [0, 0, 1, 0], [], []>} : vector<8x256xf32>, vector<64x256xf32>, vector<8x64xf32> -> vector<8x64xf32>
    %752 = arith.mulf %42, %751 : vector<8x64xf32>
    %753 = arith.addf %706, %752 : vector<8x64xf32>
    %c15 = arith.constant 15 : index
    %c0_201 = arith.constant 0 : index
    %c0_202 = arith.constant 0 : index
    %754 = vector.load %arg1[%c15, %c0_201, %c0_202] : memref<16x3x256xf32, #tpu.memory_space<vmem>>, vector<1x3x256xf32>
    %755 = vector.shape_cast %754 : vector<1x3x256xf32> to vector<3x256xf32>
    %756 = vector.shape_cast %755 : vector<3x256xf32> to vector<1x3x256xf32>
    %cst_203 = arith.constant dense<0.000000e+00> : vector<1xf32>
    %757 = vector.multi_reduction <add>, %756, %cst_203 [1, 2] : vector<1x3x256xf32> to vector<1xf32>
    %758 = vector.shape_cast %757 : vector<1xf32> to vector<1x1x1xf32>
    %759 = vector.extract %758[0, 0, 0] : f32 from vector<1x1x1xf32>
    %760 = arith.mulf %755, %755 : vector<3x256xf32>
    %761 = vector.shape_cast %760 : vector<3x256xf32> to vector<1x3x256xf32>
    %cst_204 = arith.constant dense<0.000000e+00> : vector<1xf32>
    %762 = vector.multi_reduction <add>, %761, %cst_204 [1, 2] : vector<1x3x256xf32> to vector<1xf32>
    %763 = vector.shape_cast %762 : vector<1xf32> to vector<1x1x1xf32>
    %764 = vector.extract %763[0, 0, 0] : f32 from vector<1x1x1xf32>
    %cst_205 = arith.constant 7.680000e+02 : f32
    %765 = arith.divf %759, %cst_205 : f32
    %766 = arith.mulf %759, %765 : f32
    %767 = arith.subf %764, %766 : f32
    %cst_206 = arith.constant 7.670000e+02 : f32
    %768 = arith.divf %767, %cst_206 : f32
    %cst_207 = arith.constant 0.000000e+00 : f32
    %769 = arith.maximumf %768, %cst_207 : f32
    %770 = vector.broadcast %765 : f32 to vector<3x256xf32>
    %771 = arith.subf %755, %770 : vector<3x256xf32>
    %772 = math.sqrt %769 : f32
    %cst_208 = arith.constant 9.99999974E-5 : f32
    %773 = arith.addf %772, %cst_208 : f32
    %774 = vector.broadcast %773 : f32 to vector<3x256xf32>
    %775 = arith.divf %771, %774 : vector<3x256xf32>
    %cst_209 = arith.constant -2.000000e+01 : f32
    %cst_210 = arith.constant 2.000000e+01 : f32
    %776 = vector.broadcast %cst_209 : f32 to vector<3x256xf32>
    %777 = arith.maximumf %776, %775 : vector<3x256xf32>
    %778 = vector.broadcast %cst_210 : f32 to vector<3x256xf32>
    %779 = arith.minimumf %778, %777 : vector<3x256xf32>
    %780 = vector.extract_strided_slice %779 {offsets = [0, 0], sizes = [1, 256], strides = [1, 1]} : vector<3x256xf32> to vector<1x256xf32>
    %781 = vector.broadcast %780 : vector<1x256xf32> to vector<64x256xf32>
    %782 = arith.mulf %3, %781 : vector<64x256xf32>
    %783 = vector.extract_strided_slice %779 {offsets = [1, 0], sizes = [1, 256], strides = [1, 1]} : vector<3x256xf32> to vector<1x256xf32>
    %784 = vector.broadcast %783 : vector<1x256xf32> to vector<64x256xf32>
    %785 = arith.mulf %6, %784 : vector<64x256xf32>
    %786 = arith.addf %782, %785 : vector<64x256xf32>
    %787 = vector.extract_strided_slice %779 {offsets = [2, 0], sizes = [1, 256], strides = [1, 1]} : vector<3x256xf32> to vector<1x256xf32>
    %788 = vector.broadcast %787 : vector<1x256xf32> to vector<64x256xf32>
    %789 = arith.mulf %9, %788 : vector<64x256xf32>
    %790 = arith.addf %786, %789 : vector<64x256xf32>
    %791 = arith.addf %790, %12 : vector<64x256xf32>
    %cst_211 = arith.constant 0.000000e+00 : f32
    %792 = vector.broadcast %cst_211 : f32 to vector<64x256xf32>
    %793 = arith.maximumf %791, %792 : vector<64x256xf32>
    %cst_212 = arith.constant 9.99999997E-7 : f32
    %794 = vector.broadcast %cst_212 : f32 to vector<64x256xf32>
    %795 = arith.maximumf %793, %794 : vector<64x256xf32>
    %796 = arith.mulf %795, %795 : vector<64x256xf32>
    %797 = arith.mulf %795, %796 : vector<64x256xf32>
    %cst_213 = arith.constant dense<0.000000e+00> : vector<8x64xf32>
    %798 = tpu.matmul %13, %797, %cst_213 {dimension_numbers = #tpu.dot_dimension_numbers<[1], [1], [0], [0], [0, 0, 1, 0], [], []>} : vector<8x256xf32>, vector<64x256xf32>, vector<8x64xf32> -> vector<8x64xf32>
    %799 = arith.mulf %46, %798 : vector<8x64xf32>
    %800 = arith.addf %753, %799 : vector<8x64xf32>
    %801 = tpu.concatenate %424, %800 in 0 : vector<8x64xf32>, vector<8x64xf32> -> vector<16x64xf32>
    %802 = math.log %801 : vector<16x64xf32>
    %cst_214 = arith.constant 0.333333343 : f32
    %803 = vector.broadcast %cst_214 : f32 to vector<16x64xf32>
    %804 = arith.mulf %802, %803 : vector<16x64xf32>
    %805 = math.exp %804 : vector<16x64xf32>
    %c0_215 = arith.constant 0 : index
    %c0_216 = arith.constant 0 : index
    %806 = vector.load %arg2[%c0_215, %c0_216] : memref<16x1xf32, #tpu.memory_space<vmem>>, vector<16x1xf32>
    %807 = vector.broadcast %806 : vector<16x1xf32> to vector<16x64xf32>
    %808 = arith.mulf %805, %807 : vector<16x64xf32>
    %c0_217 = arith.constant 0 : index
    %c0_218 = arith.constant 0 : index
    %809 = vector.load %arg5[%c0_217, %c0_218] : memref<64x256xf32, #tpu.memory_space<vmem>>, vector<64x256xf32>
    %cst_219 = arith.constant dense<0.000000e+00> : vector<16x256xf32>
    %810 = tpu.matmul %808, %809, %cst_219 {dimension_numbers = #tpu.dot_dimension_numbers<[1], [0], [0], [1], [0, 0, 1, 1], [], []>} : vector<16x64xf32>, vector<64x256xf32>, vector<16x256xf32> -> vector<16x256xf32>
    %c0_220 = arith.constant 0 : index
    %c0_221 = arith.constant 0 : index
    %811 = vector.load %arg6[%c0_220, %c0_221] : memref<1x256xf32, #tpu.memory_space<vmem>>, vector<1x256xf32>
    %812 = vector.broadcast %811 : vector<1x256xf32> to vector<16x256xf32>
    %813 = arith.addf %810, %812 : vector<16x256xf32>
    %c0_222 = arith.constant 0 : index
    %c0_223 = arith.constant 0 : index
    %814 = vector.load %arg7[%c0_222, %c0_223] : memref<32x128xf32, #tpu.memory_space<vmem>>, vector<32x128xf32>
    %c0_224 = arith.constant 0 : index
    %c0_225 = arith.constant 0 : index
    %815 = vector.load %arg8[%c0_224, %c0_225] : memref<32x128xf32, #tpu.memory_space<vmem>>, vector<32x128xf32>
    %cst_226 = arith.constant 0.000000e+00 : f32
    %816 = vector.broadcast %cst_226 : f32 to vector<2x32xf32>
    %817 = vector.extract_strided_slice %813 {offsets = [0, 0], sizes = [2, 128], strides = [1, 1]} : vector<16x256xf32> to vector<2x128xf32>
    %cst_227 = arith.constant dense<0.000000e+00> : vector<2x128xf32>
    %818 = tpu.matmul %816, %814, %cst_227 {dimension_numbers = #tpu.dot_dimension_numbers<[1], [0], [0], [1], [0, 0, 1, 1], [], []>} : vector<2x32xf32>, vector<32x128xf32>, vector<2x128xf32> -> vector<2x128xf32>
    %819 = arith.addf %817, %818 : vector<2x128xf32>
    %820 = vector.extract_strided_slice %813 {offsets = [14, 128], sizes = [2, 128], strides = [1, 1]} : vector<16x256xf32> to vector<2x128xf32>
    %cst_228 = arith.constant dense<0.000000e+00> : vector<2x128xf32>
    %821 = tpu.matmul %816, %815, %cst_228 {dimension_numbers = #tpu.dot_dimension_numbers<[1], [0], [0], [1], [0, 0, 1, 1], [], []>} : vector<2x32xf32>, vector<32x128xf32>, vector<2x128xf32> -> vector<2x128xf32>
    %822 = arith.addf %820, %821 : vector<2x128xf32>
    %823 = vector.extract_strided_slice %819 {offsets = [0, 0], sizes = [2, 32], strides = [1, 1]} : vector<2x128xf32> to vector<2x32xf32>
    %824 = arith.negf %823 : vector<2x32xf32>
    %825 = math.exp %824 : vector<2x32xf32>
    %cst_229 = arith.constant 1.000000e+00 : f32
    %826 = vector.broadcast %cst_229 : f32 to vector<2x32xf32>
    %827 = arith.addf %826, %825 : vector<2x32xf32>
    %828 = arith.divf %826, %827 : vector<2x32xf32>
    %829 = vector.extract_strided_slice %819 {offsets = [0, 32], sizes = [2, 32], strides = [1, 1]} : vector<2x128xf32> to vector<2x32xf32>
    %830 = arith.negf %829 : vector<2x32xf32>
    %831 = math.exp %830 : vector<2x32xf32>
    %cst_230 = arith.constant 1.000000e+00 : f32
    %832 = vector.broadcast %cst_230 : f32 to vector<2x32xf32>
    %833 = arith.addf %832, %831 : vector<2x32xf32>
    %834 = arith.divf %832, %833 : vector<2x32xf32>
    %835 = vector.extract_strided_slice %819 {offsets = [0, 64], sizes = [2, 32], strides = [1, 1]} : vector<2x128xf32> to vector<2x32xf32>
    %836 = math.tanh %835 : vector<2x32xf32>
    %837 = vector.extract_strided_slice %819 {offsets = [0, 96], sizes = [2, 32], strides = [1, 1]} : vector<2x128xf32> to vector<2x32xf32>
    %838 = arith.negf %837 : vector<2x32xf32>
    %839 = math.exp %838 : vector<2x32xf32>
    %cst_231 = arith.constant 1.000000e+00 : f32
    %840 = vector.broadcast %cst_231 : f32 to vector<2x32xf32>
    %841 = arith.addf %840, %839 : vector<2x32xf32>
    %842 = arith.divf %840, %841 : vector<2x32xf32>
    %843 = arith.mulf %834, %816 : vector<2x32xf32>
    %844 = arith.mulf %828, %836 : vector<2x32xf32>
    %845 = arith.addf %843, %844 : vector<2x32xf32>
    %846 = math.tanh %845 : vector<2x32xf32>
    %847 = arith.mulf %842, %846 : vector<2x32xf32>
    %848 = vector.extract_strided_slice %822 {offsets = [0, 0], sizes = [2, 32], strides = [1, 1]} : vector<2x128xf32> to vector<2x32xf32>
    %849 = arith.negf %848 : vector<2x32xf32>
    %850 = math.exp %849 : vector<2x32xf32>
    %cst_232 = arith.constant 1.000000e+00 : f32
    %851 = vector.broadcast %cst_232 : f32 to vector<2x32xf32>
    %852 = arith.addf %851, %850 : vector<2x32xf32>
    %853 = arith.divf %851, %852 : vector<2x32xf32>
    %854 = vector.extract_strided_slice %822 {offsets = [0, 32], sizes = [2, 32], strides = [1, 1]} : vector<2x128xf32> to vector<2x32xf32>
    %855 = arith.negf %854 : vector<2x32xf32>
    %856 = math.exp %855 : vector<2x32xf32>
    %cst_233 = arith.constant 1.000000e+00 : f32
    %857 = vector.broadcast %cst_233 : f32 to vector<2x32xf32>
    %858 = arith.addf %857, %856 : vector<2x32xf32>
    %859 = arith.divf %857, %858 : vector<2x32xf32>
    %860 = vector.extract_strided_slice %822 {offsets = [0, 64], sizes = [2, 32], strides = [1, 1]} : vector<2x128xf32> to vector<2x32xf32>
    %861 = math.tanh %860 : vector<2x32xf32>
    %862 = vector.extract_strided_slice %822 {offsets = [0, 96], sizes = [2, 32], strides = [1, 1]} : vector<2x128xf32> to vector<2x32xf32>
    %863 = arith.negf %862 : vector<2x32xf32>
    %864 = math.exp %863 : vector<2x32xf32>
    %cst_234 = arith.constant 1.000000e+00 : f32
    %865 = vector.broadcast %cst_234 : f32 to vector<2x32xf32>
    %866 = arith.addf %865, %864 : vector<2x32xf32>
    %867 = arith.divf %865, %866 : vector<2x32xf32>
    %868 = arith.mulf %859, %816 : vector<2x32xf32>
    %869 = arith.mulf %853, %861 : vector<2x32xf32>
    %870 = arith.addf %868, %869 : vector<2x32xf32>
    %871 = math.tanh %870 : vector<2x32xf32>
    %872 = arith.mulf %867, %871 : vector<2x32xf32>
    %873 = vector.extract_strided_slice %813 {offsets = [2, 0], sizes = [2, 128], strides = [1, 1]} : vector<16x256xf32> to vector<2x128xf32>
    %cst_235 = arith.constant dense<0.000000e+00> : vector<2x128xf32>
    %874 = tpu.matmul %847, %814, %cst_235 {dimension_numbers = #tpu.dot_dimension_numbers<[1], [0], [0], [1], [0, 0, 1, 1], [], []>} : vector<2x32xf32>, vector<32x128xf32>, vector<2x128xf32> -> vector<2x128xf32>
    %875 = arith.addf %873, %874 : vector<2x128xf32>
    %876 = vector.extract_strided_slice %813 {offsets = [12, 128], sizes = [2, 128], strides = [1, 1]} : vector<16x256xf32> to vector<2x128xf32>
    %cst_236 = arith.constant dense<0.000000e+00> : vector<2x128xf32>
    %877 = tpu.matmul %872, %815, %cst_236 {dimension_numbers = #tpu.dot_dimension_numbers<[1], [0], [0], [1], [0, 0, 1, 1], [], []>} : vector<2x32xf32>, vector<32x128xf32>, vector<2x128xf32> -> vector<2x128xf32>
    %878 = arith.addf %876, %877 : vector<2x128xf32>
    %879 = vector.extract_strided_slice %875 {offsets = [0, 0], sizes = [2, 32], strides = [1, 1]} : vector<2x128xf32> to vector<2x32xf32>
    %880 = arith.negf %879 : vector<2x32xf32>
    %881 = math.exp %880 : vector<2x32xf32>
    %cst_237 = arith.constant 1.000000e+00 : f32
    %882 = vector.broadcast %cst_237 : f32 to vector<2x32xf32>
    %883 = arith.addf %882, %881 : vector<2x32xf32>
    %884 = arith.divf %882, %883 : vector<2x32xf32>
    %885 = vector.extract_strided_slice %875 {offsets = [0, 32], sizes = [2, 32], strides = [1, 1]} : vector<2x128xf32> to vector<2x32xf32>
    %886 = arith.negf %885 : vector<2x32xf32>
    %887 = math.exp %886 : vector<2x32xf32>
    %cst_238 = arith.constant 1.000000e+00 : f32
    %888 = vector.broadcast %cst_238 : f32 to vector<2x32xf32>
    %889 = arith.addf %888, %887 : vector<2x32xf32>
    %890 = arith.divf %888, %889 : vector<2x32xf32>
    %891 = vector.extract_strided_slice %875 {offsets = [0, 64], sizes = [2, 32], strides = [1, 1]} : vector<2x128xf32> to vector<2x32xf32>
    %892 = math.tanh %891 : vector<2x32xf32>
    %893 = vector.extract_strided_slice %875 {offsets = [0, 96], sizes = [2, 32], strides = [1, 1]} : vector<2x128xf32> to vector<2x32xf32>
    %894 = arith.negf %893 : vector<2x32xf32>
    %895 = math.exp %894 : vector<2x32xf32>
    %cst_239 = arith.constant 1.000000e+00 : f32
    %896 = vector.broadcast %cst_239 : f32 to vector<2x32xf32>
    %897 = arith.addf %896, %895 : vector<2x32xf32>
    %898 = arith.divf %896, %897 : vector<2x32xf32>
    %899 = arith.mulf %890, %845 : vector<2x32xf32>
    %900 = arith.mulf %884, %892 : vector<2x32xf32>
    %901 = arith.addf %899, %900 : vector<2x32xf32>
    %902 = math.tanh %901 : vector<2x32xf32>
    %903 = arith.mulf %898, %902 : vector<2x32xf32>
    %904 = vector.extract_strided_slice %878 {offsets = [0, 0], sizes = [2, 32], strides = [1, 1]} : vector<2x128xf32> to vector<2x32xf32>
    %905 = arith.negf %904 : vector<2x32xf32>
    %906 = math.exp %905 : vector<2x32xf32>
    %cst_240 = arith.constant 1.000000e+00 : f32
    %907 = vector.broadcast %cst_240 : f32 to vector<2x32xf32>
    %908 = arith.addf %907, %906 : vector<2x32xf32>
    %909 = arith.divf %907, %908 : vector<2x32xf32>
    %910 = vector.extract_strided_slice %878 {offsets = [0, 32], sizes = [2, 32], strides = [1, 1]} : vector<2x128xf32> to vector<2x32xf32>
    %911 = arith.negf %910 : vector<2x32xf32>
    %912 = math.exp %911 : vector<2x32xf32>
    %cst_241 = arith.constant 1.000000e+00 : f32
    %913 = vector.broadcast %cst_241 : f32 to vector<2x32xf32>
    %914 = arith.addf %913, %912 : vector<2x32xf32>
    %915 = arith.divf %913, %914 : vector<2x32xf32>
    %916 = vector.extract_strided_slice %878 {offsets = [0, 64], sizes = [2, 32], strides = [1, 1]} : vector<2x128xf32> to vector<2x32xf32>
    %917 = math.tanh %916 : vector<2x32xf32>
    %918 = vector.extract_strided_slice %878 {offsets = [0, 96], sizes = [2, 32], strides = [1, 1]} : vector<2x128xf32> to vector<2x32xf32>
    %919 = arith.negf %918 : vector<2x32xf32>
    %920 = math.exp %919 : vector<2x32xf32>
    %cst_242 = arith.constant 1.000000e+00 : f32
    %921 = vector.broadcast %cst_242 : f32 to vector<2x32xf32>
    %922 = arith.addf %921, %920 : vector<2x32xf32>
    %923 = arith.divf %921, %922 : vector<2x32xf32>
    %924 = arith.mulf %915, %870 : vector<2x32xf32>
    %925 = arith.mulf %909, %917 : vector<2x32xf32>
    %926 = arith.addf %924, %925 : vector<2x32xf32>
    %927 = math.tanh %926 : vector<2x32xf32>
    %928 = arith.mulf %923, %927 : vector<2x32xf32>
    %929 = vector.extract_strided_slice %813 {offsets = [4, 0], sizes = [2, 128], strides = [1, 1]} : vector<16x256xf32> to vector<2x128xf32>
    %cst_243 = arith.constant dense<0.000000e+00> : vector<2x128xf32>
    %930 = tpu.matmul %903, %814, %cst_243 {dimension_numbers = #tpu.dot_dimension_numbers<[1], [0], [0], [1], [0, 0, 1, 1], [], []>} : vector<2x32xf32>, vector<32x128xf32>, vector<2x128xf32> -> vector<2x128xf32>
    %931 = arith.addf %929, %930 : vector<2x128xf32>
    %932 = vector.extract_strided_slice %813 {offsets = [10, 128], sizes = [2, 128], strides = [1, 1]} : vector<16x256xf32> to vector<2x128xf32>
    %cst_244 = arith.constant dense<0.000000e+00> : vector<2x128xf32>
    %933 = tpu.matmul %928, %815, %cst_244 {dimension_numbers = #tpu.dot_dimension_numbers<[1], [0], [0], [1], [0, 0, 1, 1], [], []>} : vector<2x32xf32>, vector<32x128xf32>, vector<2x128xf32> -> vector<2x128xf32>
    %934 = arith.addf %932, %933 : vector<2x128xf32>
    %935 = vector.extract_strided_slice %931 {offsets = [0, 0], sizes = [2, 32], strides = [1, 1]} : vector<2x128xf32> to vector<2x32xf32>
    %936 = arith.negf %935 : vector<2x32xf32>
    %937 = math.exp %936 : vector<2x32xf32>
    %cst_245 = arith.constant 1.000000e+00 : f32
    %938 = vector.broadcast %cst_245 : f32 to vector<2x32xf32>
    %939 = arith.addf %938, %937 : vector<2x32xf32>
    %940 = arith.divf %938, %939 : vector<2x32xf32>
    %941 = vector.extract_strided_slice %931 {offsets = [0, 32], sizes = [2, 32], strides = [1, 1]} : vector<2x128xf32> to vector<2x32xf32>
    %942 = arith.negf %941 : vector<2x32xf32>
    %943 = math.exp %942 : vector<2x32xf32>
    %cst_246 = arith.constant 1.000000e+00 : f32
    %944 = vector.broadcast %cst_246 : f32 to vector<2x32xf32>
    %945 = arith.addf %944, %943 : vector<2x32xf32>
    %946 = arith.divf %944, %945 : vector<2x32xf32>
    %947 = vector.extract_strided_slice %931 {offsets = [0, 64], sizes = [2, 32], strides = [1, 1]} : vector<2x128xf32> to vector<2x32xf32>
    %948 = math.tanh %947 : vector<2x32xf32>
    %949 = vector.extract_strided_slice %931 {offsets = [0, 96], sizes = [2, 32], strides = [1, 1]} : vector<2x128xf32> to vector<2x32xf32>
    %950 = arith.negf %949 : vector<2x32xf32>
    %951 = math.exp %950 : vector<2x32xf32>
    %cst_247 = arith.constant 1.000000e+00 : f32
    %952 = vector.broadcast %cst_247 : f32 to vector<2x32xf32>
    %953 = arith.addf %952, %951 : vector<2x32xf32>
    %954 = arith.divf %952, %953 : vector<2x32xf32>
    %955 = arith.mulf %946, %901 : vector<2x32xf32>
    %956 = arith.mulf %940, %948 : vector<2x32xf32>
    %957 = arith.addf %955, %956 : vector<2x32xf32>
    %958 = math.tanh %957 : vector<2x32xf32>
    %959 = arith.mulf %954, %958 : vector<2x32xf32>
    %960 = vector.extract_strided_slice %934 {offsets = [0, 0], sizes = [2, 32], strides = [1, 1]} : vector<2x128xf32> to vector<2x32xf32>
    %961 = arith.negf %960 : vector<2x32xf32>
    %962 = math.exp %961 : vector<2x32xf32>
    %cst_248 = arith.constant 1.000000e+00 : f32
    %963 = vector.broadcast %cst_248 : f32 to vector<2x32xf32>
    %964 = arith.addf %963, %962 : vector<2x32xf32>
    %965 = arith.divf %963, %964 : vector<2x32xf32>
    %966 = vector.extract_strided_slice %934 {offsets = [0, 32], sizes = [2, 32], strides = [1, 1]} : vector<2x128xf32> to vector<2x32xf32>
    %967 = arith.negf %966 : vector<2x32xf32>
    %968 = math.exp %967 : vector<2x32xf32>
    %cst_249 = arith.constant 1.000000e+00 : f32
    %969 = vector.broadcast %cst_249 : f32 to vector<2x32xf32>
    %970 = arith.addf %969, %968 : vector<2x32xf32>
    %971 = arith.divf %969, %970 : vector<2x32xf32>
    %972 = vector.extract_strided_slice %934 {offsets = [0, 64], sizes = [2, 32], strides = [1, 1]} : vector<2x128xf32> to vector<2x32xf32>
    %973 = math.tanh %972 : vector<2x32xf32>
    %974 = vector.extract_strided_slice %934 {offsets = [0, 96], sizes = [2, 32], strides = [1, 1]} : vector<2x128xf32> to vector<2x32xf32>
    %975 = arith.negf %974 : vector<2x32xf32>
    %976 = math.exp %975 : vector<2x32xf32>
    %cst_250 = arith.constant 1.000000e+00 : f32
    %977 = vector.broadcast %cst_250 : f32 to vector<2x32xf32>
    %978 = arith.addf %977, %976 : vector<2x32xf32>
    %979 = arith.divf %977, %978 : vector<2x32xf32>
    %980 = arith.mulf %971, %926 : vector<2x32xf32>
    %981 = arith.mulf %965, %973 : vector<2x32xf32>
    %982 = arith.addf %980, %981 : vector<2x32xf32>
    %983 = math.tanh %982 : vector<2x32xf32>
    %984 = arith.mulf %979, %983 : vector<2x32xf32>
    %985 = vector.extract_strided_slice %813 {offsets = [6, 0], sizes = [2, 128], strides = [1, 1]} : vector<16x256xf32> to vector<2x128xf32>
    %cst_251 = arith.constant dense<0.000000e+00> : vector<2x128xf32>
    %986 = tpu.matmul %959, %814, %cst_251 {dimension_numbers = #tpu.dot_dimension_numbers<[1], [0], [0], [1], [0, 0, 1, 1], [], []>} : vector<2x32xf32>, vector<32x128xf32>, vector<2x128xf32> -> vector<2x128xf32>
    %987 = arith.addf %985, %986 : vector<2x128xf32>
    %988 = vector.extract_strided_slice %813 {offsets = [8, 128], sizes = [2, 128], strides = [1, 1]} : vector<16x256xf32> to vector<2x128xf32>
    %cst_252 = arith.constant dense<0.000000e+00> : vector<2x128xf32>
    %989 = tpu.matmul %984, %815, %cst_252 {dimension_numbers = #tpu.dot_dimension_numbers<[1], [0], [0], [1], [0, 0, 1, 1], [], []>} : vector<2x32xf32>, vector<32x128xf32>, vector<2x128xf32> -> vector<2x128xf32>
    %990 = arith.addf %988, %989 : vector<2x128xf32>
    %991 = vector.extract_strided_slice %987 {offsets = [0, 0], sizes = [2, 32], strides = [1, 1]} : vector<2x128xf32> to vector<2x32xf32>
    %992 = arith.negf %991 : vector<2x32xf32>
    %993 = math.exp %992 : vector<2x32xf32>
    %cst_253 = arith.constant 1.000000e+00 : f32
    %994 = vector.broadcast %cst_253 : f32 to vector<2x32xf32>
    %995 = arith.addf %994, %993 : vector<2x32xf32>
    %996 = arith.divf %994, %995 : vector<2x32xf32>
    %997 = vector.extract_strided_slice %987 {offsets = [0, 32], sizes = [2, 32], strides = [1, 1]} : vector<2x128xf32> to vector<2x32xf32>
    %998 = arith.negf %997 : vector<2x32xf32>
    %999 = math.exp %998 : vector<2x32xf32>
    %cst_254 = arith.constant 1.000000e+00 : f32
    %1000 = vector.broadcast %cst_254 : f32 to vector<2x32xf32>
    %1001 = arith.addf %1000, %999 : vector<2x32xf32>
    %1002 = arith.divf %1000, %1001 : vector<2x32xf32>
    %1003 = vector.extract_strided_slice %987 {offsets = [0, 64], sizes = [2, 32], strides = [1, 1]} : vector<2x128xf32> to vector<2x32xf32>
    %1004 = math.tanh %1003 : vector<2x32xf32>
    %1005 = vector.extract_strided_slice %987 {offsets = [0, 96], sizes = [2, 32], strides = [1, 1]} : vector<2x128xf32> to vector<2x32xf32>
    %1006 = arith.negf %1005 : vector<2x32xf32>
    %1007 = math.exp %1006 : vector<2x32xf32>
    %cst_255 = arith.constant 1.000000e+00 : f32
    %1008 = vector.broadcast %cst_255 : f32 to vector<2x32xf32>
    %1009 = arith.addf %1008, %1007 : vector<2x32xf32>
    %1010 = arith.divf %1008, %1009 : vector<2x32xf32>
    %1011 = arith.mulf %1002, %957 : vector<2x32xf32>
    %1012 = arith.mulf %996, %1004 : vector<2x32xf32>
    %1013 = arith.addf %1011, %1012 : vector<2x32xf32>
    %1014 = math.tanh %1013 : vector<2x32xf32>
    %1015 = arith.mulf %1010, %1014 : vector<2x32xf32>
    %1016 = vector.extract_strided_slice %990 {offsets = [0, 0], sizes = [2, 32], strides = [1, 1]} : vector<2x128xf32> to vector<2x32xf32>
    %1017 = arith.negf %1016 : vector<2x32xf32>
    %1018 = math.exp %1017 : vector<2x32xf32>
    %cst_256 = arith.constant 1.000000e+00 : f32
    %1019 = vector.broadcast %cst_256 : f32 to vector<2x32xf32>
    %1020 = arith.addf %1019, %1018 : vector<2x32xf32>
    %1021 = arith.divf %1019, %1020 : vector<2x32xf32>
    %1022 = vector.extract_strided_slice %990 {offsets = [0, 32], sizes = [2, 32], strides = [1, 1]} : vector<2x128xf32> to vector<2x32xf32>
    %1023 = arith.negf %1022 : vector<2x32xf32>
    %1024 = math.exp %1023 : vector<2x32xf32>
    %cst_257 = arith.constant 1.000000e+00 : f32
    %1025 = vector.broadcast %cst_257 : f32 to vector<2x32xf32>
    %1026 = arith.addf %1025, %1024 : vector<2x32xf32>
    %1027 = arith.divf %1025, %1026 : vector<2x32xf32>
    %1028 = vector.extract_strided_slice %990 {offsets = [0, 64], sizes = [2, 32], strides = [1, 1]} : vector<2x128xf32> to vector<2x32xf32>
    %1029 = math.tanh %1028 : vector<2x32xf32>
    %1030 = vector.extract_strided_slice %990 {offsets = [0, 96], sizes = [2, 32], strides = [1, 1]} : vector<2x128xf32> to vector<2x32xf32>
    %1031 = arith.negf %1030 : vector<2x32xf32>
    %1032 = math.exp %1031 : vector<2x32xf32>
    %cst_258 = arith.constant 1.000000e+00 : f32
    %1033 = vector.broadcast %cst_258 : f32 to vector<2x32xf32>
    %1034 = arith.addf %1033, %1032 : vector<2x32xf32>
    %1035 = arith.divf %1033, %1034 : vector<2x32xf32>
    %1036 = arith.mulf %1027, %982 : vector<2x32xf32>
    %1037 = arith.mulf %1021, %1029 : vector<2x32xf32>
    %1038 = arith.addf %1036, %1037 : vector<2x32xf32>
    %1039 = math.tanh %1038 : vector<2x32xf32>
    %1040 = arith.mulf %1035, %1039 : vector<2x32xf32>
    %1041 = vector.extract_strided_slice %813 {offsets = [8, 0], sizes = [2, 128], strides = [1, 1]} : vector<16x256xf32> to vector<2x128xf32>
    %cst_259 = arith.constant dense<0.000000e+00> : vector<2x128xf32>
    %1042 = tpu.matmul %1015, %814, %cst_259 {dimension_numbers = #tpu.dot_dimension_numbers<[1], [0], [0], [1], [0, 0, 1, 1], [], []>} : vector<2x32xf32>, vector<32x128xf32>, vector<2x128xf32> -> vector<2x128xf32>
    %1043 = arith.addf %1041, %1042 : vector<2x128xf32>
    %1044 = vector.extract_strided_slice %813 {offsets = [6, 128], sizes = [2, 128], strides = [1, 1]} : vector<16x256xf32> to vector<2x128xf32>
    %cst_260 = arith.constant dense<0.000000e+00> : vector<2x128xf32>
    %1045 = tpu.matmul %1040, %815, %cst_260 {dimension_numbers = #tpu.dot_dimension_numbers<[1], [0], [0], [1], [0, 0, 1, 1], [], []>} : vector<2x32xf32>, vector<32x128xf32>, vector<2x128xf32> -> vector<2x128xf32>
    %1046 = arith.addf %1044, %1045 : vector<2x128xf32>
    %1047 = vector.extract_strided_slice %1043 {offsets = [0, 0], sizes = [2, 32], strides = [1, 1]} : vector<2x128xf32> to vector<2x32xf32>
    %1048 = arith.negf %1047 : vector<2x32xf32>
    %1049 = math.exp %1048 : vector<2x32xf32>
    %cst_261 = arith.constant 1.000000e+00 : f32
    %1050 = vector.broadcast %cst_261 : f32 to vector<2x32xf32>
    %1051 = arith.addf %1050, %1049 : vector<2x32xf32>
    %1052 = arith.divf %1050, %1051 : vector<2x32xf32>
    %1053 = vector.extract_strided_slice %1043 {offsets = [0, 32], sizes = [2, 32], strides = [1, 1]} : vector<2x128xf32> to vector<2x32xf32>
    %1054 = arith.negf %1053 : vector<2x32xf32>
    %1055 = math.exp %1054 : vector<2x32xf32>
    %cst_262 = arith.constant 1.000000e+00 : f32
    %1056 = vector.broadcast %cst_262 : f32 to vector<2x32xf32>
    %1057 = arith.addf %1056, %1055 : vector<2x32xf32>
    %1058 = arith.divf %1056, %1057 : vector<2x32xf32>
    %1059 = vector.extract_strided_slice %1043 {offsets = [0, 64], sizes = [2, 32], strides = [1, 1]} : vector<2x128xf32> to vector<2x32xf32>
    %1060 = math.tanh %1059 : vector<2x32xf32>
    %1061 = vector.extract_strided_slice %1043 {offsets = [0, 96], sizes = [2, 32], strides = [1, 1]} : vector<2x128xf32> to vector<2x32xf32>
    %1062 = arith.negf %1061 : vector<2x32xf32>
    %1063 = math.exp %1062 : vector<2x32xf32>
    %cst_263 = arith.constant 1.000000e+00 : f32
    %1064 = vector.broadcast %cst_263 : f32 to vector<2x32xf32>
    %1065 = arith.addf %1064, %1063 : vector<2x32xf32>
    %1066 = arith.divf %1064, %1065 : vector<2x32xf32>
    %1067 = arith.mulf %1058, %1013 : vector<2x32xf32>
    %1068 = arith.mulf %1052, %1060 : vector<2x32xf32>
    %1069 = arith.addf %1067, %1068 : vector<2x32xf32>
    %1070 = math.tanh %1069 : vector<2x32xf32>
    %1071 = arith.mulf %1066, %1070 : vector<2x32xf32>
    %1072 = vector.extract_strided_slice %1046 {offsets = [0, 0], sizes = [2, 32], strides = [1, 1]} : vector<2x128xf32> to vector<2x32xf32>
    %1073 = arith.negf %1072 : vector<2x32xf32>
    %1074 = math.exp %1073 : vector<2x32xf32>
    %cst_264 = arith.constant 1.000000e+00 : f32
    %1075 = vector.broadcast %cst_264 : f32 to vector<2x32xf32>
    %1076 = arith.addf %1075, %1074 : vector<2x32xf32>
    %1077 = arith.divf %1075, %1076 : vector<2x32xf32>
    %1078 = vector.extract_strided_slice %1046 {offsets = [0, 32], sizes = [2, 32], strides = [1, 1]} : vector<2x128xf32> to vector<2x32xf32>
    %1079 = arith.negf %1078 : vector<2x32xf32>
    %1080 = math.exp %1079 : vector<2x32xf32>
    %cst_265 = arith.constant 1.000000e+00 : f32
    %1081 = vector.broadcast %cst_265 : f32 to vector<2x32xf32>
    %1082 = arith.addf %1081, %1080 : vector<2x32xf32>
    %1083 = arith.divf %1081, %1082 : vector<2x32xf32>
    %1084 = vector.extract_strided_slice %1046 {offsets = [0, 64], sizes = [2, 32], strides = [1, 1]} : vector<2x128xf32> to vector<2x32xf32>
    %1085 = math.tanh %1084 : vector<2x32xf32>
    %1086 = vector.extract_strided_slice %1046 {offsets = [0, 96], sizes = [2, 32], strides = [1, 1]} : vector<2x128xf32> to vector<2x32xf32>
    %1087 = arith.negf %1086 : vector<2x32xf32>
    %1088 = math.exp %1087 : vector<2x32xf32>
    %cst_266 = arith.constant 1.000000e+00 : f32
    %1089 = vector.broadcast %cst_266 : f32 to vector<2x32xf32>
    %1090 = arith.addf %1089, %1088 : vector<2x32xf32>
    %1091 = arith.divf %1089, %1090 : vector<2x32xf32>
    %1092 = arith.mulf %1083, %1038 : vector<2x32xf32>
    %1093 = arith.mulf %1077, %1085 : vector<2x32xf32>
    %1094 = arith.addf %1092, %1093 : vector<2x32xf32>
    %1095 = math.tanh %1094 : vector<2x32xf32>
    %1096 = arith.mulf %1091, %1095 : vector<2x32xf32>
    %1097 = vector.extract_strided_slice %813 {offsets = [10, 0], sizes = [2, 128], strides = [1, 1]} : vector<16x256xf32> to vector<2x128xf32>
    %cst_267 = arith.constant dense<0.000000e+00> : vector<2x128xf32>
    %1098 = tpu.matmul %1071, %814, %cst_267 {dimension_numbers = #tpu.dot_dimension_numbers<[1], [0], [0], [1], [0, 0, 1, 1], [], []>} : vector<2x32xf32>, vector<32x128xf32>, vector<2x128xf32> -> vector<2x128xf32>
    %1099 = arith.addf %1097, %1098 : vector<2x128xf32>
    %1100 = vector.extract_strided_slice %813 {offsets = [4, 128], sizes = [2, 128], strides = [1, 1]} : vector<16x256xf32> to vector<2x128xf32>
    %cst_268 = arith.constant dense<0.000000e+00> : vector<2x128xf32>
    %1101 = tpu.matmul %1096, %815, %cst_268 {dimension_numbers = #tpu.dot_dimension_numbers<[1], [0], [0], [1], [0, 0, 1, 1], [], []>} : vector<2x32xf32>, vector<32x128xf32>, vector<2x128xf32> -> vector<2x128xf32>
    %1102 = arith.addf %1100, %1101 : vector<2x128xf32>
    %1103 = vector.extract_strided_slice %1099 {offsets = [0, 0], sizes = [2, 32], strides = [1, 1]} : vector<2x128xf32> to vector<2x32xf32>
    %1104 = arith.negf %1103 : vector<2x32xf32>
    %1105 = math.exp %1104 : vector<2x32xf32>
    %cst_269 = arith.constant 1.000000e+00 : f32
    %1106 = vector.broadcast %cst_269 : f32 to vector<2x32xf32>
    %1107 = arith.addf %1106, %1105 : vector<2x32xf32>
    %1108 = arith.divf %1106, %1107 : vector<2x32xf32>
    %1109 = vector.extract_strided_slice %1099 {offsets = [0, 32], sizes = [2, 32], strides = [1, 1]} : vector<2x128xf32> to vector<2x32xf32>
    %1110 = arith.negf %1109 : vector<2x32xf32>
    %1111 = math.exp %1110 : vector<2x32xf32>
    %cst_270 = arith.constant 1.000000e+00 : f32
    %1112 = vector.broadcast %cst_270 : f32 to vector<2x32xf32>
    %1113 = arith.addf %1112, %1111 : vector<2x32xf32>
    %1114 = arith.divf %1112, %1113 : vector<2x32xf32>
    %1115 = vector.extract_strided_slice %1099 {offsets = [0, 64], sizes = [2, 32], strides = [1, 1]} : vector<2x128xf32> to vector<2x32xf32>
    %1116 = math.tanh %1115 : vector<2x32xf32>
    %1117 = vector.extract_strided_slice %1099 {offsets = [0, 96], sizes = [2, 32], strides = [1, 1]} : vector<2x128xf32> to vector<2x32xf32>
    %1118 = arith.negf %1117 : vector<2x32xf32>
    %1119 = math.exp %1118 : vector<2x32xf32>
    %cst_271 = arith.constant 1.000000e+00 : f32
    %1120 = vector.broadcast %cst_271 : f32 to vector<2x32xf32>
    %1121 = arith.addf %1120, %1119 : vector<2x32xf32>
    %1122 = arith.divf %1120, %1121 : vector<2x32xf32>
    %1123 = arith.mulf %1114, %1069 : vector<2x32xf32>
    %1124 = arith.mulf %1108, %1116 : vector<2x32xf32>
    %1125 = arith.addf %1123, %1124 : vector<2x32xf32>
    %1126 = math.tanh %1125 : vector<2x32xf32>
    %1127 = arith.mulf %1122, %1126 : vector<2x32xf32>
    %1128 = vector.extract_strided_slice %1102 {offsets = [0, 0], sizes = [2, 32], strides = [1, 1]} : vector<2x128xf32> to vector<2x32xf32>
    %1129 = arith.negf %1128 : vector<2x32xf32>
    %1130 = math.exp %1129 : vector<2x32xf32>
    %cst_272 = arith.constant 1.000000e+00 : f32
    %1131 = vector.broadcast %cst_272 : f32 to vector<2x32xf32>
    %1132 = arith.addf %1131, %1130 : vector<2x32xf32>
    %1133 = arith.divf %1131, %1132 : vector<2x32xf32>
    %1134 = vector.extract_strided_slice %1102 {offsets = [0, 32], sizes = [2, 32], strides = [1, 1]} : vector<2x128xf32> to vector<2x32xf32>
    %1135 = arith.negf %1134 : vector<2x32xf32>
    %1136 = math.exp %1135 : vector<2x32xf32>
    %cst_273 = arith.constant 1.000000e+00 : f32
    %1137 = vector.broadcast %cst_273 : f32 to vector<2x32xf32>
    %1138 = arith.addf %1137, %1136 : vector<2x32xf32>
    %1139 = arith.divf %1137, %1138 : vector<2x32xf32>
    %1140 = vector.extract_strided_slice %1102 {offsets = [0, 64], sizes = [2, 32], strides = [1, 1]} : vector<2x128xf32> to vector<2x32xf32>
    %1141 = math.tanh %1140 : vector<2x32xf32>
    %1142 = vector.extract_strided_slice %1102 {offsets = [0, 96], sizes = [2, 32], strides = [1, 1]} : vector<2x128xf32> to vector<2x32xf32>
    %1143 = arith.negf %1142 : vector<2x32xf32>
    %1144 = math.exp %1143 : vector<2x32xf32>
    %cst_274 = arith.constant 1.000000e+00 : f32
    %1145 = vector.broadcast %cst_274 : f32 to vector<2x32xf32>
    %1146 = arith.addf %1145, %1144 : vector<2x32xf32>
    %1147 = arith.divf %1145, %1146 : vector<2x32xf32>
    %1148 = arith.mulf %1139, %1094 : vector<2x32xf32>
    %1149 = arith.mulf %1133, %1141 : vector<2x32xf32>
    %1150 = arith.addf %1148, %1149 : vector<2x32xf32>
    %1151 = math.tanh %1150 : vector<2x32xf32>
    %1152 = arith.mulf %1147, %1151 : vector<2x32xf32>
    %1153 = vector.extract_strided_slice %813 {offsets = [12, 0], sizes = [2, 128], strides = [1, 1]} : vector<16x256xf32> to vector<2x128xf32>
    %cst_275 = arith.constant dense<0.000000e+00> : vector<2x128xf32>
    %1154 = tpu.matmul %1127, %814, %cst_275 {dimension_numbers = #tpu.dot_dimension_numbers<[1], [0], [0], [1], [0, 0, 1, 1], [], []>} : vector<2x32xf32>, vector<32x128xf32>, vector<2x128xf32> -> vector<2x128xf32>
    %1155 = arith.addf %1153, %1154 : vector<2x128xf32>
    %1156 = vector.extract_strided_slice %813 {offsets = [2, 128], sizes = [2, 128], strides = [1, 1]} : vector<16x256xf32> to vector<2x128xf32>
    %cst_276 = arith.constant dense<0.000000e+00> : vector<2x128xf32>
    %1157 = tpu.matmul %1152, %815, %cst_276 {dimension_numbers = #tpu.dot_dimension_numbers<[1], [0], [0], [1], [0, 0, 1, 1], [], []>} : vector<2x32xf32>, vector<32x128xf32>, vector<2x128xf32> -> vector<2x128xf32>
    %1158 = arith.addf %1156, %1157 : vector<2x128xf32>
    %1159 = vector.extract_strided_slice %1155 {offsets = [0, 0], sizes = [2, 32], strides = [1, 1]} : vector<2x128xf32> to vector<2x32xf32>
    %1160 = arith.negf %1159 : vector<2x32xf32>
    %1161 = math.exp %1160 : vector<2x32xf32>
    %cst_277 = arith.constant 1.000000e+00 : f32
    %1162 = vector.broadcast %cst_277 : f32 to vector<2x32xf32>
    %1163 = arith.addf %1162, %1161 : vector<2x32xf32>
    %1164 = arith.divf %1162, %1163 : vector<2x32xf32>
    %1165 = vector.extract_strided_slice %1155 {offsets = [0, 32], sizes = [2, 32], strides = [1, 1]} : vector<2x128xf32> to vector<2x32xf32>
    %1166 = arith.negf %1165 : vector<2x32xf32>
    %1167 = math.exp %1166 : vector<2x32xf32>
    %cst_278 = arith.constant 1.000000e+00 : f32
    %1168 = vector.broadcast %cst_278 : f32 to vector<2x32xf32>
    %1169 = arith.addf %1168, %1167 : vector<2x32xf32>
    %1170 = arith.divf %1168, %1169 : vector<2x32xf32>
    %1171 = vector.extract_strided_slice %1155 {offsets = [0, 64], sizes = [2, 32], strides = [1, 1]} : vector<2x128xf32> to vector<2x32xf32>
    %1172 = math.tanh %1171 : vector<2x32xf32>
    %1173 = vector.extract_strided_slice %1155 {offsets = [0, 96], sizes = [2, 32], strides = [1, 1]} : vector<2x128xf32> to vector<2x32xf32>
    %1174 = arith.negf %1173 : vector<2x32xf32>
    %1175 = math.exp %1174 : vector<2x32xf32>
    %cst_279 = arith.constant 1.000000e+00 : f32
    %1176 = vector.broadcast %cst_279 : f32 to vector<2x32xf32>
    %1177 = arith.addf %1176, %1175 : vector<2x32xf32>
    %1178 = arith.divf %1176, %1177 : vector<2x32xf32>
    %1179 = arith.mulf %1170, %1125 : vector<2x32xf32>
    %1180 = arith.mulf %1164, %1172 : vector<2x32xf32>
    %1181 = arith.addf %1179, %1180 : vector<2x32xf32>
    %1182 = math.tanh %1181 : vector<2x32xf32>
    %1183 = arith.mulf %1178, %1182 : vector<2x32xf32>
    %1184 = vector.extract_strided_slice %1158 {offsets = [0, 0], sizes = [2, 32], strides = [1, 1]} : vector<2x128xf32> to vector<2x32xf32>
    %1185 = arith.negf %1184 : vector<2x32xf32>
    %1186 = math.exp %1185 : vector<2x32xf32>
    %cst_280 = arith.constant 1.000000e+00 : f32
    %1187 = vector.broadcast %cst_280 : f32 to vector<2x32xf32>
    %1188 = arith.addf %1187, %1186 : vector<2x32xf32>
    %1189 = arith.divf %1187, %1188 : vector<2x32xf32>
    %1190 = vector.extract_strided_slice %1158 {offsets = [0, 32], sizes = [2, 32], strides = [1, 1]} : vector<2x128xf32> to vector<2x32xf32>
    %1191 = arith.negf %1190 : vector<2x32xf32>
    %1192 = math.exp %1191 : vector<2x32xf32>
    %cst_281 = arith.constant 1.000000e+00 : f32
    %1193 = vector.broadcast %cst_281 : f32 to vector<2x32xf32>
    %1194 = arith.addf %1193, %1192 : vector<2x32xf32>
    %1195 = arith.divf %1193, %1194 : vector<2x32xf32>
    %1196 = vector.extract_strided_slice %1158 {offsets = [0, 64], sizes = [2, 32], strides = [1, 1]} : vector<2x128xf32> to vector<2x32xf32>
    %1197 = math.tanh %1196 : vector<2x32xf32>
    %1198 = vector.extract_strided_slice %1158 {offsets = [0, 96], sizes = [2, 32], strides = [1, 1]} : vector<2x128xf32> to vector<2x32xf32>
    %1199 = arith.negf %1198 : vector<2x32xf32>
    %1200 = math.exp %1199 : vector<2x32xf32>
    %cst_282 = arith.constant 1.000000e+00 : f32
    %1201 = vector.broadcast %cst_282 : f32 to vector<2x32xf32>
    %1202 = arith.addf %1201, %1200 : vector<2x32xf32>
    %1203 = arith.divf %1201, %1202 : vector<2x32xf32>
    %1204 = arith.mulf %1195, %1150 : vector<2x32xf32>
    %1205 = arith.mulf %1189, %1197 : vector<2x32xf32>
    %1206 = arith.addf %1204, %1205 : vector<2x32xf32>
    %1207 = math.tanh %1206 : vector<2x32xf32>
    %1208 = arith.mulf %1203, %1207 : vector<2x32xf32>
    %1209 = vector.extract_strided_slice %813 {offsets = [14, 0], sizes = [2, 128], strides = [1, 1]} : vector<16x256xf32> to vector<2x128xf32>
    %cst_283 = arith.constant dense<0.000000e+00> : vector<2x128xf32>
    %1210 = tpu.matmul %1183, %814, %cst_283 {dimension_numbers = #tpu.dot_dimension_numbers<[1], [0], [0], [1], [0, 0, 1, 1], [], []>} : vector<2x32xf32>, vector<32x128xf32>, vector<2x128xf32> -> vector<2x128xf32>
    %1211 = arith.addf %1209, %1210 : vector<2x128xf32>
    %1212 = vector.extract_strided_slice %813 {offsets = [0, 128], sizes = [2, 128], strides = [1, 1]} : vector<16x256xf32> to vector<2x128xf32>
    %cst_284 = arith.constant dense<0.000000e+00> : vector<2x128xf32>
    %1213 = tpu.matmul %1208, %815, %cst_284 {dimension_numbers = #tpu.dot_dimension_numbers<[1], [0], [0], [1], [0, 0, 1, 1], [], []>} : vector<2x32xf32>, vector<32x128xf32>, vector<2x128xf32> -> vector<2x128xf32>
    %1214 = arith.addf %1212, %1213 : vector<2x128xf32>
    %1215 = vector.extract_strided_slice %1211 {offsets = [0, 0], sizes = [2, 32], strides = [1, 1]} : vector<2x128xf32> to vector<2x32xf32>
    %1216 = arith.negf %1215 : vector<2x32xf32>
    %1217 = math.exp %1216 : vector<2x32xf32>
    %cst_285 = arith.constant 1.000000e+00 : f32
    %1218 = vector.broadcast %cst_285 : f32 to vector<2x32xf32>
    %1219 = arith.addf %1218, %1217 : vector<2x32xf32>
    %1220 = arith.divf %1218, %1219 : vector<2x32xf32>
    %1221 = vector.extract_strided_slice %1211 {offsets = [0, 32], sizes = [2, 32], strides = [1, 1]} : vector<2x128xf32> to vector<2x32xf32>
    %1222 = arith.negf %1221 : vector<2x32xf32>
    %1223 = math.exp %1222 : vector<2x32xf32>
    %cst_286 = arith.constant 1.000000e+00 : f32
    %1224 = vector.broadcast %cst_286 : f32 to vector<2x32xf32>
    %1225 = arith.addf %1224, %1223 : vector<2x32xf32>
    %1226 = arith.divf %1224, %1225 : vector<2x32xf32>
    %1227 = vector.extract_strided_slice %1211 {offsets = [0, 64], sizes = [2, 32], strides = [1, 1]} : vector<2x128xf32> to vector<2x32xf32>
    %1228 = math.tanh %1227 : vector<2x32xf32>
    %1229 = vector.extract_strided_slice %1211 {offsets = [0, 96], sizes = [2, 32], strides = [1, 1]} : vector<2x128xf32> to vector<2x32xf32>
    %1230 = arith.negf %1229 : vector<2x32xf32>
    %1231 = math.exp %1230 : vector<2x32xf32>
    %cst_287 = arith.constant 1.000000e+00 : f32
    %1232 = vector.broadcast %cst_287 : f32 to vector<2x32xf32>
    %1233 = arith.addf %1232, %1231 : vector<2x32xf32>
    %1234 = arith.divf %1232, %1233 : vector<2x32xf32>
    %1235 = arith.mulf %1226, %1181 : vector<2x32xf32>
    %1236 = arith.mulf %1220, %1228 : vector<2x32xf32>
    %1237 = arith.addf %1235, %1236 : vector<2x32xf32>
    %1238 = math.tanh %1237 : vector<2x32xf32>
    %1239 = arith.mulf %1234, %1238 : vector<2x32xf32>
    %1240 = vector.extract_strided_slice %1214 {offsets = [0, 0], sizes = [2, 32], strides = [1, 1]} : vector<2x128xf32> to vector<2x32xf32>
    %1241 = arith.negf %1240 : vector<2x32xf32>
    %1242 = math.exp %1241 : vector<2x32xf32>
    %cst_288 = arith.constant 1.000000e+00 : f32
    %1243 = vector.broadcast %cst_288 : f32 to vector<2x32xf32>
    %1244 = arith.addf %1243, %1242 : vector<2x32xf32>
    %1245 = arith.divf %1243, %1244 : vector<2x32xf32>
    %1246 = vector.extract_strided_slice %1214 {offsets = [0, 32], sizes = [2, 32], strides = [1, 1]} : vector<2x128xf32> to vector<2x32xf32>
    %1247 = arith.negf %1246 : vector<2x32xf32>
    %1248 = math.exp %1247 : vector<2x32xf32>
    %cst_289 = arith.constant 1.000000e+00 : f32
    %1249 = vector.broadcast %cst_289 : f32 to vector<2x32xf32>
    %1250 = arith.addf %1249, %1248 : vector<2x32xf32>
    %1251 = arith.divf %1249, %1250 : vector<2x32xf32>
    %1252 = vector.extract_strided_slice %1214 {offsets = [0, 64], sizes = [2, 32], strides = [1, 1]} : vector<2x128xf32> to vector<2x32xf32>
    %1253 = math.tanh %1252 : vector<2x32xf32>
    %1254 = vector.extract_strided_slice %1214 {offsets = [0, 96], sizes = [2, 32], strides = [1, 1]} : vector<2x128xf32> to vector<2x32xf32>
    %1255 = arith.negf %1254 : vector<2x32xf32>
    %1256 = math.exp %1255 : vector<2x32xf32>
    %cst_290 = arith.constant 1.000000e+00 : f32
    %1257 = vector.broadcast %cst_290 : f32 to vector<2x32xf32>
    %1258 = arith.addf %1257, %1256 : vector<2x32xf32>
    %1259 = arith.divf %1257, %1258 : vector<2x32xf32>
    %1260 = arith.mulf %1251, %1206 : vector<2x32xf32>
    %1261 = arith.mulf %1245, %1253 : vector<2x32xf32>
    %1262 = arith.addf %1260, %1261 : vector<2x32xf32>
    %1263 = math.tanh %1262 : vector<2x32xf32>
    %1264 = arith.mulf %1259, %1263 : vector<2x32xf32>
    %1265 = tpu.concatenate %847, %1264 in 1 : vector<2x32xf32>, vector<2x32xf32> -> vector<2x64xf32>
    %1266 = tpu.concatenate %903, %1208 in 1 : vector<2x32xf32>, vector<2x32xf32> -> vector<2x64xf32>
    %1267 = tpu.concatenate %959, %1152 in 1 : vector<2x32xf32>, vector<2x32xf32> -> vector<2x64xf32>
    %1268 = tpu.concatenate %1015, %1096 in 1 : vector<2x32xf32>, vector<2x32xf32> -> vector<2x64xf32>
    %1269 = tpu.concatenate %1071, %1040 in 1 : vector<2x32xf32>, vector<2x32xf32> -> vector<2x64xf32>
    %1270 = tpu.concatenate %1127, %984 in 1 : vector<2x32xf32>, vector<2x32xf32> -> vector<2x64xf32>
    %1271 = tpu.concatenate %1183, %928 in 1 : vector<2x32xf32>, vector<2x32xf32> -> vector<2x64xf32>
    %1272 = tpu.concatenate %1239, %872 in 1 : vector<2x32xf32>, vector<2x32xf32> -> vector<2x64xf32>
    %1273 = tpu.concatenate %1265, %1266, %1267, %1268, %1269, %1270, %1271, %1272 in 0 : vector<2x64xf32>, vector<2x64xf32>, vector<2x64xf32>, vector<2x64xf32>, vector<2x64xf32>, vector<2x64xf32>, vector<2x64xf32>, vector<2x64xf32> -> vector<16x64xf32>
    %c0_291 = arith.constant 0 : index
    %c0_292 = arith.constant 0 : index
    %1274 = vector.load %arg9[%c0_291, %c0_292] : memref<64x128xf32, #tpu.memory_space<vmem>>, vector<64x128xf32>
    %cst_293 = arith.constant dense<0.000000e+00> : vector<16x128xf32>
    %1275 = tpu.matmul %1273, %1274, %cst_293 {dimension_numbers = #tpu.dot_dimension_numbers<[1], [0], [0], [1], [0, 0, 1, 1], [], []>} : vector<16x64xf32>, vector<64x128xf32>, vector<16x128xf32> -> vector<16x128xf32>
    %c0_294 = arith.constant 0 : index
    %c0_295 = arith.constant 0 : index
    %1276 = vector.load %arg10[%c0_294, %c0_295] : memref<1x128xf32, #tpu.memory_space<vmem>>, vector<1x128xf32>
    %1277 = vector.broadcast %1276 : vector<1x128xf32> to vector<16x128xf32>
    %1278 = arith.addf %1275, %1277 : vector<16x128xf32>
    %c0_296 = arith.constant 0 : index
    %c0_297 = arith.constant 0 : index
    %1279 = vector.load %arg11[%c0_296, %c0_297] : memref<16x128xf32, #tpu.memory_space<vmem>>, vector<16x128xf32>
    tpu.vector_store %arg11[%c0_296, %c0_297], %1278 {strides = array<i32>} : memref<16x128xf32, #tpu.memory_space<vmem>>, vector<16x128xf32>,
    return
  }
  func.func @transform_0(%arg0: i32) -> (i32, i32, i32) {
    %c0_i32 = arith.constant 0 : i32
    %c0_i32_0 = arith.constant 0 : i32
    %c0_i32_1 = arith.constant 0 : i32
    %c0_i32_2 = arith.constant 0 : i32
    return %c0_i32, %c0_i32_0, %c0_i32_1 : i32, i32, i32
  }
  func.func @transform_1(%arg0: i32) -> (i32, i32) {
    %c0_i32 = arith.constant 0 : i32
    %c0_i32_0 = arith.constant 0 : i32
    %c0_i32_1 = arith.constant 0 : i32
    return %c0_i32, %c0_i32_0 : i32, i32
  }
  func.func @transform_2(%arg0: i32) -> (i32, i32) {
    %c0_i32 = arith.constant 0 : i32
    %c0_i32_0 = arith.constant 0 : i32
    %c0_i32_1 = arith.constant 0 : i32
    return %c0_i32, %c0_i32_0 : i32, i32
  }
  func.func @transform_3(%arg0: i32) -> (i32, i32) {
    %c0_i32 = arith.constant 0 : i32
    %c0_i32_0 = arith.constant 0 : i32
    %c0_i32_1 = arith.constant 0 : i32
    return %c0_i32, %c0_i32_0 : i32, i32
  }
  func.func @transform_4(%arg0: i32) -> (i32, i32) {
    %c0_i32 = arith.constant 0 : i32
    %c0_i32_0 = arith.constant 0 : i32
    %c0_i32_1 = arith.constant 0 : i32
    return %c0_i32, %c0_i32_0 : i32, i32
  }
  func.func @transform_5(%arg0: i32) -> (i32, i32) {
    %c0_i32 = arith.constant 0 : i32
    %c0_i32_0 = arith.constant 0 : i32
    %c0_i32_1 = arith.constant 0 : i32
    return %c0_i32, %c0_i32_0 : i32, i32
  }
  func.func @transform_6(%arg0: i32) -> (i32, i32) {
    %c0_i32 = arith.constant 0 : i32
    %c0_i32_0 = arith.constant 0 : i32
    %c0_i32_1 = arith.constant 0 : i32
    return %c0_i32, %c0_i32_0 : i32, i32
  }
  func.func @transform_7(%arg0: i32) -> (i32, i32) {
    %c0_i32 = arith.constant 0 : i32
    %c0_i32_0 = arith.constant 0 : i32
    %c0_i32_1 = arith.constant 0 : i32
    return %c0_i32, %c0_i32_0 : i32, i32
  }
  func.func @transform_8(%arg0: i32) -> (i32, i32) {
    %c0_i32 = arith.constant 0 : i32
    %c0_i32_0 = arith.constant 0 : i32
    %c0_i32_1 = arith.constant 0 : i32
    return %c0_i32, %c0_i32_0 : i32, i32
  }
  func.func @transform_9(%arg0: i32) -> (i32, i32) {
    %c0_i32 = arith.constant 0 : i32
    %c0_i32_0 = arith.constant 0 : i32
    %c0_i32_1 = arith.constant 0 : i32
    return %c0_i32, %c0_i32_0 : i32, i32
  }
  func.func @transform_10(%arg0: i32) -> (i32, i32) {
    %c0_i32 = arith.constant 0 : i32
    %c0_i32_0 = arith.constant 0 : i32
    %c0_i32_1 = arith.constant 0 : i32
    return %c0_i32, %c0_i32_0 : i32, i32
  }
}

</mosaic_0001>

<bundles_post_ra>
// kernel: _forward_core.1
= control target key start
LH: loop header
LB: loop body
LE: loop exit
PB: predicated region body
PF: predicated region fallthrough
CT: control target
= control target key end

     0   :  { %vm225_vm0 = vcmask 1042432   ;;  %v8846_v3 = vmov 0   ;;  %v8847_v4 = vmov 1   ;;  %s8849_s19 = smov 0.0   ;;  %s12289_s0 = inlined_call_operand.vmem [shape: f32[16,3,256], index: 0, kind: input, shape index: {}]   ;;  %s12290_s2 = inlined_call_operand.vmem [shape: f32[64,3], index: 2, kind: input, shape index: {}]   ;;  %s12291_s3 = inlined_call_operand.vmem [shape: f32[64,1], index: 3, kind: input, shape index: {}]   ;;  %s12292_s1 = inlined_call_operand.vmem [shape: f32[16,1], index: 1, kind: input, shape index: {}]   ;;  %s12293_s4 = inlined_call_operand.vmem [shape: f32[64,256], index: 4, kind: input, shape index: {}]   ;;  %s12294_s6 = inlined_call_operand.vmem [shape: f32[32,128], index: 6, kind: input, shape index: {}]   ;;  %s12295_s7 = inlined_call_operand.vmem [shape: f32[32,128], index: 7, kind: input, shape index: {}]   ;;  %s12296_s5 = inlined_call_operand.vmem [shape: f32[1,256], index: 5, kind: input, shape index: {}]   ;;  %s12297_s8 = inlined_call_operand.vmem [shape: f32[64,128], index: 8, kind: input, shape index: {}]   ;;  %s12298_s9 = inlined_call_operand.vmem [shape: f32[1,128], index: 9, kind: input, shape index: {}]   ;;  %s12299_s10 = inlined_call_operand.vmem [shape: f32[16,128], index: 10, kind: output, shape index: {}]  }
   0x1   :  { %v8914_v0 = vld [vmem:[%s12289_s0] sm:$0x77]  ;;  %v7758_v1 = vld [vmem:[%s12289_s0 + $0x8] sm:$0x77]  ;;  %v7760_v2 = vld [vmem:[%s12289_s0 + $0x10] sm:$0x77]  ;;  %8598 = vset.pattern.permute.xlu1 %v8846_v3  ;;  %8603 = vset.pattern.permute.xlu0 %v8847_v4 }
   0x2   :  { %v223_v5 = vcombine.high %v8914_v0, %v8914_v0  ;;  %v226_v6 = vsel %vm225_vm0, %v8914_v0, 0.0  ;;  %v238_v7 = vmul.f32 %v8914_v0, %v8914_v0  ;;  %v570_v8 = vcombine.high %v7758_v1, %v7758_v1  ;;  %v8933_v9 = vld [vmem:[%s12289_s0 + $0x18] sm:$0x77]  ;;  %v7764_v22 = vld [vmem:[%s12289_s0 + $0x20] sm:$0x77] }
   0x3   :  { %v572_v10 = vsel %vm225_vm0, %v7758_v1, 0.0  ;;  %v584_v11 = vmul.f32 %v7758_v1, %v7758_v1  ;;  %v930_v12 = vmul.f32 %v7760_v2, %v7760_v2  ;;  %v1276_v13 = vmul.f32 %v8933_v9, %v8933_v9  ;;  %v7766_v32 = vld [vmem:[%s12289_s0 + $0x28] sm:$0x77]  ;;  %v7768_v38 = vld [vmem:[%s12289_s0 + $0x30] sm:$0x77] }
   0x4   :  { %v227_v14 = vsel %vm225_vm0, %v223_v5, 0.0  ;;  %v240_v15 = vcombine.high %v238_v7, %v238_v7  ;;  %v242_v16 = vsel %vm225_vm0, %v238_v7, 0.0  ;;  %v573_v17 = vsel %vm225_vm0, %v570_v8, 0.0  ;;  %v8962_v44 = vld [vmem:[%s12289_s0 + $0x38] sm:$0x77] }
   0x5   :  { %v228_v18 = vadd.f32 %v227_v14, %v226_v6  ;;  %v574_v19 = vadd.f32 %v573_v17, %v572_v10  ;;  %v586_v20 = vcombine.high %v584_v11, %v584_v11  ;;  %v588_v21 = vsel %vm225_vm0, %v584_v11, 0.0  ;;  %v8967_v47 = vld [vmem:[%s12289_s0 + $0x40] sm:$0x77]  ;;  %v8986_v63 = vld [vmem:[%s12289_s0 + $0x48] sm:$0x77] }
   0x6   :  { %v243_v23 = vsel %vm225_vm0, %v240_v15, 0.0  ;;  %v932_v24 = vcombine.high %v930_v12, %v930_v12  ;;  %v934_v27 = vsel %vm225_vm0, %v930_v12, 0.0  ;;  %v1278_v30 = vcombine.high %v1276_v13, %v1276_v13 }
   0x7   :  { %229 = vadd.xlane.f32.xlu0 %v228_v18  ;;  %v244_v25 = vadd.f32 %v243_v23, %v242_v16  ;;  %575 = vadd.xlane.f32.xlu1 %v574_v19  ;;  %v589_v26 = vsel %vm225_vm0, %v586_v20, 0.0  ;;  %v1622_v31 = vmul.f32 %v7764_v22, %v7764_v22  ;;  %v1280_v34 = vsel %vm225_vm0, %v1276_v13, 0.0  ;;  %v8998_v13 = vld [vmem:[%s12289_s0 + $0x50] sm:$0x77]  ;;  %v7778_v23 = vld [vmem:[%s12289_s0 + $0x58] sm:$0x77] }
   0x8   :  { %v590_v28 = vadd.f32 %v589_v26, %v588_v21  ;;  %v935_v29 = vsel %vm225_vm0, %v932_v24, 0.0  ;;  %v1281_v35 = vsel %vm225_vm0, %v1278_v30, 0.0  ;;  %v1968_v37 = vmul.f32 %v7766_v32, %v7766_v32 }
   0x9   :  { %v936_v33 = vadd.f32 %v935_v29, %v934_v27  ;;  %v1624_v36 = vcombine.high %v1622_v31, %v1622_v31  ;;  %v1282_v39 = vadd.f32 %v1281_v35, %v1280_v34  ;;  %v1626_v40 = vsel %vm225_vm0, %v1622_v31, 0.0 }
   0xa   :  { %v1970_v42 = vcombine.high %v1968_v37, %v1968_v37  ;;  %v2314_v43 = vmul.f32 %v7768_v38, %v7768_v38  ;;  %v916_v45 = vcombine.high %v7760_v2, %v7760_v2  ;;  %v1972_v48 = vsel %vm225_vm0, %v1968_v37, 0.0 }
   0xb   :  { %245 = vadd.xlane.f32.xlu0 %v244_v25  ;;  %591 = vadd.xlane.f32.xlu1 %v590_v28  ;;  %v1627_v41 = vsel %vm225_vm0, %v1624_v36, 0.0  ;;  %v2660_v51 = vmul.f32 %v8962_v44, %v8962_v44  ;;  %v918_v52 = vsel %vm225_vm0, %v7760_v2, 0.0  ;;  %v3006_v54 = vmul.f32 %v8967_v47, %v8967_v47 }
   0xc   :  { %v1628_v46 = vadd.f32 %v1627_v41, %v1626_v40  ;;  %v1973_v49 = vsel %vm225_vm0, %v1970_v42, 0.0  ;;  %v2316_v50 = vcombine.high %v2314_v43, %v2314_v43  ;;  %v919_v53 = vsel %vm225_vm0, %v916_v45, 0.0 }
   0xd   :  { %v1974_v55 = vadd.f32 %v1973_v49, %v1972_v48  ;;  %v2318_v56 = vsel %vm225_vm0, %v2314_v43, 0.0  ;;  %v920_v57 = vadd.f32 %v919_v53, %v918_v52  ;;  %v1262_v58 = vcombine.high %v8933_v9, %v8933_v9  ;;  %v7782_v43 = vld [vmem:[%s12289_s0 + $0x68] sm:$0x77] }
   0xe   :  { %v2319_v59 = vsel %vm225_vm0, %v2316_v50, 0.0  ;;  %v2662_v60 = vcombine.high %v2660_v51, %v2660_v51  ;;  %v1264_v61 = vsel %vm225_vm0, %v8933_v9, 0.0  ;;  %v1608_v62 = vcombine.high %v7764_v22, %v7764_v22 }
   0xf   :  { %937 = vadd.xlane.f32.xlu1 %v936_v33  ;;  %921 = vadd.xlane.f32.xlu0 %v920_v57  ;;  %v1265_v1 = vsel %vm225_vm0, %v1262_v58, 0.0  ;;  %v1610_v5 = vsel %vm225_vm0, %v7764_v22, 0.0  ;;  %v1954_v7 = vcombine.high %v7766_v32, %v7766_v32  ;;  %v2320_v8 = vadd.f32 %v2319_v59, %v2318_v56  ;;  %v7780_v33 = vld [vmem:[%s12289_s0 + $0x60] sm:$0x77] }
  0x10   :  { %v1266_v2 = vadd.f32 %v1265_v1, %v1264_v61  ;;  %v1611_v6 = vsel %vm225_vm0, %v1608_v62, 0.0  ;;  %v2664_v10 = vsel %vm225_vm0, %v2660_v51, 0.0  ;;  %v2665_v9 = vsel %vm225_vm0, %v2662_v60, 0.0 }
  0x11   :  { %v3008_v11 = vcombine.high %v3006_v54, %v3006_v54  ;;  %v3352_v12 = vmul.f32 %v8986_v63, %v8986_v63  ;;  %v1612_v14 = vadd.f32 %v1611_v6, %v1610_v5  ;;  %v1956_v15 = vsel %vm225_vm0, %v7766_v32, 0.0 }
  0x12   :  { %v1957_v16 = vsel %vm225_vm0, %v1954_v7, 0.0  ;;  %v2300_v17 = vcombine.high %v7768_v38, %v7768_v38  ;;  %v2666_v18 = vadd.f32 %v2665_v9, %v2664_v10  ;;  %v3010_v19 = vsel %vm225_vm0, %v3006_v54, 0.0  ;;  %v7784_v54 = vld [vmem:[%s12289_s0 + $0x70] sm:$0x77] }
  0x13   :  { %1283 = vadd.xlane.f32.xlu1 %v1282_v39  ;;  %1267 = vadd.xlane.f32.xlu0 %v1266_v2  ;;  %v3011_v20 = vsel %vm225_vm0, %v3008_v11, 0.0  ;;  %v3354_v21 = vcombine.high %v3352_v12, %v3352_v12  ;;  %v3698_v22 = vmul.f32 %v8998_v13, %v8998_v13  ;;  %v1958_v24 = vadd.f32 %v1957_v16, %v1956_v15 }
  0x14   :  { %v2302_v25 = vsel %vm225_vm0, %v7768_v38, 0.0  ;;  %v2303_v26 = vsel %vm225_vm0, %v2300_v17, 0.0  ;;  %v2646_v27 = vcombine.high %v8962_v44, %v8962_v44  ;;  %v3012_v28 = vadd.f32 %v3011_v20, %v3010_v19 }
  0x15   :  { %v3356_v29 = vsel %vm225_vm0, %v3352_v12, 0.0  ;;  %v3357_v30 = vsel %vm225_vm0, %v3354_v21, 0.0  ;;  %v3700_v31 = vcombine.high %v3698_v22, %v3698_v22  ;;  %v4044_v32 = vmul.f32 %v7778_v23, %v7778_v23 }
  0x16   :  { %v2304_v34 = vadd.f32 %v2303_v26, %v2302_v25  ;;  %v2648_v35 = vsel %vm225_vm0, %v8962_v44, 0.0  ;;  %v2649_v36 = vsel %vm225_vm0, %v2646_v27, 0.0  ;;  %v2992_v37 = vcombine.high %v8967_v47, %v8967_v47 }
  0x17   :  { %1629 = vadd.xlane.f32.xlu1 %v1628_v46  ;;  %1613 = vadd.xlane.f32.xlu0 %v1612_v14  ;;  %v3358_v38 = vadd.f32 %v3357_v30, %v3356_v29  ;;  %v3702_v39 = vsel %vm225_vm0, %v3698_v22, 0.0  ;;  %v3703_v40 = vsel %vm225_vm0, %v3700_v31, 0.0  ;;  %v4046_v41 = vcombine.high %v4044_v32, %v4044_v32  ;;  %v36_v30 = vld [vmem:[%s12290_s2 + $0x8] sm:$0xff]  ;;  %v35_v31 = vld [vmem:[%s12290_s2] sm:$0xff] }
  0x18   :  { %v4390_v42 = vmul.f32 %v7780_v33, %v7780_v33  ;;  %v2650_v45 = vadd.f32 %v2649_v36, %v2648_v35  ;;  %v2994_v44 = vsel %vm225_vm0, %v8967_v47, 0.0  ;;  %v2995_v46 = vsel %vm225_vm0, %v2992_v37, 0.0  ;;  %v147_v35 = vld [vmem:[%s12291_s3] sm:$0xff]  ;;  %v148_v36 = vld [vmem:[%s12291_s3 + $0x8] sm:$0xff]  ;;  %v37_v37 = vld [vmem:[%s12290_s2 + $0x10] sm:$0xff] }
  0x19   :  { %v3338_v48 = vcombine.high %v8986_v63, %v8986_v63  ;;  %v3704_v49 = vadd.f32 %v3703_v40, %v3702_v39  ;;  %v4048_v50 = vsel %vm225_vm0, %v4044_v32, 0.0  ;;  %v4049_v51 = vsel %vm225_vm0, %v4046_v41, 0.0  ;;  %v151_v39 = vld [vmem:[%s12291_s3 + $0x20] sm:$0xff]  ;;  %v42_v40 = vld [vmem:[%s12290_s2 + $0x38] sm:$0xff] }
  0x1a   :  { %v4392_v52 = vcombine.high %v4390_v42, %v4390_v42  ;;  %v4736_v53 = vmul.f32 %v7782_v43, %v7782_v43  ;;  %v3340_v47 = vsel %vm225_vm0, %v8986_v63, 0.0  ;;  %v3684_v57 = vcombine.high %v8998_v13, %v8998_v13  ;;  %v150_v41 = vld [vmem:[%s12291_s3 + $0x18] sm:$0xff] }
  0x1b   :  { %1975 = vadd.xlane.f32.xlu1 %v1974_v55  ;;  %1959 = vadd.xlane.f32.xlu0 %v1958_v24  ;;  %v2996_v55 = vadd.f32 %v2995_v46, %v2994_v44  ;;  %v3341_v56 = vsel %vm225_vm0, %v3338_v48, 0.0  ;;  %v4050_v58 = vadd.f32 %v4049_v51, %v4048_v50  ;;  %v4394_v59 = vsel %vm225_vm0, %v4390_v42, 0.0  ;;  %v39_v42 = vld [vmem:[%s12290_s2 + $0x20] sm:$0xff]  ;;  %v152_v48 = vld [vmem:[%s12291_s3 + $0x28] sm:$0xff] }
  0x1c   :  { %v4395_v60 = vsel %vm225_vm0, %v4392_v52, 0.0  ;;  %v4738_v61 = vcombine.high %v4736_v53, %v4736_v53  ;;  %v5082_v62 = vmul.f32 %v7784_v54, %v7784_v54  ;;  %v3342_v1 = vadd.f32 %v3341_v56, %v3340_v47 }
  0x1d   :  { %v3686_v2 = vsel %vm225_vm0, %v8998_v13, 0.0  ;;  %v3687_v63 = vsel %vm225_vm0, %v3684_v57, 0.0  ;;  %v4030_v5 = vcombine.high %v7778_v23, %v7778_v23  ;;  %v4396_v6 = vadd.f32 %v4395_v60, %v4394_v59 }
  0x1e   :  { %v4740_v7 = vsel %vm225_vm0, %v4736_v53, 0.0  ;;  %v5084_v10 = vcombine.high %v5082_v62, %v5082_v62  ;;  %v3688_v9 = vadd.f32 %v3687_v63, %v3686_v2  ;;  %v4032_v11 = vsel %vm225_vm0, %v7778_v23, 0.0 }
  0x1f   :  { %2321 = vadd.xlane.f32.xlu1 %v2320_v8  ;;  %2305 = vadd.xlane.f32.xlu0 %v2304_v34  ;;  %v4741_v8 = vsel %vm225_vm0, %v4738_v61, 0.0  ;;  %v4033_v12 = vsel %vm225_vm0, %v4030_v5, 0.0  ;;  %v4376_v14 = vcombine.high %v7780_v33, %v7780_v33  ;;  %v5086_v13 = vsel %vm225_vm0, %v5082_v62, 0.0  ;;  %v40_v34 = vld [vmem:[%s12290_s2 + $0x28] sm:$0xff] }
  0x20   :  { %v4742_v15 = vadd.f32 %v4741_v8, %v4740_v7  ;;  %v5087_v16 = vsel %vm225_vm0, %v5084_v10, 0.0  ;;  %v4034_v17 = vadd.f32 %v4033_v12, %v4032_v11  ;;  %v4722_v20 = vcombine.high %v7782_v43, %v7782_v43 }
  0x21   :  { %v4379_v19 = vsel %vm225_vm0, %v4376_v14, 0.0  ;;  %v5088_v21 = vadd.f32 %v5087_v16, %v5086_v13  ;;  %v4724_v23 = vsel %vm225_vm0, %v7782_v43, 0.0  ;;  %v5068_v25 = vcombine.high %v7784_v54, %v7784_v54  ;;  %v153_v43 = vld [vmem:[%s12291_s3 + $0x30] sm:$0xff] }
  0x22   :  { %v4725_v24 = vsel %vm225_vm0, %v4722_v20, 0.0  ;;  %v5070_v27 = vsel %vm225_vm0, %v7784_v54, 0.0  ;;  %v8848_v32 = vmov 2   ;;  %v41_v54 = vld [vmem:[%s12290_s2 + $0x30] sm:$0xff] }
  0x23   :  { %2667 = vadd.xlane.f32.xlu1 %v2666_v18  ;;  %2651 = vadd.xlane.f32.xlu0 %v2650_v45  ;;  %v4378_v18 = vsel %vm225_vm0, %v7780_v33, 0.0  ;;  %v4726_v26 = vadd.f32 %v4725_v24, %v4724_v23  ;;  %v38_v33 = vld [vmem:[%s12290_s2 + $0x18] sm:$0xff] }
  0x24   :  { %v4380_v22 = vadd.f32 %v4379_v19, %v4378_v18 }
  0x27   :  { %3013 = vadd.xlane.f32.xlu1 %v3012_v28  ;;  %2997 = vadd.xlane.f32.xlu0 %v2996_v55  ;;  %v5071_v28 = vsel %vm225_vm0, %v5068_v25, 0.0 }
  0x28   :  { %v5072_v29 = vadd.f32 %v5071_v28, %v5070_v27 }
  0x2b   :  { %3359 = vadd.xlane.f32.xlu1 %v3358_v38  ;;  %3343 = vadd.xlane.f32.xlu0 %v3342_v1  ;;  %v149_v38 = vld [vmem:[%s12291_s3 + $0x10] sm:$0xff] }
  0x2f   :  { %3705 = vadd.xlane.f32.xlu1 %v3704_v49  ;;  %3689 = vadd.xlane.f32.xlu0 %v3688_v9 }
  0x33   :  { %4051 = vadd.xlane.f32.xlu1 %v4050_v58  ;;  %4035 = vadd.xlane.f32.xlu0 %v4034_v17 }
  0x37   :  { %4397 = vadd.xlane.f32.xlu1 %v4396_v6  ;;  %4381 = vadd.xlane.f32.xlu0 %v4380_v22  ;;  %v154_v6 = vld [vmem:[%s12291_s3 + $0x38] sm:$0xff] }
  0x3b   :  { %4743 = vadd.xlane.f32.xlu1 %v4742_v15  ;;  %4727 = vadd.xlane.f32.xlu0 %v4726_v26 }
  0x3f   :  { %5089 = vadd.xlane.f32.xlu1 %v5088_v21  ;;  %5073 = vadd.xlane.f32.xlu0 %v5072_v29 }
  0x50   :  { %50 = vperm.xlu1 %8598, %v36_v30  }
  0x54   :  { %8599 = vset.pattern.permute.xlu1 %v8847_v4 }
  0x55   :  { %84 = vperm.xlu1 %8599, %v35_v31   ;;  %96 = vperm.xlu0 %8603, %v38_v33  }
  0x59   :  { %88 = vperm.xlu1 %8599, %v36_v30   ;;  %104 = vperm.xlu0 %8603, %v40_v34  }
  0x5d   :  { %8600 = vset.pattern.permute.xlu1 %v8848_v32  ;;  %8607 = vset.pattern.permute.xlu0 %v8846_v3 }
  0x5e   :  { %116 = vperm.xlu1 %8600, %v35_v31   ;;  %45 = vperm.xlu0 %8607, %v35_v31  }
  0x62   :  { %120 = vperm.xlu1 %8600, %v36_v30   ;;  %60 = vperm.xlu0 %8607, %v38_v33  }
  0x66   :  { %8601 = vset.pattern.permute.xlu1 %v8846_v3  ;;  %167 = vperm.xlu0 %8607, %v149_v38  }
  0x67   :  { %157 = vperm.xlu1 %8601, %v147_v35  }
  0x6a   :  { %70 = vperm.xlu0 %8607, %v40_v34  }
  0x6b   :  { %162 = vperm.xlu1 %8601, %v148_v36  }
  0x6e   :  { %177 = vperm.xlu0 %8607, %v151_v39  }
  0x6f   :  { %55 = vperm.xlu1 %8601, %v37_v37  }
  0x72   :  { %80 = vperm.xlu0 %8607, %v42_v40  }
  0x73   :  { %8602 = vset.pattern.permute.xlu1 %v8847_v4 }
  0x74   :  { %92 = vperm.xlu1 %8602, %v37_v37  }
  0x76   :  { %8611 = vset.pattern.permute.xlu0 %v8847_v4 }
  0x77   :  { %112 = vperm.xlu0 %8611, %v42_v40  }
  0x78   :  { %8604 = vset.pattern.permute.xlu1 %v8848_v32 }
  0x79   :  { %124 = vperm.xlu1 %8604, %v37_v37  }
  0x7b   :  { %8613 = vset.pattern.permute.xlu0 %v8846_v3 }
  0x7c   :  { %187 = vperm.xlu0 %8613, %v153_v43  }
  0x7d   :  { %128 = vperm.xlu1 %8604, %v38_v33  }
  0x81   :  { %8605 = vset.pattern.permute.xlu1 %v8846_v3 }
  0x82   :  { %172 = vperm.xlu1 %8605, %v150_v41  }
  0x86   :  { %65 = vperm.xlu1 %8605, %v39_v42  }
  0x8a   :  { %8606 = vset.pattern.permute.xlu1 %v8847_v4 }
  0x8b   :  { %100 = vperm.xlu1 %8606, %v39_v42  }
  0x8f   :  { %8608 = vset.pattern.permute.xlu1 %v8848_v32 }
  0x90   :  { %132 = vperm.xlu1 %8608, %v39_v42  }
  0x94   :  { %v230_v45 = vpop.xlane.xlu0 %229  ;;  %136 = vperm.xlu1 %8608, %v40_v34   ;;  %v576_v44 = vpop.xlane.xlu1 %575 }
  0x95   :  { %v231_v46 = vrot.slane %v230_v45, 4  ;;  %v577_v13 = vrot.slane %v576_v44, 4 }
  0x97   :  { %v232_v49 = vadd.f32 %v231_v46, %v230_v45  ;;  %v578_v18 = vadd.f32 %v577_v13, %v576_v44 }
  0x98   :  { %v246_v50 = vpop.xlane.xlu0 %245  ;;  %8609 = vset.pattern.permute.xlu1 %v8846_v3  ;;  %v592_v51 = vpop.xlane.xlu1 %591 }
  0x99   :  { %v247_v52 = vrot.slane %v246_v50, 4  ;;  %v233_v53 = vrot.slane %v232_v49, 2  ;;  %182 = vperm.xlu1 %8609, %v152_v48   ;;  %v593_v17 = vrot.slane %v592_v51, 4  ;;  %v579_v23 = vrot.slane %v578_v18, 2 }
  0x9b   :  { %v248_v55 = vadd.f32 %v247_v52, %v246_v50  ;;  %v234_v47 = vadd.f32 %v233_v53, %v232_v49  ;;  %v594_v20 = vadd.f32 %v593_v17, %v592_v51  ;;  %v580_v27 = vadd.f32 %v579_v23, %v578_v18 }
  0x9c   :  { %v9117_v56 = vpop.xlane.xlu1 %937  ;;  %v9147_v14 = vpop.xlane.xlu0 %921  ;;  %v195_v17 = vlaneseq }
  0x9d   :  { %v235_v57 = vrot.slane %v234_v47, 1  ;;  %v249_v58 = vrot.slane %v248_v55, 2  ;;  %75 = vperm.xlu1 %8609, %v41_v54   ;;  %v595_v24 = vrot.slane %v594_v20, 2  ;;  %v581_v30 = vrot.slane %v580_v27, 1 }
  0x9e   :  { %v9226_v23 = vshrl.u32 %v195_v17, 7 }
  0x9f   :  { %v236_v59 = vadd.f32 %v235_v57, %v234_v47  ;;  %v250_v60 = vadd.f32 %v249_v58, %v248_v55  ;;  %v596_v28 = vadd.f32 %v595_v24, %v594_v20  ;;  %v582_v38 = vadd.f32 %v581_v30, %v580_v27 }
  0xa0   :  { %v9119_v61 = vpop.xlane.xlu1 %1283  ;;  %v923_v57 = vrot.slane %v9147_v14, 4  ;;  %v939_v58 = vrot.slane %v9117_v56, 4  ;;  %12497 = vst [vmem:[#allocation35_spill] sm:$0xff] %v9226_v23 }
  0xa1   :  { %8492 = vpush %v236_v59  ;;  %v251_v62 = vrot.slane %v250_v60, 1  ;;  %8610 = vset.pattern.permute.xlu1 %v8847_v4  ;;  %v597_v33 = vrot.slane %v596_v28, 1 }
  0xa2   :  { %108 = vperm.xlu1 %8610, %v41_v54  }
  0xa3   :  { %v252_v1 = vadd.f32 %v251_v62, %v250_v60  ;;  %v598_v39 = vadd.f32 %v597_v33, %v596_v28  ;;  %v924_v60 = vadd.f32 %v923_v57, %v9147_v14  ;;  %v9235_v33 = vsub.s32 0, %v9226_v23 }
  0xa4   :  { %v9122_v2 = vpop.xlane.xlu1 %1629  ;;  %v9247_v57 = vsub.s32 2, %v9226_v23 }
  0xa5   :  { %12464 = vst [vmem:[#allocation2_spill] sm:$0xff] %v9122_v2  ;;  %8494 = vpush %v252_v1  ;;  %v925_v18 = vrot.slane %v924_v60, 2 }
  0xa6   :  { %8612 = vset.pattern.permute.xlu1 %v8848_v32 }
  0xa7   :  { %140 = vperm.xlu1 %8612, %v41_v54  }
  0xa8   :  { %v9125_v63 = vpop.xlane.xlu1 %1975 }
  0xa9   :  { %12465 = vst [vmem:[#allocation3_spill] sm:$0xff] %v9125_v63 }
  0xab   :  { %144 = vperm.xlu1 %8612, %v42_v40  }
  0xac   :  { %v9127_v5 = vpop.xlane.xlu1 %2321 }
  0xad   :  { %12466 = vst [vmem:[#allocation4_spill] sm:$0xff] %v9127_v5 }
  0xaf   :  { %8614 = vset.pattern.permute.xlu1 %v8846_v3  ;;  %v9157_v3 = vpop.xlane.xlu0 %1267 }
  0xb0   :  { %192 = vperm.xlu1 %8614, %v154_v6   ;;  %v9133_v4 = vpop.xlane.xlu1 %2667  ;;  %v940_v6 = vadd.f32 %v939_v58, %v9117_v56  ;;  %v926_v56 = vadd.f32 %v925_v18, %v924_v60 }
  0xb1   :  { %12467 = vst [vmem:[#allocation5_spill] sm:$0xff] %v9133_v4 }
  0xb3   :  { %v9162_v19 = vpop.xlane.xlu0 %1613 }
  0xb4   :  { %v9135_v7 = vpop.xlane.xlu1 %3013  ;;  %12475 = vst [vmem:[#allocation13_spill] sm:$0xff] %v9162_v19 }
  0xb5   :  { %12468 = vst [vmem:[#allocation6_spill] sm:$0xff] %v9135_v7 }
  0xb7   :  { %v9166_v25 = vpop.xlane.xlu0 %1959 }
  0xb8   :  { %v9137_v8 = vpop.xlane.xlu1 %3359  ;;  %12477 = vst [vmem:[#allocation15_spill] sm:$0xff] %v9166_v25 }
  0xb9   :  { %12469 = vst [vmem:[#allocation7_spill] sm:$0xff] %v9137_v8 }
  0xbb   :  { %v9170_v31 = vpop.xlane.xlu0 %2305 }
  0xbc   :  { %v9139_v10 = vpop.xlane.xlu1 %3705  ;;  %12479 = vst [vmem:[#allocation17_spill] sm:$0xff] %v9170_v31 }
  0xbd   :  { %12470 = vst [vmem:[#allocation8_spill] sm:$0xff] %v9139_v10 }
  0xbf   :  { %v9174_v40 = vpop.xlane.xlu0 %2651 }
  0xc0   :  { %v9141_v9 = vpop.xlane.xlu1 %4051  ;;  %12481 = vst [vmem:[#allocation19_spill] sm:$0xff] %v9174_v40 }
  0xc1   :  { %12471 = vst [vmem:[#allocation9_spill] sm:$0xff] %v9141_v9 }
  0xc3   :  { %v9178_v42 = vpop.xlane.xlu0 %2997 }
  0xc4   :  { %v9143_v11 = vpop.xlane.xlu1 %4397  ;;  %12483 = vst [vmem:[#allocation21_spill] sm:$0xff] %v9178_v42 }
  0xc5   :  { %12472 = vst [vmem:[#allocation10_spill] sm:$0xff] %v9143_v11 }
  0xc7   :  { %v9182_v45 = vpop.xlane.xlu0 %3343 }
  0xc8   :  { %v9145_v12 = vpop.xlane.xlu1 %4743  ;;  %12485 = vst [vmem:[#allocation23_spill] sm:$0xff] %v9182_v45 }
  0xc9   :  { %12473 = vst [vmem:[#allocation11_spill] sm:$0xff] %v9145_v12 }
  0xcb   :  { %v9186_v46 = vpop.xlane.xlu0 %3689 }
  0xcc   :  { %v9149_v15 = vpop.xlane.xlu1 %5089  ;;  %12487 = vst [vmem:[#allocation25_spill] sm:$0xff] %v9186_v46 }
  0xcd   :  { %12474 = vst [vmem:[#allocation12_spill] sm:$0xff] %v9149_v15 }
  0xcf   :  { %v9190_v49 = vpop.xlane.xlu0 %4035 }
  0xd0   :  { %v9159_v16 = vpop.permute.xlu1 %50  ;;  %12488 = vst [vmem:[#allocation26_spill] sm:$0xff] %v9190_v49 }
  0xd2   :  { %s9151_s3 = spop %8492 }
  0xd3   :  { %s256_s14 = smul.f32 0.0013020834, %s9151_s3  ;;  %v9194_v51 = vpop.xlane.xlu0 %4381 }
  0xd4   :  { %v9164_v22 = vpop.permute.xlu1 %84  ;;  %12490 = vst [vmem:[#allocation28_spill] sm:$0xff] %v9194_v51 }
  0xd5   :  { %s257_s15 = smul.f32 %s9151_s3, %s256_s14  ;;  %12476 = vst [vmem:[#allocation14_spill] sm:$0xff] %v9164_v22  ;;  %v263_v14 = vstv %s256_s14 }
  0xd6   :  { %s8495_s16 = spop %8494 }
  0xd7   :  { %s258_s17 = ssub.f32 %s8495_s16, %s257_s15  ;;  %v9198_v53 = vpop.xlane.xlu0 %4727 }
  0xd8   :  { %v9168_v26 = vpop.permute.xlu1 %88  ;;  %12492 = vst [vmem:[#allocation30_spill] sm:$0xff] %v9198_v53 }
  0xd9   :  { %s261_s18 = smul.f32 0.0013037809, %s258_s17  ;;  %12478 = vst [vmem:[#allocation16_spill] sm:$0xff] %v9168_v26 }
  0xdb   :  { %s262_s20 = smax.f32 %s8849_s19, %s261_s18  ;;  %v9202_v55 = vpop.xlane.xlu0 %5073 }
  0xdc   :  { %v265_v21 = vstv %s262_s20  ;;  %12494 = vst [vmem:[#allocation32_spill] sm:$0xff] %v9202_v55 }
  0xdd   :  { %8631 = vrsqrt.f32 %v265_v21  ;;  %vm268_vm1 = vcmp.eq.f32.partialorder %v265_v21, inf  ;;  %v271_v34 = vand.u32 2147483648, %v265_v21  ;;  %v9172_v35 = vpop.permute.xlu1 %116  ;;  %vm270_vm2 = vcmp.eq.f32.partialorder %v265_v21, 0.0 }
  0xde   :  { %12480 = vst [vmem:[#allocation18_spill] sm:$0xff] %v9172_v35 }
  0xdf   :  { %v9208_v59 = vpop.permute.xlu0 %96 }
  0xe0   :  { %12495 = vst [vmem:[#allocation33_spill] sm:$0xff] %v9208_v59 }
  0xe1   :  { %v9176_v41 = vpop.permute.xlu1 %120 }
  0xe2   :  { %12482 = vst [vmem:[#allocation20_spill] sm:$0xff] %v9176_v41 }
  0xe3   :  { %v9220_v13 = vpop.permute.xlu0 %104 }
  0xe4   :  { %12496 = vst [vmem:[#allocation34_spill] sm:$0xff] %v9220_v13 }
  0xe6   :  { %v9180_v43 = vpop.permute.xlu1 %157 }
  0xe7   :  { %v8632_v29 = vpop.eup %8631  ;;  %12484 = vst [vmem:[#allocation22_spill] sm:$0xff] %v9180_v43  ;;  %v9229_v27 = vpop.permute.xlu0 %45 }
  0xe8   :  { %v267_v32 = vmul.f32 %v8632_v29, %v265_v21  ;;  %v264_v29 = vsub.f32 %v8914_v0, %v263_v14  ;;  %v9250_v0 = vsub.s32 6, %v9226_v23 }
  0xea   :  { %v269_v36 = vsel %vm268_vm1, %v265_v21, %v267_v32  ;;  %v9184_v44 = vpop.permute.xlu1 %162  ;;  %v941_v21 = vrot.slane %v940_v6, 2 }
  0xeb   :  { %v272_v37 = vsel %vm270_vm2, %v271_v34, %v269_v36  ;;  %12486 = vst [vmem:[#allocation24_spill] sm:$0xff] %v9184_v44  ;;  %v927_v34 = vrot.slane %v926_v56, 1 }
  0xec   :  { %8496 = vpush %v272_v37  ;;  %v942_v28 = vadd.f32 %v941_v21, %v940_v6  ;;  %v9238_v37 = vsub.s32 4, %v9226_v23 }
  0xed   :  { %8498 = vpush %v582_v38  ;;  %v9241_v38 = vsub.s32 1, %v9226_v23  ;;  %v928_v6 = vadd.f32 %v927_v34, %v926_v56 }
  0xee   :  { %8500 = vpush %v598_v39  ;;  %v9188_v48 = vpop.permute.xlu1 %55  ;;  %v9244_v39 = vsub.s32 5, %v9226_v23  ;;  %v943_v58 = vrot.slane %v942_v28, 1 }
  0xf0   :  { %v944_v15 = vadd.f32 %v943_v58, %v942_v28 }
  0xf3   :  { %v9192_v50 = vpop.permute.xlu1 %92 }
  0xf4   :  { %12489 = vst [vmem:[#allocation27_spill] sm:$0xff] %v9192_v50 }
  0xf8   :  { %v9196_v52 = vpop.permute.xlu1 %124 }
  0xf9   :  { %12491 = vst [vmem:[#allocation29_spill] sm:$0xff] %v9196_v52 }
  0xfc   :  { %v9200_v54 = vpop.permute.xlu1 %128 }
  0xfd   :  { %12493 = vst [vmem:[#allocation31_spill] sm:$0xff] %v9200_v54 }
 0x101   :  { %v9204_v47 = vpop.permute.xlu1 %172 }
 0x105   :  { %v9213_v62 = vpop.permute.xlu1 %65 }
 0x10a   :  { %v9222_v20 = vpop.permute.xlu1 %100 }
 0x10f   :  { %v9232_v32 = vpop.permute.xlu1 %132 }
 0x110   :  { %12498 = vst [vmem:[#allocation36_spill] sm:$0xff] %v9232_v32 }
 0x113   :  { %v9260_v55 = vpop.permute.xlu1 %136 }
 0x114   :  { %12500 = vst [vmem:[#allocation38_spill] sm:$0xff] %v9260_v55 }
 0x118   :  { %v9301_v46 = vpop.permute.xlu1 %182 }
 0x11d   :  { %s8497_s21 = spop %8496 }
 0x11e   :  { %s274_s22 = sadd.f32 0.0001, %s8497_s21  ;;  %s9210_s23 = spop %8498 }
 0x11f   :  { %s602_s24 = smul.f32 0.0013020834, %s9210_s23  ;;  %s8501_s26 = spop %8500 }
 0x120   :  { %v275_v1 = vstv %s274_s22 }
 0x121   :  { %8633 = vrcp.f32 %v275_v1  ;;  %s603_s25 = smul.f32 %s9210_s23, %s602_s24  ;;  %v9252_v1 = vpop.permute.xlu0 %60 }
 0x122   :  { %12499 = vst [vmem:[#allocation37_spill] sm:$0xff] %v9252_v1 }
 0x123   :  { %s604_s27 = ssub.f32 %s8501_s26, %s603_s25 }
 0x125   :  { %s607_s28 = smul.f32 0.0013037809, %s604_s27 }
 0x127   :  { %s608_s29 = smax.f32 %s8849_s19, %s607_s28 }
 0x128   :  { %v611_v24 = vstv %s608_s29 }
 0x129   :  { %8635 = vrsqrt.f32 %v611_v24  ;;  %vm614_vm3 = vcmp.eq.f32.partialorder %v611_v24, inf  ;;  %vm616_vm4 = vcmp.eq.f32.partialorder %v611_v24, 0.0  ;;  %v617_v28 = vand.u32 2147483648, %v611_v24 }
 0x12b   :  { %v8634_v30 = vpop.eup %8633 }
 0x12c   :  { %v277_v36 = vmul.f32 %v8634_v30, %v264_v29 }
 0x12e   :  { %v7757_v60 = vclamps-f32 %v277_v36, 20.0 }
 0x130   :  { %v284_v17 = vrot.slane %v7757_v60, %v9235_v33  ;;  %v288_v18 = vrot.slane %v7757_v60, %v9238_v37  ;;  %v318_v21 = vrot.slane %v7757_v60, %v9241_v38  ;;  %v322_v14 = vrot.slane %v7757_v60, %v9244_v39 }
 0x131   :  { %v368_v29 = vrot.slane %v7757_v60, %v9247_v57  ;;  %v372_v30 = vrot.slane %v7757_v60, %v9250_v0 }
 0x132   :  { %v9263_v36 = vrot.slane %v284_v17, %v9235_v33  ;;  %v9266_v56 = vrot.slane %v288_v18, %v9235_v33  ;;  %v9269_v34 = vrot.slane %v318_v21, %v9241_v38  ;;  %v9272_v12 = vrot.slane %v322_v14, %v9241_v38  ;;  %v9286_v14 = vpop.permute.xlu0 %167 }
 0x133   :  { %v8636_v53 = vpop.eup %8635  ;;  %v9275_v23 = vrot.slane %v368_v29, %v9247_v57  ;;  %v9278_v60 = vrot.slane %v372_v30, %v9247_v57 }
 0x134   :  { %v613_v58 = vmul.f32 %v8636_v53, %v611_v24  ;;  %v300_v17 = vmul.f32 %v9266_v56, %v9229_v27  ;;  %v302_v18 = vmul.f32 %v9266_v56, %v9159_v16  ;;  %v334_v21 = vmul.f32 %v9272_v12, %v9164_v22 }
 0x135   :  { %v336_v29 = vmul.f32 %v9272_v12, %v9168_v26  ;;  %v384_v30 = vmul.f32 %v9278_v60, %v9172_v35  ;;  %v386_v53 = vmul.f32 %v9278_v60, %v9176_v41  ;;  %v299_v11 = vmul.f32 %v9263_v36, %v9229_v27 }
 0x136   :  { %v615_v51 = vsel %vm614_vm3, %v611_v24, %v613_v58  ;;  %v350_v9 = vadd.f32 %v334_v21, %v300_v17  ;;  %v301_v49 = vmul.f32 %v9263_v36, %v9159_v16  ;;  %v333_v10 = vmul.f32 %v9269_v34, %v9164_v22 }
 0x137   :  { %v618_v8 = vsel %vm616_vm4, %v617_v28, %v615_v51  ;;  %v352_v45 = vadd.f32 %v336_v29, %v302_v18  ;;  %v335_v7 = vmul.f32 %v9269_v34, %v9168_v26  ;;  %v383_v42 = vmul.f32 %v9275_v23, %v9172_v35  ;;  %v9321_v18 = vpop.permute.xlu0 %70 }
 0x138   :  { %8502 = vpush %v618_v8  ;;  %v400_v58 = vadd.f32 %v384_v30, %v350_v9  ;;  %v349_v17 = vadd.f32 %v333_v10, %v299_v11  ;;  %v385_v21 = vmul.f32 %v9275_v23, %v9176_v41  ;;  %v304_v4 = vmul.f32 %v9266_v56, %v9188_v48 }
 0x139   :  { %8504 = vpush %v928_v6  ;;  %v402_v40 = vadd.f32 %v386_v53, %v352_v45  ;;  %v351_v24 = vadd.f32 %v335_v7, %v301_v49  ;;  %v306_v51 = vmul.f32 %v9266_v56, %v9252_v1  ;;  %v338_v28 = vmul.f32 %v9272_v12, %v9192_v50  ;;  %v9329_v53 = vpop.permute.xlu1 %75 }
 0x13a   :  { %8506 = vpush %v944_v15  ;;  %v416_v8 = vadd.f32 %v400_v58, %v9180_v43  ;;  %v399_v9 = vadd.f32 %v383_v42, %v349_v17  ;;  %v340_v10 = vmul.f32 %v9272_v12, %v9208_v59  ;;  %v388_v11 = vmul.f32 %v9278_v60, %v9196_v52 }
 0x13b   :  { %v418_v7 = vadd.f32 %v402_v40, %v9184_v44  ;;  %v401_v45 = vadd.f32 %v385_v21, %v351_v24  ;;  %v354_v49 = vadd.f32 %v338_v28, %v304_v4  ;;  %v390_v6 = vmul.f32 %v9278_v60, %v9200_v54 }
 0x13c   :  { %v432_v29 = vmax.f32 %v416_v8, 0.0  ;;  %v415_v15 = vadd.f32 %v399_v9, %v9180_v43  ;;  %v356_v30 = vadd.f32 %v340_v10, %v306_v51  ;;  %v303_v42 = vmul.f32 %v9263_v36, %v9188_v48 }
 0x13d   :  { %v434_v58 = vmax.f32 %v418_v7, 0.0  ;;  %v417_v17 = vadd.f32 %v401_v45, %v9184_v44  ;;  %v404_v5 = vadd.f32 %v388_v11, %v354_v49  ;;  %v305_v40 = vmul.f32 %v9263_v36, %v9252_v1  ;;  %v9340_v49 = vpop.permute.xlu0 %177 }
 0x13e   :  { %v448_v4 = vmax.f32 %v432_v29, 1e-06  ;;  %v431_v21 = vmax.f32 %v415_v15, 0.0  ;;  %v406_v24 = vadd.f32 %v390_v6, %v356_v30  ;;  %v337_v28 = vmul.f32 %v9269_v34, %v9192_v50 }
 0x13f   :  { %v450_v8 = vmax.f32 %v434_v58, 1e-06  ;;  %v433_v51 = vmax.f32 %v417_v17, 0.0  ;;  %v420_v9 = vadd.f32 %v404_v5, %v9286_v14  ;;  %v339_v10 = vmul.f32 %v9269_v34, %v9208_v59  ;;  %v9344_v17 = vpop.permute.xlu1 %108 }
 0x140   :  { %v464_v7 = vmul.f32 %v448_v4, %v448_v4  ;;  %v447_v31 = vmax.f32 %v431_v21, 1e-06  ;;  %v422_v11 = vadd.f32 %v406_v24, %v9204_v47  ;;  %v353_v45 = vadd.f32 %v337_v28, %v303_v42 }
 0x141   :  { %v466_v29 = vmul.f32 %v450_v8, %v450_v8  ;;  %v449_v15 = vmax.f32 %v433_v51, 1e-06  ;;  %v436_v6 = vmax.f32 %v420_v9, 0.0  ;;  %v355_v30 = vadd.f32 %v339_v10, %v305_v40 }
 0x142   :  { %v480_v63 = vmul.f32 %v464_v7, %v448_v4  ;;  %v463_v25 = vmul.f32 %v447_v31, %v447_v31  ;;  %v438_v58 = vmax.f32 %v422_v11, 0.0  ;;  %v387_v5 = vmul.f32 %v9275_v23, %v9196_v52 }
 0x143   :  { %v482_v2 = vmul.f32 %v466_v29, %v450_v8  ;;  %v465_v19 = vmul.f32 %v449_v15, %v449_v15  ;;  %v452_v21 = vmax.f32 %v436_v6, 1e-06  ;;  %v389_v42 = vmul.f32 %v9275_v23, %v9200_v54  ;;  %v9355_v6 = vpop.permute.xlu0 %80 }
 0x144   :  { %v479_v24 = vmul.f32 %v463_v25, %v447_v31  ;;  %v454_v28 = vmax.f32 %v438_v58, 1e-06  ;;  %v403_v44 = vadd.f32 %v387_v5, %v353_v45  ;;  %v308_v40 = vmul.f32 %v9266_v56, %v9213_v62 }
 0x145   :  { %v8108_v4 = vpack.c.bf16 %v482_v2, %v480_v63  ;;  %v481_v51 = vmul.f32 %v465_v19, %v449_v15  ;;  %v468_v9 = vmul.f32 %v452_v21, %v452_v21  ;;  %v405_v10 = vadd.f32 %v389_v42, %v355_v30  ;;  %v9362_v30 = vpop.permute.xlu1 %140 }
 0x146   :  { %v470_v7 = vmul.f32 %v454_v28, %v454_v28  ;;  %v419_v11 = vadd.f32 %v403_v44, %v9286_v14  ;;  %v310_v8 = vmul.f32 %v9266_v56, %v9321_v18  ;;  %v342_v29 = vmul.f32 %v9272_v12, %v9222_v20 }
 0x147   :  { %8109 = vmatprep.subr.bf16.mxu0 %v8108_v4  ;;  %v8110_v25 = vpack.c.bf16 %v481_v51, %v479_v24  ;;  %v484_v31 = vmul.f32 %v468_v9, %v452_v21  ;;  %v421_v45 = vadd.f32 %v405_v10, %v9204_v47  ;;  %v344_v2 = vmul.f32 %v9272_v12, %v9220_v13 }
 0x148   :  { %v486_v63 = vmul.f32 %v470_v7, %v454_v28  ;;  %v435_v19 = vmax.f32 %v419_v11, 0.0  ;;  %v358_v15 = vadd.f32 %v342_v29, %v308_v40  ;;  %v392_v44 = vmul.f32 %v9278_v60, %v9232_v32 }
 0x149   :  { %8111 = vmatpush1.bf16.xpose.msra.mxu0 %v8110_v25  ;;  %v437_v58 = vmax.f32 %v421_v45, 0.0  ;;  %v360_v5 = vadd.f32 %v344_v2, %v310_v8  ;;  %v394_v42 = vmul.f32 %v9278_v60, %v9260_v55  ;;  %v307_v21 = vmul.f32 %v9263_v36, %v9213_v62 }
 0x14a   :  { %v8112_v24 = vpack.c.bf16 %v486_v63, %v484_v31  ;;  %v451_v4 = vmax.f32 %v435_v19, 1e-06  ;;  %v408_v51 = vadd.f32 %v392_v44, %v358_v15  ;;  %v309_v28 = vmul.f32 %v9263_v36, %v9321_v18  ;;  %v9379_v31 = vpop.permute.xlu0 %112 }
 0x14b   :  { %v453_v40 = vmax.f32 %v437_v58, 1e-06  ;;  %v410_v9 = vadd.f32 %v394_v42, %v360_v5  ;;  %v341_v10 = vmul.f32 %v9269_v34, %v9222_v20  ;;  %v343_v7 = vmul.f32 %v9269_v34, %v9220_v13  ;;  %v9386_v42 = vpop.permute.xlu1 %144 }
 0x14c   :  { %8113 = vmatprep.subr.bf16.mxu0 %v8112_v24  ;;  %v467_v11 = vmul.f32 %v451_v4, %v451_v4  ;;  %v424_v8 = vadd.f32 %v408_v51, %v9340_v49  ;;  %v391_v29 = vmul.f32 %v9275_v23, %v9232_v32  ;;  %v393_v25 = vmul.f32 %v9275_v23, %v9260_v55 }
 0x14d   :  { %v469_v45 = vmul.f32 %v453_v40, %v453_v40  ;;  %v426_v2 = vadd.f32 %v410_v9, %v9301_v46  ;;  %v357_v63 = vadd.f32 %v341_v10, %v307_v21  ;;  %v359_v19 = vadd.f32 %v343_v7, %v309_v28 }
 0x14e   :  { %v483_v15 = vmul.f32 %v467_v11, %v451_v4  ;;  %v440_v44 = vmax.f32 %v424_v8, 0.0  ;;  %v312_v58 = vmul.f32 %v9266_v56, %v9329_v53  ;;  %v314_v5 = vmul.f32 %v9266_v56, %v9355_v6 }
 0x14f   :  { %v485_v24 = vmul.f32 %v469_v45, %v453_v40  ;;  %v442_v51 = vmax.f32 %v426_v2, 0.0  ;;  %v407_v55 = vadd.f32 %v391_v29, %v357_v63  ;;  %v409_v32 = vadd.f32 %v393_v25, %v359_v19  ;;  %v9398_v25 = vpop.permute.xlu1 %192  ;;  %v9400_v45 = vpop.permute.xlu0 %187 }
 0x150   :  { %v456_v13 = vmax.f32 %v440_v44, 1e-06  ;;  %v346_v9 = vmul.f32 %v9272_v12, %v9344_v17  ;;  %v348_v21 = vmul.f32 %v9272_v12, %v9379_v31  ;;  %v396_v4 = vmul.f32 %v9278_v60, %v9362_v30 }
 0x151   :  { %v8114_v28 = vpack.c.bf16 %v485_v24, %v483_v15  ;;  %v458_v10 = vmax.f32 %v442_v51, 1e-06  ;;  %v423_v56 = vadd.f32 %v407_v55, %v9340_v49  ;;  %v425_v7 = vadd.f32 %v409_v32, %v9301_v46 }
 0x152   :  { %v472_v40 = vmul.f32 %v456_v13, %v456_v13  ;;  %v362_v11 = vadd.f32 %v346_v9, %v312_v58  ;;  %v364_v8 = vadd.f32 %v348_v21, %v314_v5  ;;  %v398_v29 = vmul.f32 %v9278_v60, %v9386_v42 }
 0x153   :  { %8115 = vmatpush1.bf16.xpose.msra.mxu0 %v8114_v28  ;;  %v474_v12 = vmul.f32 %v458_v10, %v458_v10  ;;  %v439_v2 = vmax.f32 %v423_v56, 0.0  ;;  %v441_v63 = vmax.f32 %v425_v7, 0.0  ;;  %v311_v19 = vmul.f32 %v9263_v36, %v9329_v53 }
 0x154   :  { %v488_v55 = vmul.f32 %v472_v40, %v456_v13  ;;  %v412_v15 = vadd.f32 %v396_v4, %v362_v11  ;;  %v414_v32 = vadd.f32 %v398_v29, %v364_v8  ;;  %v313_v44 = vmul.f32 %v9263_v36, %v9355_v6 }
 0x155   :  { %v490_v58 = vmul.f32 %v474_v12, %v458_v10  ;;  %v455_v5 = vmax.f32 %v439_v2, 1e-06  ;;  %v457_v60 = vmax.f32 %v441_v63, 1e-06  ;;  %v345_v24 = vmul.f32 %v9269_v34, %v9344_v17 }
 0x156   :  { %v428_v51 = vadd.f32 %v412_v15, %v9400_v45  ;;  %v430_v9 = vadd.f32 %v414_v32, %v9398_v25  ;;  %v347_v21 = vmul.f32 %v9269_v34, %v9379_v31  ;;  %v395_v13 = vmul.f32 %v9275_v23, %v9362_v30 }
 0x157   :  { %v8116_v4 = vpack.c.bf16 %v490_v58, %v488_v55  ;;  %v471_v28 = vmul.f32 %v455_v5, %v455_v5  ;;  %v473_v56 = vmul.f32 %v457_v60, %v457_v60  ;;  %v361_v36 = vadd.f32 %v345_v24, %v311_v19 }
 0x158   :  { %v444_v10 = vmax.f32 %v428_v51, 0.0  ;;  %v446_v7 = vmax.f32 %v430_v9, 0.0  ;;  %v363_v40 = vadd.f32 %v347_v21, %v313_v44  ;;  %v397_v11 = vmul.f32 %v9275_v23, %v9386_v42 }
 0x159   :  { %8117 = vmatprep.subr.bf16.mxu0 %v8116_v4  ;;  %v487_v8 = vmul.f32 %v471_v28, %v455_v5  ;;  %v489_v29 = vmul.f32 %v473_v56, %v457_v60  ;;  %v411_v12 = vadd.f32 %v395_v13, %v361_v36  ;;  %v12332_v24 = vmov 0.00390625  }
 0x15a   :  { %v460_v2 = vmax.f32 %v444_v10, 1e-06  ;;  %v462_v63 = vmax.f32 %v446_v7, 1e-06  ;;  %v413_v34 = vadd.f32 %v397_v11, %v363_v40  ;;  %559 = vmatprep.mubr.f32.mxu0 %v12332_v24  ;;  %905 = vmatprep.mubr.f32.mxu1 %v12332_v24  ;;  %v1269_v10 = vrot.slane %v9157_v3, 4 }
 0x15b   :  { %v8118_v15 = vpack.c.bf16 %v489_v29, %v487_v8  ;;  %v427_v32 = vadd.f32 %v411_v12, %v9400_v45  ;;  %v1285_v7 = vrot.slane %v9119_v61, 4 }
 0x15c   :  { %v476_v55 = vmul.f32 %v460_v2, %v460_v2  ;;  %v478_v58 = vmul.f32 %v462_v63, %v462_v63  ;;  %v429_v19 = vadd.f32 %v413_v34, %v9398_v25  ;;  %v1270_v40 = vadd.f32 %v1269_v10, %v9157_v3  ;;  %v8831_v34 = vld [vmem:[%s12289_s0 + $0x8] sm:$0x77] }
 0x15d   :  { %8119 = vmatpush1.bf16.xpose.msra.mxu0 %v8118_v15  ;;  %v443_v44 = vmax.f32 %v427_v32, 0.0  ;;  %v1286_v8 = vadd.f32 %v1285_v7, %v9119_v61 }
 0x15e   :  { %v492_v23 = vmul.f32 %v476_v55, %v460_v2  ;;  %v494_v5 = vmul.f32 %v478_v58, %v462_v63  ;;  %v445_v60 = vmax.f32 %v429_v19, 0.0  ;;  %v1271_v29 = vrot.slane %v1270_v40, 2 }
 0x15f   :  { %v459_v51 = vmax.f32 %v443_v44, 1e-06  ;;  %v1287_v12 = vrot.slane %v1286_v8, 2  ;;  %v609_v2 = vstv %s602_s24 }
 0x160   :  { %v8120_v9 = vpack.c.bf16 %v494_v5, %v492_v23  ;;  %v461_v21 = vmax.f32 %v445_v60, 1e-06  ;;  %v1272_v3 = vadd.f32 %v1271_v29, %v1270_v40  ;;  %v610_v15 = vsub.f32 %v8831_v34, %v609_v2 }
 0x161   :  { %v475_v13 = vmul.f32 %v459_v51, %v459_v51  ;;  %v1288_v61 = vadd.f32 %v1287_v12, %v1286_v8 }
 0x162   :  { %8121 = vmatprep.subr.bf16.mxu0 %v8120_v9  ;;  %v477_v4 = vmul.f32 %v461_v21, %v461_v21  ;;  %v1273_v55 = vrot.slane %v1272_v3, 1 }
 0x163   :  { %v491_v28 = vmul.f32 %v475_v13, %v459_v51  ;;  %v1289_v19 = vrot.slane %v1288_v61, 1 }
 0x164   :  { %v493_v56 = vmul.f32 %v477_v4, %v461_v21  ;;  %v1274_v23 = vadd.f32 %v1273_v55, %v1272_v3 }
 0x165   :  { %v1290_v4 = vadd.f32 %v1289_v19, %v1288_v61 }
 0x166   :  { %v8122_v36 = vpack.c.bf16 %v493_v56, %v491_v28 }
 0x168   :  { %8123 = vmatpush1.bf16.xpose.msra.mxu0 %v8122_v36 }
 0x169   :  { %s8503_s30 = spop %8502 }
 0x16a   :  { %s620_s11 = sadd.f32 0.0001, %s8503_s30  ;;  %s9422_s12 = spop %8504 }
 0x16b   :  { %s948_s2 = smul.f32 0.0013020834, %s9422_s12  ;;  %s8507_s3 = spop %8506 }
 0x16c   :  { %v621_v11 = vstv %s620_s11 }
 0x16d   :  { %8637 = vrcp.f32 %v621_v11  ;;  %s949_s13 = smul.f32 %s9422_s12, %s948_s2 }
 0x16f   :  { %s950_s14 = ssub.f32 %s8507_s3, %s949_s13  ;;  %560 = vmatmul.mubr.f32.vlgmr.msra.gmra.mrb[0].mxu0 %v12332_v24 }
 0x170   :  { %1251 = vmatprep.mubr.f32.mxu0 %v12332_v24 }
 0x171   :  { %s953_s15 = smul.f32 0.0013037809, %s950_s14 }
 0x173   :  { %s954_s16 = smax.f32 %s8849_s19, %s953_s15 }
 0x174   :  { %v957_v63 = vstv %s954_s16 }
 0x175   :  { %8639 = vrsqrt.f32 %v957_v63  ;;  %vm960_vm5 = vcmp.eq.f32.partialorder %v957_v63, inf  ;;  %vm962_vm6 = vcmp.eq.f32.partialorder %v957_v63, 0.0  ;;  %v963_v8 = vand.u32 2147483648, %v957_v63 }
 0x177   :  { %v8638_v32 = vpop.eup %8637 }
 0x178   :  { %v623_v58 = vmul.f32 %v8638_v32, %v610_v15 }
 0x17a   :  { %v7759_v44 = vclamps-f32 %v623_v58, 20.0 }
 0x17c   :  { %v630_v5 = vrot.slane %v7759_v44, %v9235_v33  ;;  %v634_v60 = vrot.slane %v7759_v44, %v9238_v37  ;;  %v664_v51 = vrot.slane %v7759_v44, %v9241_v38  ;;  %v668_v9 = vrot.slane %v7759_v44, %v9244_v39 }
 0x17d   :  { %v714_v21 = vrot.slane %v7759_v44, %v9247_v57  ;;  %v718_v13 = vrot.slane %v7759_v44, %v9250_v0 }
 0x17e   :  { %v9445_v28 = vrot.slane %v630_v5, %v9235_v33  ;;  %v9448_v56 = vrot.slane %v634_v60, %v9235_v33  ;;  %v9451_v36 = vrot.slane %v664_v51, %v9241_v38  ;;  %v9454_v10 = vrot.slane %v668_v9, %v9241_v38 }
 0x17f   :  { %v8640_v7 = vpop.eup %8639  ;;  %v9457_v40 = vrot.slane %v714_v21, %v9247_v57  ;;  %v9460_v11 = vrot.slane %v718_v13, %v9247_v57 }
 0x180   :  { %v959_v29 = vmul.f32 %v8640_v7, %v957_v63  ;;  %v646_v12 = vmul.f32 %v9448_v56, %v9229_v27  ;;  %v648_v2 = vmul.f32 %v9448_v56, %v9159_v16  ;;  %v680_v3 = vmul.f32 %v9454_v10, %v9164_v22 }
 0x181   :  { %v682_v61 = vmul.f32 %v9454_v10, %v9168_v26  ;;  %v730_v34 = vmul.f32 %v9460_v11, %v9172_v35  ;;  %v732_v15 = vmul.f32 %v9460_v11, %v9176_v41  ;;  %v645_v32 = vmul.f32 %v9445_v28, %v9229_v27 }
 0x182   :  { %v961_v55 = vsel %vm960_vm5, %v957_v63, %v959_v29  ;;  %v696_v58 = vadd.f32 %v680_v3, %v646_v12  ;;  %v647_v19 = vmul.f32 %v9445_v28, %v9159_v16  ;;  %v679_v44 = vmul.f32 %v9451_v36, %v9164_v22 }
 0x183   :  { %v964_v5 = vsel %vm962_vm6, %v963_v8, %v961_v55  ;;  %v698_v60 = vadd.f32 %v682_v61, %v648_v2  ;;  %v681_v51 = vmul.f32 %v9451_v36, %v9168_v26  ;;  %v729_v9 = vmul.f32 %v9457_v40, %v9172_v35  ;;  %v12501_v55 = vld [vmem:[#allocation24_spill] sm:$0xff] }
 0x184   :  { %8508 = vpush %v964_v5  ;;  %v746_v21 = vadd.f32 %v730_v34, %v696_v58  ;;  %v695_v13 = vadd.f32 %v679_v44, %v645_v32  ;;  %v731_v63 = vmul.f32 %v9457_v40, %v9176_v41  ;;  %v650_v7 = vmul.f32 %v9448_v56, %v9188_v48 }
 0x185   :  { %8510 = vpush %v1274_v23  ;;  %v748_v29 = vadd.f32 %v732_v15, %v698_v60  ;;  %v697_v12 = vadd.f32 %v681_v51, %v647_v19  ;;  %v652_v8 = vmul.f32 %v9448_v56, %v9252_v1  ;;  %v684_v2 = vmul.f32 %v9454_v10, %v9192_v50 }
 0x186   :  { %8512 = vpush %v1290_v4  ;;  %v762_v3 = vadd.f32 %v746_v21, %v9180_v43  ;;  %v745_v61 = vadd.f32 %v729_v9, %v695_v13  ;;  %v686_v34 = vmul.f32 %v9454_v10, %v9208_v59  ;;  %v734_v32 = vmul.f32 %v9460_v11, %v9196_v52 }
 0x187   :  { %v764_v23 = vadd.f32 %v748_v29, %v12501_v55  ;;  %v747_v15 = vadd.f32 %v731_v63, %v697_v12  ;;  %v700_v58 = vadd.f32 %v684_v2, %v650_v7  ;;  %v736_v19 = vmul.f32 %v9460_v11, %v9200_v54 }
 0x188   :  { %v778_v44 = vmax.f32 %v762_v3, 0.0  ;;  %v761_v5 = vadd.f32 %v745_v61, %v9180_v43  ;;  %v702_v4 = vadd.f32 %v686_v34, %v652_v8  ;;  %v649_v60 = vmul.f32 %v9445_v28, %v9188_v48 }
 0x189   :  { %v780_v51 = vmax.f32 %v764_v23, 0.0  ;;  %v763_v9 = vadd.f32 %v747_v15, %v12501_v55  ;;  %v750_v21 = vadd.f32 %v734_v32, %v700_v58  ;;  %v651_v13 = vmul.f32 %v9445_v28, %v9252_v1 }
 0x18a   :  { %v794_v29 = vmax.f32 %v778_v44, 1e-06  ;;  %v777_v63 = vmax.f32 %v761_v5, 0.0  ;;  %v752_v7 = vadd.f32 %v736_v19, %v702_v4  ;;  %v683_v12 = vmul.f32 %v9451_v36, %v9192_v50 }
 0x18b   :  { %v796_v2 = vmax.f32 %v780_v51, 1e-06  ;;  %v779_v3 = vmax.f32 %v763_v9, 0.0  ;;  %v766_v8 = vadd.f32 %v750_v21, %v9286_v14  ;;  %v685_v61 = vmul.f32 %v9451_v36, %v9208_v59 }
 0x18c   :  { %v810_v34 = vmul.f32 %v794_v29, %v794_v29  ;;  %v793_v23 = vmax.f32 %v777_v63, 1e-06  ;;  %v768_v32 = vadd.f32 %v752_v7, %v9204_v47  ;;  %v699_v15 = vadd.f32 %v683_v12, %v649_v60 }
 0x18d   :  { %v812_v58 = vmul.f32 %v796_v2, %v796_v2  ;;  %v795_v24 = vmax.f32 %v779_v3, 1e-06  ;;  %v782_v44 = vmax.f32 %v766_v8, 0.0  ;;  %v701_v5 = vadd.f32 %v685_v61, %v651_v13 }
 0x18e   :  { %v826_v19 = vmul.f32 %v810_v34, %v794_v29  ;;  %v809_v4 = vmul.f32 %v793_v23, %v793_v23  ;;  %v784_v55 = vmax.f32 %v768_v32, 0.0  ;;  %v733_v51 = vmul.f32 %v9457_v40, %v9196_v52 }
 0x18f   :  { %v828_v9 = vmul.f32 %v812_v58, %v796_v2  ;;  %v811_v21 = vmul.f32 %v795_v24, %v795_v24  ;;  %v798_v43 = vmax.f32 %v782_v44, 1e-06  ;;  %v735_v59 = vmul.f32 %v9457_v40, %v9200_v54 }
 0x190   :  { %v825_v63 = vmul.f32 %v809_v4, %v793_v23  ;;  %v800_v50 = vmax.f32 %v784_v55, 1e-06  ;;  %v749_v7 = vadd.f32 %v733_v51, %v699_v15  ;;  %v654_v60 = vmul.f32 %v9448_v56, %v9213_v62  ;;  %v12502_v15 = vld [vmem:[#allocation34_spill] sm:$0xff] }
 0x191   :  { %v8124_v12 = vpack.c.bf16 %v828_v9, %v826_v19  ;;  %v827_v13 = vmul.f32 %v811_v21, %v795_v24  ;;  %v814_v29 = vmul.f32 %v798_v43, %v798_v43  ;;  %v751_v3 = vadd.f32 %v735_v59, %v701_v5  ;;  %v12503_v5 = vld [vmem:[#allocation36_spill] sm:$0xff]  ;;  %v12504_v9 = vld [vmem:[#allocation38_spill] sm:$0xff] }
 0x192   :  { %v816_v8 = vmul.f32 %v800_v50, %v800_v50  ;;  %v765_v61 = vadd.f32 %v749_v7, %v9286_v14  ;;  %v656_v2 = vmul.f32 %v9448_v56, %v9321_v18  ;;  %v688_v34 = vmul.f32 %v9454_v10, %v9222_v20 }
 0x193   :  { %8125 = vmatprep.subr.bf16.mxu1 %v8124_v12  ;;  %v8126_v23 = vpack.c.bf16 %v827_v13, %v825_v63  ;;  %v830_v55 = vmul.f32 %v814_v29, %v798_v43  ;;  %v767_v32 = vadd.f32 %v751_v3, %v9204_v47  ;;  %v690_v58 = vmul.f32 %v9454_v10, %v12502_v15 }
 0x194   :  { %v832_v24 = vmul.f32 %v816_v8, %v800_v50  ;;  %v781_v44 = vmax.f32 %v765_v61, 0.0  ;;  %v704_v59 = vadd.f32 %v688_v34, %v654_v60  ;;  %v738_v19 = vmul.f32 %v9460_v11, %v12503_v5 }
 0x195   :  { %8127 = vmatpush1.bf16.xpose.msra.mxu1 %v8126_v23  ;;  %v783_v4 = vmax.f32 %v767_v32, 0.0  ;;  %v706_v51 = vadd.f32 %v690_v58, %v656_v2  ;;  %v740_v21 = vmul.f32 %v9460_v11, %v12504_v9  ;;  %v653_v43 = vmul.f32 %v9445_v28, %v9213_v62 }
 0x196   :  { %v8128_v63 = vpack.c.bf16 %v832_v24, %v830_v55  ;;  %v797_v7 = vmax.f32 %v781_v44, 1e-06  ;;  %v754_v12 = vadd.f32 %v738_v19, %v704_v59  ;;  %v655_v50 = vmul.f32 %v9445_v28, %v9321_v18 }
 0x197   :  { %v799_v13 = vmax.f32 %v783_v4, 1e-06  ;;  %v756_v60 = vadd.f32 %v740_v21, %v706_v51  ;;  %v687_v29 = vmul.f32 %v9451_v36, %v9222_v20  ;;  %v689_v3 = vmul.f32 %v9451_v36, %v12502_v15 }
 0x198   :  { %8129 = vmatprep.subr.bf16.mxu1 %v8128_v63  ;;  %v813_v8 = vmul.f32 %v797_v7, %v797_v7  ;;  %v770_v61 = vadd.f32 %v754_v12, %v9340_v49  ;;  %v737_v2 = vmul.f32 %v9457_v40, %v12503_v5  ;;  %v739_v34 = vmul.f32 %v9457_v40, %v12504_v9 }
 0x199   :  { %v815_v23 = vmul.f32 %v799_v13, %v799_v13  ;;  %v772_v55 = vadd.f32 %v756_v60, %v9301_v46  ;;  %v703_v32 = vadd.f32 %v687_v29, %v653_v43  ;;  %v705_v58 = vadd.f32 %v689_v3, %v655_v50 }
 0x19a   :  { %v829_v24 = vmul.f32 %v813_v8, %v797_v7  ;;  %v786_v44 = vmax.f32 %v770_v61, 0.0  ;;  %v658_v59 = vmul.f32 %v9448_v56, %v9329_v53  ;;  %v660_v19 = vmul.f32 %v9448_v56, %v9355_v6 }
 0x19b   :  { %v831_v4 = vmul.f32 %v815_v23, %v799_v13  ;;  %v788_v51 = vmax.f32 %v772_v55, 0.0  ;;  %v753_v21 = vadd.f32 %v737_v2, %v703_v32  ;;  %v755_v63 = vadd.f32 %v739_v34, %v705_v58 }
 0x19c   :  { %v802_v12 = vmax.f32 %v786_v44, 1e-06  ;;  %v692_v9 = vmul.f32 %v9454_v10, %v9344_v17  ;;  %v694_v43 = vmul.f32 %v9454_v10, %v9379_v31  ;;  %v742_v7 = vmul.f32 %v9460_v11, %v9362_v30 }
 0x19d   :  { %v8130_v50 = vpack.c.bf16 %v831_v4, %v829_v24  ;;  %v804_v60 = vmax.f32 %v788_v51, 1e-06  ;;  %v769_v29 = vadd.f32 %v753_v21, %v9340_v49  ;;  %v771_v56 = vadd.f32 %v755_v63, %v9301_v46 }
 0x19e   :  { %v818_v13 = vmul.f32 %v802_v12, %v802_v12  ;;  %v708_v3 = vadd.f32 %v692_v9, %v658_v59  ;;  %v710_v8 = vadd.f32 %v694_v43, %v660_v19  ;;  %v744_v61 = vmul.f32 %v9460_v11, %v9386_v42 }
 0x19f   :  { %8131 = vmatpush1.bf16.xpose.msra.mxu1 %v8130_v50  ;;  %v820_v2 = vmul.f32 %v804_v60, %v804_v60  ;;  %v785_v34 = vmax.f32 %v769_v29, 0.0  ;;  %v787_v23 = vmax.f32 %v771_v56, 0.0  ;;  %v657_v10 = vmul.f32 %v9445_v28, %v9329_v53 }
 0x1a0   :  { %v834_v55 = vmul.f32 %v818_v13, %v802_v12  ;;  %v758_v32 = vadd.f32 %v742_v7, %v708_v3  ;;  %v760_v58 = vadd.f32 %v744_v61, %v710_v8  ;;  %v659_v24 = vmul.f32 %v9445_v28, %v9355_v6 }
 0x1a1   :  { %v836_v44 = vmul.f32 %v820_v2, %v804_v60  ;;  %v801_v4 = vmax.f32 %v785_v34, 1e-06  ;;  %v803_v9 = vmax.f32 %v787_v23, 1e-06  ;;  %v691_v59 = vmul.f32 %v9451_v36, %v9344_v17 }
 0x1a2   :  { %v774_v11 = vadd.f32 %v758_v32, %v9400_v45  ;;  %v776_v19 = vadd.f32 %v760_v58, %v9398_v25  ;;  %v693_v51 = vmul.f32 %v9451_v36, %v9379_v31  ;;  %v741_v21 = vmul.f32 %v9457_v40, %v9362_v30 }
 0x1a3   :  { %v8132_v63 = vpack.c.bf16 %v836_v44, %v834_v55  ;;  %v817_v12 = vmul.f32 %v801_v4, %v801_v4  ;;  %v819_v43 = vmul.f32 %v803_v9, %v803_v9  ;;  %v707_v28 = vadd.f32 %v691_v59, %v657_v10 }
 0x1a4   :  { %v790_v7 = vmax.f32 %v774_v11, 0.0  ;;  %v792_v50 = vmax.f32 %v776_v19, 0.0  ;;  %v709_v60 = vadd.f32 %v693_v51, %v659_v24  ;;  %v743_v29 = vmul.f32 %v9457_v40, %v9386_v42 }
 0x1a5   :  { %8133 = vmatprep.subr.bf16.mxu1 %v8132_v63  ;;  %v833_v56 = vmul.f32 %v817_v12, %v801_v4  ;;  %v835_v13 = vmul.f32 %v819_v43, %v803_v9  ;;  %v757_v3 = vadd.f32 %v741_v21, %v707_v28  ;;  %v12505_v63 = vld [vmem:[#allocation13_spill] sm:$0xff]  ;;  %v12506_v43 = vld [vmem:[#allocation2_spill] sm:$0xff] }
 0x1a6   :  { %v806_v8 = vmax.f32 %v790_v7, 1e-06  ;;  %v808_v61 = vmax.f32 %v792_v50, 1e-06  ;;  %v759_v36 = vadd.f32 %v743_v29, %v709_v60  ;;  %v1615_v12 = vrot.slane %v12505_v63, 4 }
 0x1a7   :  { %v8134_v2 = vpack.c.bf16 %v835_v13, %v833_v56  ;;  %v773_v34 = vadd.f32 %v757_v3, %v9400_v45  ;;  %v1631_v28 = vrot.slane %v12506_v43, 4  ;;  %v12507_v56 = vmov 0.00390625  }
 0x1a8   :  { %v822_v23 = vmul.f32 %v806_v8, %v806_v8  ;;  %v824_v55 = vmul.f32 %v808_v61, %v808_v61  ;;  %v775_v10 = vadd.f32 %v759_v36, %v9398_v25  ;;  %v1616_v7 = vadd.f32 %v1615_v12, %v12505_v63 }
 0x1a9   :  { %8135 = vmatpush1.bf16.xpose.msra.mxu1 %v8134_v2  ;;  %v789_v32 = vmax.f32 %v773_v34, 0.0  ;;  %v1632_v60 = vadd.f32 %v1631_v28, %v12506_v43  ;;  %v955_v3 = vstv %s948_s2  ;;  %v8832_v2 = vld [vmem:[%s12289_s0 + $0x10] sm:$0x77] }
 0x1aa   :  { %v838_v58 = vmul.f32 %v822_v23, %v806_v8  ;;  %v840_v24 = vmul.f32 %v824_v55, %v808_v61  ;;  %v791_v44 = vmax.f32 %v775_v10, 0.0  ;;  %v1617_v29 = vrot.slane %v1616_v7, 2 }
 0x1ab   :  { %v805_v40 = vmax.f32 %v789_v32, 1e-06  ;;  %v1633_v13 = vrot.slane %v1632_v60, 2  ;;  %v956_v34 = vsub.f32 %v8832_v2, %v955_v3 }
 0x1ac   :  { %v8136_v59 = vpack.c.bf16 %v840_v24, %v838_v58  ;;  %v807_v4 = vmax.f32 %v791_v44, 1e-06  ;;  %v1618_v8 = vadd.f32 %v1617_v29, %v1616_v7 }
 0x1ad   :  { %v821_v9 = vmul.f32 %v805_v40, %v805_v40  ;;  %v1634_v36 = vadd.f32 %v1633_v13, %v1632_v60 }
 0x1ae   :  { %8137 = vmatprep.subr.bf16.mxu1 %v8136_v59  ;;  %v823_v11 = vmul.f32 %v807_v4, %v807_v4  ;;  %v1619_v55 = vrot.slane %v1618_v8, 1 }
 0x1af   :  { %v837_v19 = vmul.f32 %v821_v9, %v805_v40  ;;  %v1635_v32 = vrot.slane %v1634_v36, 1 }
 0x1b0   :  { %v839_v51 = vmul.f32 %v823_v11, %v807_v4  ;;  %v1620_v24 = vadd.f32 %v1619_v55, %v1618_v8 }
 0x1b2   :  { %v8138_v21 = vpack.c.bf16 %v839_v51, %v837_v19  ;;  %v1636_v19 = vadd.f32 %v1635_v32, %v1634_v36 }
 0x1b4   :  { %8139 = vmatpush1.bf16.xpose.msra.mxu1 %v8138_v21 }
 0x1b5   :  { %s8509_s20 = spop %8508 }
 0x1b6   :  { %s966_s21 = sadd.f32 0.0001, %s8509_s20  ;;  %s9577_s22 = spop %8510 }
 0x1b7   :  { %s1294_s23 = smul.f32 0.0013020834, %s9577_s22  ;;  %s8513_s25 = spop %8512 }
 0x1b8   :  { %v967_v50 = vstv %s966_s21 }
 0x1b9   :  { %8641 = vrcp.f32 %v967_v50  ;;  %s1295_s24 = smul.f32 %s9577_s22, %s1294_s23 }
 0x1bb   :  { %s1296_s26 = ssub.f32 %s8513_s25, %s1295_s24  ;;  %906 = vmatmul.mubr.f32.vlgmr.msra.gmra.mrb[0].mxu1 %v12507_v56 }
 0x1bc   :  { %1597 = vmatprep.mubr.f32.mxu1 %v12507_v56 }
 0x1bd   :  { %s1299_s27 = smul.f32 0.0013037809, %s1296_s26 }
 0x1bf   :  { %s1300_s28 = smax.f32 %s8849_s19, %s1299_s27 }
 0x1c0   :  { %v1303_v61 = vstv %s1300_s28 }
 0x1c1   :  { %8643 = vrsqrt.f32 %v1303_v61  ;;  %vm1306_vm7 = vcmp.eq.f32.partialorder %v1303_v61, inf  ;;  %vm1308_vm8 = vcmp.eq.f32.partialorder %v1303_v61, 0.0  ;;  %v1309_v50 = vand.u32 2147483648, %v1303_v61 }
 0x1c3   :  { %v8642_v23 = vpop.eup %8641 }
 0x1c4   :  { %v969_v10 = vmul.f32 %v8642_v23, %v956_v34 }
 0x1c6   :  { %v7761_v58 = vclamps-f32 %v969_v10, 20.0 }
 0x1c8   :  { %v976_v44 = vrot.slane %v7761_v58, %v9235_v33  ;;  %v980_v40 = vrot.slane %v7761_v58, %v9238_v37  ;;  %v1010_v59 = vrot.slane %v7761_v58, %v9241_v38  ;;  %v1014_v4 = vrot.slane %v7761_v58, %v9244_v39 }
 0x1c9   :  { %v1060_v9 = vrot.slane %v7761_v58, %v9247_v57  ;;  %v1064_v11 = vrot.slane %v7761_v58, %v9250_v0 }
 0x1ca   :  { %v9600_v51 = vrot.slane %v976_v44, %v9235_v33  ;;  %v9603_v21 = vrot.slane %v980_v40, %v9235_v33  ;;  %v9606_v63 = vrot.slane %v1010_v59, %v9241_v38  ;;  %v9609_v12 = vrot.slane %v1014_v4, %v9241_v38 }
 0x1cb   :  { %v8644_v43 = vpop.eup %8643  ;;  %v9612_v28 = vrot.slane %v1060_v9, %v9247_v57  ;;  %v9615_v7 = vrot.slane %v1064_v11, %v9247_v57 }
 0x1cc   :  { %v1305_v60 = vmul.f32 %v8644_v43, %v1303_v61  ;;  %v992_v29 = vmul.f32 %v9603_v21, %v9229_v27  ;;  %v994_v13 = vmul.f32 %v9603_v21, %v9159_v16  ;;  %v1026_v3 = vmul.f32 %v9609_v12, %v9164_v22 }
 0x1cd   :  { %v1028_v8 = vmul.f32 %v9609_v12, %v9168_v26  ;;  %v1076_v36 = vmul.f32 %v9615_v7, %v9172_v35  ;;  %v1078_v2 = vmul.f32 %v9615_v7, %v9176_v41  ;;  %v991_v34 = vmul.f32 %v9600_v51, %v9229_v27 }
 0x1ce   :  { %v1307_v23 = vsel %vm1306_vm7, %v1303_v61, %v1305_v60  ;;  %v1042_v55 = vadd.f32 %v1026_v3, %v992_v29  ;;  %v993_v10 = vmul.f32 %v9600_v51, %v9159_v16  ;;  %v1025_v32 = vmul.f32 %v9606_v63, %v9164_v22  ;;  %v12508_v29 = vld [vmem:[#allocation27_spill] sm:$0xff]  ;;  %v12509_v3 = vld [vmem:[#allocation22_spill] sm:$0xff] }
 0x1cf   :  { %v1310_v58 = vsel %vm1308_vm8, %v1309_v50, %v1307_v23  ;;  %v1044_v44 = vadd.f32 %v1028_v8, %v994_v13  ;;  %v1027_v40 = vmul.f32 %v9606_v63, %v9168_v26  ;;  %v1075_v59 = vmul.f32 %v9612_v28, %v9172_v35 }
 0x1d0   :  { %8514 = vpush %v1310_v58  ;;  %v1092_v4 = vadd.f32 %v1076_v36, %v1042_v55  ;;  %v1041_v9 = vadd.f32 %v1025_v32, %v991_v34  ;;  %v1077_v61 = vmul.f32 %v9612_v28, %v9176_v41  ;;  %v996_v11 = vmul.f32 %v9603_v21, %v9188_v48  ;;  %v12510_v34 = vld [vmem:[#allocation33_spill] sm:$0xff]  ;;  %v12511_v32 = vld [vmem:[#allocation24_spill] sm:$0xff] }
 0x1d1   :  { %8516 = vpush %v1620_v24  ;;  %v1094_v43 = vadd.f32 %v1078_v2, %v1044_v44  ;;  %v1043_v60 = vadd.f32 %v1027_v40, %v993_v10  ;;  %v998_v50 = vmul.f32 %v9603_v21, %v9252_v1  ;;  %v1030_v13 = vmul.f32 %v9609_v12, %v12508_v29 }
 0x1d2   :  { %8518 = vpush %v1636_v19  ;;  %v1108_v8 = vadd.f32 %v1092_v4, %v12509_v3  ;;  %v1091_v36 = vadd.f32 %v1075_v59, %v1041_v9  ;;  %v1032_v23 = vmul.f32 %v9609_v12, %v12510_v34  ;;  %v1080_v55 = vmul.f32 %v9615_v7, %v9196_v52 }
 0x1d3   :  { %v1110_v24 = vadd.f32 %v1094_v43, %v12511_v32  ;;  %v1093_v2 = vadd.f32 %v1077_v61, %v1043_v60  ;;  %v1046_v10 = vadd.f32 %v1030_v13, %v996_v11  ;;  %v1082_v58 = vmul.f32 %v9615_v7, %v9200_v54 }
 0x1d4   :  { %v1124_v44 = vmax.f32 %v1108_v8, 0.0  ;;  %v1107_v40 = vadd.f32 %v1091_v36, %v12509_v3  ;;  %v1048_v19 = vadd.f32 %v1032_v23, %v998_v50  ;;  %v995_v59 = vmul.f32 %v9600_v51, %v9188_v48 }
 0x1d5   :  { %v1126_v4 = vmax.f32 %v1110_v24, 0.0  ;;  %v1109_v9 = vadd.f32 %v1093_v2, %v12511_v32  ;;  %v1096_v41 = vadd.f32 %v1080_v55, %v1046_v10  ;;  %v997_v35 = vmul.f32 %v9600_v51, %v9252_v1 }
 0x1d6   :  { %v1140_v43 = vmax.f32 %v1124_v44, 1e-06  ;;  %v1123_v61 = vmax.f32 %v1107_v40, 0.0  ;;  %v1098_v11 = vadd.f32 %v1082_v58, %v1048_v19  ;;  %v1029_v60 = vmul.f32 %v9606_v63, %v12508_v29 }
 0x1d7   :  { %v1142_v13 = vmax.f32 %v1126_v4, 1e-06  ;;  %v1125_v8 = vmax.f32 %v1109_v9, 0.0  ;;  %v1112_v50 = vadd.f32 %v1096_v41, %v9286_v14  ;;  %v1031_v36 = vmul.f32 %v9606_v63, %v12510_v34 }
 0x1d8   :  { %v1156_v23 = vmul.f32 %v1140_v43, %v1140_v43  ;;  %v1139_v24 = vmax.f32 %v1123_v61, 1e-06  ;;  %v1114_v55 = vadd.f32 %v1098_v11, %v9204_v47  ;;  %v1045_v2 = vadd.f32 %v1029_v60, %v995_v59 }
 0x1d9   :  { %v1158_v10 = vmul.f32 %v1142_v13, %v1142_v13  ;;  %v1141_v32 = vmax.f32 %v1125_v8, 1e-06  ;;  %v1128_v44 = vmax.f32 %v1112_v50, 0.0  ;;  %v1047_v40 = vadd.f32 %v1031_v36, %v997_v35 }
 0x1da   :  { %v1172_v58 = vmul.f32 %v1156_v23, %v1140_v43  ;;  %v1155_v19 = vmul.f32 %v1139_v24, %v1139_v24  ;;  %v1130_v3 = vmax.f32 %v1114_v55, 0.0  ;;  %v1079_v4 = vmul.f32 %v9612_v28, %v9196_v52 }
 0x1db   :  { %v1174_v9 = vmul.f32 %v1158_v10, %v1142_v13  ;;  %v1157_v41 = vmul.f32 %v1141_v32, %v1141_v32  ;;  %v1144_v29 = vmax.f32 %v1128_v44, 1e-06  ;;  %v1081_v34 = vmul.f32 %v9612_v28, %v9200_v54 }
 0x1dc   :  { %v1171_v61 = vmul.f32 %v1155_v19, %v1139_v24  ;;  %v1146_v1 = vmax.f32 %v1130_v3, 1e-06  ;;  %v1095_v11 = vadd.f32 %v1079_v4, %v1045_v2  ;;  %v1000_v59 = vmul.f32 %v9603_v21, %v9213_v62  ;;  %v12512_v19 = vld [vmem:[#allocation38_spill] sm:$0xff] }
 0x1dd   :  { %v8140_v60 = vpack.c.bf16 %v1174_v9, %v1172_v58  ;;  %v1173_v35 = vmul.f32 %v1157_v41, %v1141_v32  ;;  %v1160_v43 = vmul.f32 %v1144_v29, %v1144_v29  ;;  %v1097_v8 = vadd.f32 %v1081_v34, %v1047_v40 }
 0x1de   :  { %v1162_v50 = vmul.f32 %v1146_v1, %v1146_v1  ;;  %v1111_v36 = vadd.f32 %v1095_v11, %v9286_v14  ;;  %v1002_v13 = vmul.f32 %v9603_v21, %v9321_v18  ;;  %v1034_v23 = vmul.f32 %v9609_v12, %v9222_v20 }
 0x1df   :  { %8141 = vmatprep.subr.bf16.mxu0 %v8140_v60  ;;  %v8142_v24 = vpack.c.bf16 %v1173_v35, %v1171_v61  ;;  %v1176_v3 = vmul.f32 %v1160_v43, %v1144_v29  ;;  %v1113_v55 = vadd.f32 %v1097_v8, %v9204_v47  ;;  %v1036_v2 = vmul.f32 %v9609_v12, %v12502_v15 }
 0x1e0   :  { %v1178_v32 = vmul.f32 %v1162_v50, %v1146_v1  ;;  %v1127_v10 = vmax.f32 %v1111_v36, 0.0  ;;  %v1050_v34 = vadd.f32 %v1034_v23, %v1000_v59  ;;  %v1084_v44 = vmul.f32 %v9615_v7, %v12503_v5 }
 0x1e1   :  { %8143 = vmatpush1.bf16.xpose.msra.mxu0 %v8142_v24  ;;  %v1129_v40 = vmax.f32 %v1113_v55, 0.0  ;;  %v1052_v58 = vadd.f32 %v1036_v2, %v1002_v13  ;;  %v1086_v4 = vmul.f32 %v9615_v7, %v12512_v19  ;;  %v999_v29 = vmul.f32 %v9600_v51, %v9213_v62 }
 0x1e2   :  { %v8144_v9 = vpack.c.bf16 %v1178_v32, %v1176_v3  ;;  %v1143_v41 = vmax.f32 %v1127_v10, 1e-06  ;;  %v1100_v61 = vadd.f32 %v1084_v44, %v1050_v34  ;;  %v1001_v1 = vmul.f32 %v9600_v51, %v9321_v18 }
 0x1e3   :  { %v1145_v11 = vmax.f32 %v1129_v40, 1e-06  ;;  %v1102_v59 = vadd.f32 %v1086_v4, %v1052_v58  ;;  %v1033_v60 = vmul.f32 %v9606_v63, %v9222_v20  ;;  %v1035_v35 = vmul.f32 %v9606_v63, %v12502_v15 }
 0x1e4   :  { %8145 = vmatprep.subr.bf16.mxu0 %v8144_v9  ;;  %v1159_v43 = vmul.f32 %v1143_v41, %v1143_v41  ;;  %v1116_v8 = vadd.f32 %v1100_v61, %v9340_v49  ;;  %v1083_v50 = vmul.f32 %v9612_v28, %v12503_v5  ;;  %v1085_v36 = vmul.f32 %v9612_v28, %v12512_v19 }
 0x1e5   :  { %v1161_v13 = vmul.f32 %v1145_v11, %v1145_v11  ;;  %v1118_v23 = vadd.f32 %v1102_v59, %v9301_v46  ;;  %v1049_v24 = vadd.f32 %v1033_v60, %v999_v29  ;;  %v1051_v3 = vadd.f32 %v1035_v35, %v1001_v1 }
 0x1e6   :  { %v1175_v55 = vmul.f32 %v1159_v43, %v1143_v41  ;;  %v1132_v2 = vmax.f32 %v1116_v8, 0.0  ;;  %v1004_v32 = vmul.f32 %v9603_v21, %v9329_v53  ;;  %v1006_v10 = vmul.f32 %v9603_v21, %v9355_v6 }
 0x1e7   :  { %v1177_v34 = vmul.f32 %v1161_v13, %v1145_v11  ;;  %v1134_v44 = vmax.f32 %v1118_v23, 0.0  ;;  %v1099_v40 = vadd.f32 %v1083_v50, %v1049_v24  ;;  %v1101_v58 = vadd.f32 %v1085_v36, %v1051_v3 }
 0x1e8   :  { %v1148_v4 = vmax.f32 %v1132_v2, 1e-06  ;;  %v1038_v9 = vmul.f32 %v9609_v12, %v9344_v17  ;;  %v1040_v29 = vmul.f32 %v9609_v12, %v9379_v31  ;;  %v1088_v41 = vmul.f32 %v9615_v7, %v9362_v30 }
 0x1e9   :  { %v8146_v61 = vpack.c.bf16 %v1177_v34, %v1175_v55  ;;  %v1150_v1 = vmax.f32 %v1134_v44, 1e-06  ;;  %v1115_v59 = vadd.f32 %v1099_v40, %v9340_v49  ;;  %v1117_v21 = vadd.f32 %v1101_v58, %v9301_v46 }
 0x1ea   :  { %v1164_v11 = vmul.f32 %v1148_v4, %v1148_v4  ;;  %v1054_v60 = vadd.f32 %v1038_v9, %v1004_v32  ;;  %v1056_v35 = vadd.f32 %v1040_v29, %v1006_v10  ;;  %v1090_v43 = vmul.f32 %v9615_v7, %v9386_v42 }
 0x1eb   :  { %8147 = vmatpush1.bf16.xpose.msra.mxu0 %v8146_v61  ;;  %v1166_v8 = vmul.f32 %v1150_v1, %v1150_v1  ;;  %v1131_v50 = vmax.f32 %v1115_v59, 0.0  ;;  %v1133_v36 = vmax.f32 %v1117_v21, 0.0  ;;  %v1003_v12 = vmul.f32 %v9600_v51, %v9329_v53 }
 0x1ec   :  { %v1180_v13 = vmul.f32 %v1164_v11, %v1148_v4  ;;  %v1104_v23 = vadd.f32 %v1088_v41, %v1054_v60  ;;  %v1106_v24 = vadd.f32 %v1090_v43, %v1056_v35  ;;  %v1005_v3 = vmul.f32 %v9600_v51, %v9355_v6 }
 0x1ed   :  { %v1182_v55 = vmul.f32 %v1166_v8, %v1150_v1  ;;  %v1147_v2 = vmax.f32 %v1131_v50, 1e-06  ;;  %v1149_v32 = vmax.f32 %v1133_v36, 1e-06  ;;  %v1037_v10 = vmul.f32 %v9606_v63, %v9344_v17 }
 0x1ee   :  { %v1120_v7 = vadd.f32 %v1104_v23, %v9400_v45  ;;  %v1122_v34 = vadd.f32 %v1106_v24, %v9398_v25  ;;  %v1039_v44 = vmul.f32 %v9606_v63, %v9379_v31  ;;  %v1087_v40 = vmul.f32 %v9612_v28, %v9362_v30 }
 0x1ef   :  { %v8148_v58 = vpack.c.bf16 %v1182_v55, %v1180_v13  ;;  %v1163_v4 = vmul.f32 %v1147_v2, %v1147_v2  ;;  %v1165_v9 = vmul.f32 %v1149_v32, %v1149_v32  ;;  %v1053_v51 = vadd.f32 %v1037_v10, %v1003_v12 }
 0x1f0   :  { %v1136_v29 = vmax.f32 %v1120_v7, 0.0  ;;  %v1138_v41 = vmax.f32 %v1122_v34, 0.0  ;;  %v1055_v61 = vadd.f32 %v1039_v44, %v1005_v3  ;;  %v1089_v1 = vmul.f32 %v9612_v28, %v9386_v42 }
 0x1f1   :  { %8149 = vmatprep.subr.bf16.mxu0 %v8148_v58  ;;  %v1179_v59 = vmul.f32 %v1163_v4, %v1147_v2  ;;  %v1181_v21 = vmul.f32 %v1165_v9, %v1149_v32  ;;  %v1103_v11 = vadd.f32 %v1087_v40, %v1053_v51  ;;  %v12513_v40 = vld [vmem:[#allocation15_spill] sm:$0xff] }
 0x1f2   :  { %v1152_v60 = vmax.f32 %v1136_v29, 1e-06  ;;  %v1154_v35 = vmax.f32 %v1138_v41, 1e-06  ;;  %v1105_v63 = vadd.f32 %v1089_v1, %v1055_v61  ;;  %v1961_v58 = vrot.slane %v12513_v40, 4  ;;  %v12514_v4 = vld [vmem:[#allocation3_spill] sm:$0xff] }
 0x1f3   :  { %v8150_v43 = vpack.c.bf16 %v1181_v21, %v1179_v59  ;;  %v1119_v8 = vadd.f32 %v1103_v11, %v9400_v45  ;;  %v1977_v9 = vrot.slane %v12514_v4, 4  ;;  %v1301_v59 = vstv %s1294_s23 }
 0x1f4   :  { %v1168_v50 = vmul.f32 %v1152_v60, %v1152_v60  ;;  %v1170_v36 = vmul.f32 %v1154_v35, %v1154_v35  ;;  %v1121_v12 = vadd.f32 %v1105_v63, %v9398_v25  ;;  %v1962_v51 = vadd.f32 %v1961_v58, %v12513_v40 }
 0x1f5   :  { %8151 = vmatpush1.bf16.xpose.msra.mxu0 %v8150_v43  ;;  %v1135_v13 = vmax.f32 %v1119_v8, 0.0  ;;  %v1978_v41 = vadd.f32 %v1977_v9, %v12514_v4 }
 0x1f6   :  { %v1184_v23 = vmul.f32 %v1168_v50, %v1152_v60  ;;  %v1186_v24 = vmul.f32 %v1170_v36, %v1154_v35  ;;  %v1137_v3 = vmax.f32 %v1121_v12, 0.0  ;;  %v1963_v61 = vrot.slane %v1962_v51, 2  ;;  %v8833_v35 = vld [vmem:[%s12289_s0 + $0x18] sm:$0x77] }
 0x1f7   :  { %v1151_v28 = vmax.f32 %v1135_v13, 1e-06  ;;  %v1979_v1 = vrot.slane %v1978_v41, 2  ;;  %v1302_v63 = vsub.f32 %v8833_v35, %v1301_v59  ;;  %v12515_v59 = vld [vmem:[#allocation18_spill] sm:$0xff] }
 0x1f8   :  { %v8152_v55 = vpack.c.bf16 %v1186_v24, %v1184_v23  ;;  %v1153_v2 = vmax.f32 %v1137_v3, 1e-06  ;;  %v1964_v21 = vadd.f32 %v1963_v61, %v1962_v51 }
 0x1f9   :  { %v1167_v32 = vmul.f32 %v1151_v28, %v1151_v28  ;;  %v1980_v60 = vadd.f32 %v1979_v1, %v1978_v41 }
 0x1fa   :  { %8153 = vmatprep.subr.bf16.mxu0 %v8152_v55  ;;  %v1169_v10 = vmul.f32 %v1153_v2, %v1153_v2  ;;  %v1965_v8 = vrot.slane %v1964_v21, 1 }
 0x1fb   :  { %v1183_v7 = vmul.f32 %v1167_v32, %v1151_v28  ;;  %v1981_v36 = vrot.slane %v1980_v60, 1 }
 0x1fc   :  { %v1185_v34 = vmul.f32 %v1169_v10, %v1153_v2  ;;  %v1966_v13 = vadd.f32 %v1965_v8, %v1964_v21 }
 0x1fd   :  { %v1982_v32 = vadd.f32 %v1981_v36, %v1980_v60  ;;  %v12516_v60 = vld [vmem:[#allocation20_spill] sm:$0xff] }
 0x1fe   :  { %v8154_v44 = vpack.c.bf16 %v1185_v34, %v1183_v7 }
 0x200   :  { %8155 = vmatpush1.bf16.xpose.msra.mxu0 %v8154_v44 }
 0x201   :  { %s8515_s11 = spop %8514 }
 0x202   :  { %s1312_s12 = sadd.f32 0.0001, %s8515_s11  ;;  %s9732_s2 = spop %8516 }
 0x203   :  { %s1640_s13 = smul.f32 0.0013020834, %s9732_s2  ;;  %s8519_s14 = spop %8518 }
 0x204   :  { %v1313_v29 = vstv %s1312_s12 }
 0x205   :  { %8645 = vrcp.f32 %v1313_v29  ;;  %s1641_s3 = smul.f32 %s9732_s2, %s1640_s13 }
 0x207   :  { %s1642_s15 = ssub.f32 %s8519_s14, %s1641_s3  ;;  %1252 = vmatmul.mubr.f32.vlgmr.msra.gmra.mrb[2].mxu0 %v12507_v56 }
 0x208   :  { %1943 = vmatprep.mubr.f32.mxu0 %v12507_v56 }
 0x209   :  { %s1645_s16 = smul.f32 0.0013037809, %s1642_s15 }
 0x20b   :  { %s1646_s17 = smax.f32 %s8849_s19, %s1645_s16 }
 0x20c   :  { %v1649_v11 = vstv %s1646_s17 }
 0x20d   :  { %8647 = vrsqrt.f32 %v1649_v11  ;;  %vm1652_vm9 = vcmp.eq.f32.partialorder %v1649_v11, inf  ;;  %vm1654_vm10 = vcmp.eq.f32.partialorder %v1649_v11, 0.0  ;;  %v1655_v9 = vand.u32 2147483648, %v1649_v11 }
 0x20f   :  { %v8646_v43 = vpop.eup %8645 }
 0x210   :  { %v1315_v50 = vmul.f32 %v8646_v43, %v1302_v63 }
 0x212   :  { %v7763_v12 = vclamps-f32 %v1315_v50, 20.0 }
 0x214   :  { %v1322_v23 = vrot.slane %v7763_v12, %v9235_v33  ;;  %v1326_v24 = vrot.slane %v7763_v12, %v9238_v37  ;;  %v1356_v3 = vrot.slane %v7763_v12, %v9241_v38  ;;  %v1360_v28 = vrot.slane %v7763_v12, %v9244_v39 }
 0x215   :  { %v1406_v55 = vrot.slane %v7763_v12, %v9247_v57  ;;  %v1410_v2 = vrot.slane %v7763_v12, %v9250_v0 }
 0x216   :  { %v9755_v10 = vrot.slane %v1322_v23, %v9235_v33  ;;  %v9758_v7 = vrot.slane %v1326_v24, %v9235_v33  ;;  %v9761_v34 = vrot.slane %v1356_v3, %v9241_v38  ;;  %v9764_v44 = vrot.slane %v1360_v28, %v9241_v38 }
 0x217   :  { %v8648_v40 = vpop.eup %8647  ;;  %v9767_v58 = vrot.slane %v1406_v55, %v9247_v57  ;;  %v9770_v4 = vrot.slane %v1410_v2, %v9247_v57 }
 0x218   :  { %v1651_v51 = vmul.f32 %v8648_v40, %v1649_v11  ;;  %v1338_v29 = vmul.f32 %v9758_v7, %v9229_v27  ;;  %v1340_v41 = vmul.f32 %v9758_v7, %v9159_v16  ;;  %v1372_v61 = vmul.f32 %v9764_v44, %v9164_v22 }
 0x219   :  { %v1374_v1 = vmul.f32 %v9764_v44, %v9168_v26  ;;  %v1422_v21 = vmul.f32 %v9770_v4, %v12515_v59  ;;  %v1424_v35 = vmul.f32 %v9770_v4, %v12516_v60  ;;  %v1337_v63 = vmul.f32 %v9755_v10, %v9229_v27 }
 0x21a   :  { %v1653_v43 = vsel %vm1652_vm9, %v1649_v11, %v1651_v51  ;;  %v1388_v8 = vadd.f32 %v1372_v61, %v1338_v29  ;;  %v1339_v50 = vmul.f32 %v9755_v10, %v9159_v16  ;;  %v1371_v36 = vmul.f32 %v9761_v34, %v9164_v22 }
 0x21b   :  { %v1656_v12 = vsel %vm1654_vm10, %v1655_v9, %v1653_v43  ;;  %v1390_v23 = vadd.f32 %v1374_v1, %v1340_v41  ;;  %v1373_v24 = vmul.f32 %v9761_v34, %v9168_v26  ;;  %v1421_v3 = vmul.f32 %v9767_v58, %v12515_v59  ;;  %v12517_v9 = vld [vmem:[#allocation37_spill] sm:$0xff]  ;;  %v12518_v41 = vld [vmem:[#allocation27_spill] sm:$0xff]  ;;  %v12519_v1 = vld [vmem:[#allocation22_spill] sm:$0xff] }
 0x21c   :  { %8520 = vpush %v1656_v12  ;;  %v1438_v28 = vadd.f32 %v1422_v21, %v1388_v8  ;;  %v1387_v55 = vadd.f32 %v1371_v36, %v1337_v63  ;;  %v1423_v11 = vmul.f32 %v9767_v58, %v12516_v60  ;;  %v1342_v2 = vmul.f32 %v9758_v7, %v9188_v48  ;;  %v12520_v63 = vld [vmem:[#allocation33_spill] sm:$0xff]  ;;  %v12521_v12 = vld [vmem:[#allocation24_spill] sm:$0xff] }
 0x21d   :  { %8522 = vpush %v1966_v13  ;;  %v1440_v40 = vadd.f32 %v1424_v35, %v1390_v23  ;;  %v1389_v51 = vadd.f32 %v1373_v24, %v1339_v50  ;;  %v1344_v29 = vmul.f32 %v9758_v7, %v12517_v9  ;;  %v1376_v61 = vmul.f32 %v9764_v44, %v12518_v41 }
 0x21e   :  { %8524 = vpush %v1982_v32  ;;  %v1454_v43 = vadd.f32 %v1438_v28, %v12519_v1  ;;  %v1437_v21 = vadd.f32 %v1421_v3, %v1387_v55  ;;  %v1378_v8 = vmul.f32 %v9764_v44, %v12520_v63  ;;  %v1426_v36 = vmul.f32 %v9770_v4, %v9196_v52 }
 0x21f   :  { %v1456_v13 = vadd.f32 %v1440_v40, %v12521_v12  ;;  %v1439_v35 = vadd.f32 %v1423_v11, %v1389_v51  ;;  %v1392_v50 = vadd.f32 %v1376_v61, %v1342_v2  ;;  %v1428_v23 = vmul.f32 %v9770_v4, %v9200_v54 }
 0x220   :  { %v1470_v24 = vmax.f32 %v1454_v43, 0.0  ;;  %v1453_v60 = vadd.f32 %v1437_v21, %v12519_v1  ;;  %v1394_v32 = vadd.f32 %v1378_v8, %v1344_v29  ;;  %v1341_v3 = vmul.f32 %v9755_v10, %v9188_v48 }
 0x221   :  { %v1472_v28 = vmax.f32 %v1456_v13, 0.0  ;;  %v1455_v55 = vadd.f32 %v1439_v35, %v12521_v12  ;;  %v1442_v59 = vadd.f32 %v1426_v36, %v1392_v50  ;;  %v1343_v26 = vmul.f32 %v9755_v10, %v12517_v9 }
 0x222   :  { %v1486_v40 = vmax.f32 %v1470_v24, 1e-06  ;;  %v1469_v11 = vmax.f32 %v1453_v60, 0.0  ;;  %v1444_v2 = vadd.f32 %v1428_v23, %v1394_v32  ;;  %v1375_v51 = vmul.f32 %v9761_v34, %v12518_v41 }
 0x223   :  { %v1488_v61 = vmax.f32 %v1472_v28, 1e-06  ;;  %v1471_v43 = vmax.f32 %v1455_v55, 0.0  ;;  %v1458_v29 = vadd.f32 %v1442_v59, %v9286_v14  ;;  %v1377_v21 = vmul.f32 %v9761_v34, %v12520_v63 }
 0x224   :  { %v1502_v8 = vmul.f32 %v1486_v40, %v1486_v40  ;;  %v1485_v13 = vmax.f32 %v1469_v11, 1e-06  ;;  %v1460_v36 = vadd.f32 %v1444_v2, %v9204_v47  ;;  %v1391_v35 = vadd.f32 %v1375_v51, %v1341_v3 }
 0x225   :  { %v1504_v50 = vmul.f32 %v1488_v61, %v1488_v61  ;;  %v1487_v12 = vmax.f32 %v1471_v43, 1e-06  ;;  %v1474_v24 = vmax.f32 %v1458_v29, 0.0  ;;  %v1393_v60 = vadd.f32 %v1377_v21, %v1343_v26 }
 0x226   :  { %v1518_v23 = vmul.f32 %v1502_v8, %v1486_v40  ;;  %v1501_v32 = vmul.f32 %v1485_v13, %v1485_v13  ;;  %v1476_v1 = vmax.f32 %v1460_v36, 0.0  ;;  %v1425_v28 = vmul.f32 %v9767_v58, %v9196_v52 }
 0x227   :  { %v1520_v55 = vmul.f32 %v1504_v50, %v1488_v61  ;;  %v1503_v59 = vmul.f32 %v1487_v12, %v1487_v12  ;;  %v1490_v41 = vmax.f32 %v1474_v24, 1e-06  ;;  %v1427_v63 = vmul.f32 %v9767_v58, %v9200_v54 }
 0x228   :  { %v1517_v11 = vmul.f32 %v1501_v32, %v1485_v13  ;;  %v1492_v9 = vmax.f32 %v1476_v1, 1e-06  ;;  %v1441_v2 = vadd.f32 %v1425_v28, %v1391_v35  ;;  %v1346_v3 = vmul.f32 %v9758_v7, %v9213_v62 }
 0x229   :  { %v8156_v51 = vpack.c.bf16 %v1520_v55, %v1518_v23  ;;  %v1519_v26 = vmul.f32 %v1503_v59, %v1487_v12  ;;  %v1506_v40 = vmul.f32 %v1490_v41, %v1490_v41  ;;  %v1443_v43 = vadd.f32 %v1427_v63, %v1393_v60 }
 0x22a   :  { %v1508_v29 = vmul.f32 %v1492_v9, %v1492_v9  ;;  %v1457_v21 = vadd.f32 %v1441_v2, %v9286_v14  ;;  %v1348_v61 = vmul.f32 %v9758_v7, %v9321_v18  ;;  %v1380_v8 = vmul.f32 %v9764_v44, %v9222_v20 }
 0x22b   :  { %8157 = vmatprep.subr.bf16.mxu1 %v8156_v51  ;;  %v8158_v13 = vpack.c.bf16 %v1519_v26, %v1517_v11  ;;  %v1522_v1 = vmul.f32 %v1506_v40, %v1490_v41  ;;  %v1459_v36 = vadd.f32 %v1443_v43, %v9204_v47  ;;  %v1382_v35 = vmul.f32 %v9764_v44, %v12502_v15 }
 0x22c   :  { %v1524_v12 = vmul.f32 %v1508_v29, %v1492_v9  ;;  %v1473_v50 = vmax.f32 %v1457_v21, 0.0  ;;  %v1396_v63 = vadd.f32 %v1380_v8, %v1346_v3  ;;  %v1430_v24 = vmul.f32 %v9770_v4, %v12503_v5 }
 0x22d   :  { %8159 = vmatpush1.bf16.xpose.msra.mxu1 %v8158_v13  ;;  %v1475_v60 = vmax.f32 %v1459_v36, 0.0  ;;  %v1398_v23 = vadd.f32 %v1382_v35, %v1348_v61  ;;  %v1432_v32 = vmul.f32 %v9770_v4, %v12512_v19  ;;  %v1345_v41 = vmul.f32 %v9755_v10, %v9213_v62 }
 0x22e   :  { %v8160_v28 = vpack.c.bf16 %v1524_v12, %v1522_v1  ;;  %v1489_v55 = vmax.f32 %v1473_v50, 1e-06  ;;  %v1446_v59 = vadd.f32 %v1430_v24, %v1396_v63  ;;  %v1347_v9 = vmul.f32 %v9755_v10, %v9321_v18 }
 0x22f   :  { %v1491_v11 = vmax.f32 %v1475_v60, 1e-06  ;;  %v1448_v2 = vadd.f32 %v1432_v32, %v1398_v23  ;;  %v1379_v3 = vmul.f32 %v9761_v34, %v9222_v20  ;;  %v1381_v51 = vmul.f32 %v9761_v34, %v12502_v15 }
 0x230   :  { %8161 = vmatprep.subr.bf16.mxu1 %v8160_v28  ;;  %v1505_v26 = vmul.f32 %v1489_v55, %v1489_v55  ;;  %v1462_v40 = vadd.f32 %v1446_v59, %v9340_v49  ;;  %v1429_v43 = vmul.f32 %v9767_v58, %v12503_v5  ;;  %v1431_v29 = vmul.f32 %v9767_v58, %v12512_v19 }
 0x231   :  { %v1507_v21 = vmul.f32 %v1491_v11, %v1491_v11  ;;  %v1464_v61 = vadd.f32 %v1448_v2, %v9301_v46  ;;  %v1395_v8 = vadd.f32 %v1379_v3, %v1345_v41  ;;  %v1397_v13 = vadd.f32 %v1381_v51, %v1347_v9 }
 0x232   :  { %v1521_v1 = vmul.f32 %v1505_v26, %v1489_v55  ;;  %v1478_v36 = vmax.f32 %v1462_v40, 0.0  ;;  %v1350_v35 = vmul.f32 %v9758_v7, %v9329_v53  ;;  %v1352_v12 = vmul.f32 %v9758_v7, %v9355_v6 }
 0x233   :  { %v1523_v50 = vmul.f32 %v1507_v21, %v1491_v11  ;;  %v1480_v63 = vmax.f32 %v1464_v61, 0.0  ;;  %v1445_v24 = vadd.f32 %v1429_v43, %v1395_v8  ;;  %v1447_v60 = vadd.f32 %v1431_v29, %v1397_v13 }
 0x234   :  { %v1494_v23 = vmax.f32 %v1478_v36, 1e-06  ;;  %v1384_v32 = vmul.f32 %v9764_v44, %v9344_v17  ;;  %v1386_v41 = vmul.f32 %v9764_v44, %v9379_v31  ;;  %v1434_v28 = vmul.f32 %v9770_v4, %v9362_v30 }
 0x235   :  { %v8162_v55 = vpack.c.bf16 %v1523_v50, %v1521_v1  ;;  %v1496_v59 = vmax.f32 %v1480_v63, 1e-06  ;;  %v1461_v9 = vadd.f32 %v1445_v24, %v9340_v49  ;;  %v1463_v7 = vadd.f32 %v1447_v60, %v9301_v46 }
 0x236   :  { %v1510_v11 = vmul.f32 %v1494_v23, %v1494_v23  ;;  %v1400_v2 = vadd.f32 %v1384_v32, %v1350_v35  ;;  %v1402_v3 = vadd.f32 %v1386_v41, %v1352_v12  ;;  %v1436_v51 = vmul.f32 %v9770_v4, %v9386_v42 }
 0x237   :  { %8163 = vmatpush1.bf16.xpose.msra.mxu1 %v8162_v55  ;;  %v1512_v26 = vmul.f32 %v1496_v59, %v1496_v59  ;;  %v1477_v40 = vmax.f32 %v1461_v9, 0.0  ;;  %v1479_v43 = vmax.f32 %v1463_v7, 0.0  ;;  %v1349_v44 = vmul.f32 %v9755_v10, %v9329_v53 }
 0x238   :  { %v1526_v29 = vmul.f32 %v1510_v11, %v1494_v23  ;;  %v1450_v21 = vadd.f32 %v1434_v28, %v1400_v2  ;;  %v1452_v61 = vadd.f32 %v1436_v51, %v1402_v3  ;;  %v1351_v8 = vmul.f32 %v9755_v10, %v9355_v6 }
 0x239   :  { %v1528_v13 = vmul.f32 %v1512_v26, %v1496_v59  ;;  %v1493_v1 = vmax.f32 %v1477_v40, 1e-06  ;;  %v1495_v36 = vmax.f32 %v1479_v43, 1e-06  ;;  %v1383_v35 = vmul.f32 %v9761_v34, %v9344_v17 }
 0x23a   :  { %v1466_v4 = vadd.f32 %v1450_v21, %v9400_v45  ;;  %v1468_v12 = vadd.f32 %v1452_v61, %v9398_v25  ;;  %v1385_v50 = vmul.f32 %v9761_v34, %v9379_v31  ;;  %v1433_v63 = vmul.f32 %v9767_v58, %v9362_v30 }
 0x23b   :  { %v8164_v24 = vpack.c.bf16 %v1528_v13, %v1526_v29  ;;  %v1509_v60 = vmul.f32 %v1493_v1, %v1493_v1  ;;  %v1511_v23 = vmul.f32 %v1495_v36, %v1495_v36  ;;  %v1399_v10 = vadd.f32 %v1383_v35, %v1349_v44 }
 0x23c   :  { %v1482_v32 = vmax.f32 %v1466_v4, 0.0  ;;  %v1484_v41 = vmax.f32 %v1468_v12, 0.0  ;;  %v1401_v28 = vadd.f32 %v1385_v50, %v1351_v8  ;;  %v1435_v55 = vmul.f32 %v9767_v58, %v9386_v42  ;;  %v12522_v50 = vld [vmem:[#allocation17_spill] sm:$0xff] }
 0x23d   :  { %8165 = vmatprep.subr.bf16.mxu1 %v8164_v24  ;;  %v1525_v59 = vmul.f32 %v1509_v60, %v1493_v1  ;;  %v1527_v9 = vmul.f32 %v1511_v23, %v1495_v36  ;;  %v1449_v7 = vadd.f32 %v1433_v63, %v1399_v10  ;;  %v2307_v63 = vrot.slane %v12522_v50, 4  ;;  %v12523_v24 = vld [vmem:[#allocation4_spill] sm:$0xff] }
 0x23e   :  { %v1498_v11 = vmax.f32 %v1482_v32, 1e-06  ;;  %v1500_v2 = vmax.f32 %v1484_v41, 1e-06  ;;  %v1451_v34 = vadd.f32 %v1435_v55, %v1401_v28  ;;  %v2323_v60 = vrot.slane %v12523_v24, 4 }
 0x23f   :  { %v8166_v3 = vpack.c.bf16 %v1527_v9, %v1525_v59  ;;  %v1465_v51 = vadd.f32 %v1449_v7, %v9400_v45  ;;  %v2308_v23 = vadd.f32 %v2307_v63, %v12522_v50  ;;  %v1647_v55 = vstv %s1640_s13 }
 0x240   :  { %v1514_v26 = vmul.f32 %v1498_v11, %v1498_v11  ;;  %v1516_v40 = vmul.f32 %v1500_v2, %v1500_v2  ;;  %v1467_v43 = vadd.f32 %v1451_v34, %v9398_v25  ;;  %v2324_v32 = vadd.f32 %v2323_v60, %v12523_v24 }
 0x241   :  { %8167 = vmatpush1.bf16.xpose.msra.mxu1 %v8166_v3  ;;  %v1481_v44 = vmax.f32 %v1465_v51, 0.0  ;;  %v2309_v41 = vrot.slane %v2308_v23, 2 }
 0x242   :  { %v1530_v29 = vmul.f32 %v1514_v26, %v1498_v11  ;;  %v1532_v21 = vmul.f32 %v1516_v40, %v1500_v2  ;;  %v1483_v61 = vmax.f32 %v1467_v43, 0.0  ;;  %v2325_v28 = vrot.slane %v2324_v32, 2  ;;  %v8834_v11 = vld [vmem:[%s12289_s0 + $0x20] sm:$0x77] }
 0x243   :  { %v1497_v58 = vmax.f32 %v1481_v44, 1e-06  ;;  %v2310_v59 = vadd.f32 %v2309_v41, %v2308_v23  ;;  %v1648_v2 = vsub.f32 %v8834_v11, %v1647_v55  ;;  %v12524_v41 = vld [vmem:[#allocation16_spill] sm:$0xff]  ;;  %v12525_v55 = vld [vmem:[#allocation18_spill] sm:$0xff] }
 0x244   :  { %v8168_v8 = vpack.c.bf16 %v1532_v21, %v1530_v29  ;;  %v1499_v13 = vmax.f32 %v1483_v61, 1e-06  ;;  %v2326_v7 = vadd.f32 %v2325_v28, %v2324_v32 }
 0x245   :  { %v1513_v1 = vmul.f32 %v1497_v58, %v1497_v58  ;;  %v2311_v3 = vrot.slane %v2310_v59, 1 }
 0x246   :  { %8169 = vmatprep.subr.bf16.mxu1 %v8168_v8  ;;  %v1515_v36 = vmul.f32 %v1499_v13, %v1499_v13  ;;  %v2327_v26 = vrot.slane %v2326_v7, 1 }
 0x247   :  { %v1529_v35 = vmul.f32 %v1513_v1, %v1497_v58  ;;  %v2312_v43 = vadd.f32 %v2311_v3, %v2310_v59 }
 0x248   :  { %v1531_v4 = vmul.f32 %v1515_v36, %v1499_v13  ;;  %v2328_v13 = vadd.f32 %v2327_v26, %v2326_v7  ;;  %v12526_v7 = vld [vmem:[#allocation20_spill] sm:$0xff] }
 0x24a   :  { %v8170_v12 = vpack.c.bf16 %v1531_v4, %v1529_v35 }
 0x24c   :  { %8171 = vmatpush1.bf16.xpose.msra.mxu1 %v8170_v12 }
 0x24d   :  { %s8521_s21 = spop %8520 }
 0x24e   :  { %s1658_s22 = sadd.f32 0.0001, %s8521_s21  ;;  %s9887_s23 = spop %8522 }
 0x24f   :  { %s1986_s24 = smul.f32 0.0013020834, %s9887_s23  ;;  %s8525_s26 = spop %8524 }
 0x250   :  { %v1659_v10 = vstv %s1658_s22 }
 0x251   :  { %8649 = vrcp.f32 %v1659_v10  ;;  %s1987_s25 = smul.f32 %s9887_s23, %s1986_s24 }
 0x253   :  { %s1988_s27 = ssub.f32 %s8525_s26, %s1987_s25  ;;  %1598 = vmatmul.mubr.f32.vlgmr.msra.gmra.mrb[2].mxu1 %v12507_v56 }
 0x254   :  { %2289 = vmatprep.mubr.f32.mxu1 %v12507_v56 }
 0x255   :  { %s1991_s28 = smul.f32 0.0013037809, %s1988_s27 }
 0x257   :  { %s1992_s29 = smax.f32 %s8849_s19, %s1991_s28 }
 0x258   :  { %v1995_v9 = vstv %s1992_s29 }
 0x259   :  { %8651 = vrsqrt.f32 %v1995_v9  ;;  %vm1998_vm11 = vcmp.eq.f32.partialorder %v1995_v9, inf  ;;  %vm2000_vm12 = vcmp.eq.f32.partialorder %v1995_v9, 0.0  ;;  %v2001_v24 = vand.u32 2147483648, %v1995_v9 }
 0x25b   :  { %v8650_v34 = vpop.eup %8649 }
 0x25c   :  { %v1661_v51 = vmul.f32 %v8650_v34, %v1648_v2 }
 0x25e   :  { %v7765_v40 = vclamps-f32 %v1661_v51, 20.0 }
 0x260   :  { %v1668_v44 = vrot.slane %v7765_v40, %v9235_v33  ;;  %v1672_v29 = vrot.slane %v7765_v40, %v9238_v37  ;;  %v1702_v21 = vrot.slane %v7765_v40, %v9241_v38  ;;  %v1706_v61 = vrot.slane %v7765_v40, %v9244_v39 }
 0x261   :  { %v1752_v58 = vrot.slane %v7765_v40, %v9247_v57  ;;  %v1756_v8 = vrot.slane %v7765_v40, %v9250_v0 }
 0x262   :  { %v9910_v1 = vrot.slane %v1668_v44, %v9235_v33  ;;  %v9913_v36 = vrot.slane %v1672_v29, %v9235_v33  ;;  %v9916_v35 = vrot.slane %v1702_v21, %v9241_v38  ;;  %v9919_v4 = vrot.slane %v1706_v61, %v9241_v38 }
 0x263   :  { %v8652_v12 = vpop.eup %8651  ;;  %v9922_v50 = vrot.slane %v1752_v58, %v9247_v57  ;;  %v9925_v63 = vrot.slane %v1756_v8, %v9247_v57 }
 0x264   :  { %v1997_v60 = vmul.f32 %v8652_v12, %v1995_v9  ;;  %v1684_v23 = vmul.f32 %v9913_v36, %v9229_v27  ;;  %v1686_v10 = vmul.f32 %v9913_v36, %v9159_v16  ;;  %v1718_v32 = vmul.f32 %v9919_v4, %v9164_v22 }
 0x265   :  { %v1720_v28 = vmul.f32 %v9919_v4, %v12524_v41  ;;  %v1768_v59 = vmul.f32 %v9925_v63, %v12525_v55  ;;  %v1770_v11 = vmul.f32 %v9925_v63, %v12526_v7  ;;  %v1683_v2 = vmul.f32 %v9910_v1, %v9229_v27 }
 0x266   :  { %v1999_v34 = vsel %vm1998_vm11, %v1995_v9, %v1997_v60  ;;  %v1734_v3 = vadd.f32 %v1718_v32, %v1684_v23  ;;  %v1685_v51 = vmul.f32 %v9910_v1, %v9159_v16  ;;  %v1717_v26 = vmul.f32 %v9916_v35, %v9164_v22 }
 0x267   :  { %v2002_v40 = vsel %vm2000_vm12, %v2001_v24, %v1999_v34  ;;  %v1736_v44 = vadd.f32 %v1720_v28, %v1686_v10  ;;  %v1719_v29 = vmul.f32 %v9916_v35, %v12524_v41  ;;  %v1767_v21 = vmul.f32 %v9922_v50, %v12525_v55  ;;  %v12527_v24 = vld [vmem:[#allocation37_spill] sm:$0xff]  ;;  %v12528_v10 = vld [vmem:[#allocation27_spill] sm:$0xff]  ;;  %v12529_v28 = vld [vmem:[#allocation22_spill] sm:$0xff] }
 0x268   :  { %8526 = vpush %v2002_v40  ;;  %v1784_v61 = vadd.f32 %v1768_v59, %v1734_v3  ;;  %v1733_v58 = vadd.f32 %v1717_v26, %v1683_v2  ;;  %v1769_v9 = vmul.f32 %v9922_v50, %v12526_v7  ;;  %v1688_v8 = vmul.f32 %v9913_v36, %v9188_v48  ;;  %v12530_v2 = vld [vmem:[#allocation33_spill] sm:$0xff]  ;;  %v12531_v40 = vld [vmem:[#allocation24_spill] sm:$0xff] }
 0x269   :  { %8528 = vpush %v2312_v43  ;;  %v1786_v12 = vadd.f32 %v1770_v11, %v1736_v44  ;;  %v1735_v60 = vadd.f32 %v1719_v29, %v1685_v51  ;;  %v1690_v23 = vmul.f32 %v9913_v36, %v12527_v24  ;;  %v1722_v32 = vmul.f32 %v9919_v4, %v12528_v10 }
 0x26a   :  { %8530 = vpush %v2328_v13  ;;  %v1800_v34 = vadd.f32 %v1784_v61, %v12529_v28  ;;  %v1783_v59 = vadd.f32 %v1767_v21, %v1733_v58  ;;  %v1724_v3 = vmul.f32 %v9919_v4, %v12530_v2  ;;  %v1772_v26 = vmul.f32 %v9925_v63, %v9196_v52 }
 0x26b   :  { %v1802_v43 = vadd.f32 %v1786_v12, %v12531_v40  ;;  %v1785_v11 = vadd.f32 %v1769_v9, %v1735_v60  ;;  %v1738_v51 = vadd.f32 %v1722_v32, %v1688_v8  ;;  %v1774_v44 = vmul.f32 %v9925_v63, %v9200_v54 }
 0x26c   :  { %v1816_v29 = vmax.f32 %v1800_v34, 0.0  ;;  %v1799_v7 = vadd.f32 %v1783_v59, %v12529_v28  ;;  %v1740_v13 = vadd.f32 %v1724_v3, %v1690_v23  ;;  %v1687_v21 = vmul.f32 %v9910_v1, %v9188_v48 }
 0x26d   :  { %v1818_v61 = vmax.f32 %v1802_v43, 0.0  ;;  %v1801_v58 = vadd.f32 %v1785_v11, %v12531_v40  ;;  %v1788_v55 = vadd.f32 %v1772_v26, %v1738_v51  ;;  %v1689_v41 = vmul.f32 %v9910_v1, %v12527_v24 }
 0x26e   :  { %v1832_v12 = vmax.f32 %v1816_v29, 1e-06  ;;  %v1815_v9 = vmax.f32 %v1799_v7, 0.0  ;;  %v1790_v8 = vadd.f32 %v1774_v44, %v1740_v13  ;;  %v1721_v60 = vmul.f32 %v9916_v35, %v12528_v10 }
 0x26f   :  { %v1834_v32 = vmax.f32 %v1818_v61, 1e-06  ;;  %v1817_v34 = vmax.f32 %v1801_v58, 0.0  ;;  %v1804_v23 = vadd.f32 %v1788_v55, %v9286_v14  ;;  %v1723_v59 = vmul.f32 %v9916_v35, %v12530_v2 }
 0x270   :  { %v1848_v3 = vmul.f32 %v1832_v12, %v1832_v12  ;;  %v1831_v43 = vmax.f32 %v1815_v9, 1e-06  ;;  %v1806_v26 = vadd.f32 %v1790_v8, %v9204_v47  ;;  %v1737_v11 = vadd.f32 %v1721_v60, %v1687_v21 }
 0x271   :  { %v1850_v51 = vmul.f32 %v1834_v32, %v1834_v32  ;;  %v1833_v40 = vmax.f32 %v1817_v34, 1e-06  ;;  %v1820_v29 = vmax.f32 %v1804_v23, 0.0  ;;  %v1739_v7 = vadd.f32 %v1723_v59, %v1689_v41 }
 0x272   :  { %v1864_v44 = vmul.f32 %v1848_v3, %v1832_v12  ;;  %v1847_v13 = vmul.f32 %v1831_v43, %v1831_v43  ;;  %v1822_v28 = vmax.f32 %v1806_v26, 0.0  ;;  %v1771_v61 = vmul.f32 %v9922_v50, %v9196_v52 }
 0x273   :  { %v1866_v58 = vmul.f32 %v1850_v51, %v1834_v32  ;;  %v1849_v55 = vmul.f32 %v1833_v40, %v1833_v40  ;;  %v1836_v10 = vmax.f32 %v1820_v29, 1e-06  ;;  %v1773_v2 = vmul.f32 %v9922_v50, %v9200_v54 }
 0x274   :  { %v1863_v9 = vmul.f32 %v1847_v13, %v1831_v43  ;;  %v1838_v24 = vmax.f32 %v1822_v28, 1e-06  ;;  %v1787_v8 = vadd.f32 %v1771_v61, %v1737_v11  ;;  %v1692_v21 = vmul.f32 %v9913_v36, %v9213_v62 }
 0x275   :  { %v8172_v60 = vpack.c.bf16 %v1866_v58, %v1864_v44  ;;  %v1865_v41 = vmul.f32 %v1849_v55, %v1833_v40  ;;  %v1852_v12 = vmul.f32 %v1836_v10, %v1836_v10  ;;  %v1789_v34 = vadd.f32 %v1773_v2, %v1739_v7 }
 0x276   :  { %v1854_v23 = vmul.f32 %v1838_v24, %v1838_v24  ;;  %v1803_v59 = vadd.f32 %v1787_v8, %v9286_v14  ;;  %v1694_v32 = vmul.f32 %v9913_v36, %v9321_v18  ;;  %v1726_v3 = vmul.f32 %v9919_v4, %v9222_v20 }
 0x277   :  { %8173 = vmatprep.subr.bf16.mxu0 %v8172_v60  ;;  %v8174_v43 = vpack.c.bf16 %v1865_v41, %v1863_v9  ;;  %v1868_v28 = vmul.f32 %v1852_v12, %v1836_v10  ;;  %v1805_v26 = vadd.f32 %v1789_v34, %v9204_v47  ;;  %v1728_v11 = vmul.f32 %v9919_v4, %v12502_v15 }
 0x278   :  { %v1870_v40 = vmul.f32 %v1854_v23, %v1838_v24  ;;  %v1819_v51 = vmax.f32 %v1803_v59, 0.0  ;;  %v1742_v2 = vadd.f32 %v1726_v3, %v1692_v21  ;;  %v1776_v29 = vmul.f32 %v9925_v63, %v12503_v5 }
 0x279   :  { %8175 = vmatpush1.bf16.xpose.msra.mxu0 %v8174_v43  ;;  %v1821_v7 = vmax.f32 %v1805_v26, 0.0  ;;  %v1744_v44 = vadd.f32 %v1728_v11, %v1694_v32  ;;  %v1778_v13 = vmul.f32 %v9925_v63, %v12512_v19  ;;  %v1691_v10 = vmul.f32 %v9910_v1, %v9213_v62 }
 0x27a   :  { %v8176_v61 = vpack.c.bf16 %v1870_v40, %v1868_v28  ;;  %v1835_v58 = vmax.f32 %v1819_v51, 1e-06  ;;  %v1792_v55 = vadd.f32 %v1776_v29, %v1742_v2  ;;  %v1693_v24 = vmul.f32 %v9910_v1, %v9321_v18 }
 0x27b   :  { %v1837_v9 = vmax.f32 %v1821_v7, 1e-06  ;;  %v1794_v8 = vadd.f32 %v1778_v13, %v1744_v44  ;;  %v1725_v21 = vmul.f32 %v9916_v35, %v9222_v20  ;;  %v1727_v60 = vmul.f32 %v9916_v35, %v12502_v15 }
 0x27c   :  { %8177 = vmatprep.subr.bf16.mxu0 %v8176_v61  ;;  %v1851_v41 = vmul.f32 %v1835_v58, %v1835_v58  ;;  %v1808_v12 = vadd.f32 %v1792_v55, %v9340_v49  ;;  %v1775_v34 = vmul.f32 %v9922_v50, %v12503_v5  ;;  %v1777_v23 = vmul.f32 %v9922_v50, %v12512_v19 }
 0x27d   :  { %v1853_v59 = vmul.f32 %v1837_v9, %v1837_v9  ;;  %v1810_v32 = vadd.f32 %v1794_v8, %v9301_v46  ;;  %v1741_v3 = vadd.f32 %v1725_v21, %v1691_v10  ;;  %v1743_v43 = vadd.f32 %v1727_v60, %v1693_v24 }
 0x27e   :  { %v1867_v28 = vmul.f32 %v1851_v41, %v1835_v58  ;;  %v1824_v26 = vmax.f32 %v1808_v12, 0.0  ;;  %v1696_v11 = vmul.f32 %v9913_v36, %v9329_v53  ;;  %v1698_v40 = vmul.f32 %v9913_v36, %v9355_v6 }
 0x27f   :  { %v1869_v51 = vmul.f32 %v1853_v59, %v1837_v9  ;;  %v1826_v2 = vmax.f32 %v1810_v32, 0.0  ;;  %v1791_v29 = vadd.f32 %v1775_v34, %v1741_v3  ;;  %v1793_v7 = vadd.f32 %v1777_v23, %v1743_v43 }
 0x280   :  { %v1840_v44 = vmax.f32 %v1824_v26, 1e-06  ;;  %v1730_v13 = vmul.f32 %v9919_v4, %v9344_v17  ;;  %v1732_v10 = vmul.f32 %v9919_v4, %v9379_v31  ;;  %v1780_v61 = vmul.f32 %v9925_v63, %v9362_v30 }
 0x281   :  { %v8178_v58 = vpack.c.bf16 %v1869_v51, %v1867_v28  ;;  %v1842_v55 = vmax.f32 %v1826_v2, 1e-06  ;;  %v1807_v24 = vadd.f32 %v1791_v29, %v9340_v49  ;;  %v1809_v36 = vadd.f32 %v1793_v7, %v9301_v46 }
 0x282   :  { %v1856_v9 = vmul.f32 %v1840_v44, %v1840_v44  ;;  %v1746_v8 = vadd.f32 %v1730_v13, %v1696_v11  ;;  %v1748_v21 = vadd.f32 %v1732_v10, %v1698_v40  ;;  %v1782_v60 = vmul.f32 %v9925_v63, %v9386_v42 }
 0x283   :  { %8179 = vmatpush1.bf16.xpose.msra.mxu0 %v8178_v58  ;;  %v1858_v41 = vmul.f32 %v1842_v55, %v1842_v55  ;;  %v1823_v12 = vmax.f32 %v1807_v24, 0.0  ;;  %v1825_v34 = vmax.f32 %v1809_v36, 0.0  ;;  %v1695_v4 = vmul.f32 %v9910_v1, %v9329_v53 }
 0x284   :  { %v1872_v23 = vmul.f32 %v1856_v9, %v1840_v44  ;;  %v1796_v59 = vadd.f32 %v1780_v61, %v1746_v8  ;;  %v1798_v32 = vadd.f32 %v1782_v60, %v1748_v21  ;;  %v1697_v3 = vmul.f32 %v9910_v1, %v9355_v6 }
 0x285   :  { %v1874_v43 = vmul.f32 %v1858_v41, %v1842_v55  ;;  %v1839_v28 = vmax.f32 %v1823_v12, 1e-06  ;;  %v1841_v26 = vmax.f32 %v1825_v34, 1e-06  ;;  %v1729_v11 = vmul.f32 %v9916_v35, %v9344_v17 }
 0x286   :  { %v1812_v63 = vadd.f32 %v1796_v59, %v9400_v45  ;;  %v1814_v40 = vadd.f32 %v1798_v32, %v9398_v25  ;;  %v1731_v51 = vmul.f32 %v9916_v35, %v9379_v31  ;;  %v1779_v2 = vmul.f32 %v9922_v50, %v9362_v30 }
 0x287   :  { %v8180_v29 = vpack.c.bf16 %v1874_v43, %v1872_v23  ;;  %v1855_v7 = vmul.f32 %v1839_v28, %v1839_v28  ;;  %v1857_v44 = vmul.f32 %v1841_v26, %v1841_v26  ;;  %v1745_v1 = vadd.f32 %v1729_v11, %v1695_v4 }
 0x288   :  { %v1828_v13 = vmax.f32 %v1812_v63, 0.0  ;;  %v1830_v10 = vmax.f32 %v1814_v40, 0.0  ;;  %v1747_v61 = vadd.f32 %v1731_v51, %v1697_v3  ;;  %v1781_v58 = vmul.f32 %v9922_v50, %v9386_v42  ;;  %v12532_v51 = vld [vmem:[#allocation19_spill] sm:$0xff] }
 0x289   :  { %8181 = vmatprep.subr.bf16.mxu0 %v8180_v29  ;;  %v1871_v55 = vmul.f32 %v1855_v7, %v1839_v28  ;;  %v1873_v24 = vmul.f32 %v1857_v44, %v1841_v26  ;;  %v1795_v36 = vadd.f32 %v1779_v2, %v1745_v1  ;;  %v2653_v2 = vrot.slane %v12532_v51, 4  ;;  %v12533_v29 = vld [vmem:[#allocation5_spill] sm:$0xff] }
 0x28a   :  { %v1844_v9 = vmax.f32 %v1828_v13, 1e-06  ;;  %v1846_v8 = vmax.f32 %v1830_v10, 1e-06  ;;  %v1797_v35 = vadd.f32 %v1781_v58, %v1747_v61  ;;  %v2669_v7 = vrot.slane %v12533_v29, 4 }
 0x28b   :  { %v8182_v21 = vpack.c.bf16 %v1873_v24, %v1871_v55  ;;  %v1811_v60 = vadd.f32 %v1795_v36, %v9400_v45  ;;  %v2654_v44 = vadd.f32 %v2653_v2, %v12532_v51  ;;  %v1993_v58 = vstv %s1986_s24 }
 0x28c   :  { %v1860_v41 = vmul.f32 %v1844_v9, %v1844_v9  ;;  %v1862_v12 = vmul.f32 %v1846_v8, %v1846_v8  ;;  %v1813_v34 = vadd.f32 %v1797_v35, %v9398_v25  ;;  %v2670_v13 = vadd.f32 %v2669_v7, %v12533_v29 }
 0x28d   :  { %8183 = vmatpush1.bf16.xpose.msra.mxu0 %v8182_v21  ;;  %v1827_v4 = vmax.f32 %v1811_v60, 0.0  ;;  %v2655_v10 = vrot.slane %v2654_v44, 2 }
 0x28e   :  { %v1876_v23 = vmul.f32 %v1860_v41, %v1844_v9  ;;  %v1878_v59 = vmul.f32 %v1862_v12, %v1846_v8  ;;  %v1829_v32 = vmax.f32 %v1813_v34, 0.0  ;;  %v2671_v61 = vrot.slane %v2670_v13, 2  ;;  %v8835_v9 = vld [vmem:[%s12289_s0 + $0x28] sm:$0x77] }
 0x28f   :  { %v1843_v50 = vmax.f32 %v1827_v4, 1e-06  ;;  %v2656_v55 = vadd.f32 %v2655_v10, %v2654_v44  ;;  %v1994_v8 = vsub.f32 %v8835_v9, %v1993_v58  ;;  %v12534_v10 = vld [vmem:[#allocation16_spill] sm:$0xff]  ;;  %v12535_v58 = vld [vmem:[#allocation18_spill] sm:$0xff] }
 0x290   :  { %v8184_v3 = vpack.c.bf16 %v1878_v59, %v1876_v23  ;;  %v1845_v43 = vmax.f32 %v1829_v32, 1e-06  ;;  %v2672_v36 = vadd.f32 %v2671_v61, %v2670_v13 }
 0x291   :  { %v1859_v28 = vmul.f32 %v1843_v50, %v1843_v50  ;;  %v2657_v21 = vrot.slane %v2656_v55, 1 }
 0x292   :  { %8185 = vmatprep.subr.bf16.mxu0 %v8184_v3  ;;  %v1861_v26 = vmul.f32 %v1845_v43, %v1845_v43  ;;  %v2673_v41 = vrot.slane %v2672_v36, 1 }
 0x293   :  { %v1875_v11 = vmul.f32 %v1859_v28, %v1843_v50  ;;  %v2658_v34 = vadd.f32 %v2657_v21, %v2656_v55 }
 0x294   :  { %v1877_v63 = vmul.f32 %v1861_v26, %v1845_v43  ;;  %v2674_v43 = vadd.f32 %v2673_v41, %v2672_v36  ;;  %v12536_v36 = vld [vmem:[#allocation20_spill] sm:$0xff] }
 0x296   :  { %v8186_v40 = vpack.c.bf16 %v1877_v63, %v1875_v11 }
 0x298   :  { %8187 = vmatpush1.bf16.xpose.msra.mxu0 %v8186_v40 }
 0x299   :  { %s8527_s12 = spop %8526 }
 0x29a   :  { %s2004_s2 = sadd.f32 0.0001, %s8527_s12  ;;  %s10042_s13 = spop %8528 }
 0x29b   :  { %s2332_s3 = smul.f32 0.0013020834, %s10042_s13  ;;  %s8531_s15 = spop %8530 }
 0x29c   :  { %v2005_v1 = vstv %s2004_s2 }
 0x29d   :  { %8653 = vrcp.f32 %v2005_v1  ;;  %s2333_s14 = smul.f32 %s10042_s13, %s2332_s3 }
 0x29f   :  { %s2334_s16 = ssub.f32 %s8531_s15, %s2333_s14  ;;  %1944 = vmatmul.mubr.f32.vlgmr.msra.gmra.mrb[4].mxu0 %v12507_v56 }
 0x2a0   :  { %2635 = vmatprep.mubr.f32.mxu0 %v12507_v56 }
 0x2a1   :  { %s2337_s17 = smul.f32 0.0013037809, %s2334_s16 }
 0x2a3   :  { %s2338_s18 = smax.f32 %s8849_s19, %s2337_s17 }
 0x2a4   :  { %v2341_v24 = vstv %s2338_s18 }
 0x2a5   :  { %8655 = vrsqrt.f32 %v2341_v24  ;;  %vm2344_vm13 = vcmp.eq.f32.partialorder %v2341_v24, inf  ;;  %vm2346_vm14 = vcmp.eq.f32.partialorder %v2341_v24, 0.0  ;;  %v2347_v29 = vand.u32 2147483648, %v2341_v24 }
 0x2a7   :  { %v8654_v35 = vpop.eup %8653 }
 0x2a8   :  { %v2007_v60 = vmul.f32 %v8654_v35, %v1994_v8 }
 0x2aa   :  { %v7767_v12 = vclamps-f32 %v2007_v60, 20.0 }
 0x2ac   :  { %v2014_v4 = vrot.slane %v7767_v12, %v9235_v33  ;;  %v2018_v23 = vrot.slane %v7767_v12, %v9238_v37  ;;  %v2048_v59 = vrot.slane %v7767_v12, %v9241_v38  ;;  %v2052_v32 = vrot.slane %v7767_v12, %v9244_v39 }
 0x2ad   :  { %v2098_v50 = vrot.slane %v7767_v12, %v9247_v57  ;;  %v2102_v3 = vrot.slane %v7767_v12, %v9250_v0 }
 0x2ae   :  { %v10065_v28 = vrot.slane %v2014_v4, %v9235_v33  ;;  %v10068_v26 = vrot.slane %v2018_v23, %v9235_v33  ;;  %v10071_v11 = vrot.slane %v2048_v59, %v9241_v38  ;;  %v10074_v63 = vrot.slane %v2052_v32, %v9241_v38 }
 0x2af   :  { %v8656_v40 = vpop.eup %8655  ;;  %v10077_v51 = vrot.slane %v2098_v50, %v9247_v57  ;;  %v10080_v2 = vrot.slane %v2102_v3, %v9247_v57 }
 0x2b0   :  { %v2343_v7 = vmul.f32 %v8656_v40, %v2341_v24  ;;  %v2030_v44 = vmul.f32 %v10068_v26, %v9229_v27  ;;  %v2032_v1 = vmul.f32 %v10068_v26, %v9159_v16  ;;  %v2064_v13 = vmul.f32 %v10074_v63, %v9164_v22 }
 0x2b1   :  { %v2066_v61 = vmul.f32 %v10074_v63, %v12534_v10  ;;  %v2114_v55 = vmul.f32 %v10080_v2, %v12535_v58  ;;  %v2116_v9 = vmul.f32 %v10080_v2, %v12536_v36  ;;  %v2029_v8 = vmul.f32 %v10065_v28, %v9229_v27 }
 0x2b2   :  { %v2345_v35 = vsel %vm2344_vm13, %v2341_v24, %v2343_v7  ;;  %v2080_v21 = vadd.f32 %v2064_v13, %v2030_v44  ;;  %v2031_v60 = vmul.f32 %v10065_v28, %v9159_v16  ;;  %v2063_v41 = vmul.f32 %v10071_v11, %v9164_v22 }
 0x2b3   :  { %v2348_v12 = vsel %vm2346_vm14, %v2347_v29, %v2345_v35  ;;  %v2082_v4 = vadd.f32 %v2066_v61, %v2032_v1  ;;  %v2065_v23 = vmul.f32 %v10071_v11, %v12534_v10  ;;  %v2113_v59 = vmul.f32 %v10077_v51, %v12535_v58  ;;  %v12537_v29 = vld [vmem:[#allocation37_spill] sm:$0xff]  ;;  %v12538_v1 = vld [vmem:[#allocation27_spill] sm:$0xff]  ;;  %v12539_v61 = vld [vmem:[#allocation22_spill] sm:$0xff] }
 0x2b4   :  { %8532 = vpush %v2348_v12  ;;  %v2130_v32 = vadd.f32 %v2114_v55, %v2080_v21  ;;  %v2079_v50 = vadd.f32 %v2063_v41, %v2029_v8  ;;  %v2115_v24 = vmul.f32 %v10077_v51, %v12536_v36  ;;  %v2034_v3 = vmul.f32 %v10068_v26, %v9188_v48  ;;  %v12540_v8 = vld [vmem:[#allocation33_spill] sm:$0xff]  ;;  %v12541_v12 = vld [vmem:[#allocation24_spill] sm:$0xff] }
 0x2b5   :  { %8534 = vpush %v2658_v34  ;;  %v2132_v40 = vadd.f32 %v2116_v9, %v2082_v4  ;;  %v2081_v7 = vadd.f32 %v2065_v23, %v2031_v60  ;;  %v2036_v44 = vmul.f32 %v10068_v26, %v12537_v29  ;;  %v2068_v13 = vmul.f32 %v10074_v63, %v12538_v1 }
 0x2b6   :  { %8536 = vpush %v2674_v43  ;;  %v2146_v35 = vadd.f32 %v2130_v32, %v12539_v61  ;;  %v2129_v55 = vadd.f32 %v2113_v59, %v2079_v50  ;;  %v2070_v21 = vmul.f32 %v10074_v63, %v12540_v8  ;;  %v2118_v41 = vmul.f32 %v10080_v2, %v9196_v52 }
 0x2b7   :  { %v2148_v34 = vadd.f32 %v2132_v40, %v12541_v12  ;;  %v2131_v9 = vadd.f32 %v2115_v24, %v2081_v7  ;;  %v2084_v60 = vadd.f32 %v2068_v13, %v2034_v3  ;;  %v2120_v4 = vmul.f32 %v10080_v2, %v9200_v54 }
 0x2b8   :  { %v2162_v23 = vmax.f32 %v2146_v35, 0.0  ;;  %v2145_v36 = vadd.f32 %v2129_v55, %v12539_v61  ;;  %v2086_v43 = vadd.f32 %v2070_v21, %v2036_v44  ;;  %v2033_v59 = vmul.f32 %v10065_v28, %v9188_v48 }
 0x2b9   :  { %v2164_v32 = vmax.f32 %v2148_v34, 0.0  ;;  %v2147_v50 = vadd.f32 %v2131_v9, %v12541_v12  ;;  %v2134_v58 = vadd.f32 %v2118_v41, %v2084_v60  ;;  %v2035_v10 = vmul.f32 %v10065_v28, %v12537_v29 }
 0x2ba   :  { %v2178_v40 = vmax.f32 %v2162_v23, 1e-06  ;;  %v2161_v24 = vmax.f32 %v2145_v36, 0.0  ;;  %v2136_v3 = vadd.f32 %v2120_v4, %v2086_v43  ;;  %v2067_v7 = vmul.f32 %v10071_v11, %v12538_v1 }
 0x2bb   :  { %v2180_v13 = vmax.f32 %v2164_v32, 1e-06  ;;  %v2163_v35 = vmax.f32 %v2147_v50, 0.0  ;;  %v2150_v44 = vadd.f32 %v2134_v58, %v9286_v14  ;;  %v2069_v55 = vmul.f32 %v10071_v11, %v12540_v8 }
 0x2bc   :  { %v2194_v21 = vmul.f32 %v2178_v40, %v2178_v40  ;;  %v2177_v34 = vmax.f32 %v2161_v24, 1e-06  ;;  %v2152_v41 = vadd.f32 %v2136_v3, %v9204_v47  ;;  %v2083_v9 = vadd.f32 %v2067_v7, %v2033_v59 }
 0x2bd   :  { %v2196_v60 = vmul.f32 %v2180_v13, %v2180_v13  ;;  %v2179_v12 = vmax.f32 %v2163_v35, 1e-06  ;;  %v2166_v23 = vmax.f32 %v2150_v44, 0.0  ;;  %v2085_v36 = vadd.f32 %v2069_v55, %v2035_v10 }
 0x2be   :  { %v2210_v4 = vmul.f32 %v2194_v21, %v2178_v40  ;;  %v2193_v43 = vmul.f32 %v2177_v34, %v2177_v34  ;;  %v2168_v61 = vmax.f32 %v2152_v41, 0.0  ;;  %v2117_v32 = vmul.f32 %v10077_v51, %v9196_v52 }
 0x2bf   :  { %v2212_v50 = vmul.f32 %v2196_v60, %v2180_v13  ;;  %v2195_v58 = vmul.f32 %v2179_v12, %v2179_v12  ;;  %v2182_v1 = vmax.f32 %v2166_v23, 1e-06  ;;  %v2119_v8 = vmul.f32 %v10077_v51, %v9200_v54 }
 0x2c0   :  { %v2209_v24 = vmul.f32 %v2193_v43, %v2177_v34  ;;  %v2184_v29 = vmax.f32 %v2168_v61, 1e-06  ;;  %v2133_v3 = vadd.f32 %v2117_v32, %v2083_v9  ;;  %v2038_v59 = vmul.f32 %v10068_v26, %v9213_v62 }
 0x2c1   :  { %v8188_v7 = vpack.c.bf16 %v2212_v50, %v2210_v4  ;;  %v2211_v10 = vmul.f32 %v2195_v58, %v2179_v12  ;;  %v2198_v40 = vmul.f32 %v2182_v1, %v2182_v1  ;;  %v2135_v35 = vadd.f32 %v2119_v8, %v2085_v36 }
 0x2c2   :  { %v2200_v44 = vmul.f32 %v2184_v29, %v2184_v29  ;;  %v2149_v55 = vadd.f32 %v2133_v3, %v9286_v14  ;;  %v2040_v13 = vmul.f32 %v10068_v26, %v9321_v18  ;;  %v2072_v21 = vmul.f32 %v10074_v63, %v9222_v20 }
 0x2c3   :  { %8189 = vmatprep.subr.bf16.mxu1 %v8188_v7  ;;  %v8190_v34 = vpack.c.bf16 %v2211_v10, %v2209_v24  ;;  %v2214_v61 = vmul.f32 %v2198_v40, %v2182_v1  ;;  %v2151_v41 = vadd.f32 %v2135_v35, %v9204_v47  ;;  %v2074_v9 = vmul.f32 %v10074_v63, %v12502_v15 }
 0x2c4   :  { %v2216_v12 = vmul.f32 %v2200_v44, %v2184_v29  ;;  %v2165_v60 = vmax.f32 %v2149_v55, 0.0  ;;  %v2088_v8 = vadd.f32 %v2072_v21, %v2038_v59  ;;  %v2122_v23 = vmul.f32 %v10080_v2, %v12503_v5 }
 0x2c5   :  { %8191 = vmatpush1.bf16.xpose.msra.mxu1 %v8190_v34  ;;  %v2167_v36 = vmax.f32 %v2151_v41, 0.0  ;;  %v2090_v4 = vadd.f32 %v2074_v9, %v2040_v13  ;;  %v2124_v43 = vmul.f32 %v10080_v2, %v12512_v19  ;;  %v2037_v1 = vmul.f32 %v10065_v28, %v9213_v62 }
 0x2c6   :  { %v8192_v32 = vpack.c.bf16 %v2216_v12, %v2214_v61  ;;  %v2181_v50 = vmax.f32 %v2165_v60, 1e-06  ;;  %v2138_v58 = vadd.f32 %v2122_v23, %v2088_v8  ;;  %v2039_v29 = vmul.f32 %v10065_v28, %v9321_v18 }
 0x2c7   :  { %v2183_v24 = vmax.f32 %v2167_v36, 1e-06  ;;  %v2140_v3 = vadd.f32 %v2124_v43, %v2090_v4  ;;  %v2071_v59 = vmul.f32 %v10071_v11, %v9222_v20  ;;  %v2073_v7 = vmul.f32 %v10071_v11, %v12502_v15 }
 0x2c8   :  { %8193 = vmatprep.subr.bf16.mxu1 %v8192_v32  ;;  %v2197_v10 = vmul.f32 %v2181_v50, %v2181_v50  ;;  %v2154_v40 = vadd.f32 %v2138_v58, %v9340_v49  ;;  %v2121_v35 = vmul.f32 %v10077_v51, %v12503_v5  ;;  %v2123_v44 = vmul.f32 %v10077_v51, %v12512_v19 }
 0x2c9   :  { %v2199_v55 = vmul.f32 %v2183_v24, %v2183_v24  ;;  %v2156_v13 = vadd.f32 %v2140_v3, %v9301_v46  ;;  %v2087_v21 = vadd.f32 %v2071_v59, %v2037_v1  ;;  %v2089_v34 = vadd.f32 %v2073_v7, %v2039_v29 }
 0x2ca   :  { %v2213_v61 = vmul.f32 %v2197_v10, %v2181_v50  ;;  %v2170_v41 = vmax.f32 %v2154_v40, 0.0  ;;  %v2042_v9 = vmul.f32 %v10068_v26, %v9329_v53  ;;  %v2044_v12 = vmul.f32 %v10068_v26, %v9355_v6 }
 0x2cb   :  { %v2215_v60 = vmul.f32 %v2199_v55, %v2183_v24  ;;  %v2172_v8 = vmax.f32 %v2156_v13, 0.0  ;;  %v2137_v23 = vadd.f32 %v2121_v35, %v2087_v21  ;;  %v2139_v36 = vadd.f32 %v2123_v44, %v2089_v34 }
 0x2cc   :  { %v2186_v4 = vmax.f32 %v2170_v41, 1e-06  ;;  %v2076_v43 = vmul.f32 %v10074_v63, %v9344_v17  ;;  %v2078_v1 = vmul.f32 %v10074_v63, %v9379_v31  ;;  %v2126_v32 = vmul.f32 %v10080_v2, %v9362_v30 }
 0x2cd   :  { %v8194_v50 = vpack.c.bf16 %v2215_v60, %v2213_v61  ;;  %v2188_v58 = vmax.f32 %v2172_v8, 1e-06  ;;  %v2153_v29 = vadd.f32 %v2137_v23, %v9340_v49  ;;  %v2155_v26 = vadd.f32 %v2139_v36, %v9301_v46 }
 0x2ce   :  { %v2202_v24 = vmul.f32 %v2186_v4, %v2186_v4  ;;  %v2092_v3 = vadd.f32 %v2076_v43, %v2042_v9  ;;  %v2094_v59 = vadd.f32 %v2078_v1, %v2044_v12  ;;  %v2128_v7 = vmul.f32 %v10080_v2, %v9386_v42 }
 0x2cf   :  { %8195 = vmatpush1.bf16.xpose.msra.mxu1 %v8194_v50  ;;  %v2204_v10 = vmul.f32 %v2188_v58, %v2188_v58  ;;  %v2169_v40 = vmax.f32 %v2153_v29, 0.0  ;;  %v2171_v35 = vmax.f32 %v2155_v26, 0.0  ;;  %v2041_v63 = vmul.f32 %v10065_v28, %v9329_v53 }
 0x2d0   :  { %v2218_v44 = vmul.f32 %v2202_v24, %v2186_v4  ;;  %v2142_v55 = vadd.f32 %v2126_v32, %v2092_v3  ;;  %v2144_v13 = vadd.f32 %v2128_v7, %v2094_v59  ;;  %v2043_v21 = vmul.f32 %v10065_v28, %v9355_v6 }
 0x2d1   :  { %v2220_v34 = vmul.f32 %v2204_v10, %v2188_v58  ;;  %v2185_v61 = vmax.f32 %v2169_v40, 1e-06  ;;  %v2187_v41 = vmax.f32 %v2171_v35, 1e-06  ;;  %v2075_v9 = vmul.f32 %v10071_v11, %v9344_v17 }
 0x2d2   :  { %v2158_v2 = vadd.f32 %v2142_v55, %v9400_v45  ;;  %v2160_v12 = vadd.f32 %v2144_v13, %v9398_v25  ;;  %v2077_v60 = vmul.f32 %v10071_v11, %v9379_v31  ;;  %v2125_v8 = vmul.f32 %v10077_v51, %v9362_v30 }
 0x2d3   :  { %v8196_v23 = vpack.c.bf16 %v2220_v34, %v2218_v44  ;;  %v2201_v36 = vmul.f32 %v2185_v61, %v2185_v61  ;;  %v2203_v4 = vmul.f32 %v2187_v41, %v2187_v41  ;;  %v2091_v28 = vadd.f32 %v2075_v9, %v2041_v63 }
 0x2d4   :  { %v2174_v43 = vmax.f32 %v2158_v2, 0.0  ;;  %v2176_v1 = vmax.f32 %v2160_v12, 0.0  ;;  %v2093_v32 = vadd.f32 %v2077_v60, %v2043_v21  ;;  %v2127_v50 = vmul.f32 %v10077_v51, %v9386_v42  ;;  %v12542_v60 = vld [vmem:[#allocation21_spill] sm:$0xff] }
 0x2d5   :  { %8197 = vmatprep.subr.bf16.mxu1 %v8196_v23  ;;  %v2217_v58 = vmul.f32 %v2201_v36, %v2185_v61  ;;  %v2219_v29 = vmul.f32 %v2203_v4, %v2187_v41  ;;  %v2141_v26 = vadd.f32 %v2125_v8, %v2091_v28  ;;  %v2999_v8 = vrot.slane %v12542_v60, 4  ;;  %v12543_v23 = vld [vmem:[#allocation6_spill] sm:$0xff] }
 0x2d6   :  { %v2190_v24 = vmax.f32 %v2174_v43, 1e-06  ;;  %v2192_v3 = vmax.f32 %v2176_v1, 1e-06  ;;  %v2143_v11 = vadd.f32 %v2127_v50, %v2093_v32  ;;  %v3015_v36 = vrot.slane %v12543_v23, 4 }
 0x2d7   :  { %v8198_v59 = vpack.c.bf16 %v2219_v29, %v2217_v58  ;;  %v2157_v7 = vadd.f32 %v2141_v26, %v9400_v45  ;;  %v3000_v4 = vadd.f32 %v2999_v8, %v12542_v60  ;;  %v2339_v50 = vstv %s2332_s3 }
 0x2d8   :  { %v2206_v10 = vmul.f32 %v2190_v24, %v2190_v24  ;;  %v2208_v40 = vmul.f32 %v2192_v3, %v2192_v3  ;;  %v2159_v35 = vadd.f32 %v2143_v11, %v9398_v25  ;;  %v3016_v43 = vadd.f32 %v3015_v36, %v12543_v23 }
 0x2d9   :  { %8199 = vmatpush1.bf16.xpose.msra.mxu1 %v8198_v59  ;;  %v2173_v63 = vmax.f32 %v2157_v7, 0.0  ;;  %v3001_v1 = vrot.slane %v3000_v4, 2 }
 0x2da   :  { %v2222_v44 = vmul.f32 %v2206_v10, %v2190_v24  ;;  %v2224_v55 = vmul.f32 %v2208_v40, %v2192_v3  ;;  %v2175_v13 = vmax.f32 %v2159_v35, 0.0  ;;  %v3017_v32 = vrot.slane %v3016_v43, 2  ;;  %v8836_v24 = vld [vmem:[%s12289_s0 + $0x30] sm:$0x77] }
 0x2db   :  { %v2189_v51 = vmax.f32 %v2173_v63, 1e-06  ;;  %v3002_v58 = vadd.f32 %v3001_v1, %v3000_v4  ;;  %v2340_v3 = vsub.f32 %v8836_v24, %v2339_v50  ;;  %v12544_v1 = vld [vmem:[#allocation16_spill] sm:$0xff]  ;;  %v12545_v50 = vld [vmem:[#allocation18_spill] sm:$0xff] }
 0x2dc   :  { %v8200_v21 = vpack.c.bf16 %v2224_v55, %v2222_v44  ;;  %v2191_v34 = vmax.f32 %v2175_v13, 1e-06  ;;  %v3018_v26 = vadd.f32 %v3017_v32, %v3016_v43 }
 0x2dd   :  { %v2205_v61 = vmul.f32 %v2189_v51, %v2189_v51  ;;  %v3003_v59 = vrot.slane %v3002_v58, 1 }
 0x2de   :  { %8201 = vmatprep.subr.bf16.mxu1 %v8200_v21  ;;  %v2207_v41 = vmul.f32 %v2191_v34, %v2191_v34  ;;  %v3019_v10 = vrot.slane %v3018_v26, 1 }
 0x2df   :  { %v2221_v9 = vmul.f32 %v2205_v61, %v2189_v51  ;;  %v3004_v35 = vadd.f32 %v3003_v59, %v3002_v58 }
 0x2e0   :  { %v2223_v2 = vmul.f32 %v2207_v41, %v2191_v34  ;;  %v3020_v34 = vadd.f32 %v3019_v10, %v3018_v26  ;;  %v12546_v26 = vld [vmem:[#allocation20_spill] sm:$0xff] }
 0x2e2   :  { %v8202_v12 = vpack.c.bf16 %v2223_v2, %v2221_v9 }
 0x2e4   :  { %8203 = vmatpush1.bf16.xpose.msra.mxu1 %v8202_v12 }
 0x2e5   :  { %s8533_s22 = spop %8532 }
 0x2e6   :  { %s2350_s23 = sadd.f32 0.0001, %s8533_s22  ;;  %s10197_s24 = spop %8534 }
 0x2e7   :  { %s2678_s25 = smul.f32 0.0013020834, %s10197_s24  ;;  %s8537_s27 = spop %8536 }
 0x2e8   :  { %v2351_v28 = vstv %s2350_s23 }
 0x2e9   :  { %8657 = vrcp.f32 %v2351_v28  ;;  %s2679_s26 = smul.f32 %s10197_s24, %s2678_s25 }
 0x2eb   :  { %s2680_s28 = ssub.f32 %s8537_s27, %s2679_s26  ;;  %2290 = vmatmul.mubr.f32.vlgmr.msra.gmra.mrb[4].mxu1 %v12507_v56 }
 0x2ec   :  { %2981 = vmatprep.mubr.f32.mxu1 %v12507_v56 }
 0x2ed   :  { %s2683_s29 = smul.f32 0.0013037809, %s2680_s28 }
 0x2ef   :  { %s2684_s30 = smax.f32 %s8849_s19, %s2683_s29 }
 0x2f0   :  { %v2687_v29 = vstv %s2684_s30 }
 0x2f1   :  { %8659 = vrsqrt.f32 %v2687_v29  ;;  %vm2690_vm15 = vcmp.eq.f32.partialorder %v2687_v29, inf  ;;  %vm2692_vm1 = vcmp.eq.f32.partialorder %v2687_v29, 0.0  ;;  %v2693_v23 = vand.u32 2147483648, %v2687_v29 }
 0x2f3   :  { %v8658_v11 = vpop.eup %8657 }
 0x2f4   :  { %v2353_v7 = vmul.f32 %v8658_v11, %v2340_v3 }
 0x2f6   :  { %v7769_v40 = vclamps-f32 %v2353_v7, 20.0 }
 0x2f8   :  { %v2360_v63 = vrot.slane %v7769_v40, %v9235_v33  ;;  %v2364_v44 = vrot.slane %v7769_v40, %v9238_v37  ;;  %v2394_v55 = vrot.slane %v7769_v40, %v9241_v38  ;;  %v2398_v13 = vrot.slane %v7769_v40, %v9244_v39 }
 0x2f9   :  { %v2444_v51 = vrot.slane %v7769_v40, %v9247_v57  ;;  %v2448_v21 = vrot.slane %v7769_v40, %v9250_v0 }
 0x2fa   :  { %v10220_v61 = vrot.slane %v2360_v63, %v9235_v33  ;;  %v10223_v41 = vrot.slane %v2364_v44, %v9235_v33  ;;  %v10226_v9 = vrot.slane %v2394_v55, %v9241_v38  ;;  %v10229_v2 = vrot.slane %v2398_v13, %v9241_v38 }
 0x2fb   :  { %v8660_v12 = vpop.eup %8659  ;;  %v10232_v60 = vrot.slane %v2444_v51, %v9247_v57  ;;  %v10235_v8 = vrot.slane %v2448_v21, %v9247_v57 }
 0x2fc   :  { %v2689_v36 = vmul.f32 %v8660_v12, %v2687_v29  ;;  %v2376_v4 = vmul.f32 %v10223_v41, %v9229_v27  ;;  %v2378_v28 = vmul.f32 %v10223_v41, %v9159_v16  ;;  %v2410_v43 = vmul.f32 %v10229_v2, %v9164_v22 }
 0x2fd   :  { %v2412_v32 = vmul.f32 %v10229_v2, %v12544_v1  ;;  %v2460_v58 = vmul.f32 %v10235_v8, %v12545_v50  ;;  %v2462_v24 = vmul.f32 %v10235_v8, %v12546_v26  ;;  %v2375_v3 = vmul.f32 %v10220_v61, %v9229_v27 }
 0x2fe   :  { %v2691_v11 = vsel %vm2690_vm15, %v2687_v29, %v2689_v36  ;;  %v2426_v59 = vadd.f32 %v2410_v43, %v2376_v4  ;;  %v2377_v7 = vmul.f32 %v10220_v61, %v9159_v16  ;;  %v2409_v10 = vmul.f32 %v10226_v9, %v9164_v22 }
 0x2ff   :  { %v2694_v40 = vsel %vm2692_vm1, %v2693_v23, %v2691_v11  ;;  %v2428_v63 = vadd.f32 %v2412_v32, %v2378_v28  ;;  %v2411_v44 = vmul.f32 %v10226_v9, %v12544_v1  ;;  %v2459_v55 = vmul.f32 %v10232_v60, %v12545_v50  ;;  %v12547_v23 = vld [vmem:[#allocation37_spill] sm:$0xff]  ;;  %v12548_v28 = vld [vmem:[#allocation27_spill] sm:$0xff]  ;;  %v12549_v32 = vld [vmem:[#allocation22_spill] sm:$0xff] }
 0x300   :  { %8538 = vpush %v2694_v40  ;;  %v2476_v13 = vadd.f32 %v2460_v58, %v2426_v59  ;;  %v2425_v51 = vadd.f32 %v2409_v10, %v2375_v3  ;;  %v2461_v29 = vmul.f32 %v10232_v60, %v12546_v26  ;;  %v2380_v21 = vmul.f32 %v10223_v41, %v9188_v48  ;;  %v12550_v3 = vld [vmem:[#allocation33_spill] sm:$0xff]  ;;  %v12551_v40 = vld [vmem:[#allocation24_spill] sm:$0xff] }
 0x301   :  { %8540 = vpush %v3004_v35  ;;  %v2478_v12 = vadd.f32 %v2462_v24, %v2428_v63  ;;  %v2427_v36 = vadd.f32 %v2411_v44, %v2377_v7  ;;  %v2382_v4 = vmul.f32 %v10223_v41, %v12547_v23  ;;  %v2414_v43 = vmul.f32 %v10229_v2, %v12548_v28 }
 0x302   :  { %8542 = vpush %v3020_v34  ;;  %v2492_v11 = vadd.f32 %v2476_v13, %v12549_v32  ;;  %v2475_v58 = vadd.f32 %v2459_v55, %v2425_v51  ;;  %v2416_v59 = vmul.f32 %v10229_v2, %v12550_v3  ;;  %v2464_v10 = vmul.f32 %v10235_v8, %v9196_v52 }
 0x303   :  { %v2494_v35 = vadd.f32 %v2478_v12, %v12551_v40  ;;  %v2477_v24 = vadd.f32 %v2461_v29, %v2427_v36  ;;  %v2430_v7 = vadd.f32 %v2414_v43, %v2380_v21  ;;  %v2466_v63 = vmul.f32 %v10235_v8, %v9200_v54 }
 0x304   :  { %v2508_v44 = vmax.f32 %v2492_v11, 0.0  ;;  %v2491_v26 = vadd.f32 %v2475_v58, %v12549_v32  ;;  %v2432_v34 = vadd.f32 %v2416_v59, %v2382_v4  ;;  %v2379_v55 = vmul.f32 %v10220_v61, %v9188_v48 }
 0x305   :  { %v2510_v13 = vmax.f32 %v2494_v35, 0.0  ;;  %v2493_v51 = vadd.f32 %v2477_v24, %v12551_v40  ;;  %v2480_v50 = vadd.f32 %v2464_v10, %v2430_v7  ;;  %v2381_v1 = vmul.f32 %v10220_v61, %v12547_v23 }
 0x306   :  { %v2524_v12 = vmax.f32 %v2508_v44, 1e-06  ;;  %v2507_v29 = vmax.f32 %v2491_v26, 0.0  ;;  %v2482_v21 = vadd.f32 %v2466_v63, %v2432_v34  ;;  %v2413_v36 = vmul.f32 %v10226_v9, %v12548_v28 }
 0x307   :  { %v2526_v43 = vmax.f32 %v2510_v13, 1e-06  ;;  %v2509_v11 = vmax.f32 %v2493_v51, 0.0  ;;  %v2496_v4 = vadd.f32 %v2480_v50, %v9286_v14  ;;  %v2415_v58 = vmul.f32 %v10226_v9, %v12550_v3 }
 0x308   :  { %v2540_v59 = vmul.f32 %v2524_v12, %v2524_v12  ;;  %v2523_v35 = vmax.f32 %v2507_v29, 1e-06  ;;  %v2498_v10 = vadd.f32 %v2482_v21, %v9204_v47  ;;  %v2429_v24 = vadd.f32 %v2413_v36, %v2379_v55 }
 0x309   :  { %v2542_v7 = vmul.f32 %v2526_v43, %v2526_v43  ;;  %v2525_v40 = vmax.f32 %v2509_v11, 1e-06  ;;  %v2512_v44 = vmax.f32 %v2496_v4, 0.0  ;;  %v2431_v26 = vadd.f32 %v2415_v58, %v2381_v1 }
 0x30a   :  { %v2556_v63 = vmul.f32 %v2540_v59, %v2524_v12  ;;  %v2539_v34 = vmul.f32 %v2523_v35, %v2523_v35  ;;  %v2514_v32 = vmax.f32 %v2498_v10, 0.0  ;;  %v2463_v13 = vmul.f32 %v10232_v60, %v9196_v52 }
 0x30b   :  { %v2558_v51 = vmul.f32 %v2542_v7, %v2526_v43  ;;  %v2541_v50 = vmul.f32 %v2525_v40, %v2525_v40  ;;  %v2528_v28 = vmax.f32 %v2512_v44, 1e-06  ;;  %v2465_v3 = vmul.f32 %v10232_v60, %v9200_v54 }
 0x30c   :  { %v2555_v29 = vmul.f32 %v2539_v34, %v2523_v35  ;;  %v2530_v23 = vmax.f32 %v2514_v32, 1e-06  ;;  %v2479_v21 = vadd.f32 %v2463_v13, %v2429_v24  ;;  %v2384_v55 = vmul.f32 %v10223_v41, %v9213_v62 }
 0x30d   :  { %v8204_v36 = vpack.c.bf16 %v2558_v51, %v2556_v63  ;;  %v2557_v1 = vmul.f32 %v2541_v50, %v2525_v40  ;;  %v2544_v12 = vmul.f32 %v2528_v28, %v2528_v28  ;;  %v2481_v11 = vadd.f32 %v2465_v3, %v2431_v26 }
 0x30e   :  { %v2546_v4 = vmul.f32 %v2530_v23, %v2530_v23  ;;  %v2495_v58 = vadd.f32 %v2479_v21, %v9286_v14  ;;  %v2386_v43 = vmul.f32 %v10223_v41, %v9321_v18  ;;  %v2418_v59 = vmul.f32 %v10229_v2, %v9222_v20 }
 0x30f   :  { %8205 = vmatprep.subr.bf16.mxu0 %v8204_v36  ;;  %v8206_v35 = vpack.c.bf16 %v2557_v1, %v2555_v29  ;;  %v2560_v32 = vmul.f32 %v2544_v12, %v2528_v28  ;;  %v2497_v10 = vadd.f32 %v2481_v11, %v9204_v47  ;;  %v2420_v24 = vmul.f32 %v10229_v2, %v12502_v15 }
 0x310   :  { %v2562_v40 = vmul.f32 %v2546_v4, %v2530_v23  ;;  %v2511_v7 = vmax.f32 %v2495_v58, 0.0  ;;  %v2434_v3 = vadd.f32 %v2418_v59, %v2384_v55  ;;  %v2468_v44 = vmul.f32 %v10235_v8, %v12503_v5 }
 0x311   :  { %8207 = vmatpush1.bf16.xpose.msra.mxu0 %v8206_v35  ;;  %v2513_v26 = vmax.f32 %v2497_v10, 0.0  ;;  %v2436_v63 = vadd.f32 %v2420_v24, %v2386_v43  ;;  %v2470_v34 = vmul.f32 %v10235_v8, %v12512_v19  ;;  %v2383_v28 = vmul.f32 %v10220_v61, %v9213_v62 }
 0x312   :  { %v8208_v13 = vpack.c.bf16 %v2562_v40, %v2560_v32  ;;  %v2527_v51 = vmax.f32 %v2511_v7, 1e-06  ;;  %v2484_v50 = vadd.f32 %v2468_v44, %v2434_v3  ;;  %v2385_v23 = vmul.f32 %v10220_v61, %v9321_v18 }
 0x313   :  { %v2529_v29 = vmax.f32 %v2513_v26, 1e-06  ;;  %v2486_v21 = vadd.f32 %v2470_v34, %v2436_v63  ;;  %v2417_v55 = vmul.f32 %v10226_v9, %v9222_v20  ;;  %v2419_v36 = vmul.f32 %v10226_v9, %v12502_v15 }
 0x314   :  { %8209 = vmatprep.subr.bf16.mxu0 %v8208_v13  ;;  %v2543_v1 = vmul.f32 %v2527_v51, %v2527_v51  ;;  %v2500_v12 = vadd.f32 %v2484_v50, %v9340_v49  ;;  %v2467_v11 = vmul.f32 %v10232_v60, %v12503_v5  ;;  %v2469_v4 = vmul.f32 %v10232_v60, %v12512_v19 }
 0x315   :  { %v2545_v58 = vmul.f32 %v2529_v29, %v2529_v29  ;;  %v2502_v43 = vadd.f32 %v2486_v21, %v9301_v46  ;;  %v2433_v59 = vadd.f32 %v2417_v55, %v2383_v28  ;;  %v2435_v35 = vadd.f32 %v2419_v36, %v2385_v23 }
 0x316   :  { %v2559_v32 = vmul.f32 %v2543_v1, %v2527_v51  ;;  %v2516_v10 = vmax.f32 %v2500_v12, 0.0  ;;  %v2388_v24 = vmul.f32 %v10223_v41, %v9329_v53  ;;  %v2390_v40 = vmul.f32 %v10223_v41, %v9355_v6 }
 0x317   :  { %v2561_v7 = vmul.f32 %v2545_v58, %v2529_v29  ;;  %v2518_v3 = vmax.f32 %v2502_v43, 0.0  ;;  %v2483_v44 = vadd.f32 %v2467_v11, %v2433_v59  ;;  %v2485_v26 = vadd.f32 %v2469_v4, %v2435_v35 }
 0x318   :  { %v2532_v63 = vmax.f32 %v2516_v10, 1e-06  ;;  %v2422_v34 = vmul.f32 %v10229_v2, %v9344_v17  ;;  %v2424_v28 = vmul.f32 %v10229_v2, %v9379_v31  ;;  %v2472_v13 = vmul.f32 %v10235_v8, %v9362_v30 }
 0x319   :  { %v8210_v51 = vpack.c.bf16 %v2561_v7, %v2559_v32  ;;  %v2534_v50 = vmax.f32 %v2518_v3, 1e-06  ;;  %v2499_v23 = vadd.f32 %v2483_v44, %v9340_v49  ;;  %v2501_v41 = vadd.f32 %v2485_v26, %v9301_v46 }
 0x31a   :  { %v2548_v29 = vmul.f32 %v2532_v63, %v2532_v63  ;;  %v2438_v21 = vadd.f32 %v2422_v34, %v2388_v24  ;;  %v2440_v55 = vadd.f32 %v2424_v28, %v2390_v40  ;;  %v2474_v36 = vmul.f32 %v10235_v8, %v9386_v42 }
 0x31b   :  { %8211 = vmatpush1.bf16.xpose.msra.mxu0 %v8210_v51  ;;  %v2550_v1 = vmul.f32 %v2534_v50, %v2534_v50  ;;  %v2515_v12 = vmax.f32 %v2499_v23, 0.0  ;;  %v2517_v11 = vmax.f32 %v2501_v41, 0.0  ;;  %v2387_v2 = vmul.f32 %v10220_v61, %v9329_v53 }
 0x31c   :  { %v2564_v4 = vmul.f32 %v2548_v29, %v2532_v63  ;;  %v2488_v58 = vadd.f32 %v2472_v13, %v2438_v21  ;;  %v2490_v43 = vadd.f32 %v2474_v36, %v2440_v55  ;;  %v2389_v59 = vmul.f32 %v10220_v61, %v9355_v6 }
 0x31d   :  { %v2566_v35 = vmul.f32 %v2550_v1, %v2534_v50  ;;  %v2531_v32 = vmax.f32 %v2515_v12, 1e-06  ;;  %v2533_v10 = vmax.f32 %v2517_v11, 1e-06  ;;  %v2421_v24 = vmul.f32 %v10226_v9, %v9344_v17 }
 0x31e   :  { %v2504_v8 = vadd.f32 %v2488_v58, %v9400_v45  ;;  %v2506_v40 = vadd.f32 %v2490_v43, %v9398_v25  ;;  %v2423_v7 = vmul.f32 %v10226_v9, %v9379_v31  ;;  %v2471_v3 = vmul.f32 %v10232_v60, %v9362_v30 }
 0x31f   :  { %v8212_v44 = vpack.c.bf16 %v2566_v35, %v2564_v4  ;;  %v2547_v26 = vmul.f32 %v2531_v32, %v2531_v32  ;;  %v2549_v63 = vmul.f32 %v2533_v10, %v2533_v10  ;;  %v2437_v61 = vadd.f32 %v2421_v24, %v2387_v2 }
 0x320   :  { %v2520_v34 = vmax.f32 %v2504_v8, 0.0  ;;  %v2522_v28 = vmax.f32 %v2506_v40, 0.0  ;;  %v2439_v13 = vadd.f32 %v2423_v7, %v2389_v59  ;;  %v2473_v51 = vmul.f32 %v10232_v60, %v9386_v42  ;;  %v12552_v7 = vld [vmem:[#allocation23_spill] sm:$0xff] }
 0x321   :  { %8213 = vmatprep.subr.bf16.mxu0 %v8212_v44  ;;  %v2563_v50 = vmul.f32 %v2547_v26, %v2531_v32  ;;  %v2565_v23 = vmul.f32 %v2549_v63, %v2533_v10  ;;  %v2487_v41 = vadd.f32 %v2471_v3, %v2437_v61  ;;  %v3345_v3 = vrot.slane %v12552_v7, 4  ;;  %v12553_v44 = vld [vmem:[#allocation7_spill] sm:$0xff] }
 0x322   :  { %v2536_v29 = vmax.f32 %v2520_v34, 1e-06  ;;  %v2538_v21 = vmax.f32 %v2522_v28, 1e-06  ;;  %v2489_v9 = vadd.f32 %v2473_v51, %v2439_v13  ;;  %v3361_v26 = vrot.slane %v12553_v44, 4 }
 0x323   :  { %v8214_v55 = vpack.c.bf16 %v2565_v23, %v2563_v50  ;;  %v2503_v36 = vadd.f32 %v2487_v41, %v9400_v45  ;;  %v3346_v63 = vadd.f32 %v3345_v3, %v12552_v7  ;;  %v2685_v51 = vstv %s2678_s25 }
 0x324   :  { %v2552_v1 = vmul.f32 %v2536_v29, %v2536_v29  ;;  %v2554_v12 = vmul.f32 %v2538_v21, %v2538_v21  ;;  %v2505_v11 = vadd.f32 %v2489_v9, %v9398_v25  ;;  %v3362_v34 = vadd.f32 %v3361_v26, %v12553_v44 }
 0x325   :  { %8215 = vmatpush1.bf16.xpose.msra.mxu0 %v8214_v55  ;;  %v2519_v2 = vmax.f32 %v2503_v36, 0.0  ;;  %v3347_v28 = vrot.slane %v3346_v63, 2 }
 0x326   :  { %v2568_v4 = vmul.f32 %v2552_v1, %v2536_v29  ;;  %v2570_v58 = vmul.f32 %v2554_v12, %v2538_v21  ;;  %v2521_v43 = vmax.f32 %v2505_v11, 0.0  ;;  %v3363_v13 = vrot.slane %v3362_v34, 2  ;;  %v8837_v29 = vld [vmem:[%s12289_s0 + $0x38] sm:$0x77] }
 0x327   :  { %v2535_v60 = vmax.f32 %v2519_v2, 1e-06  ;;  %v3348_v50 = vadd.f32 %v3347_v28, %v3346_v63  ;;  %v2686_v21 = vsub.f32 %v8837_v29, %v2685_v51  ;;  %v12554_v28 = vld [vmem:[#allocation16_spill] sm:$0xff]  ;;  %v12555_v51 = vld [vmem:[#allocation18_spill] sm:$0xff] }
 0x328   :  { %v8216_v59 = vpack.c.bf16 %v2570_v58, %v2568_v4  ;;  %v2537_v35 = vmax.f32 %v2521_v43, 1e-06  ;;  %v3364_v41 = vadd.f32 %v3363_v13, %v3362_v34 }
 0x329   :  { %v2551_v32 = vmul.f32 %v2535_v60, %v2535_v60  ;;  %v3349_v55 = vrot.slane %v3348_v50, 1 }
 0x32a   :  { %8217 = vmatprep.subr.bf16.mxu0 %v8216_v59  ;;  %v2553_v10 = vmul.f32 %v2537_v35, %v2537_v35  ;;  %v3365_v1 = vrot.slane %v3364_v41, 1 }
 0x32b   :  { %v2567_v24 = vmul.f32 %v2551_v32, %v2535_v60  ;;  %v3350_v11 = vadd.f32 %v3349_v55, %v3348_v50 }
 0x32c   :  { %v2569_v8 = vmul.f32 %v2553_v10, %v2537_v35  ;;  %v3366_v35 = vadd.f32 %v3365_v1, %v3364_v41  ;;  %v12556_v41 = vld [vmem:[#allocation20_spill] sm:$0xff] }
 0x32e   :  { %v8218_v40 = vpack.c.bf16 %v2569_v8, %v2567_v24 }
 0x330   :  { %8219 = vmatpush1.bf16.xpose.msra.mxu0 %v8218_v40 }
 0x331   :  { %s8539_s2 = spop %8538 }
 0x332   :  { %s2696_s13 = sadd.f32 0.0001, %s8539_s2  ;;  %s10352_s3 = spop %8540 }
 0x333   :  { %s3024_s14 = smul.f32 0.0013020834, %s10352_s3  ;;  %s8543_s16 = spop %8542 }
 0x334   :  { %v2697_v61 = vstv %s2696_s13 }
 0x335   :  { %8661 = vrcp.f32 %v2697_v61  ;;  %s3025_s15 = smul.f32 %s10352_s3, %s3024_s14 }
 0x337   :  { %s3026_s17 = ssub.f32 %s8543_s16, %s3025_s15  ;;  %2636 = vmatmul.mubr.f32.vlgmr.msra.gmra.mrb[6].mxu0 %v12507_v56 }
 0x338   :  { %3327 = vmatprep.mubr.f32.mxu0 %v12507_v56 }
 0x339   :  { %s3029_s18 = smul.f32 0.0013037809, %s3026_s17 }
 0x33b   :  { %s3030_s20 = smax.f32 %s8849_s19, %s3029_s18 }
 0x33c   :  { %v3033_v23 = vstv %s3030_s20 }
 0x33d   :  { %8663 = vrsqrt.f32 %v3033_v23  ;;  %vm3036_vm2 = vcmp.eq.f32.partialorder %v3033_v23, inf  ;;  %vm3038_vm3 = vcmp.eq.f32.partialorder %v3033_v23, 0.0  ;;  %v3039_v44 = vand.u32 2147483648, %v3033_v23 }
 0x33f   :  { %v8662_v9 = vpop.eup %8661 }
 0x340   :  { %v2699_v36 = vmul.f32 %v8662_v9, %v2686_v21 }
 0x342   :  { %v7771_v12 = vclamps-f32 %v2699_v36, 20.0 }
 0x344   :  { %v2706_v2 = vrot.slane %v7771_v12, %v9235_v33  ;;  %v2710_v4 = vrot.slane %v7771_v12, %v9238_v37  ;;  %v2740_v58 = vrot.slane %v7771_v12, %v9241_v38  ;;  %v2744_v43 = vrot.slane %v7771_v12, %v9244_v39 }
 0x345   :  { %v2790_v60 = vrot.slane %v7771_v12, %v9247_v57  ;;  %v2794_v59 = vrot.slane %v7771_v12, %v9250_v0 }
 0x346   :  { %v10375_v32 = vrot.slane %v2706_v2, %v9235_v33  ;;  %v10378_v10 = vrot.slane %v2710_v4, %v9235_v33  ;;  %v10381_v24 = vrot.slane %v2740_v58, %v9241_v38  ;;  %v10384_v8 = vrot.slane %v2744_v43, %v9241_v38 }
 0x347   :  { %v8664_v40 = vpop.eup %8663  ;;  %v10387_v7 = vrot.slane %v2790_v60, %v9247_v57  ;;  %v10390_v3 = vrot.slane %v2794_v59, %v9247_v57 }
 0x348   :  { %v3035_v26 = vmul.f32 %v8664_v40, %v3033_v23  ;;  %v2722_v63 = vmul.f32 %v10378_v10, %v9229_v27  ;;  %v2724_v61 = vmul.f32 %v10378_v10, %v9159_v16  ;;  %v2756_v34 = vmul.f32 %v10384_v8, %v9164_v22 }
 0x349   :  { %v2758_v13 = vmul.f32 %v10384_v8, %v12554_v28  ;;  %v2806_v50 = vmul.f32 %v10390_v3, %v12555_v51  ;;  %v2808_v29 = vmul.f32 %v10390_v3, %v12556_v41  ;;  %v2721_v21 = vmul.f32 %v10375_v32, %v9229_v27 }
 0x34a   :  { %v3037_v9 = vsel %vm3036_vm2, %v3033_v23, %v3035_v26  ;;  %v2772_v55 = vadd.f32 %v2756_v34, %v2722_v63  ;;  %v2723_v36 = vmul.f32 %v10375_v32, %v9159_v16  ;;  %v2755_v1 = vmul.f32 %v10381_v24, %v9164_v22 }
 0x34b   :  { %v3040_v12 = vsel %vm3038_vm3, %v3039_v44, %v3037_v9  ;;  %v2774_v2 = vadd.f32 %v2758_v13, %v2724_v61  ;;  %v2757_v4 = vmul.f32 %v10381_v24, %v12554_v28  ;;  %v2805_v58 = vmul.f32 %v10387_v7, %v12555_v51  ;;  %v12557_v44 = vld [vmem:[#allocation37_spill] sm:$0xff]  ;;  %v12558_v61 = vld [vmem:[#allocation27_spill] sm:$0xff]  ;;  %v12559_v13 = vld [vmem:[#allocation22_spill] sm:$0xff] }
 0x34c   :  { %8544 = vpush %v3040_v12  ;;  %v2822_v43 = vadd.f32 %v2806_v50, %v2772_v55  ;;  %v2771_v60 = vadd.f32 %v2755_v1, %v2721_v21  ;;  %v2807_v23 = vmul.f32 %v10387_v7, %v12556_v41  ;;  %v2726_v59 = vmul.f32 %v10378_v10, %v9188_v48  ;;  %v12560_v21 = vld [vmem:[#allocation33_spill] sm:$0xff]  ;;  %v12561_v12 = vld [vmem:[#allocation24_spill] sm:$0xff] }
 0x34d   :  { %8546 = vpush %v3350_v11  ;;  %v2824_v40 = vadd.f32 %v2808_v29, %v2774_v2  ;;  %v2773_v26 = vadd.f32 %v2757_v4, %v2723_v36  ;;  %v2728_v63 = vmul.f32 %v10378_v10, %v12557_v44  ;;  %v2760_v34 = vmul.f32 %v10384_v8, %v12558_v61 }
 0x34e   :  { %8548 = vpush %v3366_v35  ;;  %v2838_v9 = vadd.f32 %v2822_v43, %v12559_v13  ;;  %v2821_v50 = vadd.f32 %v2805_v58, %v2771_v60  ;;  %v2762_v55 = vmul.f32 %v10384_v8, %v12560_v21  ;;  %v2810_v1 = vmul.f32 %v10390_v3, %v9196_v52 }
 0x34f   :  { %v2840_v11 = vadd.f32 %v2824_v40, %v12561_v12  ;;  %v2823_v29 = vadd.f32 %v2807_v23, %v2773_v26  ;;  %v2776_v36 = vadd.f32 %v2760_v34, %v2726_v59  ;;  %v2812_v2 = vmul.f32 %v10390_v3, %v9200_v54 }
 0x350   :  { %v2854_v4 = vmax.f32 %v2838_v9, 0.0  ;;  %v2837_v41 = vadd.f32 %v2821_v50, %v12559_v13  ;;  %v2778_v35 = vadd.f32 %v2762_v55, %v2728_v63  ;;  %v2725_v58 = vmul.f32 %v10375_v32, %v9188_v48 }
 0x351   :  { %v2856_v43 = vmax.f32 %v2840_v11, 0.0  ;;  %v2839_v60 = vadd.f32 %v2823_v29, %v12561_v12  ;;  %v2826_v51 = vadd.f32 %v2810_v1, %v2776_v36  ;;  %v2727_v28 = vmul.f32 %v10375_v32, %v12557_v44 }
 0x352   :  { %v2870_v40 = vmax.f32 %v2854_v4, 1e-06  ;;  %v2853_v23 = vmax.f32 %v2837_v41, 0.0  ;;  %v2828_v59 = vadd.f32 %v2812_v2, %v2778_v35  ;;  %v2759_v26 = vmul.f32 %v10381_v24, %v12558_v61 }
 0x353   :  { %v2872_v34 = vmax.f32 %v2856_v43, 1e-06  ;;  %v2855_v9 = vmax.f32 %v2839_v60, 0.0  ;;  %v2842_v63 = vadd.f32 %v2826_v51, %v9286_v14  ;;  %v2761_v50 = vmul.f32 %v10381_v24, %v12560_v21 }
 0x354   :  { %v2886_v55 = vmul.f32 %v2870_v40, %v2870_v40  ;;  %v2869_v11 = vmax.f32 %v2853_v23, 1e-06  ;;  %v2844_v1 = vadd.f32 %v2828_v59, %v9204_v47  ;;  %v2775_v29 = vadd.f32 %v2759_v26, %v2725_v58 }
 0x355   :  { %v2888_v36 = vmul.f32 %v2872_v34, %v2872_v34  ;;  %v2871_v12 = vmax.f32 %v2855_v9, 1e-06  ;;  %v2858_v4 = vmax.f32 %v2842_v63, 0.0  ;;  %v2777_v41 = vadd.f32 %v2761_v50, %v2727_v28 }
 0x356   :  { %v2902_v2 = vmul.f32 %v2886_v55, %v2870_v40  ;;  %v2885_v35 = vmul.f32 %v2869_v11, %v2869_v11  ;;  %v2860_v13 = vmax.f32 %v2844_v1, 0.0  ;;  %v2809_v43 = vmul.f32 %v10387_v7, %v9196_v52 }
 0x357   :  { %v2904_v60 = vmul.f32 %v2888_v36, %v2872_v34  ;;  %v2887_v51 = vmul.f32 %v2871_v12, %v2871_v12  ;;  %v2874_v61 = vmax.f32 %v2858_v4, 1e-06  ;;  %v2811_v21 = vmul.f32 %v10387_v7, %v9200_v54 }
 0x358   :  { %v2901_v23 = vmul.f32 %v2885_v35, %v2869_v11  ;;  %v2876_v44 = vmax.f32 %v2860_v13, 1e-06  ;;  %v2825_v59 = vadd.f32 %v2809_v43, %v2775_v29  ;;  %v2730_v58 = vmul.f32 %v10378_v10, %v9213_v62 }
 0x359   :  { %v8220_v26 = vpack.c.bf16 %v2904_v60, %v2902_v2  ;;  %v2903_v28 = vmul.f32 %v2887_v51, %v2871_v12  ;;  %v2890_v40 = vmul.f32 %v2874_v61, %v2874_v61  ;;  %v2827_v9 = vadd.f32 %v2811_v21, %v2777_v41 }
 0x35a   :  { %v2892_v63 = vmul.f32 %v2876_v44, %v2876_v44  ;;  %v2841_v50 = vadd.f32 %v2825_v59, %v9286_v14  ;;  %v2732_v34 = vmul.f32 %v10378_v10, %v9321_v18  ;;  %v2764_v55 = vmul.f32 %v10384_v8, %v9222_v20 }
 0x35b   :  { %8221 = vmatprep.subr.bf16.mxu1 %v8220_v26  ;;  %v8222_v11 = vpack.c.bf16 %v2903_v28, %v2901_v23  ;;  %v2906_v13 = vmul.f32 %v2890_v40, %v2874_v61  ;;  %v2843_v1 = vadd.f32 %v2827_v9, %v9204_v47  ;;  %v2766_v29 = vmul.f32 %v10384_v8, %v12502_v15 }
 0x35c   :  { %v2908_v12 = vmul.f32 %v2892_v63, %v2876_v44  ;;  %v2857_v36 = vmax.f32 %v2841_v50, 0.0  ;;  %v2780_v21 = vadd.f32 %v2764_v55, %v2730_v58  ;;  %v2814_v4 = vmul.f32 %v10390_v3, %v12503_v5 }
 0x35d   :  { %8223 = vmatpush1.bf16.xpose.msra.mxu1 %v8222_v11  ;;  %v2859_v41 = vmax.f32 %v2843_v1, 0.0  ;;  %v2782_v2 = vadd.f32 %v2766_v29, %v2732_v34  ;;  %v2816_v35 = vmul.f32 %v10390_v3, %v12512_v19  ;;  %v2729_v61 = vmul.f32 %v10375_v32, %v9213_v62 }
 0x35e   :  { %v8224_v43 = vpack.c.bf16 %v2908_v12, %v2906_v13  ;;  %v2873_v60 = vmax.f32 %v2857_v36, 1e-06  ;;  %v2830_v51 = vadd.f32 %v2814_v4, %v2780_v21  ;;  %v2731_v44 = vmul.f32 %v10375_v32, %v9321_v18 }
 0x35f   :  { %v2875_v23 = vmax.f32 %v2859_v41, 1e-06  ;;  %v2832_v59 = vadd.f32 %v2816_v35, %v2782_v2  ;;  %v2763_v58 = vmul.f32 %v10381_v24, %v9222_v20  ;;  %v2765_v26 = vmul.f32 %v10381_v24, %v12502_v15 }
 0x360   :  { %8225 = vmatprep.subr.bf16.mxu1 %v8224_v43  ;;  %v2889_v28 = vmul.f32 %v2873_v60, %v2873_v60  ;;  %v2846_v40 = vadd.f32 %v2830_v51, %v9340_v49  ;;  %v2813_v9 = vmul.f32 %v10387_v7, %v12503_v5  ;;  %v2815_v63 = vmul.f32 %v10387_v7, %v12512_v19 }
 0x361   :  { %v2891_v50 = vmul.f32 %v2875_v23, %v2875_v23  ;;  %v2848_v34 = vadd.f32 %v2832_v59, %v9301_v46  ;;  %v2779_v55 = vadd.f32 %v2763_v58, %v2729_v61  ;;  %v2781_v11 = vadd.f32 %v2765_v26, %v2731_v44 }
 0x362   :  { %v2905_v13 = vmul.f32 %v2889_v28, %v2873_v60  ;;  %v2862_v1 = vmax.f32 %v2846_v40, 0.0  ;;  %v2734_v29 = vmul.f32 %v10378_v10, %v9329_v53  ;;  %v2736_v12 = vmul.f32 %v10378_v10, %v9355_v6 }
 0x363   :  { %v2907_v36 = vmul.f32 %v2891_v50, %v2875_v23  ;;  %v2864_v21 = vmax.f32 %v2848_v34, 0.0  ;;  %v2829_v4 = vadd.f32 %v2813_v9, %v2779_v55  ;;  %v2831_v41 = vadd.f32 %v2815_v63, %v2781_v11 }
 0x364   :  { %v2878_v2 = vmax.f32 %v2862_v1, 1e-06  ;;  %v2768_v35 = vmul.f32 %v10384_v8, %v9344_v17  ;;  %v2770_v61 = vmul.f32 %v10384_v8, %v9379_v31  ;;  %v2818_v43 = vmul.f32 %v10390_v3, %v9362_v30 }
 0x365   :  { %v8226_v60 = vpack.c.bf16 %v2907_v36, %v2905_v13  ;;  %v2880_v51 = vmax.f32 %v2864_v21, 1e-06  ;;  %v2845_v44 = vadd.f32 %v2829_v4, %v9340_v49  ;;  %v2847_v10 = vadd.f32 %v2831_v41, %v9301_v46 }
 0x366   :  { %v2894_v23 = vmul.f32 %v2878_v2, %v2878_v2  ;;  %v2784_v59 = vadd.f32 %v2768_v35, %v2734_v29  ;;  %v2786_v58 = vadd.f32 %v2770_v61, %v2736_v12  ;;  %v2820_v26 = vmul.f32 %v10390_v3, %v9386_v42 }
 0x367   :  { %8227 = vmatpush1.bf16.xpose.msra.mxu1 %v8226_v60  ;;  %v2896_v28 = vmul.f32 %v2880_v51, %v2880_v51  ;;  %v2861_v40 = vmax.f32 %v2845_v44, 0.0  ;;  %v2863_v9 = vmax.f32 %v2847_v10, 0.0  ;;  %v2733_v8 = vmul.f32 %v10375_v32, %v9329_v53 }
 0x368   :  { %v2910_v63 = vmul.f32 %v2894_v23, %v2878_v2  ;;  %v2834_v50 = vadd.f32 %v2818_v43, %v2784_v59  ;;  %v2836_v34 = vadd.f32 %v2820_v26, %v2786_v58  ;;  %v2735_v55 = vmul.f32 %v10375_v32, %v9355_v6 }
 0x369   :  { %v2912_v11 = vmul.f32 %v2896_v28, %v2880_v51  ;;  %v2877_v13 = vmax.f32 %v2861_v40, 1e-06  ;;  %v2879_v1 = vmax.f32 %v2863_v9, 1e-06  ;;  %v2767_v29 = vmul.f32 %v10381_v24, %v9344_v17 }
 0x36a   :  { %v2850_v3 = vadd.f32 %v2834_v50, %v9400_v45  ;;  %v2852_v12 = vadd.f32 %v2836_v34, %v9398_v25  ;;  %v2769_v36 = vmul.f32 %v10381_v24, %v9379_v31  ;;  %v2817_v21 = vmul.f32 %v10387_v7, %v9362_v30 }
 0x36b   :  { %v8228_v4 = vpack.c.bf16 %v2912_v11, %v2910_v63  ;;  %v2893_v41 = vmul.f32 %v2877_v13, %v2877_v13  ;;  %v2895_v2 = vmul.f32 %v2879_v1, %v2879_v1  ;;  %v2783_v32 = vadd.f32 %v2767_v29, %v2733_v8 }
 0x36c   :  { %v2866_v35 = vmax.f32 %v2850_v3, 0.0  ;;  %v2868_v61 = vmax.f32 %v2852_v12, 0.0  ;;  %v2785_v43 = vadd.f32 %v2769_v36, %v2735_v55  ;;  %v2819_v60 = vmul.f32 %v10387_v7, %v9386_v42  ;;  %v12562_v36 = vld [vmem:[#allocation25_spill] sm:$0xff] }
 0x36d   :  { %8229 = vmatprep.subr.bf16.mxu1 %v8228_v4  ;;  %v2909_v51 = vmul.f32 %v2893_v41, %v2877_v13  ;;  %v2911_v44 = vmul.f32 %v2895_v2, %v2879_v1  ;;  %v2833_v10 = vadd.f32 %v2817_v21, %v2783_v32  ;;  %v3691_v21 = vrot.slane %v12562_v36, 4  ;;  %v12563_v4 = vld [vmem:[#allocation8_spill] sm:$0xff] }
 0x36e   :  { %v2882_v23 = vmax.f32 %v2866_v35, 1e-06  ;;  %v2884_v59 = vmax.f32 %v2868_v61, 1e-06  ;;  %v2835_v24 = vadd.f32 %v2819_v60, %v2785_v43  ;;  %v3707_v41 = vrot.slane %v12563_v4, 4 }
 0x36f   :  { %v8230_v58 = vpack.c.bf16 %v2911_v44, %v2909_v51  ;;  %v2849_v26 = vadd.f32 %v2833_v10, %v9400_v45  ;;  %v3692_v2 = vadd.f32 %v3691_v21, %v12562_v36  ;;  %v3031_v60 = vstv %s3024_s14 }
 0x370   :  { %v2898_v28 = vmul.f32 %v2882_v23, %v2882_v23  ;;  %v2900_v40 = vmul.f32 %v2884_v59, %v2884_v59  ;;  %v2851_v9 = vadd.f32 %v2835_v24, %v9398_v25  ;;  %v3708_v35 = vadd.f32 %v3707_v41, %v12563_v4 }
 0x371   :  { %8231 = vmatpush1.bf16.xpose.msra.mxu1 %v8230_v58  ;;  %v2865_v8 = vmax.f32 %v2849_v26, 0.0  ;;  %v3693_v61 = vrot.slane %v3692_v2, 2 }
 0x372   :  { %v2914_v63 = vmul.f32 %v2898_v28, %v2882_v23  ;;  %v2916_v50 = vmul.f32 %v2900_v40, %v2884_v59  ;;  %v2867_v34 = vmax.f32 %v2851_v9, 0.0  ;;  %v3709_v43 = vrot.slane %v3708_v35, 2  ;;  %v8838_v23 = vld [vmem:[%s12289_s0 + $0x40] sm:$0x77] }
 0x373   :  { %v2881_v7 = vmax.f32 %v2865_v8, 1e-06  ;;  %v3694_v51 = vadd.f32 %v3693_v61, %v3692_v2  ;;  %v3032_v59 = vsub.f32 %v8838_v23, %v3031_v60  ;;  %v12564_v61 = vld [vmem:[#allocation16_spill] sm:$0xff]  ;;  %v12565_v60 = vld [vmem:[#allocation18_spill] sm:$0xff] }
 0x374   :  { %v8232_v55 = vpack.c.bf16 %v2916_v50, %v2914_v63  ;;  %v2883_v11 = vmax.f32 %v2867_v34, 1e-06  ;;  %v3710_v10 = vadd.f32 %v3709_v43, %v3708_v35 }
 0x375   :  { %v2897_v13 = vmul.f32 %v2881_v7, %v2881_v7  ;;  %v3695_v58 = vrot.slane %v3694_v51, 1 }
 0x376   :  { %8233 = vmatprep.subr.bf16.mxu1 %v8232_v55  ;;  %v2899_v1 = vmul.f32 %v2883_v11, %v2883_v11  ;;  %v3711_v28 = vrot.slane %v3710_v10, 1 }
 0x377   :  { %v2913_v29 = vmul.f32 %v2897_v13, %v2881_v7  ;;  %v3696_v9 = vadd.f32 %v3695_v58, %v3694_v51 }
 0x378   :  { %v2915_v3 = vmul.f32 %v2899_v1, %v2883_v11  ;;  %v3712_v11 = vadd.f32 %v3711_v28, %v3710_v10  ;;  %v12566_v10 = vld [vmem:[#allocation20_spill] sm:$0xff] }
 0x37a   :  { %v8234_v12 = vpack.c.bf16 %v2915_v3, %v2913_v29 }
 0x37c   :  { %8235 = vmatpush1.bf16.xpose.msra.mxu1 %v8234_v12 }
 0x37d   :  { %s8545_s23 = spop %8544 }
 0x37e   :  { %s3042_s24 = sadd.f32 0.0001, %s8545_s23  ;;  %s10507_s25 = spop %8546 }
 0x37f   :  { %s3370_s26 = smul.f32 0.0013020834, %s10507_s25  ;;  %s8549_s28 = spop %8548 }
 0x380   :  { %v3043_v32 = vstv %s3042_s24 }
 0x381   :  { %8665 = vrcp.f32 %v3043_v32  ;;  %s3371_s27 = smul.f32 %s10507_s25, %s3370_s26 }
 0x383   :  { %s3372_s29 = ssub.f32 %s8549_s28, %s3371_s27  ;;  %2982 = vmatmul.mubr.f32.vlgmr.msra.gmra.mrb[6].mxu1 %v12507_v56 }
 0x384   :  { %3673 = vmatprep.mubr.f32.mxu1 %v12507_v56 }
 0x385   :  { %s3375_s30 = smul.f32 0.0013037809, %s3372_s29 }
 0x387   :  { %s3376_s11 = smax.f32 %s8849_s19, %s3375_s30 }
 0x388   :  { %v3379_v44 = vstv %s3376_s11 }
 0x389   :  { %8667 = vrsqrt.f32 %v3379_v44  ;;  %vm3382_vm4 = vcmp.eq.f32.partialorder %v3379_v44, inf  ;;  %vm3384_vm5 = vcmp.eq.f32.partialorder %v3379_v44, 0.0  ;;  %v3385_v4 = vand.u32 2147483648, %v3379_v44 }
 0x38b   :  { %v8666_v24 = vpop.eup %8665 }
 0x38c   :  { %v3045_v26 = vmul.f32 %v8666_v24, %v3032_v59 }
 0x38e   :  { %v7773_v40 = vclamps-f32 %v3045_v26, 20.0 }
 0x390   :  { %v3052_v8 = vrot.slane %v7773_v40, %v9235_v33  ;;  %v3056_v63 = vrot.slane %v7773_v40, %v9238_v37  ;;  %v3086_v50 = vrot.slane %v7773_v40, %v9241_v38  ;;  %v3090_v34 = vrot.slane %v7773_v40, %v9244_v39 }
 0x391   :  { %v3136_v7 = vrot.slane %v7773_v40, %v9247_v57  ;;  %v3140_v55 = vrot.slane %v7773_v40, %v9250_v0 }
 0x392   :  { %v10530_v13 = vrot.slane %v3052_v8, %v9235_v33  ;;  %v10533_v1 = vrot.slane %v3056_v63, %v9235_v33  ;;  %v10536_v29 = vrot.slane %v3086_v50, %v9241_v38  ;;  %v10539_v3 = vrot.slane %v3090_v34, %v9241_v38 }
 0x393   :  { %v8668_v12 = vpop.eup %8667  ;;  %v10542_v36 = vrot.slane %v3136_v7, %v9247_v57  ;;  %v10545_v21 = vrot.slane %v3140_v55, %v9247_v57 }
 0x394   :  { %v3381_v41 = vmul.f32 %v8668_v12, %v3379_v44  ;;  %v3068_v2 = vmul.f32 %v10533_v1, %v9229_v27  ;;  %v3070_v32 = vmul.f32 %v10533_v1, %v9159_v16  ;;  %v3102_v35 = vmul.f32 %v10539_v3, %v9164_v22 }
 0x395   :  { %v3104_v43 = vmul.f32 %v10539_v3, %v12564_v61  ;;  %v3152_v51 = vmul.f32 %v10545_v21, %v12565_v60  ;;  %v3154_v23 = vmul.f32 %v10545_v21, %v12566_v10  ;;  %v3067_v59 = vmul.f32 %v10530_v13, %v9229_v27 }
 0x396   :  { %v3383_v24 = vsel %vm3382_vm4, %v3379_v44, %v3381_v41  ;;  %v3118_v58 = vadd.f32 %v3102_v35, %v3068_v2  ;;  %v3069_v26 = vmul.f32 %v10530_v13, %v9159_v16  ;;  %v3101_v28 = vmul.f32 %v10536_v29, %v9164_v22 }
 0x397   :  { %v3386_v40 = vsel %vm3384_vm5, %v3385_v4, %v3383_v24  ;;  %v3120_v8 = vadd.f32 %v3104_v43, %v3070_v32  ;;  %v3103_v63 = vmul.f32 %v10536_v29, %v12564_v61  ;;  %v3151_v50 = vmul.f32 %v10542_v36, %v12565_v60  ;;  %v12567_v4 = vld [vmem:[#allocation37_spill] sm:$0xff]  ;;  %v12568_v32 = vld [vmem:[#allocation27_spill] sm:$0xff]  ;;  %v12569_v43 = vld [vmem:[#allocation22_spill] sm:$0xff] }
 0x398   :  { %8550 = vpush %v3386_v40  ;;  %v3168_v34 = vadd.f32 %v3152_v51, %v3118_v58  ;;  %v3117_v7 = vadd.f32 %v3101_v28, %v3067_v59  ;;  %v3153_v44 = vmul.f32 %v10542_v36, %v12566_v10  ;;  %v3072_v55 = vmul.f32 %v10533_v1, %v9188_v48  ;;  %v12570_v59 = vld [vmem:[#allocation33_spill] sm:$0xff]  ;;  %v12571_v40 = vld [vmem:[#allocation24_spill] sm:$0xff] }
 0x399   :  { %8552 = vpush %v3696_v9  ;;  %v3170_v12 = vadd.f32 %v3154_v23, %v3120_v8  ;;  %v3119_v41 = vadd.f32 %v3103_v63, %v3069_v26  ;;  %v3074_v2 = vmul.f32 %v10533_v1, %v12567_v4  ;;  %v3106_v35 = vmul.f32 %v10539_v3, %v12568_v32 }
 0x39a   :  { %8554 = vpush %v3712_v11  ;;  %v3184_v24 = vadd.f32 %v3168_v34, %v12569_v43  ;;  %v3167_v51 = vadd.f32 %v3151_v50, %v3117_v7  ;;  %v3108_v58 = vmul.f32 %v10539_v3, %v12570_v59  ;;  %v3156_v28 = vmul.f32 %v10545_v21, %v9196_v52 }
 0x39b   :  { %v3186_v9 = vadd.f32 %v3170_v12, %v12571_v40  ;;  %v3169_v23 = vadd.f32 %v3153_v44, %v3119_v41  ;;  %v3122_v26 = vadd.f32 %v3106_v35, %v3072_v55  ;;  %v3158_v8 = vmul.f32 %v10545_v21, %v9200_v54 }
 0x39c   :  { %v3200_v63 = vmax.f32 %v3184_v24, 0.0  ;;  %v3183_v10 = vadd.f32 %v3167_v51, %v12569_v43  ;;  %v3124_v11 = vadd.f32 %v3108_v58, %v3074_v2  ;;  %v3071_v50 = vmul.f32 %v10530_v13, %v9188_v48 }
 0x39d   :  { %v3202_v34 = vmax.f32 %v3186_v9, 0.0  ;;  %v3185_v7 = vadd.f32 %v3169_v23, %v12571_v40  ;;  %v3172_v60 = vadd.f32 %v3156_v28, %v3122_v26  ;;  %v3073_v61 = vmul.f32 %v10530_v13, %v12567_v4 }
 0x39e   :  { %v3216_v12 = vmax.f32 %v3200_v63, 1e-06  ;;  %v3199_v44 = vmax.f32 %v3183_v10, 0.0  ;;  %v3174_v55 = vadd.f32 %v3158_v8, %v3124_v11  ;;  %v3105_v41 = vmul.f32 %v10536_v29, %v12568_v32 }
 0x39f   :  { %v3218_v35 = vmax.f32 %v3202_v34, 1e-06  ;;  %v3201_v24 = vmax.f32 %v3185_v7, 0.0  ;;  %v3188_v2 = vadd.f32 %v3172_v60, %v9286_v14  ;;  %v3107_v51 = vmul.f32 %v10536_v29, %v12570_v59 }
 0x3a0   :  { %v3232_v58 = vmul.f32 %v3216_v12, %v3216_v12  ;;  %v3215_v9 = vmax.f32 %v3199_v44, 1e-06  ;;  %v3190_v28 = vadd.f32 %v3174_v55, %v9204_v47  ;;  %v3121_v23 = vadd.f32 %v3105_v41, %v3071_v50 }
 0x3a1   :  { %v3234_v26 = vmul.f32 %v3218_v35, %v3218_v35  ;;  %v3217_v40 = vmax.f32 %v3201_v24, 1e-06  ;;  %v3204_v63 = vmax.f32 %v3188_v2, 0.0  ;;  %v3123_v10 = vadd.f32 %v3107_v51, %v3073_v61 }
 0x3a2   :  { %v3248_v8 = vmul.f32 %v3232_v58, %v3216_v12  ;;  %v3231_v11 = vmul.f32 %v3215_v9, %v3215_v9  ;;  %v3206_v43 = vmax.f32 %v3190_v28, 0.0  ;;  %v3155_v34 = vmul.f32 %v10542_v36, %v9196_v52 }
 0x3a3   :  { %v3250_v7 = vmul.f32 %v3234_v26, %v3218_v35  ;;  %v3233_v60 = vmul.f32 %v3217_v40, %v3217_v40  ;;  %v3220_v32 = vmax.f32 %v3204_v63, 1e-06  ;;  %v3157_v59 = vmul.f32 %v10542_v36, %v9200_v54 }
 0x3a4   :  { %v3247_v44 = vmul.f32 %v3231_v11, %v3215_v9  ;;  %v3222_v4 = vmax.f32 %v3206_v43, 1e-06  ;;  %v3171_v55 = vadd.f32 %v3155_v34, %v3121_v23  ;;  %v3076_v50 = vmul.f32 %v10533_v1, %v9213_v62 }
 0x3a5   :  { %v8236_v41 = vpack.c.bf16 %v3250_v7, %v3248_v8  ;;  %v3249_v61 = vmul.f32 %v3233_v60, %v3217_v40  ;;  %v3236_v12 = vmul.f32 %v3220_v32, %v3220_v32  ;;  %v3173_v24 = vadd.f32 %v3157_v59, %v3123_v10 }
 0x3a6   :  { %v3238_v2 = vmul.f32 %v3222_v4, %v3222_v4  ;;  %v3187_v51 = vadd.f32 %v3171_v55, %v9286_v14  ;;  %v3078_v35 = vmul.f32 %v10533_v1, %v9321_v18  ;;  %v3110_v58 = vmul.f32 %v10539_v3, %v9222_v20 }
 0x3a7   :  { %8237 = vmatprep.subr.bf16.mxu0 %v8236_v41  ;;  %v8238_v9 = vpack.c.bf16 %v3249_v61, %v3247_v44  ;;  %v3252_v43 = vmul.f32 %v3236_v12, %v3220_v32  ;;  %v3189_v28 = vadd.f32 %v3173_v24, %v9204_v47  ;;  %v3112_v23 = vmul.f32 %v10539_v3, %v12502_v15 }
 0x3a8   :  { %v3254_v40 = vmul.f32 %v3238_v2, %v3222_v4  ;;  %v3203_v26 = vmax.f32 %v3187_v51, 0.0  ;;  %v3126_v59 = vadd.f32 %v3110_v58, %v3076_v50  ;;  %v3160_v63 = vmul.f32 %v10545_v21, %v12503_v5 }
 0x3a9   :  { %8239 = vmatpush1.bf16.xpose.msra.mxu0 %v8238_v9  ;;  %v3205_v10 = vmax.f32 %v3189_v28, 0.0  ;;  %v3128_v8 = vadd.f32 %v3112_v23, %v3078_v35  ;;  %v3162_v11 = vmul.f32 %v10545_v21, %v12512_v19  ;;  %v3075_v32 = vmul.f32 %v10530_v13, %v9213_v62 }
 0x3aa   :  { %v8240_v34 = vpack.c.bf16 %v3254_v40, %v3252_v43  ;;  %v3219_v7 = vmax.f32 %v3203_v26, 1e-06  ;;  %v3176_v60 = vadd.f32 %v3160_v63, %v3126_v59  ;;  %v3077_v4 = vmul.f32 %v10530_v13, %v9321_v18 }
 0x3ab   :  { %v3221_v44 = vmax.f32 %v3205_v10, 1e-06  ;;  %v3178_v55 = vadd.f32 %v3162_v11, %v3128_v8  ;;  %v3109_v50 = vmul.f32 %v10536_v29, %v9222_v20  ;;  %v3111_v41 = vmul.f32 %v10536_v29, %v12502_v15 }
 0x3ac   :  { %8241 = vmatprep.subr.bf16.mxu0 %v8240_v34  ;;  %v3235_v61 = vmul.f32 %v3219_v7, %v3219_v7  ;;  %v3192_v12 = vadd.f32 %v3176_v60, %v9340_v49  ;;  %v3159_v24 = vmul.f32 %v10542_v36, %v12503_v5  ;;  %v3161_v2 = vmul.f32 %v10542_v36, %v12512_v19 }
 0x3ad   :  { %v3237_v51 = vmul.f32 %v3221_v44, %v3221_v44  ;;  %v3194_v35 = vadd.f32 %v3178_v55, %v9301_v46  ;;  %v3125_v58 = vadd.f32 %v3109_v50, %v3075_v32  ;;  %v3127_v9 = vadd.f32 %v3111_v41, %v3077_v4 }
 0x3ae   :  { %v3251_v43 = vmul.f32 %v3235_v61, %v3219_v7  ;;  %v3208_v28 = vmax.f32 %v3192_v12, 0.0  ;;  %v3080_v23 = vmul.f32 %v10533_v1, %v9329_v53  ;;  %v3082_v40 = vmul.f32 %v10533_v1, %v9355_v6 }
 0x3af   :  { %v3253_v26 = vmul.f32 %v3237_v51, %v3221_v44  ;;  %v3210_v59 = vmax.f32 %v3194_v35, 0.0  ;;  %v3175_v63 = vadd.f32 %v3159_v24, %v3125_v58  ;;  %v3177_v10 = vadd.f32 %v3161_v2, %v3127_v9 }
 0x3b0   :  { %v3224_v8 = vmax.f32 %v3208_v28, 1e-06  ;;  %v3114_v11 = vmul.f32 %v10539_v3, %v9344_v17  ;;  %v3116_v32 = vmul.f32 %v10539_v3, %v9379_v31  ;;  %v3164_v34 = vmul.f32 %v10545_v21, %v9362_v30 }
 0x3b1   :  { %v8242_v7 = vpack.c.bf16 %v3253_v26, %v3251_v43  ;;  %v3226_v60 = vmax.f32 %v3210_v59, 1e-06  ;;  %v3191_v4 = vadd.f32 %v3175_v63, %v9340_v49  ;;  %v3193_v1 = vadd.f32 %v3177_v10, %v9301_v46 }
 0x3b2   :  { %v3240_v44 = vmul.f32 %v3224_v8, %v3224_v8  ;;  %v3130_v55 = vadd.f32 %v3114_v11, %v3080_v23  ;;  %v3132_v50 = vadd.f32 %v3116_v32, %v3082_v40  ;;  %v3166_v41 = vmul.f32 %v10545_v21, %v9386_v42 }
 0x3b3   :  { %8243 = vmatpush1.bf16.xpose.msra.mxu0 %v8242_v7  ;;  %v3242_v61 = vmul.f32 %v3226_v60, %v3226_v60  ;;  %v3207_v12 = vmax.f32 %v3191_v4, 0.0  ;;  %v3209_v24 = vmax.f32 %v3193_v1, 0.0  ;;  %v3079_v3 = vmul.f32 %v10530_v13, %v9329_v53 }
 0x3b4   :  { %v3256_v2 = vmul.f32 %v3240_v44, %v3224_v8  ;;  %v3180_v51 = vadd.f32 %v3164_v34, %v3130_v55  ;;  %v3182_v35 = vadd.f32 %v3166_v41, %v3132_v50  ;;  %v3081_v58 = vmul.f32 %v10530_v13, %v9355_v6 }
 0x3b5   :  { %v3258_v9 = vmul.f32 %v3242_v61, %v3226_v60  ;;  %v3223_v43 = vmax.f32 %v3207_v12, 1e-06  ;;  %v3225_v28 = vmax.f32 %v3209_v24, 1e-06  ;;  %v3113_v23 = vmul.f32 %v10536_v29, %v9344_v17 }
 0x3b6   :  { %v3196_v21 = vadd.f32 %v3180_v51, %v9400_v45  ;;  %v3198_v40 = vadd.f32 %v3182_v35, %v9398_v25  ;;  %v3115_v26 = vmul.f32 %v10536_v29, %v9379_v31  ;;  %v3163_v59 = vmul.f32 %v10542_v36, %v9362_v30 }
 0x3b7   :  { %v8244_v63 = vpack.c.bf16 %v3258_v9, %v3256_v2  ;;  %v3239_v10 = vmul.f32 %v3223_v43, %v3223_v43  ;;  %v3241_v8 = vmul.f32 %v3225_v28, %v3225_v28  ;;  %v3129_v13 = vadd.f32 %v3113_v23, %v3079_v3 }
 0x3b8   :  { %v3212_v11 = vmax.f32 %v3196_v21, 0.0  ;;  %v3214_v32 = vmax.f32 %v3198_v40, 0.0  ;;  %v3131_v34 = vadd.f32 %v3115_v26, %v3081_v58  ;;  %v3165_v7 = vmul.f32 %v10542_v36, %v9386_v42 }
 0x3b9   :  { %8245 = vmatprep.subr.bf16.mxu0 %v8244_v63  ;;  %v3255_v60 = vmul.f32 %v3239_v10, %v3223_v43  ;;  %v3257_v4 = vmul.f32 %v3241_v8, %v3225_v28  ;;  %v3179_v1 = vadd.f32 %v3163_v59, %v3129_v13  ;;  %v7786_v28 = vld [vmem:[%s12289_s0 + $0x78] sm:$0x77] }
 0x3ba   :  { %v3228_v44 = vmax.f32 %v3212_v11, 1e-06  ;;  %v3230_v55 = vmax.f32 %v3214_v32, 1e-06  ;;  %v3181_v29 = vadd.f32 %v3165_v7, %v3131_v34  ;;  %v5414_v21 = vcombine.high %v7786_v28, %v7786_v28  ;;  %v12572_v34 = vld [vmem:[#allocation26_spill] sm:$0xff] }
 0x3bb   :  { %v8246_v50 = vpack.c.bf16 %v3257_v4, %v3255_v60  ;;  %v3195_v41 = vadd.f32 %v3179_v1, %v9400_v45  ;;  %v5416_v40 = vsel %vm225_vm0, %v7786_v28, 0.0  ;;  %v5428_v10 = vmul.f32 %v7786_v28, %v7786_v28  ;;  %v12573_v4 = vld [vmem:[#allocation9_spill] sm:$0xff] }
 0x3bc   :  { %v3244_v61 = vmul.f32 %v3228_v44, %v3228_v44  ;;  %v3246_v12 = vmul.f32 %v3230_v55, %v3230_v55  ;;  %v3197_v24 = vadd.f32 %v3181_v29, %v9398_v25  ;;  %v5417_v63 = vsel %vm225_vm0, %v5414_v21, 0.0  ;;  %v5768_v21 = vld [vmem:[%s12292_s1 + $0x8] sm:$0xff] }
 0x3bd   :  { %8247 = vmatpush1.bf16.xpose.msra.mxu0 %v8246_v50  ;;  %v3211_v3 = vmax.f32 %v3195_v41, 0.0  ;;  %v5418_v8 = vadd.f32 %v5417_v63, %v5416_v40  ;;  %v5430_v11 = vcombine.high %v5428_v10, %v5428_v10  ;;  %v5432_v32 = vsel %vm225_vm0, %v5428_v10, 0.0 }
 0x3be   :  { %v3260_v2 = vmul.f32 %v3244_v61, %v3228_v44  ;;  %v3262_v51 = vmul.f32 %v3246_v12, %v3230_v55  ;;  %v3213_v35 = vmax.f32 %v3197_v24, 0.0  ;;  %v4037_v7 = vrot.slane %v12572_v34, 4 }
 0x3bf   :  { %v3227_v36 = vmax.f32 %v3211_v3, 1e-06  ;;  %5419 = vadd.xlane.f32.xlu1 %v5418_v8  ;;  %v5433_v60 = vsel %vm225_vm0, %v5430_v11, 0.0  ;;  %v4053_v1 = vrot.slane %v12573_v4, 4  ;;  %v3377_v12 = vstv %s3370_s26 }
 0x3c0   :  { %v8248_v58 = vpack.c.bf16 %v3262_v51, %v3260_v2  ;;  %v3229_v9 = vmax.f32 %v3213_v35, 1e-06  ;;  %v5434_v44 = vadd.f32 %v5433_v60, %v5432_v32  ;;  %v4038_v55 = vadd.f32 %v4037_v7, %v12572_v34  ;;  %v8839_v51 = vld [vmem:[%s12289_s0 + $0x48] sm:$0x77] }
 0x3c1   :  { %v3243_v43 = vmul.f32 %v3227_v36, %v3227_v36  ;;  %v4054_v50 = vadd.f32 %v4053_v1, %v12573_v4  ;;  %v3378_v35 = vsub.f32 %v8839_v51, %v3377_v12  ;;  %v12574_v12 = vld [vmem:[#allocation16_spill] sm:$0xff] }
 0x3c2   :  { %8249 = vmatprep.subr.bf16.mxu0 %v8248_v58  ;;  %v3245_v23 = vmul.f32 %v3229_v9, %v3229_v9  ;;  %5435 = vadd.xlane.f32.xlu0 %v5434_v44  ;;  %v4039_v41 = vrot.slane %v4038_v55, 2 }
 0x3c3   :  { %v3259_v26 = vmul.f32 %v3243_v43, %v3227_v36  ;;  %v4055_v61 = vrot.slane %v4054_v50, 2 }
 0x3c4   :  { %v3261_v59 = vmul.f32 %v3245_v23, %v3229_v9  ;;  %v4040_v24 = vadd.f32 %v4039_v41, %v4038_v55 }
 0x3c5   :  { %v4056_v2 = vadd.f32 %v4055_v61, %v4054_v50  ;;  %v5767_v61 = vld [vmem:[%s12292_s1] sm:$0xff] }
 0x3c6   :  { %v8250_v13 = vpack.c.bf16 %v3261_v59, %v3259_v26  ;;  %v4041_v58 = vrot.slane %v4040_v24, 1 }
 0x3c7   :  { %v4057_v43 = vrot.slane %v4056_v2, 1 }
 0x3c8   :  { %8251 = vmatpush1.bf16.xpose.msra.mxu0 %v8250_v13  ;;  %v4042_v23 = vadd.f32 %v4041_v58, %v4040_v24 }
 0x3c9   :  { %s8551_s14 = spop %8550  ;;  %v4058_v13 = vadd.f32 %v4057_v43, %v4056_v2  ;;  %v12575_v2 = vld [vmem:[#allocation18_spill] sm:$0xff] }
 0x3ca   :  { %s3388_s15 = sadd.f32 0.0001, %s8551_s14  ;;  %s10669_s16 = spop %8552 }
 0x3cb   :  { %s3716_s17 = smul.f32 0.0013020834, %s10669_s16  ;;  %s8555_s20 = spop %8554 }
 0x3cc   :  { %v3389_v29 = vstv %s3388_s15 }
 0x3cd   :  { %8669 = vrcp.f32 %v3389_v29  ;;  %s3717_s18 = smul.f32 %s10669_s16, %s3716_s17 }
 0x3cf   :  { %s3718_s21 = ssub.f32 %s8555_s20, %s3717_s18  ;;  %3328 = vmatmul.mubr.f32.vlgmr.msra.gmra.mrb[8].mxu0 %v12507_v56 }
 0x3d0   :  { %4019 = vmatprep.mubr.f32.mxu0 %v12507_v56  ;;  %5776 = vperm.xlu1 %8614, %v5768_v21  }
 0x3d1   :  { %s3721_s22 = smul.f32 0.0013037809, %s3718_s21 }
 0x3d3   :  { %s3722_s23 = smax.f32 %s8849_s19, %s3721_s22 }
 0x3d4   :  { %v3725_v3 = vstv %s3722_s23 }
 0x3d5   :  { %8671 = vrsqrt.f32 %v3725_v3  ;;  %vm3728_vm0 = vcmp.eq.f32.partialorder %v3725_v3, inf  ;;  %vm3730_vm6 = vcmp.eq.f32.partialorder %v3725_v3, 0.0  ;;  %v3731_v44 = vand.u32 2147483648, %v3725_v3 }
 0x3d7   :  { %v8670_v36 = vpop.eup %8669 }
 0x3d8   :  { %v3391_v9 = vmul.f32 %v8670_v36, %v3378_v35  ;;  %v12576_v35 = vld [vmem:[#allocation20_spill] sm:$0xff]  ;;  %5771 = vperm.xlu0 %8613, %v5767_v61  }
 0x3da   :  { %v7775_v28 = vclamps-f32 %v3391_v9, 20.0 }
 0x3dc   :  { %v3398_v40 = vrot.slane %v7775_v28, %v9235_v33  ;;  %v3402_v26 = vrot.slane %v7775_v28, %v9238_v37  ;;  %v3432_v59 = vrot.slane %v7775_v28, %v9241_v38  ;;  %v3436_v63 = vrot.slane %v7775_v28, %v9244_v39 }
 0x3dd   :  { %v3482_v10 = vrot.slane %v7775_v28, %v9247_v57  ;;  %v3486_v8 = vrot.slane %v7775_v28, %v9250_v0 }
 0x3de   :  { %v10695_v11 = vrot.slane %v3398_v40, %v9235_v33  ;;  %v10698_v32 = vrot.slane %v3402_v26, %v9235_v33  ;;  %v10701_v34 = vrot.slane %v3432_v59, %v9241_v38  ;;  %v10704_v7 = vrot.slane %v3436_v63, %v9241_v38 }
 0x3df   :  { %v8672_v60 = vpop.eup %8671  ;;  %v10707_v4 = vrot.slane %v3482_v10, %v9247_v57  ;;  %v10710_v1 = vrot.slane %v3486_v8, %v9247_v57 }
 0x3e0   :  { %v3727_v55 = vmul.f32 %v8672_v60, %v3725_v3  ;;  %v3414_v29 = vmul.f32 %v10698_v32, %v9229_v27  ;;  %v3416_v50 = vmul.f32 %v10698_v32, %v9159_v16  ;;  %v3448_v41 = vmul.f32 %v10704_v7, %v9164_v22 }
 0x3e1   :  { %v3450_v24 = vmul.f32 %v10704_v7, %v12574_v12  ;;  %v3498_v51 = vmul.f32 %v10710_v1, %v12575_v2  ;;  %v3500_v36 = vmul.f32 %v10710_v1, %v12576_v35  ;;  %v3413_v58 = vmul.f32 %v10695_v11, %v9229_v27 }
 0x3e2   :  { %v3729_v9 = vsel %vm3728_vm0, %v3725_v3, %v3727_v55  ;;  %v3464_v43 = vadd.f32 %v3448_v41, %v3414_v29  ;;  %v3415_v28 = vmul.f32 %v10695_v11, %v9159_v16  ;;  %v3447_v21 = vmul.f32 %v10701_v34, %v9164_v22  ;;  %v12578_v41 = vld [vmem:[#allocation27_spill] sm:$0xff] }
 0x3e3   :  { %v3732_v40 = vsel %vm3730_vm6, %v3731_v44, %v3729_v9  ;;  %v3466_v26 = vadd.f32 %v3450_v24, %v3416_v50  ;;  %v3449_v59 = vmul.f32 %v10701_v34, %v12574_v12  ;;  %v3497_v63 = vmul.f32 %v10707_v4, %v12575_v2  ;;  %v12577_v44 = vld [vmem:[#allocation37_spill] sm:$0xff]  ;;  %v12579_v24 = vld [vmem:[#allocation22_spill] sm:$0xff] }
 0x3e4   :  { %8556 = vpush %v3732_v40  ;;  %v3514_v10 = vadd.f32 %v3498_v51, %v3464_v43  ;;  %v3463_v8 = vadd.f32 %v3447_v21, %v3413_v58  ;;  %v3499_v60 = vmul.f32 %v10707_v4, %v12576_v35  ;;  %v3418_v55 = vmul.f32 %v10698_v32, %v9188_v48  ;;  %v12580_v58 = vld [vmem:[#allocation33_spill] sm:$0xff]  ;;  %v12581_v40 = vld [vmem:[#allocation24_spill] sm:$0xff] }
 0x3e5   :  { %8558 = vpush %v4042_v23  ;;  %v3516_v29 = vadd.f32 %v3500_v36, %v3466_v26  ;;  %v3465_v3 = vadd.f32 %v3449_v59, %v3415_v28  ;;  %v3420_v50 = vmul.f32 %v10698_v32, %v12577_v44  ;;  %v3452_v61 = vmul.f32 %v10704_v7, %v12578_v41 }
 0x3e6   :  { %8560 = vpush %v4058_v13  ;;  %v3530_v9 = vadd.f32 %v3514_v10, %v12579_v24  ;;  %v3513_v51 = vadd.f32 %v3497_v63, %v3463_v8  ;;  %v3454_v43 = vmul.f32 %v10704_v7, %v12580_v58  ;;  %v3502_v21 = vmul.f32 %v10710_v1, %v9196_v52 }
 0x3e7   :  { %v3532_v23 = vadd.f32 %v3516_v29, %v12581_v40  ;;  %v3515_v36 = vadd.f32 %v3499_v60, %v3465_v3  ;;  %v3468_v28 = vadd.f32 %v3452_v61, %v3418_v55  ;;  %v3504_v26 = vmul.f32 %v10710_v1, %v9200_v54 }
 0x3e8   :  { %v3546_v59 = vmax.f32 %v3530_v9, 0.0  ;;  %v3529_v35 = vadd.f32 %v3513_v51, %v12579_v24  ;;  %v3470_v13 = vadd.f32 %v3454_v43, %v3420_v50  ;;  %v3417_v63 = vmul.f32 %v10695_v11, %v9188_v48 }
 0x3e9   :  { %v3548_v10 = vmax.f32 %v3532_v23, 0.0  ;;  %v3531_v8 = vadd.f32 %v3515_v36, %v12581_v40  ;;  %v3518_v2 = vadd.f32 %v3502_v21, %v3468_v28  ;;  %v3419_v12 = vmul.f32 %v10695_v11, %v12577_v44 }
 0x3ea   :  { %v3562_v29 = vmax.f32 %v3546_v59, 1e-06  ;;  %v3545_v60 = vmax.f32 %v3529_v35, 0.0  ;;  %v3520_v55 = vadd.f32 %v3504_v26, %v3470_v13  ;;  %v3451_v3 = vmul.f32 %v10701_v34, %v12578_v41 }
 0x3eb   :  { %v3564_v61 = vmax.f32 %v3548_v10, 1e-06  ;;  %v3547_v9 = vmax.f32 %v3531_v8, 0.0  ;;  %v3534_v50 = vadd.f32 %v3518_v2, %v9286_v14  ;;  %v3453_v51 = vmul.f32 %v10701_v34, %v12580_v58 }
 0x3ec   :  { %v3578_v43 = vmul.f32 %v3562_v29, %v3562_v29  ;;  %v3561_v23 = vmax.f32 %v3545_v60, 1e-06  ;;  %v3536_v21 = vadd.f32 %v3520_v55, %v9204_v47  ;;  %v3467_v36 = vadd.f32 %v3451_v3, %v3417_v63 }
 0x3ed   :  { %v3580_v28 = vmul.f32 %v3564_v61, %v3564_v61  ;;  %v3563_v40 = vmax.f32 %v3547_v9, 1e-06  ;;  %v3550_v59 = vmax.f32 %v3534_v50, 0.0  ;;  %v3469_v35 = vadd.f32 %v3453_v51, %v3419_v12 }
 0x3ee   :  { %v3594_v26 = vmul.f32 %v3578_v43, %v3562_v29  ;;  %v3577_v13 = vmul.f32 %v3561_v23, %v3561_v23  ;;  %v3552_v24 = vmax.f32 %v3536_v21, 0.0  ;;  %v3501_v10 = vmul.f32 %v10707_v4, %v9196_v52 }
 0x3ef   :  { %v3596_v8 = vmul.f32 %v3580_v28, %v3564_v61  ;;  %v3579_v2 = vmul.f32 %v3563_v40, %v3563_v40  ;;  %v3566_v41 = vmax.f32 %v3550_v59, 1e-06  ;;  %v3503_v58 = vmul.f32 %v10707_v4, %v9200_v54 }
 0x3f0   :  { %v3593_v60 = vmul.f32 %v3577_v13, %v3561_v23  ;;  %v3568_v44 = vmax.f32 %v3552_v24, 1e-06  ;;  %v3517_v55 = vadd.f32 %v3501_v10, %v3467_v36  ;;  %v3422_v63 = vmul.f32 %v10698_v32, %v9213_v62 }
 0x3f1   :  { %v8252_v3 = vpack.c.bf16 %v3596_v8, %v3594_v26  ;;  %v3595_v12 = vmul.f32 %v3579_v2, %v3563_v40  ;;  %v3582_v29 = vmul.f32 %v3566_v41, %v3566_v41  ;;  %v3519_v9 = vadd.f32 %v3503_v58, %v3469_v35 }
 0x3f2   :  { %v3584_v50 = vmul.f32 %v3568_v44, %v3568_v44  ;;  %v3533_v51 = vadd.f32 %v3517_v55, %v9286_v14  ;;  %v3424_v61 = vmul.f32 %v10698_v32, %v9321_v18  ;;  %v3456_v43 = vmul.f32 %v10704_v7, %v9222_v20 }
 0x3f3   :  { %8253 = vmatprep.subr.bf16.mxu1 %v8252_v3  ;;  %v8254_v23 = vpack.c.bf16 %v3595_v12, %v3593_v60  ;;  %v3598_v24 = vmul.f32 %v3582_v29, %v3566_v41  ;;  %v3535_v21 = vadd.f32 %v3519_v9, %v9204_v47  ;;  %v3458_v36 = vmul.f32 %v10704_v7, %v12502_v15 }
 0x3f4   :  { %v3600_v40 = vmul.f32 %v3584_v50, %v3568_v44  ;;  %v3549_v28 = vmax.f32 %v3533_v51, 0.0  ;;  %v3472_v58 = vadd.f32 %v3456_v43, %v3422_v63  ;;  %v3506_v59 = vmul.f32 %v10710_v1, %v12503_v5 }
 0x3f5   :  { %8255 = vmatpush1.bf16.xpose.msra.mxu1 %v8254_v23  ;;  %v3551_v35 = vmax.f32 %v3535_v21, 0.0  ;;  %v3474_v26 = vadd.f32 %v3458_v36, %v3424_v61  ;;  %v3508_v13 = vmul.f32 %v10710_v1, %v12512_v19  ;;  %v3421_v41 = vmul.f32 %v10695_v11, %v9213_v62 }
 0x3f6   :  { %v8256_v10 = vpack.c.bf16 %v3600_v40, %v3598_v24  ;;  %v3565_v8 = vmax.f32 %v3549_v28, 1e-06  ;;  %v3522_v2 = vadd.f32 %v3506_v59, %v3472_v58  ;;  %v3423_v44 = vmul.f32 %v10695_v11, %v9321_v18 }
 0x3f7   :  { %v3567_v60 = vmax.f32 %v3551_v35, 1e-06  ;;  %v3524_v55 = vadd.f32 %v3508_v13, %v3474_v26  ;;  %v3455_v63 = vmul.f32 %v10701_v34, %v9222_v20  ;;  %v3457_v3 = vmul.f32 %v10701_v34, %v12502_v15 }
 0x3f8   :  { %8257 = vmatprep.subr.bf16.mxu1 %v8256_v10  ;;  %v3581_v12 = vmul.f32 %v3565_v8, %v3565_v8  ;;  %v3538_v29 = vadd.f32 %v3522_v2, %v9340_v49  ;;  %v3505_v9 = vmul.f32 %v10707_v4, %v12503_v5  ;;  %v3507_v50 = vmul.f32 %v10707_v4, %v12512_v19 }
 0x3f9   :  { %v3583_v51 = vmul.f32 %v3567_v60, %v3567_v60  ;;  %v3540_v61 = vadd.f32 %v3524_v55, %v9301_v46  ;;  %v3471_v43 = vadd.f32 %v3455_v63, %v3421_v41  ;;  %v3473_v23 = vadd.f32 %v3457_v3, %v3423_v44 }
 0x3fa   :  { %v3597_v24 = vmul.f32 %v3581_v12, %v3565_v8  ;;  %v3554_v21 = vmax.f32 %v3538_v29, 0.0  ;;  %v3426_v36 = vmul.f32 %v10698_v32, %v9329_v53  ;;  %v3428_v40 = vmul.f32 %v10698_v32, %v9355_v6 }
 0x3fb   :  { %v3599_v28 = vmul.f32 %v3583_v51, %v3567_v60  ;;  %v3556_v58 = vmax.f32 %v3540_v61, 0.0  ;;  %v3521_v59 = vadd.f32 %v3505_v9, %v3471_v43  ;;  %v3523_v35 = vadd.f32 %v3507_v50, %v3473_v23 }
 0x3fc   :  { %v3570_v26 = vmax.f32 %v3554_v21, 1e-06  ;;  %v3460_v13 = vmul.f32 %v10704_v7, %v9344_v17  ;;  %v3462_v41 = vmul.f32 %v10704_v7, %v9379_v31  ;;  %v3510_v10 = vmul.f32 %v10710_v1, %v9362_v30 }
 0x3fd   :  { %v8258_v8 = vpack.c.bf16 %v3599_v28, %v3597_v24  ;;  %v3572_v2 = vmax.f32 %v3556_v58, 1e-06  ;;  %v3537_v44 = vadd.f32 %v3521_v59, %v9340_v49  ;;  %v3539_v32 = vadd.f32 %v3523_v35, %v9301_v46 }
 0x3fe   :  { %v3586_v60 = vmul.f32 %v3570_v26, %v3570_v26  ;;  %v3476_v55 = vadd.f32 %v3460_v13, %v3426_v36  ;;  %v3478_v63 = vadd.f32 %v3462_v41, %v3428_v40  ;;  %v3512_v3 = vmul.f32 %v10710_v1, %v9386_v42 }
 0x3ff   :  { %8259 = vmatpush1.bf16.xpose.msra.mxu1 %v8258_v8  ;;  %v3588_v12 = vmul.f32 %v3572_v2, %v3572_v2  ;;  %v3553_v29 = vmax.f32 %v3537_v44, 0.0  ;;  %v3555_v9 = vmax.f32 %v3539_v32, 0.0  ;;  %v3425_v7 = vmul.f32 %v10695_v11, %v9329_v53 }
 0x400   :  { %v3602_v50 = vmul.f32 %v3586_v60, %v3570_v26  ;;  %v3526_v51 = vadd.f32 %v3510_v10, %v3476_v55  ;;  %v3528_v61 = vadd.f32 %v3512_v3, %v3478_v63  ;;  %v3427_v43 = vmul.f32 %v10695_v11, %v9355_v6 }
 0x401   :  { %v3604_v23 = vmul.f32 %v3588_v12, %v3572_v2  ;;  %v3569_v24 = vmax.f32 %v3553_v29, 1e-06  ;;  %v3571_v21 = vmax.f32 %v3555_v9, 1e-06  ;;  %v3459_v36 = vmul.f32 %v10701_v34, %v9344_v17 }
 0x402   :  { %v3542_v1 = vadd.f32 %v3526_v51, %v9400_v45  ;;  %v3544_v40 = vadd.f32 %v3528_v61, %v9398_v25  ;;  %v3461_v28 = vmul.f32 %v10701_v34, %v9379_v31  ;;  %v3509_v58 = vmul.f32 %v10707_v4, %v9362_v30 }
 0x403   :  { %v8260_v59 = vpack.c.bf16 %v3604_v23, %v3602_v50  ;;  %v3585_v35 = vmul.f32 %v3569_v24, %v3569_v24  ;;  %v3587_v26 = vmul.f32 %v3571_v21, %v3571_v21  ;;  %v3475_v11 = vadd.f32 %v3459_v36, %v3425_v7 }
 0x404   :  { %v3558_v13 = vmax.f32 %v3542_v1, 0.0  ;;  %v3560_v41 = vmax.f32 %v3544_v40, 0.0  ;;  %v3477_v10 = vadd.f32 %v3461_v28, %v3427_v43  ;;  %v3511_v8 = vmul.f32 %v10707_v4, %v9386_v42  ;;  %v12582_v28 = vld [vmem:[#allocation28_spill] sm:$0xff] }
 0x405   :  { %8261 = vmatprep.subr.bf16.mxu1 %v8260_v59  ;;  %v3601_v2 = vmul.f32 %v3585_v35, %v3569_v24  ;;  %v3603_v44 = vmul.f32 %v3587_v26, %v3571_v21  ;;  %v3525_v32 = vadd.f32 %v3509_v58, %v3475_v11  ;;  %v4383_v58 = vrot.slane %v12582_v28, 4  ;;  %v12583_v59 = vld [vmem:[#allocation10_spill] sm:$0xff] }
 0x406   :  { %v3574_v60 = vmax.f32 %v3558_v13, 1e-06  ;;  %v3576_v55 = vmax.f32 %v3560_v41, 1e-06  ;;  %v3527_v34 = vadd.f32 %v3511_v8, %v3477_v10  ;;  %v4399_v35 = vrot.slane %v12583_v59, 4 }
 0x407   :  { %v8262_v63 = vpack.c.bf16 %v3603_v44, %v3601_v2  ;;  %v3541_v3 = vadd.f32 %v3525_v32, %v9400_v45  ;;  %v4384_v26 = vadd.f32 %v4383_v58, %v12582_v28  ;;  %v3723_v8 = vstv %s3716_s17 }
 0x408   :  { %v3590_v12 = vmul.f32 %v3574_v60, %v3574_v60  ;;  %v3592_v29 = vmul.f32 %v3576_v55, %v3576_v55  ;;  %v3543_v9 = vadd.f32 %v3527_v34, %v9398_v25  ;;  %v4400_v13 = vadd.f32 %v4399_v35, %v12583_v59 }
 0x409   :  { %8263 = vmatpush1.bf16.xpose.msra.mxu1 %v8262_v63  ;;  %v3557_v7 = vmax.f32 %v3541_v3, 0.0  ;;  %v4385_v41 = vrot.slane %v4384_v26, 2 }
 0x40a   :  { %v3606_v50 = vmul.f32 %v3590_v12, %v3574_v60  ;;  %v3608_v51 = vmul.f32 %v3592_v29, %v3576_v55  ;;  %v3559_v61 = vmax.f32 %v3543_v9, 0.0  ;;  %v4401_v10 = vrot.slane %v4400_v13, 2  ;;  %v8840_v60 = vld [vmem:[%s12289_s0 + $0x50] sm:$0x77] }
 0x40b   :  { %v3573_v4 = vmax.f32 %v3557_v7, 1e-06  ;;  %v4386_v2 = vadd.f32 %v4385_v41, %v4384_v26  ;;  %v3724_v55 = vsub.f32 %v8840_v60, %v3723_v8  ;;  %v12584_v41 = vld [vmem:[#allocation16_spill] sm:$0xff]  ;;  %v12585_v8 = vld [vmem:[#allocation18_spill] sm:$0xff] }
 0x40c   :  { %v8264_v43 = vpack.c.bf16 %v3608_v51, %v3606_v50  ;;  %v3575_v23 = vmax.f32 %v3559_v61, 1e-06  ;;  %v4402_v32 = vadd.f32 %v4401_v10, %v4400_v13 }
 0x40d   :  { %v3589_v24 = vmul.f32 %v3573_v4, %v3573_v4  ;;  %v4387_v63 = vrot.slane %v4386_v2, 1 }
 0x40e   :  { %8265 = vmatprep.subr.bf16.mxu1 %v8264_v43  ;;  %v3591_v21 = vmul.f32 %v3575_v23, %v3575_v23  ;;  %v4403_v12 = vrot.slane %v4402_v32, 1 }
 0x40f   :  { %v3605_v36 = vmul.f32 %v3589_v24, %v3573_v4  ;;  %v4388_v9 = vadd.f32 %v4387_v63, %v4386_v2 }
 0x410   :  { %v3607_v1 = vmul.f32 %v3591_v21, %v3575_v23  ;;  %v4404_v23 = vadd.f32 %v4403_v12, %v4402_v32  ;;  %v12586_v32 = vld [vmem:[#allocation20_spill] sm:$0xff] }
 0x412   :  { %v8266_v40 = vpack.c.bf16 %v3607_v1, %v3605_v36 }
 0x414   :  { %8267 = vmatpush1.bf16.xpose.msra.mxu1 %v8266_v40 }
 0x415   :  { %s8557_s1 = spop %8556 }
 0x416   :  { %s3734_s30 = sadd.f32 0.0001, %s8557_s1  ;;  %s10831_s11 = spop %8558 }
 0x417   :  { %s4062_s12 = smul.f32 0.0013020834, %s10831_s11  ;;  %s8561_s13 = spop %8560 }
 0x418   :  { %v3735_v11 = vstv %s3734_s30 }
 0x419   :  { %8673 = vrcp.f32 %v3735_v11  ;;  %s4063_s2 = smul.f32 %s10831_s11, %s4062_s12 }
 0x41b   :  { %s4064_s3 = ssub.f32 %s8561_s13, %s4063_s2  ;;  %3674 = vmatmul.mubr.f32.vlgmr.msra.gmra.mrb[8].mxu1 %v12507_v56 }
 0x41c   :  { %4365 = vmatprep.mubr.f32.mxu1 %v12507_v56 }
 0x41d   :  { %s4067_s14 = smul.f32 0.0013037809, %s4064_s3 }
 0x41f   :  { %s4068_s15 = smax.f32 %s8849_s19, %s4067_s14 }
 0x420   :  { %v4071_v44 = vstv %s4068_s15 }
 0x421   :  { %8675 = vrsqrt.f32 %v4071_v44  ;;  %vm4074_vm7 = vcmp.eq.f32.partialorder %v4071_v44, inf  ;;  %vm4076_vm8 = vcmp.eq.f32.partialorder %v4071_v44, 0.0  ;;  %v4077_v59 = vand.u32 2147483648, %v4071_v44 }
 0x423   :  { %v8674_v34 = vpop.eup %8673 }
 0x424   :  { %v3737_v3 = vmul.f32 %v8674_v34, %v3724_v55 }
 0x426   :  { %v7777_v29 = vclamps-f32 %v3737_v3, 20.0 }
 0x428   :  { %v3744_v7 = vrot.slane %v7777_v29, %v9235_v33  ;;  %v3748_v50 = vrot.slane %v7777_v29, %v9238_v37  ;;  %v3778_v51 = vrot.slane %v7777_v29, %v9241_v38  ;;  %v3782_v61 = vrot.slane %v7777_v29, %v9244_v39 }
 0x429   :  { %v3828_v4 = vrot.slane %v7777_v29, %v9247_v57  ;;  %v3832_v43 = vrot.slane %v7777_v29, %v9250_v0 }
 0x42a   :  { %v10854_v24 = vrot.slane %v3744_v7, %v9235_v33  ;;  %v10857_v21 = vrot.slane %v3748_v50, %v9235_v33  ;;  %v10860_v36 = vrot.slane %v3778_v51, %v9241_v38  ;;  %v10863_v1 = vrot.slane %v3782_v61, %v9241_v38 }
 0x42b   :  { %v8676_v40 = vpop.eup %8675  ;;  %v10866_v28 = vrot.slane %v3828_v4, %v9247_v57  ;;  %v10869_v58 = vrot.slane %v3832_v43, %v9247_v57 }
 0x42c   :  { %v4073_v35 = vmul.f32 %v8676_v40, %v4071_v44  ;;  %v3760_v26 = vmul.f32 %v10857_v21, %v9229_v27  ;;  %v3762_v11 = vmul.f32 %v10857_v21, %v9159_v16  ;;  %v3794_v13 = vmul.f32 %v10863_v1, %v9164_v22 }
 0x42d   :  { %v3796_v10 = vmul.f32 %v10863_v1, %v12584_v41  ;;  %v3844_v2 = vmul.f32 %v10869_v58, %v12585_v8  ;;  %v3846_v60 = vmul.f32 %v10869_v58, %v12586_v32  ;;  %v3759_v55 = vmul.f32 %v10854_v24, %v9229_v27 }
 0x42e   :  { %v4075_v34 = vsel %vm4074_vm7, %v4071_v44, %v4073_v35  ;;  %v3810_v63 = vadd.f32 %v3794_v13, %v3760_v26  ;;  %v3761_v3 = vmul.f32 %v10854_v24, %v9159_v16  ;;  %v3793_v12 = vmul.f32 %v10860_v36, %v9164_v22 }
 0x42f   :  { %v4078_v29 = vsel %vm4076_vm8, %v4077_v59, %v4075_v34  ;;  %v3812_v7 = vadd.f32 %v3796_v10, %v3762_v11  ;;  %v3795_v50 = vmul.f32 %v10860_v36, %v12584_v41  ;;  %v3843_v51 = vmul.f32 %v10866_v28, %v12585_v8  ;;  %v12587_v59 = vld [vmem:[#allocation37_spill] sm:$0xff]  ;;  %v12588_v11 = vld [vmem:[#allocation27_spill] sm:$0xff]  ;;  %v12589_v10 = vld [vmem:[#allocation22_spill] sm:$0xff] }
 0x430   :  { %8562 = vpush %v4078_v29  ;;  %v3860_v61 = vadd.f32 %v3844_v2, %v3810_v63  ;;  %v3809_v4 = vadd.f32 %v3793_v12, %v3759_v55  ;;  %v3845_v44 = vmul.f32 %v10866_v28, %v12586_v32  ;;  %v3764_v43 = vmul.f32 %v10857_v21, %v9188_v48  ;;  %v12590_v55 = vld [vmem:[#allocation33_spill] sm:$0xff]  ;;  %v12591_v29 = vld [vmem:[#allocation24_spill] sm:$0xff] }
 0x431   :  { %8564 = vpush %v4388_v9  ;;  %v3862_v40 = vadd.f32 %v3846_v60, %v3812_v7  ;;  %v3811_v35 = vadd.f32 %v3795_v50, %v3761_v3  ;;  %v3766_v26 = vmul.f32 %v10857_v21, %v12587_v59  ;;  %v3798_v13 = vmul.f32 %v10863_v1, %v12588_v11 }
 0x432   :  { %8566 = vpush %v4404_v23  ;;  %v3876_v34 = vadd.f32 %v3860_v61, %v12589_v10  ;;  %v3859_v2 = vadd.f32 %v3843_v51, %v3809_v4  ;;  %v3800_v63 = vmul.f32 %v10863_v1, %v12590_v55  ;;  %v3848_v12 = vmul.f32 %v10869_v58, %v9196_v52 }
 0x433   :  { %v3878_v9 = vadd.f32 %v3862_v40, %v12591_v29  ;;  %v3861_v60 = vadd.f32 %v3845_v44, %v3811_v35  ;;  %v3814_v3 = vadd.f32 %v3798_v13, %v3764_v43  ;;  %v3850_v7 = vmul.f32 %v10869_v58, %v9200_v54 }
 0x434   :  { %v3892_v50 = vmax.f32 %v3876_v34, 0.0  ;;  %v3875_v32 = vadd.f32 %v3859_v2, %v12589_v10  ;;  %v3816_v23 = vadd.f32 %v3800_v63, %v3766_v26  ;;  %v3763_v51 = vmul.f32 %v10854_v24, %v9188_v48 }
 0x435   :  { %v3894_v61 = vmax.f32 %v3878_v9, 0.0  ;;  %v3877_v4 = vadd.f32 %v3861_v60, %v12591_v29  ;;  %v3864_v8 = vadd.f32 %v3848_v12, %v3814_v3  ;;  %v3765_v41 = vmul.f32 %v10854_v24, %v12587_v59 }
 0x436   :  { %v3908_v40 = vmax.f32 %v3892_v50, 1e-06  ;;  %v3891_v44 = vmax.f32 %v3875_v32, 0.0  ;;  %v3866_v43 = vadd.f32 %v3850_v7, %v3816_v23  ;;  %v3797_v35 = vmul.f32 %v10860_v36, %v12588_v11 }
 0x437   :  { %v3910_v13 = vmax.f32 %v3894_v61, 1e-06  ;;  %v3893_v34 = vmax.f32 %v3877_v4, 0.0  ;;  %v3880_v26 = vadd.f32 %v3864_v8, %v9286_v14  ;;  %v3799_v2 = vmul.f32 %v10860_v36, %v12590_v55 }
 0x438   :  { %v3924_v63 = vmul.f32 %v3908_v40, %v3908_v40  ;;  %v3907_v9 = vmax.f32 %v3891_v44, 1e-06  ;;  %v3882_v12 = vadd.f32 %v3866_v43, %v9204_v47  ;;  %v3813_v60 = vadd.f32 %v3797_v35, %v3763_v51 }
 0x439   :  { %v3926_v3 = vmul.f32 %v3910_v13, %v3910_v13  ;;  %v3909_v29 = vmax.f32 %v3893_v34, 1e-06  ;;  %v3896_v50 = vmax.f32 %v3880_v26, 0.0  ;;  %v3815_v32 = vadd.f32 %v3799_v2, %v3765_v41 }
 0x43a   :  { %v3940_v7 = vmul.f32 %v3924_v63, %v3908_v40  ;;  %v3923_v23 = vmul.f32 %v3907_v9, %v3907_v9  ;;  %v3898_v10 = vmax.f32 %v3882_v12, 0.0  ;;  %v3847_v61 = vmul.f32 %v10866_v28, %v9196_v52 }
 0x43b   :  { %v3942_v4 = vmul.f32 %v3926_v3, %v3910_v13  ;;  %v3925_v8 = vmul.f32 %v3909_v29, %v3909_v29  ;;  %v3912_v11 = vmax.f32 %v3896_v50, 1e-06  ;;  %v3849_v55 = vmul.f32 %v10866_v28, %v9200_v54 }
 0x43c   :  { %v3939_v44 = vmul.f32 %v3923_v23, %v3907_v9  ;;  %v3914_v59 = vmax.f32 %v3898_v10, 1e-06  ;;  %v3863_v43 = vadd.f32 %v3847_v61, %v3813_v60  ;;  %v3768_v51 = vmul.f32 %v10857_v21, %v9213_v62 }
 0x43d   :  { %v8268_v35 = vpack.c.bf16 %v3942_v4, %v3940_v7  ;;  %v3941_v41 = vmul.f32 %v3925_v8, %v3909_v29  ;;  %v3928_v40 = vmul.f32 %v3912_v11, %v3912_v11  ;;  %v3865_v34 = vadd.f32 %v3849_v55, %v3815_v32 }
 0x43e   :  { %v3930_v26 = vmul.f32 %v3914_v59, %v3914_v59  ;;  %v3879_v2 = vadd.f32 %v3863_v43, %v9286_v14  ;;  %v3770_v13 = vmul.f32 %v10857_v21, %v9321_v18  ;;  %v3802_v63 = vmul.f32 %v10863_v1, %v9222_v20 }
 0x43f   :  { %8269 = vmatprep.subr.bf16.mxu0 %v8268_v35  ;;  %v8270_v9 = vpack.c.bf16 %v3941_v41, %v3939_v44  ;;  %v3944_v10 = vmul.f32 %v3928_v40, %v3912_v11  ;;  %v3881_v12 = vadd.f32 %v3865_v34, %v9204_v47  ;;  %v3804_v60 = vmul.f32 %v10863_v1, %v12502_v15  ;;  %v10948_v41 = vpop.f32.mrb[0].mxu0  ;;  %v10950_v40 = vpop.f32.mrb[0].mxu1 }
 0x440   :  { %v3946_v29 = vmul.f32 %v3930_v26, %v3914_v59  ;;  %v3895_v3 = vmax.f32 %v3879_v2, 0.0  ;;  %v3818_v55 = vadd.f32 %v3802_v63, %v3768_v51  ;;  %v3852_v50 = vmul.f32 %v10869_v58, %v12503_v5  ;;  %v563_v63 = vpop.f32.mrb[1].mxu0 }
 0x441   :  { %8271 = vmatpush1.bf16.xpose.msra.mxu0 %v8270_v9  ;;  %v3897_v32 = vmax.f32 %v3881_v12, 0.0  ;;  %v3820_v7 = vadd.f32 %v3804_v60, %v3770_v13  ;;  %v3854_v23 = vmul.f32 %v10869_v58, %v12512_v19  ;;  %v3767_v11 = vmul.f32 %v10854_v24, %v9213_v62  ;;  %v909_v9 = vpop.f32.mrb[1].mxu1 }
 0x442   :  { %v8272_v61 = vpack.c.bf16 %v3946_v29, %v3944_v10  ;;  %v3911_v4 = vmax.f32 %v3895_v3, 1e-06  ;;  %v3868_v8 = vadd.f32 %v3852_v50, %v3818_v55  ;;  %v3769_v59 = vmul.f32 %v10854_v24, %v9321_v18  ;;  %v10958_v3 = vpop.f32.mrb[2].mxu0  ;;  %v10960_v55 = vpop.f32.mrb[2].mxu1 }
 0x443   :  { %v3913_v44 = vmax.f32 %v3897_v32, 1e-06  ;;  %v3870_v43 = vadd.f32 %v3854_v23, %v3820_v7  ;;  %v3801_v51 = vmul.f32 %v10860_v36, %v9222_v20  ;;  %v3803_v35 = vmul.f32 %v10860_v36, %v12502_v15 }
 0x444   :  { %8273 = vmatprep.subr.bf16.mxu0 %v8272_v61  ;;  %v3927_v34 = vmul.f32 %v3911_v4, %v3911_v4  ;;  %v3884_v26 = vadd.f32 %v3868_v8, %v9340_v49  ;;  %v3851_v2 = vmul.f32 %v10866_v28, %v12503_v5  ;;  %v3853_v13 = vmul.f32 %v10866_v28, %v12512_v19  ;;  %v1255_v61 = vpop.f32.mrb[3].mxu0  ;;  %v1601_v8 = vpop.f32.mrb[3].mxu1 }
 0x445   :  { %v3929_v10 = vmul.f32 %v3913_v44, %v3913_v44  ;;  %v3886_v12 = vadd.f32 %v3870_v43, %v9301_v46  ;;  %v3817_v60 = vadd.f32 %v3801_v51, %v3767_v11  ;;  %v3819_v29 = vadd.f32 %v3803_v35, %v3769_v59  ;;  %v10966_v11 = vpop.f32.mrb[4].mxu0  ;;  %v10968_v59 = vpop.f32.mrb[4].mxu1 }
 0x446   :  { %v3943_v50 = vmul.f32 %v3927_v34, %v3911_v4  ;;  %v3900_v32 = vmax.f32 %v3884_v26, 0.0  ;;  %v3772_v7 = vmul.f32 %v10857_v21, %v9329_v53  ;;  %v3774_v23 = vmul.f32 %v10857_v21, %v9355_v6  ;;  %v1947_v34 = vpop.f32.mrb[5].mxu0  ;;  %v2293_v26 = vpop.f32.mrb[5].mxu1 }
 0x447   :  { %v3945_v63 = vmul.f32 %v3929_v10, %v3913_v44  ;;  %v3902_v9 = vmax.f32 %v3886_v12, 0.0  ;;  %v3867_v19 = vadd.f32 %v3851_v2, %v3817_v60  ;;  %v3869_v43 = vadd.f32 %v3853_v13, %v3819_v29  ;;  %v10978_v12 = vpop.f32.mrb[6].mxu0 }
 0x448   :  { %v3916_v51 = vmax.f32 %v3900_v32, 1e-06  ;;  %v3806_v4 = vmul.f32 %v10863_v1, %v9344_v17  ;;  %v3808_v35 = vmul.f32 %v10863_v1, %v9379_v31  ;;  %v3856_v21 = vmul.f32 %v10869_v58, %v9362_v30  ;;  %v2639_v1 = vpop.f32.mrb[7].mxu0 }
 0x449   :  { %v8274_v44 = vpack.c.bf16 %v3945_v63, %v3943_v50  ;;  %v3918_v10 = vmax.f32 %v3902_v9, 1e-06  ;;  %v3883_v2 = vadd.f32 %v3867_v19, %v9340_v49  ;;  %v3885_v13 = vadd.f32 %v3869_v43, %v9301_v46 }
 0x44a   :  { %v3932_v60 = vmul.f32 %v3916_v51, %v3916_v51  ;;  %v3822_v29 = vadd.f32 %v3806_v4, %v3772_v7  ;;  %v3824_v32 = vadd.f32 %v3808_v35, %v3774_v23  ;;  %v3858_v61 = vmul.f32 %v10869_v58, %v9386_v42 }
 0x44b   :  { %8275 = vmatpush1.bf16.xpose.msra.mxu0 %v8274_v44  ;;  %v3934_v8 = vmul.f32 %v3918_v10, %v3918_v10  ;;  %v3899_v5 = vmax.f32 %v3883_v2, 0.0  ;;  %v3901_v34 = vmax.f32 %v3885_v13, 0.0  ;;  %v3771_v50 = vmul.f32 %v10854_v24, %v9329_v53 }
 0x44c   :  { %v3948_v63 = vmul.f32 %v3932_v60, %v3916_v51  ;;  %v3872_v19 = vadd.f32 %v3856_v21, %v3822_v29  ;;  %v3874_v9 = vadd.f32 %v3858_v61, %v3824_v32  ;;  %v3773_v43 = vmul.f32 %v10854_v24, %v9355_v6 }
 0x44d   :  { %v3950_v26 = vmul.f32 %v3934_v8, %v3918_v10  ;;  %v3915_v7 = vmax.f32 %v3899_v5, 1e-06  ;;  %v3917_v23 = vmax.f32 %v3901_v34, 1e-06  ;;  %v3805_v58 = vmul.f32 %v10860_v36, %v9344_v17  ;;  %v12592_v8 = vld [vmem:[#allocation35_spill] sm:$0xff] }
 0x44e   :  { %v3888_v4 = vadd.f32 %v3872_v19, %v9400_v45  ;;  %v3890_v35 = vadd.f32 %v3874_v9, %v9398_v25  ;;  %v3807_v44 = vmul.f32 %v10860_v36, %v9379_v31  ;;  %v3855_v51 = vmul.f32 %v10866_v28, %v9362_v30 }
 0x44f   :  { %v8276_v21 = vpack.c.bf16 %v3950_v26, %v3948_v63  ;;  %v3931_v2 = vmul.f32 %v3915_v7, %v3915_v7  ;;  %v3933_v13 = vmul.f32 %v3917_v23, %v3917_v23  ;;  %v3821_v24 = vadd.f32 %v3805_v58, %v3771_v50 }
 0x450   :  { %v3904_v10 = vmax.f32 %v3888_v4, 0.0  ;;  %v3906_v5 = vmax.f32 %v3890_v35, 0.0  ;;  %v3823_v60 = vadd.f32 %v3807_v44, %v3773_v43  ;;  %v3857_v29 = vmul.f32 %v10866_v28, %v9386_v42 }
 0x451   :  { %8277 = vmatprep.subr.bf16.mxu0 %v8276_v21  ;;  %v3947_v32 = vmul.f32 %v3931_v2, %v3915_v7  ;;  %v3949_v61 = vmul.f32 %v3933_v13, %v3917_v23  ;;  %v3871_v1 = vadd.f32 %v3855_v51, %v3821_v24  ;;  %vm197_vm9 = vcmp.eq.s32.totalorder %v12592_v8, 0 }
 0x452   :  { %v3920_v36 = vmax.f32 %v3904_v10, 1e-06  ;;  %v3922_v34 = vmax.f32 %v3906_v5, 1e-06  ;;  %v3873_v19 = vadd.f32 %v3857_v29, %v3823_v60  ;;  %v12419_v26 = vmov 0.0  }
 0x453   :  { %v8278_v9 = vpack.c.bf16 %v3949_v61, %v3947_v32  ;;  %v3887_v63 = vadd.f32 %v3871_v1, %v9400_v45  ;;  %v10999_v50 = vsel %vm197_vm9, 1.0, %v12419_v26  ;;  %vm200_vm10 = vcmp.eq.s32.totalorder %v12592_v8, 1 }
 0x454   :  { %12593 = vst [vmem:[#allocation34_spill] sm:$0xff] %v10999_v50  ;;  %v3936_v43 = vmul.f32 %v3920_v36, %v3920_v36  ;;  %v3938_v28 = vmul.f32 %v3922_v34, %v3922_v34  ;;  %v3889_v7 = vadd.f32 %v3873_v19, %v9398_v25  ;;  %v565_v23 = vmul.f32 %v10999_v50, %v10948_v41 }
 0x455   :  { %8279 = vmatpush1.bf16.xpose.msra.mxu0 %v8278_v9  ;;  %v3903_v58 = vmax.f32 %v3887_v63, 0.0  ;;  %v11006_v4 = vsel %vm200_vm10, 1.0, %v12419_v26  ;;  %vm203_vm11 = vcmp.eq.s32.totalorder %v12592_v8, 2  ;;  %vm206_vm12 = vcmp.eq.s32.totalorder %v12592_v8, 3 }
 0x456   :  { %12594 = vst [vmem:[#allocation13_spill] sm:$0xff] %v11006_v4  ;;  %v3952_v35 = vmul.f32 %v3936_v43, %v3920_v36  ;;  %v3954_v44 = vmul.f32 %v3938_v28, %v3922_v34  ;;  %v3905_v51 = vmax.f32 %v3889_v7, 0.0  ;;  %v911_v21 = vmul.f32 %v11006_v4, %v10950_v40  ;;  %v2983_v2 = vpop.f32.mrb[6].mxu1  ;;  %v12611_v4 = vld [vmem:[#allocation24_spill] sm:$0xff] }
 0x457   :  { %v3919_v13 = vmax.f32 %v3903_v58, 1e-06  ;;  %v11013_v24 = vsel %vm203_vm11, 1.0, %v12419_v26  ;;  %v11016_v41 = vsel %vm206_vm12, 1.0, %v12419_v26  ;;  %vm209_vm13 = vcmp.eq.s32.totalorder %v12592_v8, 4  ;;  %v2985_v10 = vpop.f32.mrb[7].mxu1 }
 0x458   :  { %12595 = vst [vmem:[#allocation2_spill] sm:$0xff] %v11013_v24  ;;  %12596 = vst [vmem:[#allocation15_spill] sm:$0xff] %v11016_v41  ;;  %v8280_v5 = vpack.c.bf16 %v3954_v44, %v3952_v35  ;;  %v3921_v60 = vmax.f32 %v3905_v51, 1e-06  ;;  %v912_v29 = vadd.f32 %v911_v21, %v565_v23  ;;  %v1257_v32 = vmul.f32 %v11013_v24, %v10958_v3  ;;  %v12601_v35 = vld [vmem:[#allocation30_spill] sm:$0xff]  ;;  %v12602_v21 = vld [vmem:[#allocation11_spill] sm:$0xff] }
 0x459   :  { %v3935_v61 = vmul.f32 %v3919_v13, %v3919_v13  ;;  %v1603_v40 = vmul.f32 %v11016_v41, %v10960_v55  ;;  %v11024_v1 = vsel %vm209_vm13, 1.0, %v12419_v26  ;;  %vm212_vm14 = vcmp.eq.s32.totalorder %v12592_v8, 5  ;;  %v12609_v24 = vld [vmem:[#allocation22_spill] sm:$0xff] }
 0x45a   :  { %12597 = vst [vmem:[#allocation3_spill] sm:$0xff] %v11024_v1  ;;  %8281 = vmatprep.subr.bf16.mxu0 %v8280_v5  ;;  %v3937_v36 = vmul.f32 %v3921_v60, %v3921_v60  ;;  %v1258_v34 = vadd.f32 %v1257_v32, %v912_v29  ;;  %v1949_v19 = vmul.f32 %v11024_v1, %v10966_v11  ;;  %v11030_v9 = vsel %vm212_vm14, 1.0, %v12419_v26 }
 0x45b   :  { %12598 = vst [vmem:[#allocation17_spill] sm:$0xff] %v11030_v9  ;;  %v3951_v63 = vmul.f32 %v3935_v61, %v3919_v13  ;;  %vm215_vm15 = vcmp.eq.s32.totalorder %v12592_v8, 6  ;;  %vm218_vm1 = vcmp.eq.s32.totalorder %v12592_v8, 7  ;;  %v2295_v43 = vmul.f32 %v11030_v9, %v10968_v59 }
 0x45c   :  { %v3953_v3 = vmul.f32 %v3937_v36, %v3921_v60  ;;  %v1604_v55 = vadd.f32 %v1603_v40, %v1258_v34  ;;  %v11037_v28 = vsel %vm215_vm15, 1.0, %v12419_v26  ;;  %v11040_v7 = vsel %vm218_vm1, 1.0, %v12419_v26  ;;  %v8841_v34 = vld [vmem:[%s12289_s0 + $0x58] sm:$0x77] }
 0x45d   :  { %12599 = vst [vmem:[#allocation4_spill] sm:$0xff] %v11037_v28  ;;  %12600 = vst [vmem:[#allocation19_spill] sm:$0xff] %v11040_v7  ;;  %v2641_v58 = vmul.f32 %v11037_v28, %v10978_v12  ;;  %v4729_v44 = vrot.slane %v12601_v35, 4  ;;  %v2987_v51 = vmul.f32 %v11040_v7, %v2983_v2  ;;  %v4745_v13 = vrot.slane %v12602_v21, 4 }
 0x45e   :  { %v8282_v11 = vpack.c.bf16 %v3953_v3, %v3951_v63  ;;  %v1950_v23 = vadd.f32 %v1949_v19, %v1604_v55  ;;  %v4069_v32 = vstv %s4062_s12  ;;  %vm5809_vm9 = vcmask 523264  }
 0x45f   :  { %v4730_v10 = vadd.f32 %v4729_v44, %v12601_v35  ;;  %v4746_v60 = vadd.f32 %v4745_v13, %v12602_v21  ;;  %v4070_v19 = vsub.f32 %v8841_v34, %v4069_v32  ;;  %vm8853_vm10 = vmmov 0  }
 0x460   :  { %8283 = vmatpush1.bf16.xpose.msra.mxu0 %v8282_v11  ;;  %v2296_v8 = vadd.f32 %v2295_v43, %v1950_v23  ;;  %vm5901_vm11 = vcmask 261120   ;;  %vm7638_vm12 = vcmask 1041408   ;;  %vm7642_vm13 = vcmask 1045504  }
 0x461   :  { %s8563_s16 = spop %8562  ;;  %v4731_v2 = vrot.slane %v4730_v10, 2  ;;  %v4747_v29 = vrot.slane %v4746_v60, 2  ;;  %vm7640_vm14 = vcmask 1043456  }
 0x462   :  { %s4080_s17 = sadd.f32 0.0001, %s8563_s16  ;;  %s11047_s21 = spop %8564  ;;  %v2642_v59 = vadd.f32 %v2641_v58, %v2296_v8 }
 0x463   :  { %s4408_s22 = smul.f32 0.0013020834, %s11047_s21  ;;  %s8567_s24 = spop %8566  ;;  %v4732_v61 = vadd.f32 %v4731_v2, %v4730_v10  ;;  %v4748_v36 = vadd.f32 %v4747_v29, %v4746_v60 }
 0x464   :  { %v4081_v12 = vstv %s4080_s17  ;;  %v11051_v5 = vadd.f32 %v2987_v51, %v2642_v59 }
 0x465   :  { %8677 = vrcp.f32 %v4081_v12  ;;  %s4409_s23 = smul.f32 %s11047_s21, %s4408_s22  ;;  %v4733_v3 = vrot.slane %v4732_v61, 1  ;;  %v4749_v43 = vrot.slane %v4748_v36, 1 }
 0x466   :  { %12603 = vst [vmem:[#allocation5_spill] sm:$0xff] %v11051_v5 }
 0x467   :  { %s4410_s27 = ssub.f32 %s8567_s24, %s4409_s23  ;;  %4020 = vmatmul.mubr.f32.vlgmr.msra.gmra.mrb[10].mxu0 %v12507_v56  ;;  %v4734_v23 = vadd.f32 %v4733_v3, %v4732_v61  ;;  %v4750_v13 = vadd.f32 %v4749_v43, %v4748_v36  ;;  %v12604_v3 = vld [vmem:[#allocation16_spill] sm:$0xff]  ;;  %v12605_v43 = vld [vmem:[#allocation18_spill] sm:$0xff] }
 0x468   :  { %4711 = vmatprep.mubr.f32.mxu0 %v12507_v56 }
 0x469   :  { %s4413_s28 = smul.f32 0.0013037809, %s4410_s27 }
 0x46b   :  { %s4414_s25 = smax.f32 %s8849_s19, %s4413_s28 }
 0x46c   :  { %v4417_v40 = vstv %s4414_s25 }
 0x46d   :  { %8679 = vrsqrt.f32 %v4417_v40  ;;  %vm4420_vm2 = vcmp.eq.f32.partialorder %v4417_v40, inf  ;;  %vm4422_vm3 = vcmp.eq.f32.partialorder %v4417_v40, 0.0  ;;  %v4423_v61 = vand.u32 2147483648, %v4417_v40 }
 0x46f   :  { %v8678_v63 = vpop.eup %8677 }
 0x470   :  { %v4083_v55 = vmul.f32 %v8678_v63, %v4070_v19 }
 0x472   :  { %v7779_v11 = vclamps-f32 %v4083_v55, 20.0 }
 0x474   :  { %v4090_v58 = vrot.slane %v7779_v11, %v9235_v33  ;;  %v4094_v35 = vrot.slane %v7779_v11, %v9238_v37  ;;  %v4124_v44 = vrot.slane %v7779_v11, %v9241_v38  ;;  %v4128_v8 = vrot.slane %v7779_v11, %v9244_v39 }
 0x475   :  { %v4174_v51 = vrot.slane %v7779_v11, %v9247_v57  ;;  %v4178_v21 = vrot.slane %v7779_v11, %v9250_v0 }
 0x476   :  { %v11072_v59 = vrot.slane %v4090_v58, %v9235_v33  ;;  %v11075_v10 = vrot.slane %v4094_v35, %v9235_v33  ;;  %v11078_v12 = vrot.slane %v4124_v44, %v9241_v38  ;;  %v11081_v60 = vrot.slane %v4128_v8, %v9241_v38  ;;  %v12606_v58 = vld [vmem:[#allocation20_spill] sm:$0xff] }
 0x477   :  { %v8680_v2 = vpop.eup %8679  ;;  %v11084_v29 = vrot.slane %v4174_v51, %v9247_v57  ;;  %v11087_v32 = vrot.slane %v4178_v21, %v9247_v57 }
 0x478   :  { %v4419_v36 = vmul.f32 %v8680_v2, %v4417_v40  ;;  %v4106_v34 = vmul.f32 %v11075_v10, %v9229_v27  ;;  %v4108_v19 = vmul.f32 %v11075_v10, %v9159_v16  ;;  %v4140_v63 = vmul.f32 %v11081_v60, %v9164_v22 }
 0x479   :  { %v4142_v55 = vmul.f32 %v11081_v60, %v12604_v3  ;;  %v4190_v11 = vmul.f32 %v11087_v32, %v12605_v43  ;;  %v4192_v35 = vmul.f32 %v11087_v32, %v12606_v58  ;;  %v4105_v44 = vmul.f32 %v11072_v59, %v9229_v27 }
 0x47a   :  { %v4421_v8 = vsel %vm4420_vm2, %v4417_v40, %v4419_v36  ;;  %v4156_v51 = vadd.f32 %v4140_v63, %v4106_v34  ;;  %v4107_v21 = vmul.f32 %v11072_v59, %v9159_v16  ;;  %v4139_v2 = vmul.f32 %v11078_v12, %v9164_v22 }
 0x47b   :  { %v4424_v26 = vsel %vm4422_vm3, %v4423_v61, %v4421_v8  ;;  %v4158_v7 = vadd.f32 %v4142_v55, %v4108_v19  ;;  %v4141_v28 = vmul.f32 %v11078_v12, %v12604_v3  ;;  %v4189_v9 = vmul.f32 %v11084_v29, %v12605_v43  ;;  %v12607_v61 = vld [vmem:[#allocation37_spill] sm:$0xff]  ;;  %v12608_v55 = vld [vmem:[#allocation27_spill] sm:$0xff] }
 0x47c   :  { %8568 = vpush %v4424_v26  ;;  %v4206_v1 = vadd.f32 %v4190_v11, %v4156_v51  ;;  %v4155_v41 = vadd.f32 %v4139_v2, %v4105_v44  ;;  %v4191_v40 = vmul.f32 %v11084_v29, %v12606_v58  ;;  %v4110_v36 = vmul.f32 %v11075_v10, %v9188_v48  ;;  %v12610_v44 = vld [vmem:[#allocation33_spill] sm:$0xff] }
 0x47d   :  { %8570 = vpush %v4734_v23  ;;  %v4208_v34 = vadd.f32 %v4192_v35, %v4158_v7  ;;  %v4157_v63 = vadd.f32 %v4141_v28, %v4107_v21  ;;  %v4112_v19 = vmul.f32 %v11075_v10, %v12607_v61  ;;  %v4144_v8 = vmul.f32 %v11081_v60, %v12608_v55 }
 0x47e   :  { %8572 = vpush %v4750_v13  ;;  %v4222_v26 = vadd.f32 %v4206_v1, %v12609_v24  ;;  %v4205_v11 = vadd.f32 %v4189_v9, %v4155_v41  ;;  %v4146_v51 = vmul.f32 %v11081_v60, %v12610_v44  ;;  %v4194_v2 = vmul.f32 %v11087_v32, %v9196_v52 }
 0x47f   :  { %v4224_v23 = vadd.f32 %v4208_v34, %v12611_v4  ;;  %v4207_v7 = vadd.f32 %v4191_v40, %v4157_v63  ;;  %v4160_v28 = vadd.f32 %v4144_v8, %v4110_v36  ;;  %v4196_v35 = vmul.f32 %v11087_v32, %v9200_v54 }
 0x480   :  { %v4238_v21 = vmax.f32 %v4222_v26, 0.0  ;;  %v4221_v50 = vadd.f32 %v4205_v11, %v12609_v24  ;;  %v4162_v13 = vadd.f32 %v4146_v51, %v4112_v19  ;;  %v4109_v41 = vmul.f32 %v11072_v59, %v9188_v48 }
 0x481   :  { %v4240_v1 = vmax.f32 %v4224_v23, 0.0  ;;  %v4223_v9 = vadd.f32 %v4207_v7, %v12611_v4  ;;  %v4210_v5 = vadd.f32 %v4194_v2, %v4160_v28  ;;  %v4111_v58 = vmul.f32 %v11072_v59, %v12607_v61 }
 0x482   :  { %v4254_v34 = vmax.f32 %v4238_v21, 1e-06  ;;  %v4237_v40 = vmax.f32 %v4221_v50, 0.0  ;;  %v4212_v36 = vadd.f32 %v4196_v35, %v4162_v13  ;;  %v4143_v63 = vmul.f32 %v11078_v12, %v12608_v55 }
 0x483   :  { %v4256_v8 = vmax.f32 %v4240_v1, 1e-06  ;;  %v4239_v26 = vmax.f32 %v4223_v9, 0.0  ;;  %v4226_v19 = vadd.f32 %v4210_v5, %v9286_v14  ;;  %v4145_v11 = vmul.f32 %v11078_v12, %v12610_v44 }
 0x484   :  { %v4270_v51 = vmul.f32 %v4254_v34, %v4254_v34  ;;  %v4253_v23 = vmax.f32 %v4237_v40, 1e-06  ;;  %v4228_v2 = vadd.f32 %v4212_v36, %v9204_v47  ;;  %v4159_v7 = vadd.f32 %v4143_v63, %v4109_v41 }
 0x485   :  { %v4272_v28 = vmul.f32 %v4256_v8, %v4256_v8  ;;  %v4255_v4 = vmax.f32 %v4239_v26, 1e-06  ;;  %v4242_v21 = vmax.f32 %v4226_v19, 0.0  ;;  %v4161_v50 = vadd.f32 %v4145_v11, %v4111_v58 }
 0x486   :  { %v4286_v35 = vmul.f32 %v4270_v51, %v4254_v34  ;;  %v4269_v13 = vmul.f32 %v4253_v23, %v4253_v23  ;;  %v4244_v24 = vmax.f32 %v4228_v2, 0.0  ;;  %v4193_v1 = vmul.f32 %v11084_v29, %v9196_v52 }
 0x487   :  { %v4288_v9 = vmul.f32 %v4272_v28, %v4256_v8  ;;  %v4271_v5 = vmul.f32 %v4255_v4, %v4255_v4  ;;  %v4258_v55 = vmax.f32 %v4242_v21, 1e-06  ;;  %v4195_v44 = vmul.f32 %v11084_v29, %v9200_v54  ;;  %v12612_v21 = vld [vmem:[#allocation36_spill] sm:$0xff] }
 0x488   :  { %v4285_v40 = vmul.f32 %v4269_v13, %v4253_v23  ;;  %v4260_v61 = vmax.f32 %v4244_v24, 1e-06  ;;  %v4209_v36 = vadd.f32 %v4193_v1, %v4159_v7  ;;  %v4114_v41 = vmul.f32 %v11075_v10, %v9213_v62  ;;  %v12613_v1 = vld [vmem:[#allocation38_spill] sm:$0xff] }
 0x489   :  { %v8284_v63 = vpack.c.bf16 %v4288_v9, %v4286_v35  ;;  %v4287_v58 = vmul.f32 %v4271_v5, %v4255_v4  ;;  %v4274_v34 = vmul.f32 %v4258_v55, %v4258_v55  ;;  %v4211_v26 = vadd.f32 %v4195_v44, %v4161_v50 }
 0x48a   :  { %v4276_v19 = vmul.f32 %v4260_v61, %v4260_v61  ;;  %v4225_v11 = vadd.f32 %v4209_v36, %v9286_v14  ;;  %v4116_v8 = vmul.f32 %v11075_v10, %v9321_v18  ;;  %v4148_v51 = vmul.f32 %v11081_v60, %v9222_v20 }
 0x48b   :  { %8285 = vmatprep.subr.bf16.mxu1 %v8284_v63  ;;  %v8286_v23 = vpack.c.bf16 %v4287_v58, %v4285_v40  ;;  %v4290_v24 = vmul.f32 %v4274_v34, %v4258_v55  ;;  %v4227_v2 = vadd.f32 %v4211_v26, %v9204_v47  ;;  %v4150_v7 = vmul.f32 %v11081_v60, %v12502_v15 }
 0x48c   :  { %v4292_v4 = vmul.f32 %v4276_v19, %v4260_v61  ;;  %v4241_v28 = vmax.f32 %v4225_v11, 0.0  ;;  %v4164_v44 = vadd.f32 %v4148_v51, %v4114_v41  ;;  %v4198_v50 = vmul.f32 %v11087_v32, %v12612_v21 }
 0x48d   :  { %8287 = vmatpush1.bf16.xpose.msra.mxu1 %v8286_v23  ;;  %v4243_v35 = vmax.f32 %v4227_v2, 0.0  ;;  %v4166_v13 = vadd.f32 %v4150_v7, %v4116_v8  ;;  %v4200_v9 = vmul.f32 %v11087_v32, %v12613_v1  ;;  %v4113_v55 = vmul.f32 %v11072_v59, %v9213_v62 }
 0x48e   :  { %v8288_v5 = vpack.c.bf16 %v4292_v4, %v4290_v24  ;;  %v4257_v40 = vmax.f32 %v4241_v28, 1e-06  ;;  %v4214_v36 = vadd.f32 %v4198_v50, %v4164_v44  ;;  %v4115_v61 = vmul.f32 %v11072_v59, %v9321_v18 }
 0x48f   :  { %v4259_v63 = vmax.f32 %v4243_v35, 1e-06  ;;  %v4216_v41 = vadd.f32 %v4200_v9, %v4166_v13  ;;  %v4147_v58 = vmul.f32 %v11078_v12, %v9222_v20  ;;  %v4149_v34 = vmul.f32 %v11078_v12, %v12502_v15 }
 0x490   :  { %8289 = vmatprep.subr.bf16.mxu1 %v8288_v5  ;;  %v4273_v26 = vmul.f32 %v4257_v40, %v4257_v40  ;;  %v4230_v19 = vadd.f32 %v4214_v36, %v9340_v49  ;;  %v4197_v11 = vmul.f32 %v11084_v29, %v12612_v21  ;;  %v4199_v8 = vmul.f32 %v11084_v29, %v12613_v1 }
 0x491   :  { %v4275_v51 = vmul.f32 %v4259_v63, %v4259_v63  ;;  %v4232_v23 = vadd.f32 %v4216_v41, %v9301_v46  ;;  %v4163_v24 = vadd.f32 %v4147_v58, %v4113_v55  ;;  %v4165_v2 = vadd.f32 %v4149_v34, %v4115_v61 }
 0x492   :  { %v4289_v7 = vmul.f32 %v4273_v26, %v4257_v40  ;;  %v4246_v4 = vmax.f32 %v4230_v19, 0.0  ;;  %v4118_v28 = vmul.f32 %v11075_v10, %v9329_v53  ;;  %v4120_v44 = vmul.f32 %v11075_v10, %v9355_v6 }
 0x493   :  { %v4291_v50 = vmul.f32 %v4275_v51, %v4259_v63  ;;  %v4248_v35 = vmax.f32 %v4232_v23, 0.0  ;;  %v4213_v13 = vadd.f32 %v4197_v11, %v4163_v24  ;;  %v4215_v9 = vadd.f32 %v4199_v8, %v4165_v2 }
 0x494   :  { %v4262_v5 = vmax.f32 %v4246_v4, 1e-06  ;;  %v4152_v36 = vmul.f32 %v11081_v60, %v9344_v17  ;;  %v4154_v55 = vmul.f32 %v11081_v60, %v9379_v31  ;;  %v4202_v40 = vmul.f32 %v11087_v32, %v9362_v30 }
 0x495   :  { %v8290_v61 = vpack.c.bf16 %v4291_v50, %v4289_v7  ;;  %v4264_v41 = vmax.f32 %v4248_v35, 1e-06  ;;  %v4229_v58 = vadd.f32 %v4213_v13, %v9340_v49  ;;  %v4231_v10 = vadd.f32 %v4215_v9, %v9301_v46 }
 0x496   :  { %v4278_v63 = vmul.f32 %v4262_v5, %v4262_v5  ;;  %v4168_v34 = vadd.f32 %v4152_v36, %v4118_v28  ;;  %v4170_v26 = vadd.f32 %v4154_v55, %v4120_v44  ;;  %v4204_v19 = vmul.f32 %v11087_v32, %v9386_v42 }
 0x497   :  { %8291 = vmatpush1.bf16.xpose.msra.mxu1 %v8290_v61  ;;  %v4280_v11 = vmul.f32 %v4264_v41, %v4264_v41  ;;  %v4245_v8 = vmax.f32 %v4229_v58, 0.0  ;;  %v4247_v51 = vmax.f32 %v4231_v10, 0.0  ;;  %v4117_v60 = vmul.f32 %v11072_v59, %v9329_v53 }
 0x498   :  { %v4294_v23 = vmul.f32 %v4278_v63, %v4262_v5  ;;  %v4218_v24 = vadd.f32 %v4202_v40, %v4168_v34  ;;  %v4220_v2 = vadd.f32 %v4204_v19, %v4170_v26  ;;  %v4119_v7 = vmul.f32 %v11072_v59, %v9355_v6 }
 0x499   :  { %v4296_v4 = vmul.f32 %v4280_v11, %v4264_v41  ;;  %v4261_v50 = vmax.f32 %v4245_v8, 1e-06  ;;  %v4263_v28 = vmax.f32 %v4247_v51, 1e-06  ;;  %v4151_v44 = vmul.f32 %v11078_v12, %v9344_v17 }
 0x49a   :  { %v4234_v32 = vadd.f32 %v4218_v24, %v9400_v45  ;;  %v4236_v35 = vadd.f32 %v4220_v2, %v9398_v25  ;;  %v4153_v13 = vmul.f32 %v11078_v12, %v9379_v31  ;;  %v4201_v9 = vmul.f32 %v11084_v29, %v9362_v30 }
 0x49b   :  { %v8292_v5 = vpack.c.bf16 %v4296_v4, %v4294_v23  ;;  %v4277_v36 = vmul.f32 %v4261_v50, %v4261_v50  ;;  %v4279_v55 = vmul.f32 %v4263_v28, %v4263_v28  ;;  %v4167_v59 = vadd.f32 %v4151_v44, %v4117_v60 }
 0x49c   :  { %v4250_v40 = vmax.f32 %v4234_v32, 0.0  ;;  %v4252_v61 = vmax.f32 %v4236_v35, 0.0  ;;  %v4169_v41 = vadd.f32 %v4153_v13, %v4119_v7  ;;  %v4203_v58 = vmul.f32 %v11084_v29, %v9386_v42 }
 0x49d   :  { %8293 = vmatprep.subr.bf16.mxu1 %v8292_v5  ;;  %v4293_v10 = vmul.f32 %v4277_v36, %v4261_v50  ;;  %v4295_v63 = vmul.f32 %v4279_v55, %v4263_v28  ;;  %v4217_v34 = vadd.f32 %v4201_v9, %v4167_v59  ;;  %v12614_v5 = vld [vmem:[#allocation12_spill] sm:$0xff] }
 0x49e   :  { %v4266_v26 = vmax.f32 %v4250_v40, 1e-06  ;;  %v4268_v19 = vmax.f32 %v4252_v61, 1e-06  ;;  %v4219_v12 = vadd.f32 %v4203_v58, %v4169_v41  ;;  %v5091_v36 = vrot.slane %v12614_v5, 4  ;;  %v12615_v55 = vld [vmem:[#allocation32_spill] sm:$0xff] }
 0x49f   :  { %v8294_v11 = vpack.c.bf16 %v4295_v63, %v4293_v10  ;;  %v4233_v8 = vadd.f32 %v4217_v34, %v9400_v45  ;;  %v5075_v59 = vrot.slane %v12615_v55, 4  ;;  %v4415_v63 = vstv %s4408_s22 }
 0x4a0   :  { %v4282_v51 = vmul.f32 %v4266_v26, %v4266_v26  ;;  %v4284_v23 = vmul.f32 %v4268_v19, %v4268_v19  ;;  %v4235_v60 = vadd.f32 %v4219_v12, %v9398_v25  ;;  %v5092_v40 = vadd.f32 %v5091_v36, %v12614_v5  ;;  %v8842_v12 = vld [vmem:[%s12289_s0 + $0x60] sm:$0x77] }
 0x4a1   :  { %8295 = vmatpush1.bf16.xpose.msra.mxu1 %v8294_v11  ;;  %v4249_v24 = vmax.f32 %v4233_v8, 0.0  ;;  %v5076_v41 = vadd.f32 %v5075_v59, %v12615_v55  ;;  %v4416_v11 = vsub.f32 %v8842_v12, %v4415_v63 }
 0x4a2   :  { %v4298_v2 = vmul.f32 %v4282_v51, %v4266_v26  ;;  %v4300_v7 = vmul.f32 %v4284_v23, %v4268_v19  ;;  %v4251_v4 = vmax.f32 %v4235_v60, 0.0  ;;  %v5093_v58 = vrot.slane %v5092_v40, 2 }
 0x4a3   :  { %v4265_v29 = vmax.f32 %v4249_v24, 1e-06  ;;  %v5077_v10 = vrot.slane %v5076_v41, 2 }
 0x4a4   :  { %v8296_v44 = vpack.c.bf16 %v4300_v7, %v4298_v2  ;;  %v4267_v50 = vmax.f32 %v4251_v4, 1e-06  ;;  %v5094_v34 = vadd.f32 %v5093_v58, %v5092_v40 }
 0x4a5   :  { %v4281_v28 = vmul.f32 %v4265_v29, %v4265_v29  ;;  %v5078_v19 = vadd.f32 %v5077_v10, %v5076_v41 }
 0x4a6   :  { %8297 = vmatprep.subr.bf16.mxu1 %v8296_v44  ;;  %v4283_v32 = vmul.f32 %v4267_v50, %v4267_v50  ;;  %v5095_v51 = vrot.slane %v5094_v34, 1 }
 0x4a7   :  { %v4297_v35 = vmul.f32 %v4281_v28, %v4265_v29  ;;  %v5079_v60 = vrot.slane %v5078_v19, 1 }
 0x4a8   :  { %v4299_v13 = vmul.f32 %v4283_v32, %v4267_v50  ;;  %v5096_v2 = vadd.f32 %v5095_v51, %v5094_v34 }
 0x4a9   :  { %v5080_v32 = vadd.f32 %v5079_v60, %v5078_v19  ;;  %v12616_v19 = vld [vmem:[#allocation20_spill] sm:$0xff] }
 0x4aa   :  { %v8298_v9 = vpack.c.bf16 %v4299_v13, %v4297_v35 }
 0x4ac   :  { %8299 = vmatpush1.bf16.xpose.msra.mxu1 %v8298_v9 }
 0x4ad   :  { %s8569_s1 = spop %8568 }
 0x4ae   :  { %s4426_s30 = sadd.f32 0.0001, %s8569_s1  ;;  %s11204_s11 = spop %8570 }
 0x4af   :  { %s4754_s12 = smul.f32 0.0013020834, %s11204_s11  ;;  %s8573_s13 = spop %8572 }
 0x4b0   :  { %v4427_v61 = vstv %s4426_s30 }
 0x4b1   :  { %8681 = vrcp.f32 %v4427_v61  ;;  %s4755_s2 = smul.f32 %s11204_s11, %s4754_s12 }
 0x4b3   :  { %s4756_s3 = ssub.f32 %s8573_s13, %s4755_s2  ;;  %4366 = vmatmul.mubr.f32.vlgmr.msra.gmra.mrb[10].mxu1 %v12507_v56 }
 0x4b4   :  { %5057 = vmatprep.mubr.f32.mxu1 %v12507_v56 }
 0x4b5   :  { %s4759_s14 = smul.f32 0.0013037809, %s4756_s3 }
 0x4b7   :  { %s4760_s15 = smax.f32 %s8849_s19, %s4759_s14 }
 0x4b8   :  { %v4763_v26 = vstv %s4760_s15 }
 0x4b9   :  { %8683 = vrsqrt.f32 %v4763_v26  ;;  %vm4766_vm4 = vcmp.eq.f32.partialorder %v4763_v26, inf  ;;  %vm4768_vm5 = vcmp.eq.f32.partialorder %v4763_v26, 0.0  ;;  %v4769_v40 = vand.u32 2147483648, %v4763_v26 }
 0x4bb   :  { %v8682_v8 = vpop.eup %8681 }
 0x4bc   :  { %v4429_v23 = vmul.f32 %v8682_v8, %v4416_v11 }
 0x4be   :  { %v7781_v24 = vclamps-f32 %v4429_v23, 20.0 }
 0x4c0   :  { %v4436_v7 = vrot.slane %v7781_v24, %v9235_v33  ;;  %v4440_v4 = vrot.slane %v7781_v24, %v9238_v37  ;;  %v4470_v29 = vrot.slane %v7781_v24, %v9241_v38  ;;  %v4474_v44 = vrot.slane %v7781_v24, %v9244_v39 }
 0x4c1   :  { %v4520_v50 = vrot.slane %v7781_v24, %v9247_v57  ;;  %v4524_v28 = vrot.slane %v7781_v24, %v9250_v0 }
 0x4c2   :  { %v11227_v35 = vrot.slane %v4436_v7, %v9235_v33  ;;  %v11230_v13 = vrot.slane %v4440_v4, %v9235_v33  ;;  %v11233_v9 = vrot.slane %v4470_v29, %v9241_v38  ;;  %v11236_v5 = vrot.slane %v4474_v44, %v9241_v38 }
 0x4c3   :  { %v8684_v36 = vpop.eup %8683  ;;  %v11239_v55 = vrot.slane %v4520_v50, %v9247_v57  ;;  %v11242_v59 = vrot.slane %v4524_v28, %v9247_v57 }
 0x4c4   :  { %v4765_v61 = vmul.f32 %v8684_v36, %v4763_v26  ;;  %v4452_v41 = vmul.f32 %v11230_v13, %v9229_v27  ;;  %v4454_v58 = vmul.f32 %v11230_v13, %v9159_v16  ;;  %v4486_v10 = vmul.f32 %v11236_v5, %v9164_v22 }
 0x4c5   :  { %v4488_v63 = vmul.f32 %v11236_v5, %v12604_v3  ;;  %v4536_v34 = vmul.f32 %v11242_v59, %v12605_v43  ;;  %v4538_v12 = vmul.f32 %v11242_v59, %v12616_v19  ;;  %v4451_v11 = vmul.f32 %v11227_v35, %v9229_v27 }
 0x4c6   :  { %v4767_v8 = vsel %vm4766_vm4, %v4763_v26, %v4765_v61  ;;  %v4502_v51 = vadd.f32 %v4486_v10, %v4452_v41  ;;  %v4453_v23 = vmul.f32 %v11227_v35, %v9159_v16  ;;  %v4485_v60 = vmul.f32 %v11233_v9, %v9164_v22 }
 0x4c7   :  { %v4770_v24 = vsel %vm4768_vm5, %v4769_v40, %v4767_v8  ;;  %v4504_v7 = vadd.f32 %v4488_v63, %v4454_v58  ;;  %v4487_v4 = vmul.f32 %v11233_v9, %v12604_v3  ;;  %v4535_v29 = vmul.f32 %v11239_v55, %v12605_v43  ;;  %v12617_v40 = vld [vmem:[#allocation37_spill] sm:$0xff]  ;;  %v12618_v58 = vld [vmem:[#allocation27_spill] sm:$0xff]  ;;  %v12619_v63 = vld [vmem:[#allocation22_spill] sm:$0xff] }
 0x4c8   :  { %8574 = vpush %v4770_v24  ;;  %v4552_v44 = vadd.f32 %v4536_v34, %v4502_v51  ;;  %v4501_v50 = vadd.f32 %v4485_v60, %v4451_v11  ;;  %v4537_v26 = vmul.f32 %v11239_v55, %v12616_v19  ;;  %v4456_v28 = vmul.f32 %v11230_v13, %v9188_v48  ;;  %v12620_v11 = vld [vmem:[#allocation33_spill] sm:$0xff]  ;;  %v12621_v24 = vld [vmem:[#allocation24_spill] sm:$0xff] }
 0x4c9   :  { %8576 = vpush %v5080_v32  ;;  %v4554_v36 = vadd.f32 %v4538_v12, %v4504_v7  ;;  %v4503_v61 = vadd.f32 %v4487_v4, %v4453_v23  ;;  %v4458_v41 = vmul.f32 %v11230_v13, %v12617_v40  ;;  %v4490_v10 = vmul.f32 %v11236_v5, %v12618_v58 }
 0x4ca   :  { %8578 = vpush %v5096_v2  ;;  %v4568_v8 = vadd.f32 %v4552_v44, %v12619_v63  ;;  %v4551_v34 = vadd.f32 %v4535_v29, %v4501_v50  ;;  %v4492_v51 = vmul.f32 %v11236_v5, %v12620_v11  ;;  %v4540_v60 = vmul.f32 %v11242_v59, %v9196_v52 }
 0x4cb   :  { %v4570_v32 = vadd.f32 %v4554_v36, %v12621_v24  ;;  %v4553_v12 = vadd.f32 %v4537_v26, %v4503_v61  ;;  %v4506_v23 = vadd.f32 %v4490_v10, %v4456_v28  ;;  %v4542_v7 = vmul.f32 %v11242_v59, %v9200_v54 }
 0x4cc   :  { %v4584_v4 = vmax.f32 %v4568_v8, 0.0  ;;  %v4567_v19 = vadd.f32 %v4551_v34, %v12619_v63  ;;  %v4508_v2 = vadd.f32 %v4492_v51, %v4458_v41  ;;  %v4455_v29 = vmul.f32 %v11227_v35, %v9188_v48 }
 0x4cd   :  { %v4586_v44 = vmax.f32 %v4570_v32, 0.0  ;;  %v4569_v50 = vadd.f32 %v4553_v12, %v12621_v24  ;;  %v4556_v43 = vadd.f32 %v4540_v60, %v4506_v23  ;;  %v4457_v3 = vmul.f32 %v11227_v35, %v12617_v40 }
 0x4ce   :  { %v4600_v36 = vmax.f32 %v4584_v4, 1e-06  ;;  %v4583_v26 = vmax.f32 %v4567_v19, 0.0  ;;  %v4558_v28 = vadd.f32 %v4542_v7, %v4508_v2  ;;  %v4489_v61 = vmul.f32 %v11233_v9, %v12618_v58 }
 0x4cf   :  { %v4602_v10 = vmax.f32 %v4586_v44, 1e-06  ;;  %v4585_v8 = vmax.f32 %v4569_v50, 0.0  ;;  %v4572_v41 = vadd.f32 %v4556_v43, %v9286_v14  ;;  %v4491_v34 = vmul.f32 %v11233_v9, %v12620_v11 }
 0x4d0   :  { %v4616_v51 = vmul.f32 %v4600_v36, %v4600_v36  ;;  %v4599_v32 = vmax.f32 %v4583_v26, 1e-06  ;;  %v4574_v60 = vadd.f32 %v4558_v28, %v9204_v47  ;;  %v4505_v12 = vadd.f32 %v4489_v61, %v4455_v29 }
 0x4d1   :  { %v4618_v23 = vmul.f32 %v4602_v10, %v4602_v10  ;;  %v4601_v24 = vmax.f32 %v4585_v8, 1e-06  ;;  %v4588_v4 = vmax.f32 %v4572_v41, 0.0  ;;  %v4507_v19 = vadd.f32 %v4491_v34, %v4457_v3 }
 0x4d2   :  { %v4632_v7 = vmul.f32 %v4616_v51, %v4600_v36  ;;  %v4615_v2 = vmul.f32 %v4599_v32, %v4599_v32  ;;  %v4590_v63 = vmax.f32 %v4574_v60, 0.0  ;;  %v4539_v44 = vmul.f32 %v11239_v55, %v9196_v52 }
 0x4d3   :  { %v4634_v50 = vmul.f32 %v4618_v23, %v4602_v10  ;;  %v4617_v43 = vmul.f32 %v4601_v24, %v4601_v24  ;;  %v4604_v58 = vmax.f32 %v4588_v4, 1e-06  ;;  %v4541_v11 = vmul.f32 %v11239_v55, %v9200_v54 }
 0x4d4   :  { %v4631_v26 = vmul.f32 %v4615_v2, %v4599_v32  ;;  %v4606_v40 = vmax.f32 %v4590_v63, 1e-06  ;;  %v4555_v28 = vadd.f32 %v4539_v44, %v4505_v12  ;;  %v4460_v29 = vmul.f32 %v11230_v13, %v9213_v62 }
 0x4d5   :  { %v8300_v61 = vpack.c.bf16 %v4634_v50, %v4632_v7  ;;  %v4633_v3 = vmul.f32 %v4617_v43, %v4601_v24  ;;  %v4620_v36 = vmul.f32 %v4604_v58, %v4604_v58  ;;  %v4557_v8 = vadd.f32 %v4541_v11, %v4507_v19 }
 0x4d6   :  { %v4622_v41 = vmul.f32 %v4606_v40, %v4606_v40  ;;  %v4571_v34 = vadd.f32 %v4555_v28, %v9286_v14  ;;  %v4462_v10 = vmul.f32 %v11230_v13, %v9321_v18  ;;  %v4494_v51 = vmul.f32 %v11236_v5, %v9222_v20 }
 0x4d7   :  { %8301 = vmatprep.subr.bf16.mxu0 %v8300_v61  ;;  %v8302_v32 = vpack.c.bf16 %v4633_v3, %v4631_v26  ;;  %v4636_v63 = vmul.f32 %v4620_v36, %v4604_v58  ;;  %v4573_v60 = vadd.f32 %v4557_v8, %v9204_v47  ;;  %v4496_v12 = vmul.f32 %v11236_v5, %v12502_v15 }
 0x4d8   :  { %v4638_v24 = vmul.f32 %v4622_v41, %v4606_v40  ;;  %v4587_v23 = vmax.f32 %v4571_v34, 0.0  ;;  %v4510_v11 = vadd.f32 %v4494_v51, %v4460_v29  ;;  %v4544_v4 = vmul.f32 %v11242_v59, %v12612_v21 }
 0x4d9   :  { %8303 = vmatpush1.bf16.xpose.msra.mxu0 %v8302_v32  ;;  %v4589_v19 = vmax.f32 %v4573_v60, 0.0  ;;  %v4512_v7 = vadd.f32 %v4496_v12, %v4462_v10  ;;  %v4546_v2 = vmul.f32 %v11242_v59, %v12613_v1  ;;  %v4459_v58 = vmul.f32 %v11227_v35, %v9213_v62 }
 0x4da   :  { %v8304_v44 = vpack.c.bf16 %v4638_v24, %v4636_v63  ;;  %v4603_v50 = vmax.f32 %v4587_v23, 1e-06  ;;  %v4560_v43 = vadd.f32 %v4544_v4, %v4510_v11  ;;  %v4461_v40 = vmul.f32 %v11227_v35, %v9321_v18 }
 0x4db   :  { %v4605_v26 = vmax.f32 %v4589_v19, 1e-06  ;;  %v4562_v28 = vadd.f32 %v4546_v2, %v4512_v7  ;;  %v4493_v29 = vmul.f32 %v11233_v9, %v9222_v20  ;;  %v4495_v61 = vmul.f32 %v11233_v9, %v12502_v15 }
 0x4dc   :  { %8305 = vmatprep.subr.bf16.mxu0 %v8304_v44  ;;  %v4619_v3 = vmul.f32 %v4603_v50, %v4603_v50  ;;  %v4576_v36 = vadd.f32 %v4560_v43, %v9340_v49  ;;  %v4543_v8 = vmul.f32 %v11239_v55, %v12612_v21  ;;  %v4545_v41 = vmul.f32 %v11239_v55, %v12613_v1 }
 0x4dd   :  { %v4621_v34 = vmul.f32 %v4605_v26, %v4605_v26  ;;  %v4578_v10 = vadd.f32 %v4562_v28, %v9301_v46  ;;  %v4509_v51 = vadd.f32 %v4493_v29, %v4459_v58  ;;  %v4511_v32 = vadd.f32 %v4495_v61, %v4461_v40 }
 0x4de   :  { %v4635_v63 = vmul.f32 %v4619_v3, %v4603_v50  ;;  %v4592_v60 = vmax.f32 %v4576_v36, 0.0  ;;  %v4464_v12 = vmul.f32 %v11230_v13, %v9329_v53  ;;  %v4466_v24 = vmul.f32 %v11230_v13, %v9355_v6 }
 0x4df   :  { %v4637_v23 = vmul.f32 %v4621_v34, %v4605_v26  ;;  %v4594_v11 = vmax.f32 %v4578_v10, 0.0  ;;  %v4559_v4 = vadd.f32 %v4543_v8, %v4509_v51  ;;  %v4561_v19 = vadd.f32 %v4545_v41, %v4511_v32 }
 0x4e0   :  { %v4608_v7 = vmax.f32 %v4592_v60, 1e-06  ;;  %v4498_v2 = vmul.f32 %v11236_v5, %v9344_v17  ;;  %v4500_v58 = vmul.f32 %v11236_v5, %v9379_v31  ;;  %v4548_v44 = vmul.f32 %v11242_v59, %v9362_v30 }
 0x4e1   :  { %v8306_v50 = vpack.c.bf16 %v4637_v23, %v4635_v63  ;;  %v4610_v43 = vmax.f32 %v4594_v11, 1e-06  ;;  %v4575_v40 = vadd.f32 %v4559_v4, %v9340_v49  ;;  %v4577_v13 = vadd.f32 %v4561_v19, %v9301_v46 }
 0x4e2   :  { %v4624_v26 = vmul.f32 %v4608_v7, %v4608_v7  ;;  %v4514_v28 = vadd.f32 %v4498_v2, %v4464_v12  ;;  %v4516_v29 = vadd.f32 %v4500_v58, %v4466_v24  ;;  %v4550_v61 = vmul.f32 %v11242_v59, %v9386_v42 }
 0x4e3   :  { %8307 = vmatpush1.bf16.xpose.msra.mxu0 %v8306_v50  ;;  %v4626_v3 = vmul.f32 %v4610_v43, %v4610_v43  ;;  %v4591_v36 = vmax.f32 %v4575_v40, 0.0  ;;  %v4593_v8 = vmax.f32 %v4577_v13, 0.0  ;;  %v4463_v5 = vmul.f32 %v11227_v35, %v9329_v53 }
 0x4e4   :  { %v4640_v41 = vmul.f32 %v4624_v26, %v4608_v7  ;;  %v4564_v34 = vadd.f32 %v4548_v44, %v4514_v28  ;;  %v4566_v10 = vadd.f32 %v4550_v61, %v4516_v29  ;;  %v4465_v51 = vmul.f32 %v11227_v35, %v9355_v6 }
 0x4e5   :  { %v4642_v32 = vmul.f32 %v4626_v3, %v4610_v43  ;;  %v4607_v63 = vmax.f32 %v4591_v36, 1e-06  ;;  %v4609_v60 = vmax.f32 %v4593_v8, 1e-06  ;;  %v4497_v12 = vmul.f32 %v11233_v9, %v9344_v17 }
 0x4e6   :  { %v4580_v59 = vadd.f32 %v4564_v34, %v9400_v45  ;;  %v4582_v24 = vadd.f32 %v4566_v10, %v9398_v25  ;;  %v4499_v23 = vmul.f32 %v11233_v9, %v9379_v31  ;;  %v4547_v11 = vmul.f32 %v11239_v55, %v9362_v30 }
 0x4e7   :  { %v8308_v4 = vpack.c.bf16 %v4642_v32, %v4640_v41  ;;  %v4623_v19 = vmul.f32 %v4607_v63, %v4607_v63  ;;  %v4625_v7 = vmul.f32 %v4609_v60, %v4609_v60  ;;  %v4513_v35 = vadd.f32 %v4497_v12, %v4463_v5 }
 0x4e8   :  { %v4596_v2 = vmax.f32 %v4580_v59, 0.0  ;;  %v4598_v58 = vmax.f32 %v4582_v24, 0.0  ;;  %v4515_v44 = vadd.f32 %v4499_v23, %v4465_v51  ;;  %v4549_v50 = vmul.f32 %v11239_v55, %v9386_v42  ;;  %v5420_v24 = vpop.xlane.xlu1 %5419 }
 0x4e9   :  { %8309 = vmatprep.subr.bf16.mxu0 %v8308_v4  ;;  %v4639_v43 = vmul.f32 %v4623_v19, %v4607_v63  ;;  %v4641_v40 = vmul.f32 %v4625_v7, %v4609_v60  ;;  %v4563_v13 = vadd.f32 %v4547_v11, %v4513_v35  ;;  %v5421_v11 = vrot.slane %v5420_v24, 4  ;;  %v5436_v4 = vpop.xlane.xlu0 %5435 }
 0x4ea   :  { %v4612_v26 = vmax.f32 %v4596_v2, 1e-06  ;;  %v4614_v28 = vmax.f32 %v4598_v58, 1e-06  ;;  %v4565_v9 = vadd.f32 %v4549_v50, %v4515_v44  ;;  %v5437_v19 = vrot.slane %v5436_v4, 4 }
 0x4eb   :  { %v8310_v29 = vpack.c.bf16 %v4641_v40, %v4639_v43  ;;  %v4579_v61 = vadd.f32 %v4563_v13, %v9400_v45  ;;  %v5422_v7 = vadd.f32 %v5421_v11, %v5420_v24  ;;  %v4761_v50 = vstv %s4754_s12 }
 0x4ec   :  { %v4628_v3 = vmul.f32 %v4612_v26, %v4612_v26  ;;  %v4630_v36 = vmul.f32 %v4614_v28, %v4614_v28  ;;  %v4581_v8 = vadd.f32 %v4565_v9, %v9398_v25  ;;  %v5438_v2 = vadd.f32 %v5437_v19, %v5436_v4 }
 0x4ed   :  { %8311 = vmatpush1.bf16.xpose.msra.mxu0 %v8310_v29  ;;  %v4595_v5 = vmax.f32 %v4579_v61, 0.0  ;;  %v5423_v58 = vrot.slane %v5422_v7, 2 }
 0x4ee   :  { %v4644_v41 = vmul.f32 %v4628_v3, %v4612_v26  ;;  %v4646_v34 = vmul.f32 %v4630_v36, %v4614_v28  ;;  %v4597_v10 = vmax.f32 %v4581_v8, 0.0  ;;  %v5439_v44 = vrot.slane %v5438_v2, 2  ;;  %v8843_v26 = vld [vmem:[%s12289_s0 + $0x68] sm:$0x77] }
 0x4ef   :  { %v4611_v55 = vmax.f32 %v4595_v5, 1e-06  ;;  %v5424_v43 = vadd.f32 %v5423_v58, %v5422_v7  ;;  %v4762_v28 = vsub.f32 %v8843_v26, %v4761_v50  ;;  %v12622_v58 = vld [vmem:[#allocation16_spill] sm:$0xff]  ;;  %v12623_v50 = vld [vmem:[#allocation18_spill] sm:$0xff] }
 0x4f0   :  { %v8312_v51 = vpack.c.bf16 %v4646_v34, %v4644_v41  ;;  %v4613_v32 = vmax.f32 %v4597_v10, 1e-06  ;;  %v5440_v13 = vadd.f32 %v5439_v44, %v5438_v2 }
 0x4f1   :  { %v4627_v63 = vmul.f32 %v4611_v55, %v4611_v55  ;;  %v5425_v29 = vrot.slane %v5424_v43, 1 }
 0x4f2   :  { %8313 = vmatprep.subr.bf16.mxu0 %v8312_v51  ;;  %v4629_v60 = vmul.f32 %v4613_v32, %v4613_v32  ;;  %v5441_v3 = vrot.slane %v5440_v13, 1 }
 0x4f3   :  { %v4643_v12 = vmul.f32 %v4627_v63, %v4611_v55  ;;  %v5426_v8 = vadd.f32 %v5425_v29, %v5424_v43 }
 0x4f4   :  { %v4645_v59 = vmul.f32 %v4629_v60, %v4613_v32  ;;  %v5442_v32 = vadd.f32 %v5441_v3, %v5440_v13  ;;  %v12624_v13 = vld [vmem:[#allocation20_spill] sm:$0xff] }
 0x4f6   :  { %v8314_v23 = vpack.c.bf16 %v4645_v59, %v4643_v12 }
 0x4f8   :  { %8315 = vmatpush1.bf16.xpose.msra.mxu0 %v8314_v23 }
 0x4f9   :  { %s8575_s16 = spop %8574 }
 0x4fa   :  { %s4772_s17 = sadd.f32 0.0001, %s8575_s16  ;;  %s11357_s21 = spop %8576 }
 0x4fb   :  { %s5100_s22 = smul.f32 0.0013020834, %s11357_s21  ;;  %s8579_s24 = spop %8578 }
 0x4fc   :  { %v4773_v35 = vstv %s4772_s17 }
 0x4fd   :  { %8685 = vrcp.f32 %v4773_v35  ;;  %s5101_s23 = smul.f32 %s11357_s21, %s5100_s22 }
 0x4ff   :  { %s5102_s27 = ssub.f32 %s8579_s24, %s5101_s23  ;;  %4712 = vmatmul.mubr.f32.vlgmr.msra.gmra.mrb[12].mxu0 %v12507_v56  ;;  %s8855_s24 = smov 32  }
 0x500   :  { %5403 = vmatprep.mubr.f32.mxu0 %v12507_v56 }
 0x501   :  { %s5105_s28 = smul.f32 0.0013037809, %s5102_s27 }
 0x503   :  { %s5106_s25 = smax.f32 %s8849_s19, %s5105_s28 }
 0x504   :  { %v5109_v40 = vstv %s5106_s25 }
 0x505   :  { %8687 = vrsqrt.f32 %v5109_v40  ;;  %vm5112_vm0 = vcmp.eq.f32.partialorder %v5109_v40, inf  ;;  %vm5114_vm6 = vcmp.eq.f32.partialorder %v5109_v40, 0.0  ;;  %v5115_v4 = vand.u32 2147483648, %v5109_v40 }
 0x507   :  { %v8686_v9 = vpop.eup %8685 }
 0x508   :  { %v4775_v61 = vmul.f32 %v8686_v9, %v4762_v28 }
 0x50a   :  { %v7783_v36 = vclamps-f32 %v4775_v61, 20.0 }
 0x50c   :  { %v4782_v5 = vrot.slane %v7783_v36, %v9235_v33  ;;  %v4786_v41 = vrot.slane %v7783_v36, %v9238_v37  ;;  %v4816_v34 = vrot.slane %v7783_v36, %v9241_v38  ;;  %v4820_v10 = vrot.slane %v7783_v36, %v9244_v39 }
 0x50d   :  { %v4866_v55 = vrot.slane %v7783_v36, %v9247_v57  ;;  %v4870_v51 = vrot.slane %v7783_v36, %v9250_v0 }
 0x50e   :  { %v11378_v63 = vrot.slane %v4782_v5, %v9235_v33  ;;  %v11381_v60 = vrot.slane %v4786_v41, %v9235_v33  ;;  %v11384_v12 = vrot.slane %v4816_v34, %v9241_v38  ;;  %v11387_v59 = vrot.slane %v4820_v10, %v9241_v38 }
 0x50f   :  { %v8688_v24 = vpop.eup %8687  ;;  %v11390_v23 = vrot.slane %v4866_v55, %v9247_v57  ;;  %v11393_v11 = vrot.slane %v4870_v51, %v9247_v57 }
 0x510   :  { %v5111_v19 = vmul.f32 %v8688_v24, %v5109_v40  ;;  %v4798_v7 = vmul.f32 %v11381_v60, %v9229_v27  ;;  %v4800_v35 = vmul.f32 %v11381_v60, %v9159_v16  ;;  %v4832_v2 = vmul.f32 %v11387_v59, %v9164_v22 }
 0x511   :  { %v4834_v44 = vmul.f32 %v11387_v59, %v12622_v58  ;;  %v4882_v43 = vmul.f32 %v11393_v11, %v12623_v50  ;;  %v4884_v26 = vmul.f32 %v11393_v11, %v12624_v13  ;;  %v4797_v28 = vmul.f32 %v11378_v63, %v9229_v27 }
 0x512   :  { %v5113_v9 = vsel %vm5112_vm0, %v5109_v40, %v5111_v19  ;;  %v4848_v29 = vadd.f32 %v4832_v2, %v4798_v7  ;;  %v4799_v61 = vmul.f32 %v11378_v63, %v9159_v16  ;;  %v4831_v3 = vmul.f32 %v11384_v12, %v9164_v22 }
 0x513   :  { %v5116_v36 = vsel %vm5114_vm6, %v5115_v4, %v5113_v9  ;;  %v4850_v5 = vadd.f32 %v4834_v44, %v4800_v35  ;;  %v4833_v41 = vmul.f32 %v11384_v12, %v12622_v58  ;;  %v4881_v34 = vmul.f32 %v11390_v23, %v12623_v50  ;;  %v12625_v4 = vld [vmem:[#allocation37_spill] sm:$0xff]  ;;  %v12626_v35 = vld [vmem:[#allocation27_spill] sm:$0xff]  ;;  %v12627_v44 = vld [vmem:[#allocation22_spill] sm:$0xff] }
 0x514   :  { %8580 = vpush %v5116_v36  ;;  %v4898_v10 = vadd.f32 %v4882_v43, %v4848_v29  ;;  %v4847_v55 = vadd.f32 %v4831_v3, %v4797_v28  ;;  %v4883_v40 = vmul.f32 %v11390_v23, %v12624_v13  ;;  %v4802_v51 = vmul.f32 %v11381_v60, %v9188_v48  ;;  %v12628_v28 = vld [vmem:[#allocation33_spill] sm:$0xff]  ;;  %v12629_v36 = vld [vmem:[#allocation24_spill] sm:$0xff] }
 0x515   :  { %8582 = vpush %v5426_v8  ;;  %v4900_v24 = vadd.f32 %v4884_v26, %v4850_v5  ;;  %v4849_v19 = vadd.f32 %v4833_v41, %v4799_v61  ;;  %v4804_v7 = vmul.f32 %v11381_v60, %v12625_v4  ;;  %v4836_v2 = vmul.f32 %v11387_v59, %v12626_v35 }
 0x516   :  { %8584 = vpush %v5442_v32  ;;  %v4914_v9 = vadd.f32 %v4898_v10, %v12627_v44  ;;  %v4897_v43 = vadd.f32 %v4881_v34, %v4847_v55  ;;  %v4838_v29 = vmul.f32 %v11387_v59, %v12628_v28  ;;  %v4886_v3 = vmul.f32 %v11393_v11, %v9196_v52 }
 0x517   :  { %v4916_v8 = vadd.f32 %v4900_v24, %v12629_v36  ;;  %v4899_v26 = vadd.f32 %v4883_v40, %v4849_v19  ;;  %v4852_v61 = vadd.f32 %v4836_v2, %v4802_v51  ;;  %v4888_v5 = vmul.f32 %v11393_v11, %v9200_v54 }
 0x518   :  { %v4930_v41 = vmax.f32 %v4914_v9, 0.0  ;;  %v4913_v13 = vadd.f32 %v4897_v43, %v12627_v44  ;;  %v4854_v32 = vadd.f32 %v4838_v29, %v4804_v7  ;;  %v4801_v34 = vmul.f32 %v11378_v63, %v9188_v48 }
 0x519   :  { %v4932_v10 = vmax.f32 %v4916_v8, 0.0  ;;  %v4915_v55 = vadd.f32 %v4899_v26, %v12629_v36  ;;  %v4902_v50 = vadd.f32 %v4886_v3, %v4852_v61  ;;  %v4803_v58 = vmul.f32 %v11378_v63, %v12625_v4 }
 0x51a   :  { %v4946_v24 = vmax.f32 %v4930_v41, 1e-06  ;;  %v4929_v40 = vmax.f32 %v4913_v13, 0.0  ;;  %v4904_v51 = vadd.f32 %v4888_v5, %v4854_v32  ;;  %v4835_v19 = vmul.f32 %v11384_v12, %v12626_v35 }
 0x51b   :  { %v4948_v2 = vmax.f32 %v4932_v10, 1e-06  ;;  %v4931_v9 = vmax.f32 %v4915_v55, 0.0  ;;  %v4918_v7 = vadd.f32 %v4902_v50, %v9286_v14  ;;  %v4837_v43 = vmul.f32 %v11384_v12, %v12628_v28 }
 0x51c   :  { %v4962_v29 = vmul.f32 %v4946_v24, %v4946_v24  ;;  %v4945_v8 = vmax.f32 %v4929_v40, 1e-06  ;;  %v4920_v3 = vadd.f32 %v4904_v51, %v9204_v47  ;;  %v4851_v26 = vadd.f32 %v4835_v19, %v4801_v34 }
 0x51d   :  { %v4964_v61 = vmul.f32 %v4948_v2, %v4948_v2  ;;  %v4947_v36 = vmax.f32 %v4931_v9, 1e-06  ;;  %v4934_v41 = vmax.f32 %v4918_v7, 0.0  ;;  %v4853_v13 = vadd.f32 %v4837_v43, %v4803_v58 }
 0x51e   :  { %v4978_v5 = vmul.f32 %v4962_v29, %v4946_v24  ;;  %v4961_v32 = vmul.f32 %v4945_v8, %v4945_v8  ;;  %v4936_v44 = vmax.f32 %v4920_v3, 0.0  ;;  %v4885_v10 = vmul.f32 %v11390_v23, %v9196_v52 }
 0x51f   :  { %v4980_v55 = vmul.f32 %v4964_v61, %v4948_v2  ;;  %v4963_v50 = vmul.f32 %v4947_v36, %v4947_v36  ;;  %v4950_v35 = vmax.f32 %v4934_v41, 1e-06  ;;  %v4887_v28 = vmul.f32 %v11390_v23, %v9200_v54 }
 0x520   :  { %v4977_v40 = vmul.f32 %v4961_v32, %v4945_v8  ;;  %v4952_v4 = vmax.f32 %v4936_v44, 1e-06  ;;  %v4901_v51 = vadd.f32 %v4885_v10, %v4851_v26  ;;  %v4806_v34 = vmul.f32 %v11381_v60, %v9213_v62 }
 0x521   :  { %v8316_v19 = vpack.c.bf16 %v4980_v55, %v4978_v5  ;;  %v4979_v58 = vmul.f32 %v4963_v50, %v4947_v36  ;;  %v4966_v24 = vmul.f32 %v4950_v35, %v4950_v35  ;;  %v4903_v9 = vadd.f32 %v4887_v28, %v4853_v13 }
 0x522   :  { %v4968_v7 = vmul.f32 %v4952_v4, %v4952_v4  ;;  %v4917_v43 = vadd.f32 %v4901_v51, %v9286_v14  ;;  %v4808_v2 = vmul.f32 %v11381_v60, %v9321_v18  ;;  %v4840_v29 = vmul.f32 %v11387_v59, %v9222_v20 }
 0x523   :  { %8317 = vmatprep.subr.bf16.mxu1 %v8316_v19  ;;  %v8318_v8 = vpack.c.bf16 %v4979_v58, %v4977_v40  ;;  %v4982_v44 = vmul.f32 %v4966_v24, %v4950_v35  ;;  %v4919_v3 = vadd.f32 %v4903_v9, %v9204_v47  ;;  %v4842_v26 = vmul.f32 %v11387_v59, %v12502_v15 }
 0x524   :  { %v4984_v36 = vmul.f32 %v4968_v7, %v4952_v4  ;;  %v4933_v61 = vmax.f32 %v4917_v43, 0.0  ;;  %v4856_v28 = vadd.f32 %v4840_v29, %v4806_v34  ;;  %v4890_v41 = vmul.f32 %v11393_v11, %v12612_v21 }
 0x525   :  { %8319 = vmatpush1.bf16.xpose.msra.mxu1 %v8318_v8  ;;  %v4935_v13 = vmax.f32 %v4919_v3, 0.0  ;;  %v4858_v5 = vadd.f32 %v4842_v26, %v4808_v2  ;;  %v4892_v32 = vmul.f32 %v11393_v11, %v12613_v1  ;;  %v4805_v35 = vmul.f32 %v11378_v63, %v9213_v62 }
 0x526   :  { %v8320_v10 = vpack.c.bf16 %v4984_v36, %v4982_v44  ;;  %v4949_v55 = vmax.f32 %v4933_v61, 1e-06  ;;  %v4906_v50 = vadd.f32 %v4890_v41, %v4856_v28  ;;  %v4807_v4 = vmul.f32 %v11378_v63, %v9321_v18 }
 0x527   :  { %v4951_v40 = vmax.f32 %v4935_v13, 1e-06  ;;  %v4908_v51 = vadd.f32 %v4892_v32, %v4858_v5  ;;  %v4839_v34 = vmul.f32 %v11384_v12, %v9222_v20  ;;  %v4841_v19 = vmul.f32 %v11384_v12, %v12502_v15 }
 0x528   :  { %8321 = vmatprep.subr.bf16.mxu1 %v8320_v10  ;;  %v4965_v58 = vmul.f32 %v4949_v55, %v4949_v55  ;;  %v4922_v24 = vadd.f32 %v4906_v50, %v9340_v49  ;;  %v4889_v9 = vmul.f32 %v11390_v23, %v12612_v21  ;;  %v4891_v7 = vmul.f32 %v11390_v23, %v12613_v1 }
 0x529   :  { %v4967_v43 = vmul.f32 %v4951_v40, %v4951_v40  ;;  %v4924_v2 = vadd.f32 %v4908_v51, %v9301_v46  ;;  %v4855_v29 = vadd.f32 %v4839_v34, %v4805_v35  ;;  %v4857_v8 = vadd.f32 %v4841_v19, %v4807_v4 }
 0x52a   :  { %v4981_v44 = vmul.f32 %v4965_v58, %v4949_v55  ;;  %v4938_v3 = vmax.f32 %v4922_v24, 0.0  ;;  %v4810_v26 = vmul.f32 %v11381_v60, %v9329_v53  ;;  %v4812_v36 = vmul.f32 %v11381_v60, %v9355_v6 }
 0x52b   :  { %v4983_v61 = vmul.f32 %v4967_v43, %v4951_v40  ;;  %v4940_v28 = vmax.f32 %v4924_v2, 0.0  ;;  %v4905_v41 = vadd.f32 %v4889_v9, %v4855_v29  ;;  %v4907_v13 = vadd.f32 %v4891_v7, %v4857_v8 }
 0x52c   :  { %v4954_v5 = vmax.f32 %v4938_v3, 1e-06  ;;  %v4844_v32 = vmul.f32 %v11387_v59, %v9344_v17  ;;  %v4846_v35 = vmul.f32 %v11387_v59, %v9379_v31  ;;  %v4894_v10 = vmul.f32 %v11393_v11, %v9362_v30 }
 0x52d   :  { %v8322_v55 = vpack.c.bf16 %v4983_v61, %v4981_v44  ;;  %v4956_v50 = vmax.f32 %v4940_v28, 1e-06  ;;  %v4921_v4 = vadd.f32 %v4905_v41, %v9340_v49  ;;  %v4923_v60 = vadd.f32 %v4907_v13, %v9301_v46 }
 0x52e   :  { %v4970_v40 = vmul.f32 %v4954_v5, %v4954_v5  ;;  %v4860_v51 = vadd.f32 %v4844_v32, %v4810_v26  ;;  %v4862_v34 = vadd.f32 %v4846_v35, %v4812_v36  ;;  %v4896_v19 = vmul.f32 %v11393_v11, %v9386_v42 }
 0x52f   :  { %8323 = vmatpush1.bf16.xpose.msra.mxu1 %v8322_v55  ;;  %v4972_v58 = vmul.f32 %v4956_v50, %v4956_v50  ;;  %v4937_v24 = vmax.f32 %v4921_v4, 0.0  ;;  %v4939_v9 = vmax.f32 %v4923_v60, 0.0  ;;  %v4809_v59 = vmul.f32 %v11378_v63, %v9329_v53 }
 0x530   :  { %v4986_v7 = vmul.f32 %v4970_v40, %v4954_v5  ;;  %v4910_v43 = vadd.f32 %v4894_v10, %v4860_v51  ;;  %v4912_v2 = vadd.f32 %v4896_v19, %v4862_v34  ;;  %v4811_v29 = vmul.f32 %v11378_v63, %v9355_v6 }
 0x531   :  { %v4988_v8 = vmul.f32 %v4972_v58, %v4956_v50  ;;  %v4953_v44 = vmax.f32 %v4937_v24, 1e-06  ;;  %v4955_v3 = vmax.f32 %v4939_v9, 1e-06  ;;  %v4843_v26 = vmul.f32 %v11384_v12, %v9344_v17 }
 0x532   :  { %v4926_v11 = vadd.f32 %v4910_v43, %v9400_v45  ;;  %v4928_v36 = vadd.f32 %v4912_v2, %v9398_v25  ;;  %v4845_v61 = vmul.f32 %v11384_v12, %v9379_v31  ;;  %v4893_v28 = vmul.f32 %v11390_v23, %v9362_v30 }
 0x533   :  { %v8324_v41 = vpack.c.bf16 %v4988_v8, %v4986_v7  ;;  %v4969_v13 = vmul.f32 %v4953_v44, %v4953_v44  ;;  %v4971_v5 = vmul.f32 %v4955_v3, %v4955_v3  ;;  %v4859_v63 = vadd.f32 %v4843_v26, %v4809_v59 }
 0x534   :  { %v4942_v32 = vmax.f32 %v4926_v11, 0.0  ;;  %v4944_v35 = vmax.f32 %v4928_v36, 0.0  ;;  %v4861_v10 = vadd.f32 %v4845_v61, %v4811_v29  ;;  %v4895_v55 = vmul.f32 %v11390_v23, %v9386_v42 }
 0x535   :  { %8325 = vmatprep.subr.bf16.mxu1 %v8324_v41  ;;  %v4985_v50 = vmul.f32 %v4969_v13, %v4953_v44  ;;  %v4987_v4 = vmul.f32 %v4971_v5, %v4955_v3  ;;  %v4909_v60 = vadd.f32 %v4893_v28, %v4859_v63  ;;  %v5107_v28 = vstv %s5100_s22  ;;  %v8844_v13 = vld [vmem:[%s12289_s0 + $0x70] sm:$0x77] }
 0x536   :  { %v4958_v40 = vmax.f32 %v4942_v32, 1e-06  ;;  %v4960_v51 = vmax.f32 %v4944_v35, 1e-06  ;;  %v4911_v12 = vadd.f32 %v4895_v55, %v4861_v10  ;;  %v5108_v5 = vsub.f32 %v8844_v13, %v5107_v28 }
 0x537   :  { %v8326_v34 = vpack.c.bf16 %v4987_v4, %v4985_v50  ;;  %v4925_v19 = vadd.f32 %v4909_v60, %v9400_v45  ;;  %v12630_v60 = vld [vmem:[#allocation5_spill] sm:$0xff] }
 0x538   :  { %v4974_v58 = vmul.f32 %v4958_v40, %v4958_v40  ;;  %v4976_v24 = vmul.f32 %v4960_v51, %v4960_v51  ;;  %v4927_v9 = vadd.f32 %v4911_v12, %v9398_v25 }
 0x539   :  { %8327 = vmatpush1.bf16.xpose.msra.mxu1 %v8326_v34  ;;  %v4941_v59 = vmax.f32 %v4925_v19, 0.0 }
 0x53a   :  { %v4990_v7 = vmul.f32 %v4974_v58, %v4958_v40  ;;  %v4992_v43 = vmul.f32 %v4976_v24, %v4960_v51  ;;  %v4943_v2 = vmax.f32 %v4927_v9, 0.0 }
 0x53b   :  { %v4957_v23 = vmax.f32 %v4941_v59, 1e-06 }
 0x53c   :  { %v8328_v29 = vpack.c.bf16 %v4992_v43, %v4990_v7  ;;  %v4959_v8 = vmax.f32 %v4943_v2, 1e-06 }
 0x53d   :  { %v4973_v44 = vmul.f32 %v4957_v23, %v4957_v23 }
 0x53e   :  { %8329 = vmatprep.subr.bf16.mxu1 %v8328_v29  ;;  %v4975_v3 = vmul.f32 %v4959_v8, %v4959_v8 }
 0x53f   :  { %v4989_v26 = vmul.f32 %v4973_v44, %v4957_v23 }
 0x540   :  { %v4991_v11 = vmul.f32 %v4975_v3, %v4959_v8  ;;  %v12631_v8 = vld [vmem:[#allocation16_spill] sm:$0xff]  ;;  %v12632_v3 = vld [vmem:[#allocation18_spill] sm:$0xff] }
 0x542   :  { %v8330_v36 = vpack.c.bf16 %v4991_v11, %v4989_v26  ;;  %v12633_v11 = vld [vmem:[#allocation20_spill] sm:$0xff] }
 0x544   :  { %8331 = vmatpush1.bf16.xpose.msra.mxu1 %v8330_v36 }
 0x545   :  { %s8581_s1 = spop %8580 }
 0x546   :  { %s5118_s30 = sadd.f32 0.0001, %s8581_s1  ;;  %s11508_s11 = spop %8582 }
 0x547   :  { %s5446_s12 = smul.f32 0.0013020834, %s11508_s11  ;;  %s8585_s13 = spop %8584 }
 0x548   :  { %v5119_v61 = vstv %s5118_s30 }
 0x549   :  { %8689 = vrcp.f32 %v5119_v61  ;;  %s5447_s2 = smul.f32 %s11508_s11, %s5446_s12 }
 0x54b   :  { %s5448_s3 = ssub.f32 %s8585_s13, %s5447_s2  ;;  %5058 = vmatmul.mubr.f32.vlgmr.msra.gmra.mrb[12].mxu1 %v12507_v56 }
 0x54c   :  { %5749 = vmatprep.mubr.f32.mxu1 %v12507_v56 }
 0x54d   :  { %s5451_s14 = smul.f32 0.0013037809, %s5448_s3 }
 0x54f   :  { %s5452_s15 = smax.f32 %s8849_s19, %s5451_s14 }
 0x550   :  { %v5455_v41 = vstv %s5452_s15 }
 0x551   :  { %8691 = vrsqrt.f32 %v5455_v41  ;;  %vm5458_vm7 = vcmp.eq.f32.partialorder %v5455_v41, inf  ;;  %vm5460_vm8 = vcmp.eq.f32.partialorder %v5455_v41, 0.0  ;;  %v5461_v7 = vand.u32 2147483648, %v5455_v41 }
 0x552   :  { %8693 = vlog2.f32 %v12630_v60 }
 0x553   :  { %v8690_v63 = vpop.eup %8689 }
 0x554   :  { %v5121_v32 = vmul.f32 %v8690_v63, %v5108_v5 }
 0x556   :  { %v7785_v35 = vclamps-f32 %v5121_v32, 20.0 }
 0x558   :  { %v5128_v10 = vrot.slane %v7785_v35, %v9235_v33  ;;  %v5132_v55 = vrot.slane %v7785_v35, %v9238_v37  ;;  %v5162_v50 = vrot.slane %v7785_v35, %v9241_v38  ;;  %v5166_v4 = vrot.slane %v7785_v35, %v9244_v39 }
 0x559   :  { %v5212_v40 = vrot.slane %v7785_v35, %v9247_v57  ;;  %v5216_v51 = vrot.slane %v7785_v35, %v9250_v0 }
 0x55a   :  { %v11530_v12 = vrot.slane %v5128_v10, %v9235_v33  ;;  %v11533_v34 = vrot.slane %v5132_v55, %v9235_v33  ;;  %v11536_v19 = vrot.slane %v5162_v50, %v9241_v38  ;;  %v11539_v58 = vrot.slane %v5166_v4, %v9241_v38 }
 0x55b   :  { %v8692_v24 = vpop.eup %8691  ;;  %v11542_v9 = vrot.slane %v5212_v40, %v9247_v57  ;;  %v11545_v59 = vrot.slane %v5216_v51, %v9247_v57 }
 0x55c   :  { %v5457_v43 = vmul.f32 %v8692_v24, %v5455_v41  ;;  %v5144_v2 = vmul.f32 %v11533_v34, %v9229_v27  ;;  %v5146_v23 = vmul.f32 %v11533_v34, %v9159_v16  ;;  %v5178_v29 = vmul.f32 %v11539_v58, %v9164_v22  ;;  %v12634_v24 = vld [vmem:[#allocation37_spill] sm:$0xff] }
 0x55d   :  { %v5180_v44 = vmul.f32 %v11539_v58, %v12631_v8  ;;  %v5228_v26 = vmul.f32 %v11545_v59, %v12632_v3  ;;  %v5230_v36 = vmul.f32 %v11545_v59, %v12633_v11  ;;  %v5143_v61 = vmul.f32 %v11530_v12, %v9229_v27 }
 0x55e   :  { %v5459_v28 = vsel %vm5458_vm7, %v5455_v41, %v5457_v43  ;;  %v5194_v13 = vadd.f32 %v5178_v29, %v5144_v2  ;;  %v5145_v5 = vmul.f32 %v11530_v12, %v9159_v16  ;;  %v5177_v63 = vmul.f32 %v11536_v19, %v9164_v22  ;;  %v12635_v43 = vld [vmem:[#allocation27_spill] sm:$0xff] }
 0x55f   :  { %v5462_v32 = vsel %vm5460_vm8, %v5461_v7, %v5459_v28  ;;  %v5196_v35 = vadd.f32 %v5180_v44, %v5146_v23  ;;  %v5179_v10 = vmul.f32 %v11536_v19, %v12631_v8  ;;  %v5227_v55 = vmul.f32 %v11542_v9, %v12632_v3  ;;  %v12636_v23 = vld [vmem:[#allocation22_spill] sm:$0xff]  ;;  %v12637_v28 = vld [vmem:[#allocation33_spill] sm:$0xff] }
 0x560   :  { %8586 = vpush %v5462_v32  ;;  %v5244_v50 = vadd.f32 %v5228_v26, %v5194_v13  ;;  %v5193_v4 = vadd.f32 %v5177_v63, %v5143_v61  ;;  %v5229_v41 = vmul.f32 %v11542_v9, %v12633_v11  ;;  %v5148_v60 = vmul.f32 %v11533_v34, %v9188_v48  ;;  %v11583_v13 = vpop.eup %8693  ;;  %v12638_v63 = vld [vmem:[#allocation24_spill] sm:$0xff] }
 0x561   :  { %v5246_v40 = vadd.f32 %v5230_v36, %v5196_v35  ;;  %v5195_v51 = vadd.f32 %v5179_v10, %v5145_v5  ;;  %v5150_v7 = vmul.f32 %v11533_v34, %v12634_v24  ;;  %v5182_v2 = vmul.f32 %v11539_v58, %v12635_v43 }
 0x562   :  { %v5260_v29 = vadd.f32 %v5244_v50, %v12636_v23  ;;  %v5243_v44 = vadd.f32 %v5227_v55, %v5193_v4  ;;  %v5184_v26 = vmul.f32 %v11539_v58, %v12637_v28  ;;  %v5232_v61 = vmul.f32 %v11545_v59, %v9196_v52 }
 0x563   :  { %v5262_v36 = vadd.f32 %v5246_v40, %v12638_v63  ;;  %v5245_v5 = vadd.f32 %v5229_v41, %v5195_v51  ;;  %v5198_v32 = vadd.f32 %v5182_v2, %v5148_v60  ;;  %v5234_v35 = vmul.f32 %v11545_v59, %v9200_v54 }
 0x564   :  { %v5276_v10 = vmax.f32 %v5260_v29, 0.0  ;;  %v5259_v11 = vadd.f32 %v5243_v44, %v12636_v23  ;;  %v5200_v50 = vadd.f32 %v5184_v26, %v5150_v7  ;;  %v5147_v55 = vmul.f32 %v11530_v12, %v9188_v48 }
 0x565   :  { %v5278_v4 = vmax.f32 %v5262_v36, 0.0  ;;  %v5261_v3 = vadd.f32 %v5245_v5, %v12638_v63  ;;  %v5248_v8 = vadd.f32 %v5232_v61, %v5198_v32  ;;  %v5149_v22 = vmul.f32 %v11530_v12, %v12634_v24 }
 0x566   :  { %v5292_v40 = vmax.f32 %v5276_v10, 1e-06  ;;  %v5275_v41 = vmax.f32 %v5259_v11, 0.0  ;;  %v5250_v60 = vadd.f32 %v5234_v35, %v5200_v50  ;;  %v5181_v51 = vmul.f32 %v11536_v19, %v12635_v43 }
 0x567   :  { %v5294_v2 = vmax.f32 %v5278_v4, 1e-06  ;;  %v5277_v29 = vmax.f32 %v5261_v3, 0.0  ;;  %v5264_v7 = vadd.f32 %v5248_v8, %v9286_v14  ;;  %v5183_v44 = vmul.f32 %v11536_v19, %v12637_v28 }
 0x568   :  { %v5308_v26 = vmul.f32 %v5292_v40, %v5292_v40  ;;  %v5291_v36 = vmax.f32 %v5275_v41, 1e-06  ;;  %v5266_v61 = vadd.f32 %v5250_v60, %v9204_v47  ;;  %v5197_v5 = vadd.f32 %v5181_v51, %v5147_v55  ;;  %v11604_v41 = vpop.f32.mrb[8].mxu0  ;;  %v11606_v60 = vpop.f32.mrb[8].mxu1 }
 0x569   :  { %v5310_v32 = vmul.f32 %v5294_v2, %v5294_v2  ;;  %v5293_v63 = vmax.f32 %v5277_v29, 1e-06  ;;  %v5280_v10 = vmax.f32 %v5264_v7, 0.0  ;;  %v5199_v11 = vadd.f32 %v5183_v44, %v5149_v22  ;;  %v3677_v7 = vpop.f32.mrb[9].mxu1 }
 0x56a   :  { %v5324_v35 = vmul.f32 %v5308_v26, %v5292_v40  ;;  %v5307_v50 = vmul.f32 %v5291_v36, %v5291_v36  ;;  %v5282_v23 = vmax.f32 %v5266_v61, 0.0  ;;  %v5231_v3 = vmul.f32 %v11542_v9, %v9196_v52  ;;  %v3331_v40 = vpop.f32.mrb[9].mxu0 }
 0x56b   :  { %v5326_v4 = vmul.f32 %v5310_v32, %v5294_v2  ;;  %v5309_v8 = vmul.f32 %v5293_v63, %v5293_v63  ;;  %v5296_v43 = vmax.f32 %v5280_v10, 1e-06  ;;  %v5233_v28 = vmul.f32 %v11542_v9, %v9200_v54  ;;  %v11610_v32 = vpop.f32.mrb[10].mxu0 }
 0x56c   :  { %v5323_v55 = vmul.f32 %v5307_v50, %v5291_v36  ;;  %v5298_v51 = vmax.f32 %v5282_v23, 1e-06  ;;  %v5247_v29 = vadd.f32 %v5231_v3, %v5197_v5  ;;  %v5152_v22 = vmul.f32 %v11533_v34, %v9213_v62  ;;  %v4023_v36 = vpop.f32.mrb[11].mxu0 }
 0x56d   :  { %v8332_v44 = vpack.c.bf16 %v5326_v4, %v5324_v35  ;;  %v5325_v26 = vmul.f32 %v5309_v8, %v5293_v63  ;;  %v5312_v2 = vmul.f32 %v5296_v43, %v5296_v43  ;;  %v5249_v61 = vadd.f32 %v5233_v28, %v5199_v11 }
 0x56e   :  { %v5314_v10 = vmul.f32 %v5298_v51, %v5298_v51  ;;  %v5263_v54 = vadd.f32 %v5247_v29, %v9286_v14  ;;  %v5154_v52 = vmul.f32 %v11533_v34, %v9321_v18  ;;  %v5186_v23 = vmul.f32 %v11539_v58, %v9222_v20 }
 0x56f   :  { %8333 = vmatprep.subr.bf16.mxu0 %v8332_v44  ;;  %v8334_v5 = vpack.c.bf16 %v5325_v26, %v5323_v55  ;;  %v5328_v50 = vmul.f32 %v5312_v2, %v5296_v43  ;;  %v5265_v35 = vadd.f32 %v5249_v61, %v9204_v47  ;;  %v5188_v28 = vmul.f32 %v11539_v58, %v12502_v15 }
 0x570   :  { %v5330_v63 = vmul.f32 %v5314_v10, %v5298_v51  ;;  %v5279_v11 = vmax.f32 %v5263_v54, 0.0  ;;  %v5202_v3 = vadd.f32 %v5186_v23, %v5152_v22  ;;  %v5236_v4 = vmul.f32 %v11545_v59, %v12612_v21 }
 0x571   :  { %8335 = vmatpush1.bf16.xpose.msra.mxu0 %v8334_v5  ;;  %v5281_v8 = vmax.f32 %v5265_v35, 0.0  ;;  %v5204_v29 = vadd.f32 %v5188_v28, %v5154_v52  ;;  %v5238_v40 = vmul.f32 %v11545_v59, %v12613_v1  ;;  %v5151_v43 = vmul.f32 %v11530_v12, %v9213_v62 }
 0x572   :  { %v8336_v55 = vpack.c.bf16 %v5330_v63, %v5328_v50  ;;  %v5295_v7 = vmax.f32 %v5279_v11, 1e-06  ;;  %v5252_v44 = vadd.f32 %v5236_v4, %v5202_v3  ;;  %v5153_v51 = vmul.f32 %v11530_v12, %v9321_v18 }
 0x573   :  { %v5297_v54 = vmax.f32 %v5281_v8, 1e-06  ;;  %v5254_v22 = vadd.f32 %v5238_v40, %v5204_v29  ;;  %v5185_v26 = vmul.f32 %v11536_v19, %v9222_v20  ;;  %v5187_v52 = vmul.f32 %v11536_v19, %v12502_v15 }
 0x574   :  { %8337 = vmatprep.subr.bf16.mxu0 %v8336_v55  ;;  %v5311_v2 = vmul.f32 %v5295_v7, %v5295_v7  ;;  %v5268_v61 = vadd.f32 %v5252_v44, %v9340_v49  ;;  %v5235_v10 = vmul.f32 %v11542_v9, %v12612_v21  ;;  %v5237_v23 = vmul.f32 %v11542_v9, %v12613_v1 }
 0x575   :  { %v5313_v36 = vmul.f32 %v5297_v54, %v5297_v54  ;;  %v5270_v5 = vadd.f32 %v5254_v22, %v9301_v46  ;;  %v5201_v50 = vadd.f32 %v5185_v26, %v5151_v43  ;;  %v5203_v35 = vadd.f32 %v5187_v52, %v5153_v51 }
 0x576   :  { %v5327_v28 = vmul.f32 %v5311_v2, %v5295_v7  ;;  %v5284_v63 = vmax.f32 %v5268_v61, 0.0  ;;  %v5156_v11 = vmul.f32 %v11533_v34, %v9329_v53  ;;  %v5158_v3 = vmul.f32 %v11533_v34, %v9355_v6 }
 0x577   :  { %v5329_v4 = vmul.f32 %v5313_v36, %v5297_v54  ;;  %v5286_v8 = vmax.f32 %v5270_v5, 0.0  ;;  %v5251_v29 = vadd.f32 %v5235_v10, %v5201_v50  ;;  %v5253_v40 = vadd.f32 %v5237_v23, %v5203_v35 }
 0x578   :  { %v5300_v55 = vmax.f32 %v5284_v63, 1e-06  ;;  %v5190_v44 = vmul.f32 %v11539_v58, %v9344_v17  ;;  %v5192_v43 = vmul.f32 %v11539_v58, %v9379_v31  ;;  %v5240_v7 = vmul.f32 %v11545_v59, %v9362_v30 }
 0x579   :  { %v8338_v51 = vpack.c.bf16 %v5329_v4, %v5327_v28  ;;  %v5302_v22 = vmax.f32 %v5286_v8, 1e-06  ;;  %v5267_v26 = vadd.f32 %v5251_v29, %v9340_v49  ;;  %v5269_v34 = vadd.f32 %v5253_v40, %v9301_v46 }
 0x57a   :  { %v5316_v54 = vmul.f32 %v5300_v55, %v5300_v55  ;;  %v5206_v52 = vadd.f32 %v5190_v44, %v5156_v11  ;;  %v5208_v2 = vadd.f32 %v5192_v43, %v5158_v3  ;;  %v5242_v61 = vmul.f32 %v11545_v59, %v9386_v42 }
 0x57b   :  { %8339 = vmatpush1.bf16.xpose.msra.mxu0 %v8338_v51  ;;  %v5318_v10 = vmul.f32 %v5302_v22, %v5302_v22  ;;  %v5283_v23 = vmax.f32 %v5267_v26, 0.0  ;;  %v5285_v36 = vmax.f32 %v5269_v34, 0.0  ;;  %v5155_v58 = vmul.f32 %v11530_v12, %v9329_v53 }
 0x57c   :  { %v5332_v5 = vmul.f32 %v5316_v54, %v5300_v55  ;;  %v5256_v50 = vadd.f32 %v5240_v7, %v5206_v52  ;;  %v5258_v35 = vadd.f32 %v5242_v61, %v5208_v2  ;;  %v5157_v28 = vmul.f32 %v11530_v12, %v9355_v6 }
 0x57d   :  { %v5334_v63 = vmul.f32 %v5318_v10, %v5302_v22  ;;  %v5299_v4 = vmax.f32 %v5283_v23, 1e-06  ;;  %v5301_v11 = vmax.f32 %v5285_v36, 1e-06  ;;  %v5189_v3 = vmul.f32 %v11536_v19, %v9344_v17 }
 0x57e   :  { %v5272_v59 = vadd.f32 %v5256_v50, %v9400_v45  ;;  %v5274_v8 = vadd.f32 %v5258_v35, %v9398_v25  ;;  %v5191_v29 = vmul.f32 %v11536_v19, %v9379_v31  ;;  %v5239_v40 = vmul.f32 %v11542_v9, %v9362_v30  ;;  %v12639_v50 = vld [vmem:[#allocation34_spill] sm:$0xff] }
 0x57f   :  { %v8340_v55 = vpack.c.bf16 %v5334_v63, %v5332_v5  ;;  %v5315_v44 = vmul.f32 %v5299_v4, %v5299_v4  ;;  %v5317_v43 = vmul.f32 %v5301_v11, %v5301_v11  ;;  %v5205_v12 = vadd.f32 %v5189_v3, %v5155_v58 }
 0x580   :  { %v5288_v7 = vmax.f32 %v5272_v59, 0.0  ;;  %v5290_v51 = vmax.f32 %v5274_v8, 0.0  ;;  %v5207_v22 = vadd.f32 %v5191_v29, %v5157_v28  ;;  %v5241_v26 = vmul.f32 %v11542_v9, %v9386_v42  ;;  %v12640_v9 = vld [vmem:[#allocation13_spill] sm:$0xff] }
 0x581   :  { %8341 = vmatprep.subr.bf16.mxu0 %v8340_v55  ;;  %v5331_v34 = vmul.f32 %v5315_v44, %v5299_v4  ;;  %v5333_v54 = vmul.f32 %v5317_v43, %v5301_v11  ;;  %v5255_v52 = vadd.f32 %v5239_v40, %v5205_v12  ;;  %v3333_v35 = vmul.f32 %v12639_v50, %v11604_v41  ;;  %v12641_v4 = vld [vmem:[#allocation2_spill] sm:$0xff]  ;;  %v12642_v44 = vld [vmem:[#allocation15_spill] sm:$0xff] }
 0x582   :  { %v5304_v2 = vmax.f32 %v5288_v7, 1e-06  ;;  %v5306_v61 = vmax.f32 %v5290_v51, 1e-06  ;;  %v5257_v19 = vadd.f32 %v5241_v26, %v5207_v22  ;;  %v3679_v63 = vmul.f32 %v12640_v9, %v11606_v60  ;;  %v5782_v60 = vld [vmem:[%s12293_s4 + $0x8] sm:$0xff]  ;;  %v5785_v9 = vld [vmem:[%s12293_s4 + $0x20] sm:$0xff] }
 0x583   :  { %v8342_v10 = vpack.c.bf16 %v5333_v54, %v5331_v34  ;;  %v5271_v23 = vadd.f32 %v5255_v52, %v9400_v45  ;;  %v4025_v11 = vmul.f32 %v12641_v4, %v11610_v32  ;;  %v5784_v32 = vld [vmem:[%s12293_s4 + $0x18] sm:$0xff]  ;;  %v5758_v52 = vmul.f32 0.6931472, %v11583_v13  ;;  %v5786_v13 = vld [vmem:[%s12293_s4 + $0x28] sm:$0xff] }
 0x584   :  { %v5320_v36 = vmul.f32 %v5304_v2, %v5304_v2  ;;  %v5322_v5 = vmul.f32 %v5306_v61, %v5306_v61  ;;  %v5273_v58 = vadd.f32 %v5257_v19, %v9398_v25  ;;  %v3680_v55 = vadd.f32 %v3679_v63, %v3333_v35  ;;  %v5787_v63 = vld [vmem:[%s12293_s4 + $0x30] sm:$0xff]  ;;  %v5790_v4 = vld [vmem:[%s12293_s4 + $0x48] sm:$0xff] }
 0x585   :  { %8343 = vmatpush1.bf16.xpose.msra.mxu0 %v8342_v10  ;;  %v5287_v28 = vmax.f32 %v5271_v23, 0.0  ;;  %v5761_v10 = vmul.f32 0.33333334, %v5758_v52  ;;  %v5781_v23 = vld [vmem:[%s12293_s4] sm:$0xff] }
 0x586   :  { %v5336_v3 = vmul.f32 %v5320_v36, %v5304_v2  ;;  %v5338_v59 = vmul.f32 %v5322_v5, %v5306_v61  ;;  %v5289_v8 = vmax.f32 %v5273_v58, 0.0  ;;  %v4367_v29 = vpop.f32.mrb[10].mxu1  ;;  %v4026_v22 = vadd.f32 %v4025_v11, %v3680_v55  ;;  %v5783_v36 = vld [vmem:[%s12293_s4 + $0x10] sm:$0xff]  ;;  %v5788_v5 = vld [vmem:[%s12293_s4 + $0x38] sm:$0xff]  ;;  %v5794_v55 = vld [vmem:[%s12293_s4 + $0x68] sm:$0xff] }
 0x587   :  { %v5303_v40 = vmax.f32 %v5287_v28, 1e-06  ;;  %v4371_v43 = vmul.f32 %v12642_v44, %v4367_v29  ;;  %v4369_v12 = vpop.f32.mrb[11].mxu1  ;;  %v8364_v61 = vpack.c.bf16 %v5784_v32, %v5782_v60  ;;  %v5763_v58 = vmul.f32 1.442695, %v5761_v10  ;;  %v5792_v11 = vld [vmem:[%s12293_s4 + $0x58] sm:$0xff] }
 0x588   :  { %v8344_v7 = vpack.c.bf16 %v5338_v59, %v5336_v3  ;;  %v5305_v51 = vmax.f32 %v5289_v8, 1e-06  ;;  %v8366_v50 = vpack.c.bf16 %v5783_v36, %v5781_v23  ;;  %v8368_v28 = vpack.c.bf16 %v5788_v5, %v5786_v13  ;;  %v5789_v29 = vld [vmem:[%s12293_s4 + $0x40] sm:$0xff]  ;;  %v5796_v44 = vld [vmem:[%s12293_s4 + $0x78] sm:$0xff]  ;;  %v5894_v5 = vld [vmem:[%s12294_s6 + $0x8] sm:$0xff] }
 0x589   :  { %v5319_v41 = vmul.f32 %v5303_v40, %v5303_v40  ;;  %v11681_v54 = vadd.f32 %v4371_v43, %v4026_v22  ;;  %v8370_v3 = vpack.c.bf16 %v5787_v63, %v5785_v9  ;;  %v12643_v59 = vmov 0.0   ;;  %v8845_v22 = vld [vmem:[%s12289_s0 + $0x78] sm:$0x77] }
 0x58a   :  { %8345 = vmatprep.subr.bf16.mxu0 %v8344_v7  ;;  %v5321_v26 = vmul.f32 %v5305_v51, %v5305_v51  ;;  %v8372_v8 = vpack.c.bf16 %v5792_v11, %v5790_v4  ;;  %v5453_v43 = vstv %s5446_s12  ;;  %v8376_v7 = vpack.c.bf16 %v5796_v44, %v5794_v55  ;;  %v12644_v44 = vld [vmem:[#allocation14_spill] sm:$0xff] }
 0x58b   :  { %v5335_v34 = vmul.f32 %v5319_v41, %v5303_v40  ;;  %v5791_v40 = vld [vmem:[%s12293_s4 + $0x50] sm:$0xff]  ;;  %v8852_v9 = vmov 0.0|0.0  }
 0x58c   :  { %v5337_v2 = vmul.f32 %v5321_v26, %v5305_v51  ;;  %v8374_v12 = vpack.c.bf16 %v5791_v40, %v5789_v29  ;;  %v5793_v51 = vld [vmem:[%s12293_s4 + $0x60] sm:$0xff]  ;;  %v5795_v41 = vld [vmem:[%s12293_s4 + $0x70] sm:$0xff]  ;;  %v5454_v26 = vsub.f32 %v8845_v22, %v5453_v43 }
 0x58e   :  { %v8346_v19 = vpack.c.bf16 %v5337_v2, %v5335_v34  ;;  %v8378_v34 = vpack.c.bf16 %v5795_v41, %v5793_v51  ;;  %v5772_v2 = vpop.permute.xlu0 %5771  ;;  %v12647_v41 = vld [vmem:[#allocation20_spill] sm:$0xff] }
 0x590   :  { %8347 = vmatpush1.bf16.xpose.msra.mxu0 %v8346_v19  ;;  %v5893_v19 = vld [vmem:[%s12294_s6] sm:$0xff] }
 0x591   :  { %8365 = vmatprep.subr.bf16.mxu0 %v8364_v61  ;;  %s8587_s28 = spop %8586 }
 0x592   :  { %s5464_s25 = sadd.f32 0.0001, %s8587_s28 }
 0x594   :  { %v5465_v35 = vstv %s5464_s25 }
 0x595   :  { %8695 = vrcp.f32 %v5465_v35 }
 0x596   :  { %8697 = vpow2.f32 %v5763_v58  ;;  %v5895_v58 = vld [vmem:[%s12294_s6 + $0x10] sm:$0xff] }
 0x597   :  { %5404 = vmatmul.mubr.f32.vlgmr.msra.gmra.mrb[14].mxu0 %v12507_v56 }
 0x598   :  { %8367 = vmatpush1.bf16.msra.mxu0 %v8366_v50  ;;  %5880 = vmatprep.mubr.f32.mxu0 %v12643_v59  ;;  %v5896_v50 = vld [vmem:[%s12294_s6 + $0x18] sm:$0xff] }
 0x599   :  { %8369 = vmatprep.subr.bf16.mxu0 %v8368_v28  ;;  %v11773_v29 = vpack.c.bf16 %v5896_v50, %v5895_v58  ;;  %v12649_v50 = vld [vmem:[#allocation33_spill] sm:$0xff] }
 0x59c   :  { %8371 = vmatpush1.bf16.msra.mxu0 %v8370_v3 }
 0x59d   :  { %8373 = vmatprep.subr.bf16.mxu0 %v8372_v8  ;;  %v11771_v8 = vpack.c.bf16 %v5894_v5, %v5893_v19  ;;  %v12648_v5 = vld [vmem:[#allocation27_spill] sm:$0xff] }
 0x59f   :  { %v8696_v60 = vpop.eup %8695 }
 0x5a0   :  { %v5467_v32 = vmul.f32 %v8696_v60, %v5454_v26  ;;  %8375 = vmatpush1.bf16.msra.mxu0 %v8374_v12  ;;  %v8698_v52 = vpop.eup %8697  ;;  %v12645_v12 = vld [vmem:[#allocation16_spill] sm:$0xff] }
 0x5a1   :  { %8377 = vmatprep.subr.bf16.mxu0 %v8376_v7  ;;  %v5779_v35 = vmul.f32 %v8698_v52, %v5772_v2 }
 0x5a2   :  { %v7787_v61 = vclamps-f32 %v5467_v32, 20.0 }
 0x5a4   :  { %v5474_v10 = vrot.slane %v7787_v61, %v9235_v33  ;;  %v5478_v23 = vrot.slane %v7787_v61, %v9238_v37  ;;  %v5508_v36 = vrot.slane %v7787_v61, %v9241_v38  ;;  %v5512_v13 = vrot.slane %v7787_v61, %v9244_v39  ;;  %8379 = vmatpush1.bf16.msra.mxu0 %v8378_v34 }
 0x5a5   :  { %v5558_v37 = vrot.slane %v7787_v61, %v9247_v57  ;;  %v5562_v28 = vrot.slane %v7787_v61, %v9250_v0  ;;  %8404 = vmatprep.subr.bf16.mxu0 %v8852_v9 }
 0x5a6   :  { %v11753_v39 = vrot.slane %v5474_v10, %v9235_v33  ;;  %v11756_v63 = vrot.slane %v5478_v23, %v9235_v33  ;;  %v11759_v4 = vrot.slane %v5508_v36, %v9241_v38  ;;  %v11762_v11 = vrot.slane %v5512_v13, %v9241_v38 }
 0x5a7   :  { %v11765_v3 = vrot.slane %v5558_v37, %v9247_v57  ;;  %v11768_v0 = vrot.slane %v5562_v28, %v9247_v57  ;;  %7788 = vmatmul.mubr.msk.f32.vlgmr.msra.gmra.mrb[16].mxu0 %vm5809_vm9, %v5779_v35  ;;  %v12646_v57 = vld [vmem:[#allocation18_spill] sm:$0xff]  ;;  %v12650_v37 = vld [vmem:[#allocation29_spill] sm:$0xff] }
 0x5a8   :  { %v5490_v40 = vmul.f32 %v11756_v63, %v9229_v27  ;;  %v5492_v55 = vmul.f32 %v11756_v63, %v9159_v16  ;;  %v5524_v43 = vmul.f32 %v11762_v11, %v12644_v44  ;;  %v5526_v7 = vmul.f32 %v11762_v11, %v12645_v12  ;;  %5886 = vmatprep.mubr.f32.mxu0 %v12643_v59 }
 0x5a9   :  { %v5574_v51 = vmul.f32 %v11768_v0, %v12646_v57  ;;  %v5576_v22 = vmul.f32 %v11768_v0, %v12647_v41  ;;  %v5489_v26 = vmul.f32 %v11753_v39, %v9229_v27  ;;  %v5491_v60 = vmul.f32 %v11753_v39, %v9159_v16  ;;  %8406 = vmatpush3.bf16.msra.mxu0 %v11771_v8 }
 0x5aa   :  { %v5540_v32 = vadd.f32 %v5524_v43, %v5490_v40  ;;  %v5542_v34 = vadd.f32 %v5526_v7, %v5492_v55  ;;  %v5523_v52 = vmul.f32 %v11759_v4, %v12644_v44  ;;  %v5525_v2 = vmul.f32 %v11759_v4, %v12645_v12  ;;  %8407 = vmatprep.subr.bf16.mxu0 %v8852_v9  ;;  %v12651_v40 = vld [vmem:[#allocation31_spill] sm:$0xff]  ;;  %v12652_v44 = vld [vmem:[#allocation22_spill] sm:$0xff]  ;;  %v12653_v12 = vld [vmem:[#allocation24_spill] sm:$0xff] }
 0x5ab   :  { %v5573_v61 = vmul.f32 %v11765_v3, %v12646_v57  ;;  %v5575_v27 = vmul.f32 %v11765_v3, %v12647_v41  ;;  %v5494_v16 = vmul.f32 %v11756_v63, %v9188_v48  ;;  %v5496_v19 = vmul.f32 %v11756_v63, %v12634_v24 }
 0x5ac   :  { %v5590_v10 = vadd.f32 %v5574_v51, %v5540_v32  ;;  %v5592_v23 = vadd.f32 %v5576_v22, %v5542_v34  ;;  %v5539_v36 = vadd.f32 %v5523_v52, %v5489_v26  ;;  %v5541_v13 = vadd.f32 %v5525_v2, %v5491_v60 }
 0x5ad   :  { %v5528_v58 = vmul.f32 %v11762_v11, %v12648_v5  ;;  %v5530_v35 = vmul.f32 %v11762_v11, %v12649_v50  ;;  %v5578_v28 = vmul.f32 %v11768_v0, %v12650_v37  ;;  %v5580_v55 = vmul.f32 %v11768_v0, %v12651_v40  ;;  %8409 = vmatpush3.bf16.msra.mxu0 %v11773_v29 }
 0x5ae   :  { %v5606_v43 = vadd.f32 %v5590_v10, %v12652_v44  ;;  %v5608_v7 = vadd.f32 %v5592_v23, %v12653_v12  ;;  %v5589_v57 = vadd.f32 %v5573_v61, %v5539_v36  ;;  %v5591_v51 = vadd.f32 %v5575_v27, %v5541_v13  ;;  %8416 = vmatprep.subr.bf16.mxu0 %v8852_v9 }
 0x5af   :  { %v5544_v41 = vadd.f32 %v5528_v58, %v5494_v16  ;;  %v5546_v22 = vadd.f32 %v5530_v35, %v5496_v19  ;;  %v5493_v26 = vmul.f32 %v11753_v39, %v9188_v48  ;;  %v5495_v60 = vmul.f32 %v11753_v39, %v12634_v24 }
 0x5b0   :  { %v5622_v32 = vmax.f32 %v5606_v43, 0.0  ;;  %v5624_v34 = vmax.f32 %v5608_v7, 0.0  ;;  %v5605_v52 = vadd.f32 %v5589_v57, %v12652_v44  ;;  %v5607_v2 = vadd.f32 %v5591_v51, %v12653_v12 }
 0x5b1   :  { %v5594_v10 = vadd.f32 %v5578_v28, %v5544_v41  ;;  %v5596_v23 = vadd.f32 %v5580_v55, %v5546_v22  ;;  %v5527_v61 = vmul.f32 %v11759_v4, %v12648_v5  ;;  %v5529_v27 = vmul.f32 %v11759_v4, %v12649_v50 }
 0x5b2   :  { %v5638_v16 = vmax.f32 %v5622_v32, 1e-06  ;;  %v5640_v19 = vmax.f32 %v5624_v34, 1e-06  ;;  %v5621_v48 = vmax.f32 %v5605_v52, 0.0  ;;  %v5623_v36 = vmax.f32 %v5607_v2, 0.0 }
 0x5b3   :  { %v5610_v24 = vadd.f32 %v5594_v10, %v9286_v14  ;;  %v5612_v13 = vadd.f32 %v5596_v23, %v9204_v47  ;;  %v5543_v58 = vadd.f32 %v5527_v61, %v5493_v26  ;;  %v5545_v35 = vadd.f32 %v5529_v27, %v5495_v60 }
 0x5b4   :  { %v5654_v44 = vmul.f32 %v5638_v16, %v5638_v16  ;;  %v5656_v43 = vmul.f32 %v5640_v19, %v5640_v19  ;;  %v5637_v28 = vmax.f32 %v5621_v48, 1e-06  ;;  %v5639_v55 = vmax.f32 %v5623_v36, 1e-06 }
 0x5b5   :  { %v5626_v12 = vmax.f32 %v5610_v24, 0.0  ;;  %v5628_v7 = vmax.f32 %v5612_v13, 0.0  ;;  %v5577_v5 = vmul.f32 %v11765_v3, %v12650_v37  ;;  %v5579_v50 = vmul.f32 %v11765_v3, %v12651_v40 }
 0x5b6   :  { %v5670_v57 = vmul.f32 %v5654_v44, %v5638_v16  ;;  %v5672_v51 = vmul.f32 %v5656_v43, %v5640_v19  ;;  %v5653_v41 = vmul.f32 %v5637_v28, %v5637_v28  ;;  %v5655_v22 = vmul.f32 %v5639_v55, %v5639_v55 }
 0x5b7   :  { %v5642_v32 = vmax.f32 %v5626_v12, 1e-06  ;;  %v5644_v34 = vmax.f32 %v5628_v7, 1e-06  ;;  %v5593_v26 = vadd.f32 %v5577_v5, %v5543_v58  ;;  %v5595_v60 = vadd.f32 %v5579_v50, %v5545_v35 }
 0x5b8   :  { %v8348_v52 = vpack.c.bf16 %v5672_v51, %v5670_v57  ;;  %v5669_v2 = vmul.f32 %v5653_v41, %v5637_v28  ;;  %v5671_v10 = vmul.f32 %v5655_v22, %v5639_v55  ;;  %v5498_v23 = vmul.f32 %v11756_v63, %v9213_v62 }
 0x5b9   :  { %v5658_v61 = vmul.f32 %v5642_v32, %v5642_v32  ;;  %v5660_v27 = vmul.f32 %v5644_v34, %v5644_v34  ;;  %v5609_v37 = vadd.f32 %v5593_v26, %v9286_v14  ;;  %v5611_v40 = vadd.f32 %v5595_v60, %v9204_v47 }
 0x5ba   :  { %8349 = vmatprep.subr.bf16.mxu1 %v8348_v52  ;;  %v8350_v16 = vpack.c.bf16 %v5671_v10, %v5669_v2  ;;  %v5500_v19 = vmul.f32 %v11756_v63, %v9321_v18  ;;  %v5532_v48 = vmul.f32 %v11762_v11, %v9222_v20  ;;  %v5534_v36 = vmul.f32 %v11762_v11, %v12502_v15 }
 0x5bb   :  { %v5674_v24 = vmul.f32 %v5658_v61, %v5642_v32  ;;  %v5676_v13 = vmul.f32 %v5660_v27, %v5644_v34  ;;  %v5625_v58 = vmax.f32 %v5609_v37, 0.0  ;;  %v5627_v35 = vmax.f32 %v5611_v40, 0.0 }
 0x5bc   :  { %8351 = vmatpush1.bf16.xpose.msra.mxu1 %v8350_v16  ;;  %v5548_v44 = vadd.f32 %v5532_v48, %v5498_v23  ;;  %v5550_v14 = vadd.f32 %v5534_v36, %v5500_v19  ;;  %v5582_v47 = vmul.f32 %v11768_v0, %v12612_v21  ;;  %v5584_v43 = vmul.f32 %v11768_v0, %v12613_v1 }
 0x5bd   :  { %v8352_v28 = vpack.c.bf16 %v5676_v13, %v5674_v24  ;;  %v5641_v55 = vmax.f32 %v5625_v58, 1e-06  ;;  %v5643_v12 = vmax.f32 %v5627_v35, 1e-06  ;;  %v5497_v7 = vmul.f32 %v11753_v39, %v9213_v62 }
 0x5be   :  { %v5598_v5 = vadd.f32 %v5582_v47, %v5548_v44  ;;  %v5600_v50 = vadd.f32 %v5584_v43, %v5550_v14  ;;  %v5499_v57 = vmul.f32 %v11753_v39, %v9321_v18  ;;  %v5531_v51 = vmul.f32 %v11759_v4, %v9222_v20 }
 0x5bf   :  { %8353 = vmatprep.subr.bf16.mxu1 %v8352_v28  ;;  %v5657_v41 = vmul.f32 %v5641_v55, %v5641_v55  ;;  %v5659_v22 = vmul.f32 %v5643_v12, %v5643_v12  ;;  %v5533_v32 = vmul.f32 %v11759_v4, %v12502_v15  ;;  %v5581_v34 = vmul.f32 %v11765_v3, %v12612_v21 }
 0x5c0   :  { %v5614_v26 = vadd.f32 %v5598_v5, %v9340_v49  ;;  %v5616_v62 = vadd.f32 %v5600_v50, %v9301_v46  ;;  %v5547_v60 = vadd.f32 %v5531_v51, %v5497_v7  ;;  %v5583_v18 = vmul.f32 %v11765_v3, %v12613_v1 }
 0x5c1   :  { %v5673_v52 = vmul.f32 %v5657_v41, %v5641_v55  ;;  %v5675_v2 = vmul.f32 %v5659_v22, %v5643_v12  ;;  %v5549_v20 = vadd.f32 %v5533_v32, %v5499_v57  ;;  %v5502_v10 = vmul.f32 %v11756_v63, %v9329_v53 }
 0x5c2   :  { %v5630_v23 = vmax.f32 %v5614_v26, 0.0  ;;  %v5632_v61 = vmax.f32 %v5616_v62, 0.0  ;;  %v5597_v15 = vadd.f32 %v5581_v34, %v5547_v60  ;;  %v5504_v21 = vmul.f32 %v11756_v63, %v9355_v6 }
 0x5c3   :  { %v8354_v27 = vpack.c.bf16 %v5675_v2, %v5673_v52  ;;  %v5599_v37 = vadd.f32 %v5583_v18, %v5549_v20  ;;  %v5536_v40 = vmul.f32 %v11762_v11, %v9344_v17  ;;  %v5538_v1 = vmul.f32 %v11762_v11, %v9379_v31 }
 0x5c4   :  { %v5646_v16 = vmax.f32 %v5630_v23, 1e-06  ;;  %v5648_v19 = vmax.f32 %v5632_v61, 1e-06  ;;  %v5613_v48 = vadd.f32 %v5597_v15, %v9340_v49  ;;  %v5586_v36 = vmul.f32 %v11768_v0, %v9362_v30 }
 0x5c5   :  { %8355 = vmatpush1.bf16.xpose.msra.mxu1 %v8354_v27  ;;  %v5615_v24 = vadd.f32 %v5599_v37, %v9301_v46  ;;  %v5552_v13 = vadd.f32 %v5536_v40, %v5502_v10  ;;  %v5554_v63 = vadd.f32 %v5538_v1, %v5504_v21  ;;  %v5588_v58 = vmul.f32 %v11768_v0, %v9386_v42 }
 0x5c6   :  { %v5662_v35 = vmul.f32 %v5646_v16, %v5646_v16  ;;  %v5664_v44 = vmul.f32 %v5648_v19, %v5648_v19  ;;  %v5629_v14 = vmax.f32 %v5613_v48, 0.0  ;;  %v5501_v11 = vmul.f32 %v11753_v39, %v9329_v53 }
 0x5c7   :  { %v5631_v47 = vmax.f32 %v5615_v24, 0.0  ;;  %v5602_v43 = vadd.f32 %v5586_v36, %v5552_v13  ;;  %v5604_v49 = vadd.f32 %v5588_v58, %v5554_v63  ;;  %v5503_v28 = vmul.f32 %v11753_v39, %v9355_v6  ;;  %v12655_v13 = vld [vmem:[#allocation17_spill] sm:$0xff] }
 0x5c8   :  { %v5678_v55 = vmul.f32 %v5662_v35, %v5646_v16  ;;  %v5680_v12 = vmul.f32 %v5664_v44, %v5648_v19  ;;  %v5645_v46 = vmax.f32 %v5629_v14, 1e-06  ;;  %v5535_v7 = vmul.f32 %v11759_v4, %v9344_v17  ;;  %v5897_v35 = vld [vmem:[%s12295_s7] sm:$0xff]  ;;  %v5898_v44 = vld [vmem:[%s12295_s7 + $0x8] sm:$0xff]  ;;  %v5899_v14 = vld [vmem:[%s12295_s7 + $0x10] sm:$0xff] }
 0x5c9   :  { %v5647_v5 = vmax.f32 %v5631_v47, 1e-06  ;;  %v5618_v0 = vadd.f32 %v5602_v43, %v9400_v45  ;;  %v5620_v50 = vadd.f32 %v5604_v49, %v9398_v25  ;;  %v5537_v53 = vmul.f32 %v11759_v4, %v9379_v31  ;;  %v5900_v47 = vld [vmem:[%s12295_s7 + $0x18] sm:$0xff] }
 0x5ca   :  { %v8356_v57 = vpack.c.bf16 %v5680_v12, %v5678_v55  ;;  %v5661_v51 = vmul.f32 %v5645_v46, %v5645_v46  ;;  %v5551_v41 = vadd.f32 %v5535_v7, %v5501_v11  ;;  %v5585_v6 = vmul.f32 %v11765_v3, %v9362_v30 }
 0x5cb   :  { %v5663_v39 = vmul.f32 %v5647_v5, %v5647_v5  ;;  %v5634_v22 = vmax.f32 %v5618_v0, 0.0  ;;  %v5636_v32 = vmax.f32 %v5620_v50, 0.0  ;;  %v5553_v34 = vadd.f32 %v5537_v53, %v5503_v28  ;;  %v12656_v28 = vld [vmem:[#allocation4_spill] sm:$0xff]  ;;  %v5797_v0 = vld [vmem:[%s12296_s5] sm:$0x3]  ;;  %v12657_v53 = vld [vmem:[#allocation19_spill] sm:$0xff] }
 0x5cc   :  { %8357 = vmatprep.subr.bf16.mxu1 %v8356_v57  ;;  %v5677_v17 = vmul.f32 %v5661_v51, %v5645_v46  ;;  %v5587_v26 = vmul.f32 %v11765_v3, %v9386_v42  ;;  %v5601_v62 = vadd.f32 %v5585_v6, %v5551_v41  ;;  %v12654_v3 = vld [vmem:[#allocation3_spill] sm:$0xff]  ;;  %v11915_v11 = vpack.c.bf16 %v5898_v44, %v5897_v35  ;;  %s8854_s5 = smov 64  }
 0x5cd   :  { %v5679_v60 = vmul.f32 %v5663_v39, %v5647_v5  ;;  %v5650_v18 = vmax.f32 %v5634_v22, 1e-06  ;;  %v5652_v52 = vmax.f32 %v5636_v32, 1e-06  ;;  %v11921_v43 = vpack.c.bf16 %v5900_v47, %v5899_v14 }
 0x5ce   :  { %v5603_v31 = vadd.f32 %v5587_v26, %v5553_v34  ;;  %v5617_v4 = vadd.f32 %v5601_v62, %v9400_v45  ;;  %v11941_v41 = vrot.slane %v5797_v0, %v9235_v33 }
 0x5cf   :  { %v8358_v2 = vpack.c.bf16 %v5679_v60, %v5677_v17  ;;  %v5666_v20 = vmul.f32 %v5650_v18, %v5650_v18  ;;  %v5668_v10 = vmul.f32 %v5652_v52, %v5652_v52 }
 0x5d0   :  { %v5619_v30 = vadd.f32 %v5603_v31, %v9398_v25  ;;  %v5633_v23 = vmax.f32 %v5617_v4, 0.0 }
 0x5d1   :  { %8359 = vmatpush1.bf16.xpose.msra.mxu1 %v8358_v2  ;;  %v5682_v61 = vmul.f32 %v5666_v20, %v5650_v18  ;;  %v5684_v15 = vmul.f32 %v5668_v10, %v5652_v52  ;;  %v5777_v52 = vpop.permute.xlu1 %5776 }
 0x5d2   :  { %v5635_v21 = vmax.f32 %v5619_v30, 0.0  ;;  %v5649_v27 = vmax.f32 %v5633_v23, 1e-06  ;;  %v4713_v37 = vpop.f32.mrb[12].mxu0 }
 0x5d3   :  { %v8360_v42 = vpack.c.bf16 %v5684_v15, %v5682_v61  ;;  %v4717_v40 = vmul.f32 %v12654_v3, %v4713_v37  ;;  %v4715_v1 = vpop.f32.mrb[13].mxu0 }
 0x5d4   :  { %v5651_v16 = vmax.f32 %v5635_v21, 1e-06  ;;  %v5665_v19 = vmul.f32 %v5649_v27, %v5649_v27  ;;  %v11953_v21 = vrot.slane %v5797_v0, %v9241_v38 }
 0x5d5   :  { %8361 = vmatprep.subr.bf16.mxu1 %v8360_v42  ;;  %v4718_v45 = vadd.f32 %v4717_v40, %v11681_v54 }
 0x5d6   :  { %v5667_v48 = vmul.f32 %v5651_v16, %v5651_v16  ;;  %v5681_v36 = vmul.f32 %v5665_v19, %v5649_v27 }
 0x5d8   :  { %v5683_v24 = vmul.f32 %v5667_v48, %v5651_v16 }
 0x5da   :  { %v8362_v25 = vpack.c.bf16 %v5683_v24, %v5681_v36 }
 0x5dc   :  { %8363 = vmatpush1.bf16.xpose.msra.mxu1 %v8362_v25 }
 0x5dd   :  { %8380 = vmatprep.subr.bf16.mxu1 %v8852_v9 }
 0x5e3   :  { %5750 = vmatmul.mubr.f32.vlgmr.msra.gmra.mrb[14].mxu1 %v12507_v56 }
 0x5e4   :  { %8382 = vmatpush3.bf16.msra.mxu1 %v11771_v8  ;;  %7921 = vmatprep.mubr.msk.f32.mxu1 %vm8853_vm10, %v12643_v59 }
 0x5e5   :  { %8383 = vmatprep.subr.bf16.mxu1 %v8852_v9 }
 0x5e8   :  { %8385 = vmatpush3.bf16.msra.mxu1 %v11773_v29 }
 0x5e9   :  { %8386 = vmatprep.subr.bf16.mxu1 %v8852_v9 }
 0x5eb   :  { %7922 = vmatmul.mubr.f32.vlgmr.msra.gmra.mrb[16].mxu1 %v12643_v59 }
 0x5ec   :  { %7932 = vmatprep.mubr.msk.f32.mxu1 %vm8853_vm10, %v12643_v59  ;;  %8388 = vmatpush3.bf16.msra.mxu1 %v11915_v11 }
 0x5ed   :  { %8389 = vmatprep.subr.bf16.mxu1 %v8852_v9 }
 0x5f0   :  { %8391 = vmatpush3.bf16.msra.mxu1 %v11921_v43 }
 0x5f1   :  { %8392 = vmatprep.subr.bf16.mxu1 %v8852_v9 }
 0x5f3   :  { %7933 = vmatmul.mubr.f32.vlgmr.msra.gmra.mrb[18].mxu1 %v12643_v59 }
 0x5f4   :  { %8394 = vmatpush3.bf16.msra.mxu1 %v11771_v8  ;;  %7943 = vmatprep.mubr.msk.f32.mxu1 %vm8853_vm10, %v12643_v59 }
 0x5f5   :  { %8395 = vmatprep.subr.bf16.mxu1 %v8852_v9 }
 0x5f8   :  { %8397 = vmatpush3.bf16.msra.mxu1 %v11773_v29 }
 0x5f9   :  { %8398 = vmatprep.subr.bf16.mxu1 %v8852_v9 }
 0x61e   :  { %v5059_v54 = vpop.f32.mrb[12].mxu1 }
 0x61f   :  { %v5063_v56 = vmul.f32 %v12655_v13, %v5059_v54  ;;  %v5061_v63 = vpop.f32.mrb[13].mxu1 }
 0x621   :  { %v5064_v58 = vadd.f32 %v5063_v56, %v4718_v45 }
 0x66a   :  { %v5405_v49 = vpop.f32.mrb[14].mxu0 }
 0x66b   :  { %v5409_v55 = vmul.f32 %v12656_v28, %v5405_v49  ;;  %v5407_v12 = vpop.f32.mrb[15].mxu0 }
 0x66d   :  { %v5410_v46 = vadd.f32 %v5409_v55, %v5064_v58 }
 0x67a   :  { %v5882_v7 = vpop.f32.mrb[16].mxu0 }
 0x67b   :  { %v11934_v5 = vpop.f32.mrb[17].mxu0  ;;  %v11944_v39 = vadd.f32 %v5882_v7, %v11941_v41 }
 0x6b6   :  { %v5751_v50 = vpop.f32.mrb[14].mxu1 }
 0x6b7   :  { %v5755_v57 = vmul.f32 %v12657_v53, %v5751_v50  ;;  %v5753_v51 = vpop.f32.mrb[15].mxu1 }
 0x6b9   :  { %v5756_v6 = vadd.f32 %v5755_v57, %v5410_v46 }
 0x6bb   :  { %8699 = vlog2.f32 %v5756_v6 }
 0x6be   :  { %v5971_v22 = vpop.f32.mrb[16].mxu1 }
 0x6bf   :  { %v5975_v32 = vadd.f32 %v5971_v22, %v11944_v39  ;;  %v7923_v34 = vpop.f32.mrb[17].mxu1 }
 0x6c1   :  { %8701 = vtanh.f32 %v5975_v32  ;;  %v7790_v4 = vmul.f32 -1.442695, %v5975_v32 }
 0x6c5   :  { %v8700_v17 = vpop.eup %8699 }
 0x6c6   :  { %v5760_v26 = vmul.f32 0.6931472, %v8700_v17  ;;  %v6042_v20 = vpop.f32.mrb[18].mxu1 }
 0x6c7   :  { %v7934_v10 = vpop.f32.mrb[19].mxu1  ;;  %v6047_v37 = vrot.slane %v6042_v20, 2 }
 0x6c8   :  { %v5762_v62 = vmul.f32 0.33333334, %v5760_v26 }
 0x6ca   :  { %v5765_v60 = vmul.f32 1.442695, %v5762_v62 }
 0x6cb   :  { %v8702_v18 = vpop.eup %8701 }
 0x6cc   :  { %8703 = vpow2.f32 %v5765_v60  ;;  %6059 = vrot.lane.b32.xlu1 %v8702_v18, %s8854_s5 }
 0x6cd   :  { %8705 = vpow2.f32 %v7790_v4 }
 0x6d6   :  { %v8704_v33 = vpop.eup %8703 }
 0x6d7   :  { %v5780_v31 = vmul.f32 %v8704_v33, %v5777_v52  ;;  %v8706_v2 = vpop.eup %8705 }
 0x6d8   :  { %v6053_v30 = vadd.f32 1.0, %v8706_v2 }
 0x6d9   :  { %7789 = vmatmul.mubr.msk.f32.gmra.mrb[18].mxu0 %vm5809_vm9, %v5780_v31 }
 0x6da   :  { %7965 = vmatprep.mubr.msk.f32.mxu0 %vm8853_vm10, %v12643_v59  ;;  %8707 = vrcp.f32 %v6053_v30 }
 0x6e4   :  { %v8708_v23 = vpop.eup %8707 }
 0x6e5   :  { %v6057_v1 = vmul.f32 0.0, %v8708_v23 }
 0x73e   :  { %v6060_v61 = vpop.permute.xlu1 %6059 }
 0x73f   :  { %v6062_v15 = vmul.f32 %v8708_v23, %v6060_v61 }
 0x741   :  { %6064 = vrot.lane.b32.xlu1 %v6062_v15, %s8855_s24 }
 0x7ac   :  { %v11955_v27 = vpop.f32.mrb[18].mxu0 }
 0x7ad   :  { %v5890_v42 = vpop.f32.mrb[19].mxu0 }
 0x7ae   :  { %v11958_v3 = vadd.f32 %v5890_v42, %v11953_v21 }
 0x7b0   :  { %v6049_v40 = vadd.f32 %v6047_v37, %v11958_v3 }
 0x7b2   :  { %8709 = vtanh.f32 %v6049_v40  ;;  %v7791_v48 = vmul.f32 -1.442695, %v6049_v40 }
 0x7b3   :  { %v6065_v16 = vpop.permute.xlu1 %6064 }
 0x7b4   :  { %v11961_v19 = vadd.f32 %v6065_v16, %v6057_v1 }
 0x7b6   :  { %8711 = vtanh.f32 %v11961_v19  ;;  %v6265_v26 = vrot.slane %v11961_v19, 6 }
 0x7b7   :  { %8713 = vpow2.f32 %v7791_v48 }
 0x7bc   :  { %v8710_v45 = vpop.eup %8709 }
 0x7bd   :  { %6083 = vrot.lane.b32.xlu0 %v8710_v45, %s8854_s5 }
 0x7c0   :  { %v8712_v38 = vpop.eup %8711 }
 0x7c1   :  { %6070 = vrot.lane.b32.xlu1 %v8712_v38, %s8854_s5  ;;  %v8714_v36 = vpop.eup %8713 }
 0x7c2   :  { %v6077_v24 = vadd.f32 1.0, %v8714_v36 }
 0x7c4   :  { %8715 = vrcp.f32 %v6077_v24 }
 0x7ce   :  { %v8716_v25 = vpop.eup %8715 }
 0x7cf   :  { %v6081_v58 = vmul.f32 0.0, %v8716_v25 }
 0x82f   :  { %v6084_v54 = vpop.permute.xlu0 %6083 }
 0x830   :  { %v6086_v13 = vmul.f32 %v8716_v25, %v6084_v54 }
 0x832   :  { %6088 = vrot.lane.b32.xlu0 %v6086_v13, %s8855_s24 }
 0x833   :  { %v6071_v56 = vpop.permute.xlu1 %6070 }
 0x834   :  { %v6073_v63 = vmul.f32 %v8708_v23, %v6071_v56 }
 0x836   :  { %6099 = vrot.lane.b32.xlu1 %v6073_v63, %s8855_s24 }
 0x8a4   :  { %v6089_v35 = vpop.permute.xlu0 %6088 }
 0x8a5   :  { %v11968_v44 = vadd.f32 %v6089_v35, %v6081_v58 }
 0x8a7   :  { %8717 = vtanh.f32 %v11968_v44  ;;  %v6292_v1 = vrot.slane %v11968_v44, 2 }
 0x8a8   :  { %v11971_v14 = vpop.permute.xlu1 %6099 }
 0x8a9   :  { %7944 = vmatmul.mubr.msk.f32.vlgmr.msra.gmra.mrb[20].mxu1 %vm5901_vm11, %v11971_v14 }
 0x8aa   :  { %8400 = vmatpush3.bf16.msra.mxu1 %v11915_v11  ;;  %7954 = vmatprep.mubr.msk.f32.mxu1 %vm8853_vm10, %v12643_v59 }
 0x8ab   :  { %8401 = vmatprep.subr.bf16.mxu1 %v8852_v9 }
 0x8ae   :  { %8403 = vmatpush3.bf16.msra.mxu1 %v11921_v43 }
 0x8af   :  { %8410 = vmatprep.subr.bf16.mxu1 %v8852_v9 }
 0x8b1   :  { %v8718_v47 = vpop.eup %8717 }
 0x8b2   :  { %6094 = vrot.lane.b32.xlu0 %v8718_v47, %s8854_s5 }
 0x924   :  { %v6095_v49 = vpop.permute.xlu0 %6094 }
 0x925   :  { %v11982_v28 = vmul.f32 %v8716_v25, %v6095_v49 }
 0x927   :  { %v6178_v55 = vrot.slane %v11982_v28, 6 }
 0x929   :  { %6179 = vrot.lane.b32.xlu0 %v6178_v55, %s8855_s24 }
 0x97c   :  { %v6169_v12 = vpop.f32.mrb[20].mxu1 }
 0x97d   :  { %v6174_v46 = vrot.slane %v6169_v12, 6  ;;  %v7945_v7 = vpop.f32.mrb[21].mxu1 }
 0x97f   :  { %v6176_v0 = vadd.f32 %v6174_v46, %v11944_v39 }
 0x981   :  { %8719 = vtanh.f32 %v6176_v0  ;;  %v7794_v57 = vmul.f32 -1.442695, %v6176_v0 }
 0x983   :  { %8721 = vpow2.f32 %v7794_v57 }
 0x98b   :  { %v8720_v50 = vpop.eup %8719 }
 0x98c   :  { %6269 = vrot.lane.b32.xlu0 %v8720_v50, %s8854_s5 }
 0x98d   :  { %v8722_v51 = vpop.eup %8721 }
 0x98e   :  { %v6260_v6 = vadd.f32 1.0, %v8722_v51 }
 0x990   :  { %8723 = vrcp.f32 %v6260_v6 }
 0x99a   :  { %v8724_v22 = vpop.eup %8723 }
 0x99b   :  { %v6180_v53 = vpop.permute.xlu0 %6179  ;;  %v6267_v33 = vmul.f32 %v8724_v22, %v6265_v26 }
 0x99c   :  { %7955 = vmatmul.mubr.msk.f32.vlgmr.msra.gmra.mrb[22].mxu1 %vm5901_vm11, %v6180_v53 }
 0x99d   :  { %8412 = vmatpush3.bf16.msra.mxu1 %v11915_v11  ;;  %7976 = vmatprep.mubr.msk.f32.mxu1 %vm8853_vm10, %v12643_v59 }
 0x99e   :  { %8413 = vmatprep.subr.bf16.mxu1 %v8852_v9 }
 0x9a1   :  { %8415 = vmatpush3.bf16.msra.mxu1 %v11921_v43 }
 0x9a2   :  { %8422 = vmatprep.subr.bf16.mxu1 %v8852_v9 }
 0x9fe   :  { %v6270_v32 = vpop.permute.xlu0 %6269 }
 0x9ff   :  { %v6272_v34 = vmul.f32 %v8724_v22, %v6270_v32 }
 0xa01   :  { %6274 = vrot.lane.b32.xlu0 %v6272_v34, %s8855_s24 }
 0xa6f   :  { %v6249_v17 = vpop.f32.mrb[22].mxu1 }
 0xa70   :  { %v6254_v62 = vrot.slane %v6249_v17, 4  ;;  %v7956_v60 = vpop.f32.mrb[23].mxu1 }
 0xa72   :  { %v6256_v18 = vadd.f32 %v6254_v62, %v11958_v3 }
 0xa73   :  { %v6275_v52 = vpop.permute.xlu0 %6274 }
 0xa74   :  { %8725 = vtanh.f32 %v6256_v18  ;;  %v11998_v31 = vadd.f32 %v6275_v52, %v6267_v33  ;;  %v7795_v20 = vmul.f32 -1.442695, %v6256_v18 }
 0xa76   :  { %8727 = vtanh.f32 %v11998_v31  ;;  %v6479_v53 = vrot.slane %v11998_v31, 6 }
 0xa77   :  { %8729 = vpow2.f32 %v7795_v20 }
 0xa7e   :  { %v8726_v4 = vpop.eup %8725 }
 0xa7f   :  { %6296 = vrot.lane.b32.xlu1 %v8726_v4, %s8854_s5 }
 0xa80   :  { %v8728_v2 = vpop.eup %8727 }
 0xa81   :  { %6280 = vrot.lane.b32.xlu0 %v8728_v2, %s8854_s5  ;;  %v8730_v10 = vpop.eup %8729 }
 0xa82   :  { %v6287_v30 = vadd.f32 1.0, %v8730_v10 }
 0xa84   :  { %8731 = vrcp.f32 %v6287_v30 }
 0xa8e   :  { %v8732_v23 = vpop.eup %8731 }
 0xa8f   :  { %v6294_v16 = vmul.f32 %v8732_v23, %v6292_v1 }
 0xaf1   :  { %v6297_v61 = vpop.permute.xlu1 %6296 }
 0xaf2   :  { %v6299_v15 = vmul.f32 %v8732_v23, %v6297_v61 }
 0xaf3   :  { %v6281_v37 = vpop.permute.xlu0 %6280 }
 0xaf4   :  { %6301 = vrot.lane.b32.xlu1 %v6299_v15, %s8855_s24  ;;  %v12004_v42 = vmul.f32 %v8724_v22, %v6281_v37 }
 0xaf6   :  { %v6312_v40 = vrot.slane %v12004_v42, 2 }
 0xaf8   :  { %6313 = vrot.lane.b32.xlu0 %v6312_v40, %s8855_s24 }
 0xb66   :  { %v6302_v19 = vpop.permute.xlu1 %6301 }
 0xb67   :  { %v12009_v45 = vadd.f32 %v6302_v19, %v6294_v16 }
 0xb69   :  { %8733 = vtanh.f32 %v12009_v45  ;;  %v6506_v2 = vrot.slane %v12009_v45, 2 }
 0xb6a   :  { %v6314_v38 = vpop.permute.xlu0 %6313 }
 0xb6b   :  { %7966 = vmatmul.mubr.msk.f32.vlgmr.msra.gmra.mrb[20].mxu0 %vm5901_vm11, %v6314_v38 }
 0xb6c   :  { %8418 = vmatpush3.bf16.msra.mxu0 %v11771_v8  ;;  %7987 = vmatprep.mubr.msk.f32.mxu0 %vm8853_vm10, %v12643_v59 }
 0xb6d   :  { %8419 = vmatprep.subr.bf16.mxu0 %v8852_v9 }
 0xb70   :  { %8421 = vmatpush3.bf16.msra.mxu0 %v11773_v29 }
 0xb71   :  { %8428 = vmatprep.subr.bf16.mxu0 %v8852_v9 }
 0xb73   :  { %v8734_v48 = vpop.eup %8733 }
 0xb74   :  { %6307 = vrot.lane.b32.xlu1 %v8734_v48, %s8854_s5 }
 0xbe6   :  { %v6308_v36 = vpop.permute.xlu1 %6307 }
 0xbe7   :  { %v12020_v24 = vmul.f32 %v8732_v23, %v6308_v36 }
 0xbe9   :  { %v6392_v25 = vrot.slane %v12020_v24, 4 }
 0xbeb   :  { %6393 = vrot.lane.b32.xlu1 %v6392_v25, %s8855_s24 }
 0xc3e   :  { %v6383_v54 = vpop.f32.mrb[20].mxu0 }
 0xc3f   :  { %v6388_v13 = vrot.slane %v6383_v54, 4  ;;  %v7967_v56 = vpop.f32.mrb[21].mxu0 }
 0xc41   :  { %v6390_v63 = vadd.f32 %v6388_v13, %v11944_v39 }
 0xc43   :  { %8735 = vtanh.f32 %v6390_v63  ;;  %v7798_v44 = vmul.f32 -1.442695, %v6390_v63 }
 0xc45   :  { %8737 = vpow2.f32 %v7798_v44 }
 0xc4d   :  { %v8736_v58 = vpop.eup %8735 }
 0xc4e   :  { %6483 = vrot.lane.b32.xlu0 %v8736_v58, %s8854_s5 }
 0xc4f   :  { %v8738_v47 = vpop.eup %8737 }
 0xc50   :  { %v6474_v49 = vadd.f32 1.0, %v8738_v47 }
 0xc52   :  { %8739 = vrcp.f32 %v6474_v49 }
 0xc5c   :  { %v8740_v55 = vpop.eup %8739 }
 0xc5d   :  { %v6394_v35 = vpop.permute.xlu1 %6393  ;;  %v6481_v51 = vmul.f32 %v8740_v55, %v6479_v53 }
 0xc5e   :  { %7977 = vmatmul.mubr.msk.f32.vlgmr.msra.gmra.mrb[24].mxu1 %vm5901_vm11, %v6394_v35 }
 0xc5f   :  { %8424 = vmatpush3.bf16.msra.mxu1 %v11915_v11  ;;  %7998 = vmatprep.mubr.msk.f32.mxu1 %vm8853_vm10, %v12643_v59 }
 0xc60   :  { %8425 = vmatprep.subr.bf16.mxu1 %v8852_v9 }
 0xc63   :  { %8427 = vmatpush3.bf16.msra.mxu1 %v11921_v43 }
 0xc64   :  { %8434 = vmatprep.subr.bf16.mxu1 %v8852_v9 }
 0xcc0   :  { %v6484_v12 = vpop.permute.xlu0 %6483 }
 0xcc1   :  { %v6486_v46 = vmul.f32 %v8740_v55, %v6484_v12 }
 0xcc3   :  { %6488 = vrot.lane.b32.xlu0 %v6486_v46, %s8855_s24 }
 0xd31   :  { %v6463_v7 = vpop.f32.mrb[24].mxu1 }
 0xd32   :  { %v6468_v0 = vrot.slane %v6463_v7, 6  ;;  %v7978_v50 = vpop.f32.mrb[25].mxu1 }
 0xd34   :  { %v6470_v57 = vadd.f32 %v6468_v0, %v11958_v3 }
 0xd35   :  { %v6489_v6 = vpop.permute.xlu0 %6488 }
 0xd36   :  { %8741 = vtanh.f32 %v6470_v57  ;;  %v12036_v22 = vadd.f32 %v6489_v6, %v6481_v51  ;;  %v7799_v17 = vmul.f32 -1.442695, %v6470_v57 }
 0xd38   :  { %8743 = vtanh.f32 %v12036_v22  ;;  %v6690_v44 = vrot.slane %v12036_v22, 6 }
 0xd39   :  { %8745 = vpow2.f32 %v7799_v17 }
 0xd40   :  { %v8742_v32 = vpop.eup %8741 }
 0xd41   :  { %6510 = vrot.lane.b32.xlu1 %v8742_v32, %s8854_s5 }
 0xd42   :  { %v8744_v34 = vpop.eup %8743 }
 0xd43   :  { %6494 = vrot.lane.b32.xlu0 %v8744_v34, %s8854_s5  ;;  %v8746_v26 = vpop.eup %8745 }
 0xd44   :  { %v6501_v62 = vadd.f32 1.0, %v8746_v26 }
 0xd46   :  { %8747 = vrcp.f32 %v6501_v62 }
 0xd50   :  { %v8748_v60 = vpop.eup %8747 }
 0xd51   :  { %v6508_v20 = vmul.f32 %v8748_v60, %v6506_v2 }
 0xdb3   :  { %v6511_v18 = vpop.permute.xlu1 %6510 }
 0xdb4   :  { %v6513_v33 = vmul.f32 %v8748_v60, %v6511_v18 }
 0xdb5   :  { %v6495_v52 = vpop.permute.xlu0 %6494 }
 0xdb6   :  { %6515 = vrot.lane.b32.xlu1 %v6513_v33, %s8855_s24  ;;  %v12042_v31 = vmul.f32 %v8740_v55, %v6495_v52  ;;  %v12102_v52 = vadd.f32 %v11955_v27, %v11941_v41 }
 0xdb8   :  { %v6526_v4 = vrot.slane %v12042_v31, 4 }
 0xdba   :  { %6527 = vrot.lane.b32.xlu0 %v6526_v4, %s8855_s24 }
 0xe28   :  { %v6516_v10 = vpop.permute.xlu1 %6515 }
 0xe29   :  { %v12047_v30 = vadd.f32 %v6516_v10, %v6508_v20 }
 0xe2b   :  { %8749 = vtanh.f32 %v12047_v30  ;;  %v6717_v32 = vrot.slane %v12047_v30, 2 }
 0xe2c   :  { %v6528_v23 = vpop.permute.xlu0 %6527 }
 0xe2d   :  { %7988 = vmatmul.mubr.msk.f32.vlgmr.msra.gmra.mrb[22].mxu0 %vm5901_vm11, %v6528_v23 }
 0xe2e   :  { %8430 = vmatpush3.bf16.msra.mxu0 %v11771_v8  ;;  %8009 = vmatprep.mubr.msk.f32.mxu0 %vm8853_vm10, %v12643_v59 }
 0xe2f   :  { %8431 = vmatprep.subr.bf16.mxu0 %v8852_v9 }
 0xe32   :  { %8433 = vmatpush3.bf16.msra.mxu0 %v11773_v29 }
 0xe33   :  { %8440 = vmatprep.subr.bf16.mxu0 %v8852_v9 }
 0xe35   :  { %v8750_v61 = vpop.eup %8749 }
 0xe36   :  { %6521 = vrot.lane.b32.xlu1 %v8750_v61, %s8854_s5 }
 0xea8   :  { %v6522_v15 = vpop.permute.xlu1 %6521 }
 0xea9   :  { %v12058_v37 = vmul.f32 %v8748_v60, %v6522_v15 }
 0xeab   :  { %v6606_v40 = vrot.slane %v12058_v37, 2 }
 0xead   :  { %6607 = vrot.lane.b32.xlu1 %v6606_v40, %s8855_s24 }
 0xf00   :  { %v6597_v1 = vpop.f32.mrb[22].mxu0 }
 0xf01   :  { %v6602_v16 = vrot.slane %v6597_v1, 2  ;;  %v7989_v19 = vpop.f32.mrb[23].mxu0 }
 0xf03   :  { %v6604_v45 = vadd.f32 %v6602_v16, %v11944_v39  ;;  %v12116_v16 = vadd.f32 %v11934_v5, %v11953_v21 }
 0xf05   :  { %8751 = vtanh.f32 %v6604_v45  ;;  %v7802_v36 = vmul.f32 -1.442695, %v6604_v45 }
 0xf07   :  { %8753 = vpow2.f32 %v7802_v36 }
 0xf0f   :  { %v8752_v38 = vpop.eup %8751 }
 0xf10   :  { %6694 = vrot.lane.b32.xlu0 %v8752_v38, %s8854_s5 }
 0xf11   :  { %v8754_v39 = vpop.eup %8753 }
 0xf12   :  { %v6685_v25 = vadd.f32 1.0, %v8754_v39 }
 0xf14   :  { %8755 = vrcp.f32 %v6685_v25 }
 0xf1e   :  { %v8756_v54 = vpop.eup %8755 }
 0xf1f   :  { %v6608_v48 = vpop.permute.xlu1 %6607  ;;  %v6692_v47 = vmul.f32 %v8756_v54, %v6690_v44 }
 0xf20   :  { %7999 = vmatmul.mubr.msk.f32.vlgmr.msra.gmra.mrb[26].mxu1 %vm5901_vm11, %v6608_v48 }
 0xf21   :  { %8436 = vmatpush3.bf16.msra.mxu1 %v11915_v11  ;;  %8020 = vmatprep.mubr.msk.f32.mxu1 %vm8853_vm10, %v12643_v59 }
 0xf22   :  { %8437 = vmatprep.subr.bf16.mxu1 %v8852_v9 }
 0xf25   :  { %8439 = vmatpush3.bf16.msra.mxu1 %v11921_v43 }
 0xf26   :  { %8446 = vmatprep.subr.bf16.mxu1 %v8852_v9 }
 0xf82   :  { %v6695_v13 = vpop.permute.xlu0 %6694 }
 0xf83   :  { %v6697_v56 = vmul.f32 %v8756_v54, %v6695_v13 }
 0xf85   :  { %6699 = vrot.lane.b32.xlu0 %v6697_v56, %s8855_s24 }
 0xff3   :  { %v6677_v63 = vpop.f32.mrb[26].mxu1 }
 0xff4   :  { %v6681_v58 = vadd.f32 %v6677_v63, %v11958_v3  ;;  %v8000_v35 = vpop.f32.mrb[27].mxu1 }
 0xff6   :  { %8757 = vtanh.f32 %v6681_v58  ;;  %v7803_v7 = vmul.f32 -1.442695, %v6681_v58 }
 0xff7   :  { %v6700_v49 = vpop.permute.xlu0 %6699 }
 0xff8   :  { %v12074_v55 = vadd.f32 %v6700_v49, %v6692_v47 }
 0xffa   :  { %8759 = vtanh.f32 %v12074_v55  ;;  %v6900_v48 = vrot.slane %v12074_v55, 6 }
 0xffb   :  { %8761 = vpow2.f32 %v7803_v7 }
0x1000   :  { %v8758_v12 = vpop.eup %8757 }
0x1001   :  { %6721 = vrot.lane.b32.xlu1 %v8758_v12, %s8854_s5 }
0x1004   :  { %v8760_v46 = vpop.eup %8759 }
0x1005   :  { %6705 = vrot.lane.b32.xlu0 %v8760_v46, %s8854_s5  ;;  %v8762_v0 = vpop.eup %8761 }
0x1006   :  { %v6712_v3 = vadd.f32 1.0, %v8762_v0 }
0x1008   :  { %8763 = vrcp.f32 %v6712_v3 }
0x1012   :  { %v8764_v50 = vpop.eup %8763 }
0x1013   :  { %v6719_v34 = vmul.f32 %v8764_v50, %v6717_v32 }
0x1073   :  { %v6722_v53 = vpop.permute.xlu1 %6721 }
0x1074   :  { %v6724_v57 = vmul.f32 %v8764_v50, %v6722_v53 }
0x1076   :  { %6726 = vrot.lane.b32.xlu1 %v6724_v57, %s8855_s24 }
0x1077   :  { %v6706_v51 = vpop.permute.xlu0 %6705 }
0x1078   :  { %v12080_v6 = vmul.f32 %v8756_v54, %v6706_v51 }
0x107a   :  { %v6737_v22 = vrot.slane %v12080_v6, 6 }
0x107c   :  { %6738 = vrot.lane.b32.xlu0 %v6737_v22, %s8855_s24 }
0x10e8   :  { %v6727_v17 = vpop.permute.xlu1 %6726 }
0x10e9   :  { %v12085_v26 = vadd.f32 %v6727_v17, %v6719_v34 }
0x10eb   :  { %8765 = vtanh.f32 %v12085_v26  ;;  %v6927_v49 = vrot.slane %v12085_v26, 2 }
0x10ee   :  { %v6739_v62 = vpop.permute.xlu0 %6738 }
0x10ef   :  { %8010 = vmatmul.mubr.msk.f32.vlgmr.msra.gmra.mrb[24].mxu0 %vm5901_vm11, %v6739_v62 }
0x10f0   :  { %8442 = vmatpush3.bf16.msra.mxu0 %v11771_v8  ;;  %8031 = vmatprep.mubr.msk.f32.mxu0 %vm8853_vm10, %v12643_v59 }
0x10f1   :  { %8443 = vmatprep.subr.bf16.mxu0 %v8852_v9 }
0x10f4   :  { %8445 = vmatpush3.bf16.msra.mxu0 %v11773_v29 }
0x10f5   :  { %v8766_v60 = vpop.eup %8765  ;;  %8452 = vmatprep.subr.bf16.mxu0 %v8852_v9 }
0x10f6   :  { %6732 = vrot.lane.b32.xlu1 %v8766_v60, %s8854_s5 }
0x1168   :  { %v6733_v18 = vpop.permute.xlu1 %6732 }
0x1169   :  { %v12096_v33 = vmul.f32 %v8764_v50, %v6733_v18 }
0x116b   :  { %6814 = vrot.lane.b32.xlu1 %v12096_v33, %s8855_s24 }
0x11c2   :  { %v6808_v4 = vpop.f32.mrb[24].mxu0 }
0x11c3   :  { %v6812_v2 = vadd.f32 %v6808_v4, %v12102_v52  ;;  %v8011_v20 = vpop.f32.mrb[25].mxu0 }
0x11c5   :  { %8767 = vtanh.f32 %v6812_v2  ;;  %v7806_v41 = vmul.f32 -1.442695, %v6812_v2 }
0x11c7   :  { %8769 = vpow2.f32 %v7806_v41 }
0x11cf   :  { %v8768_v10 = vpop.eup %8767 }
0x11d0   :  { %6904 = vrot.lane.b32.xlu0 %v8768_v10, %s8854_s5 }
0x11d1   :  { %v8770_v27 = vpop.eup %8769 }
0x11d2   :  { %v6895_v23 = vadd.f32 1.0, %v8770_v27 }
0x11d4   :  { %8771 = vrcp.f32 %v6895_v23 }
0x11dd   :  { %v6815_v30 = vpop.permute.xlu1 %6814 }
0x11de   :  { %8021 = vmatmul.mubr.msk.f32.vlgmr.msra.gmra.mrb[28].mxu1 %vm5901_vm11, %v6815_v30  ;;  %v8772_v61 = vpop.eup %8771 }
0x11df   :  { %8448 = vmatpush3.bf16.msra.mxu1 %v11915_v11  ;;  %8042 = vmatprep.mubr.msk.f32.mxu1 %vm8853_vm10, %v12643_v59  ;;  %v6902_v36 = vmul.f32 %v8772_v61, %v6900_v48 }
0x11e0   :  { %8449 = vmatprep.subr.bf16.mxu1 %v8852_v9 }
0x11e3   :  { %8451 = vmatpush3.bf16.msra.mxu1 %v11921_v43 }
0x11e4   :  { %8458 = vmatprep.subr.bf16.mxu1 %v8852_v9 }
0x1242   :  { %v6905_v15 = vpop.permute.xlu0 %6904 }
0x1243   :  { %v6907_v40 = vmul.f32 %v8772_v61, %v6905_v15 }
0x1245   :  { %6909 = vrot.lane.b32.xlu0 %v6907_v40, %s8855_s24 }
0x12b1   :  { %v6884_v1 = vpop.f32.mrb[28].mxu1 }
0x12b2   :  { %v6889_v19 = vrot.slane %v6884_v1, 2  ;;  %v8022_v45 = vpop.f32.mrb[29].mxu1 }
0x12b4   :  { %v6891_v38 = vadd.f32 %v6889_v19, %v12116_v16 }
0x12b6   :  { %8773 = vtanh.f32 %v6891_v38  ;;  %v7807_v5 = vmul.f32 -1.442695, %v6891_v38 }
0x12b7   :  { %v6910_v39 = vpop.permute.xlu0 %6909 }
0x12b8   :  { %v12120_v25 = vadd.f32 %v6910_v39, %v6902_v36 }
0x12ba   :  { %8775 = vtanh.f32 %v12120_v25  ;;  %v7113_v41 = vrot.slane %v12120_v25, 6 }
0x12bb   :  { %8777 = vpow2.f32 %v7807_v5 }
0x12c0   :  { %v8774_v54 = vpop.eup %8773 }
0x12c1   :  { %6931 = vrot.lane.b32.xlu1 %v8774_v54, %s8854_s5 }
0x12c4   :  { %v8776_v13 = vpop.eup %8775 }
0x12c5   :  { %6915 = vrot.lane.b32.xlu0 %v8776_v13, %s8854_s5  ;;  %v8778_v21 = vpop.eup %8777 }
0x12c6   :  { %v6922_v56 = vadd.f32 1.0, %v8778_v21 }
0x12c8   :  { %8779 = vrcp.f32 %v6922_v56 }
0x12d2   :  { %v8780_v63 = vpop.eup %8779 }
0x12d3   :  { %v6929_v55 = vmul.f32 %v8780_v63, %v6927_v49 }
0x1333   :  { %v6932_v58 = vpop.permute.xlu1 %6931 }
0x1334   :  { %v6934_v35 = vmul.f32 %v8780_v63, %v6932_v58 }
0x1336   :  { %6936 = vrot.lane.b32.xlu1 %v6934_v35, %s8855_s24 }
0x1337   :  { %v6916_v44 = vpop.permute.xlu0 %6915 }
0x1338   :  { %v6918_v47 = vmul.f32 %v8772_v61, %v6916_v44 }
0x133a   :  { %6947 = vrot.lane.b32.xlu0 %v6918_v47, %s8855_s24 }
0x13a8   :  { %v6937_v12 = vpop.permute.xlu1 %6936 }
0x13a9   :  { %v12128_v46 = vadd.f32 %v6937_v12, %v6929_v55 }
0x13ab   :  { %8781 = vtanh.f32 %v12128_v46  ;;  %v7140_v5 = vrot.slane %v12128_v46, 2 }
0x13ac   :  { %v12131_v7 = vpop.permute.xlu0 %6947 }
0x13ad   :  { %8032 = vmatmul.mubr.msk.f32.vlgmr.msra.gmra.mrb[26].mxu0 %vm5901_vm11, %v12131_v7 }
0x13ae   :  { %8454 = vmatpush3.bf16.msra.mxu0 %v11771_v8  ;;  %8053 = vmatprep.mubr.msk.f32.mxu0 %vm8853_vm10, %v12643_v59 }
0x13af   :  { %8455 = vmatprep.subr.bf16.mxu0 %v8852_v9 }
0x13b2   :  { %8457 = vmatpush3.bf16.msra.mxu0 %v11773_v29 }
0x13b3   :  { %8464 = vmatprep.subr.bf16.mxu0 %v8852_v9 }
0x13b5   :  { %v8782_v0 = vpop.eup %8781 }
0x13b6   :  { %6942 = vrot.lane.b32.xlu1 %v8782_v0, %s8854_s5 }
0x1428   :  { %v6943_v3 = vpop.permute.xlu1 %6942 }
0x1429   :  { %v12142_v50 = vmul.f32 %v8780_v63, %v6943_v3 }
0x142b   :  { %v7026_v53 = vrot.slane %v12142_v50, 6 }
0x142d   :  { %7027 = vrot.lane.b32.xlu1 %v7026_v53, %s8855_s24 }
0x1480   :  { %v7017_v57 = vpop.f32.mrb[26].mxu0 }
0x1481   :  { %v7022_v51 = vrot.slane %v7017_v57, 6  ;;  %v8033_v22 = vpop.f32.mrb[27].mxu0 }
0x1483   :  { %v7024_v32 = vadd.f32 %v7022_v51, %v12102_v52 }
0x1485   :  { %8783 = vtanh.f32 %v7024_v32  ;;  %v7810_v26 = vmul.f32 -1.442695, %v7024_v32 }
0x1487   :  { %8785 = vpow2.f32 %v7810_v26 }
0x148f   :  { %v8784_v34 = vpop.eup %8783 }
0x1490   :  { %7117 = vrot.lane.b32.xlu0 %v8784_v34, %s8854_s5 }
0x1491   :  { %v8786_v62 = vpop.eup %8785 }
0x1492   :  { %v7108_v60 = vadd.f32 1.0, %v8786_v62 }
0x1494   :  { %8787 = vrcp.f32 %v7108_v60 }
0x149e   :  { %v8788_v18 = vpop.eup %8787 }
0x149f   :  { %v7028_v17 = vpop.permute.xlu1 %7027  ;;  %v7115_v23 = vmul.f32 %v8788_v18, %v7113_v41 }
0x14a0   :  { %8043 = vmatmul.mubr.msk.f32.vlgmr.msra.gmra.mrb[30].mxu1 %vm5901_vm11, %v7028_v17 }
0x14a1   :  { %8460 = vmatpush3.bf16.msra.mxu1 %v11915_v11  ;;  %8064 = vmatprep.mubr.msk.f32.mxu1 %vm8853_vm10, %v12643_v59 }
0x14a2   :  { %8461 = vmatprep.subr.bf16.mxu1 %v8852_v9 }
0x14a5   :  { %8463 = vmatpush3.bf16.msra.mxu1 %v11921_v43 }
0x14a6   :  { %8470 = vmatprep.subr.bf16.mxu1 %v8852_v9 }
0x1502   :  { %v7118_v4 = vpop.permute.xlu0 %7117 }
0x1503   :  { %v7120_v2 = vmul.f32 %v8788_v18, %v7118_v4 }
0x1505   :  { %7122 = vrot.lane.b32.xlu0 %v7120_v2, %s8855_s24 }
0x1573   :  { %v7097_v20 = vpop.f32.mrb[30].mxu1 }
0x1574   :  { %v7102_v10 = vrot.slane %v7097_v20, 4  ;;  %v8044_v30 = vpop.f32.mrb[31].mxu1 }
0x1576   :  { %v7104_v27 = vadd.f32 %v7102_v10, %v12116_v16 }
0x1577   :  { %v7123_v61 = vpop.permute.xlu0 %7122 }
0x1578   :  { %8789 = vtanh.f32 %v7104_v27  ;;  %v12158_v15 = vadd.f32 %v7123_v61, %v7115_v23  ;;  %v7811_v19 = vmul.f32 -1.442695, %v7104_v27 }
0x157a   :  { %8791 = vtanh.f32 %v12158_v15  ;;  %v7327_v26 = vrot.slane %v12158_v15, 6 }
0x157b   :  { %8793 = vpow2.f32 %v7811_v19 }
0x1582   :  { %v8790_v40 = vpop.eup %8789 }
0x1583   :  { %7144 = vrot.lane.b32.xlu1 %v8790_v40, %s8854_s5 }
0x1584   :  { %v8792_v1 = vpop.eup %8791 }
0x1585   :  { %7128 = vrot.lane.b32.xlu0 %v8792_v1, %s8854_s5  ;;  %v8794_v45 = vpop.eup %8793 }
0x1586   :  { %v7135_v38 = vadd.f32 1.0, %v8794_v45 }
0x1588   :  { %8795 = vrcp.f32 %v7135_v38 }
0x1592   :  { %v8796_v48 = vpop.eup %8795 }
0x1593   :  { %v7142_v21 = vmul.f32 %v8796_v48, %v7140_v5 }
0x15f5   :  { %v7145_v36 = vpop.permute.xlu1 %7144 }
0x15f6   :  { %v7147_v39 = vmul.f32 %v8796_v48, %v7145_v36 }
0x15f7   :  { %v7129_v25 = vpop.permute.xlu0 %7128 }
0x15f8   :  { %7149 = vrot.lane.b32.xlu1 %v7147_v39, %s8855_s24  ;;  %v12164_v54 = vmul.f32 %v8788_v18, %v7129_v25 }
0x15fa   :  { %v7160_v13 = vrot.slane %v12164_v54, 2 }
0x15fc   :  { %7161 = vrot.lane.b32.xlu0 %v7160_v13, %s8855_s24 }
0x166a   :  { %v7150_v56 = vpop.permute.xlu1 %7149 }
0x166b   :  { %v12169_v63 = vadd.f32 %v7150_v56, %v7142_v21 }
0x166d   :  { %8797 = vtanh.f32 %v12169_v63  ;;  %v7354_v15 = vrot.slane %v12169_v63, 2 }
0x166e   :  { %v7162_v58 = vpop.permute.xlu0 %7161 }
0x166f   :  { %8054 = vmatmul.mubr.msk.f32.vlgmr.msra.gmra.mrb[28].mxu0 %vm5901_vm11, %v7162_v58 }
0x1670   :  { %8466 = vmatpush3.bf16.msra.mxu0 %v11771_v8  ;;  %8075 = vmatprep.mubr.msk.f32.mxu0 %vm8853_vm10, %v12643_v59 }
0x1671   :  { %8467 = vmatprep.subr.bf16.mxu0 %v8852_v9 }
0x1674   :  { %8469 = vmatpush3.bf16.msra.mxu0 %v11773_v29 }
0x1677   :  { %v8798_v35 = vpop.eup %8797 }
0x1678   :  { %7155 = vrot.lane.b32.xlu1 %v8798_v35, %s8854_s5 }
0x16ea   :  { %v7156_v44 = vpop.permute.xlu1 %7155 }
0x16eb   :  { %v12179_v47 = vmul.f32 %v8796_v48, %v7156_v44 }
0x16ed   :  { %v7240_v49 = vrot.slane %v12179_v47, 4 }
0x16ef   :  { %7241 = vrot.lane.b32.xlu1 %v7240_v49, %s8855_s24 }
0x1742   :  { %v7231_v55 = vpop.f32.mrb[28].mxu0 }
0x1743   :  { %v7236_v12 = vrot.slane %v7231_v55, 4  ;;  %v8055_v8 = vpop.f32.mrb[29].mxu0 }
0x1745   :  { %v7238_v46 = vadd.f32 %v7236_v12, %v12102_v52 }
0x1747   :  { %8799 = vtanh.f32 %v7238_v46  ;;  %v7814_v3 = vmul.f32 -1.442695, %v7238_v46 }
0x1749   :  { %8801 = vpow2.f32 %v7814_v3 }
0x1751   :  { %v8800_v0 = vpop.eup %8799 }
0x1752   :  { %7331 = vrot.lane.b32.xlu0 %v8800_v0, %s8854_s5 }
0x1753   :  { %v8802_v53 = vpop.eup %8801 }
0x1754   :  { %v7322_v57 = vadd.f32 1.0, %v8802_v53 }
0x1756   :  { %8803 = vrcp.f32 %v7322_v57 }
0x1760   :  { %v8804_v51 = vpop.eup %8803 }
0x1761   :  { %v7242_v29 = vpop.permute.xlu1 %7241 }
0x1762   :  { %8065 = vmatmul.mubr.msk.f32.vlgmr.msra.gmra.mrb[32].mxu1 %vm5901_vm11, %v7242_v29 }
0x1763   :  { %8472 = vmatpush3.bf16.msra.mxu1 %v11915_v11  ;;  %8086 = vmatprep.mubr.msk.f32.mxu1 %vm8853_vm10, %v12643_v59 }
0x1764   :  { %8473 = vmatprep.subr.bf16.mxu1 %v8852_v9  ;;  %v7329_v9 = vmul.f32 %v8804_v51, %v7327_v26  ;;  %v7649_v26 = vld [vmem:[%s12297_s8 + $0x10] sm:$0xff] }
0x1767   :  { %8475 = vmatpush3.bf16.msra.mxu1 %v11921_v43 }
0x17c4   :  { %v7332_v22 = vpop.permute.xlu0 %7331 }
0x17c5   :  { %v7334_v32 = vmul.f32 %v8804_v51, %v7332_v22 }
0x17c7   :  { %7336 = vrot.lane.b32.xlu0 %v7334_v32, %s8855_s24 }
0x1835   :  { %v7311_v34 = vpop.f32.mrb[32].mxu1 }
0x1836   :  { %v7316_v17 = vrot.slane %v7311_v34, 6  ;;  %v8066_v11 = vpop.f32.mrb[33].mxu1 }
0x1838   :  { %v7318_v59 = vadd.f32 %v7316_v17, %v12116_v16 }
0x1839   :  { %v7337_v43 = vpop.permute.xlu0 %7336 }
0x183a   :  { %8805 = vtanh.f32 %v7318_v59  ;;  %v7339_v62 = vadd.f32 %v7337_v43, %v7329_v9  ;;  %v7815_v4 = vmul.f32 -1.442695, %v7318_v59  ;;  %v7650_v9 = vld [vmem:[%s12297_s8 + $0x18] sm:$0xff] }
0x183b   :  { %v8480_v43 = vpack.c.bf16 %v7650_v9, %v7649_v26 }
0x183c   :  { %8807 = vtanh.f32 %v7339_v62  ;;  %v7538_v0 = vrot.slane %v7339_v62, 6  ;;  %v7652_v62 = vld [vmem:[%s12297_s8 + $0x28] sm:$0xff] }
0x183d   :  { %8809 = vpow2.f32 %v7815_v4 }
0x1844   :  { %v8806_v60 = vpop.eup %8805 }
0x1845   :  { %7358 = vrot.lane.b32.xlu1 %v8806_v60, %s8854_s5 }
0x1846   :  { %v8808_v18 = vpop.eup %8807 }
0x1847   :  { %7342 = vrot.lane.b32.xlu0 %v8808_v18, %s8854_s5  ;;  %v8810_v2 = vpop.eup %8809  ;;  %v7653_v18 = vld [vmem:[%s12297_s8 + $0x30] sm:$0xff] }
0x1848   :  { %v7349_v20 = vadd.f32 1.0, %v8810_v2 }
0x184a   :  { %8811 = vrcp.f32 %v7349_v20 }
0x1854   :  { %v8812_v10 = vpop.eup %8811 }
0x1855   :  { %v7356_v40 = vmul.f32 %v8812_v10, %v7354_v15 }
0x18b7   :  { %v7359_v30 = vpop.permute.xlu1 %7358 }
0x18b8   :  { %v7361_v41 = vmul.f32 %v8812_v10, %v7359_v30 }
0x18b9   :  { %v7343_v27 = vpop.permute.xlu0 %7342 }
0x18ba   :  { %7363 = vrot.lane.b32.xlu1 %v7361_v41, %s8855_s24  ;;  %v12197_v23 = vmul.f32 %v8804_v51, %v7343_v27 }
0x18bc   :  { %v7374_v61 = vrot.slane %v12197_v23, 4 }
0x18be   :  { %7375 = vrot.lane.b32.xlu0 %v7374_v61, %s8855_s24 }
0x192c   :  { %v7364_v1 = vpop.permute.xlu1 %7363 }
0x192d   :  { %v7366_v19 = vadd.f32 %v7364_v1, %v7356_v40 }
0x192f   :  { %8813 = vtanh.f32 %v7366_v19 }
0x1930   :  { %v7376_v45 = vpop.permute.xlu0 %7375 }
0x1931   :  { %8076 = vmatmul.mubr.msk.f32.vlgmr.msra.gmra.mrb[30].mxu0 %vm5901_vm11, %v7376_v45 }
0x1939   :  { %v8814_v38 = vpop.eup %8813 }
0x193a   :  { %7369 = vrot.lane.b32.xlu1 %v8814_v38, %s8854_s5 }
0x19ac   :  { %v7370_v48 = vpop.permute.xlu1 %7369 }
0x19ad   :  { %v7372_v36 = vmul.f32 %v8812_v10, %v7370_v48 }
0x19af   :  { %v7454_v39 = vrot.slane %v7372_v36, 2 }
0x19b1   :  { %7455 = vrot.lane.b32.xlu1 %v7454_v39, %s8855_s24 }
0x1a04   :  { %v7445_v25 = vpop.f32.mrb[30].mxu0 }
0x1a05   :  { %v7450_v13 = vrot.slane %v7445_v25, 2  ;;  %v8077_v5 = vpop.f32.mrb[31].mxu0 }
0x1a07   :  { %v7452_v21 = vadd.f32 %v7450_v13, %v12102_v52 }
0x1a09   :  { %8815 = vtanh.f32 %v7452_v21  ;;  %v7818_v58 = vmul.f32 -1.442695, %v7452_v21 }
0x1a0b   :  { %8817 = vpow2.f32 %v7818_v58 }
0x1a13   :  { %v8816_v56 = vpop.eup %8815 }
0x1a14   :  { %7542 = vrot.lane.b32.xlu0 %v8816_v56, %s8854_s5 }
0x1a15   :  { %v8818_v35 = vpop.eup %8817 }
0x1a16   :  { %v7533_v44 = vadd.f32 1.0, %v8818_v35 }
0x1a18   :  { %8819 = vrcp.f32 %v7533_v44 }
0x1a22   :  { %v12208_v49 = vpop.eup %8819 }
0x1a23   :  { %v7456_v63 = vpop.permute.xlu1 %7455  ;;  %v7540_v29 = vmul.f32 %v12208_v49, %v7538_v0 }
0x1a24   :  { %8087 = vmatmul.mubr.msk.f32.vlgmr.msra.gmra.mrb[34].mxu1 %vm5901_vm11, %v7456_v63 }
0x1a86   :  { %v7543_v55 = vpop.permute.xlu0 %7542 }
0x1a87   :  { %v7545_v12 = vmul.f32 %v12208_v49, %v7543_v55 }
0x1a89   :  { %7547 = vrot.lane.b32.xlu0 %v7545_v12, %s8855_s24 }
0x1af7   :  { %v7525_v52 = vpop.f32.mrb[34].mxu1 }
0x1af8   :  { %v7529_v8 = vadd.f32 %v7525_v52, %v12116_v16  ;;  %v8088_v46 = vpop.f32.mrb[35].mxu1 }
0x1afa   :  { %8821 = vtanh.f32 %v7529_v8  ;;  %v7819_v16 = vmul.f32 -1.442695, %v7529_v8  ;;  %v7820_v8 = vld [vmem:[%s12298_s9] ss:$0 sm:$0xff] }
0x1afb   :  { %v7548_v3 = vpop.permute.xlu0 %7547 }
0x1afc   :  { %v7550_v53 = vadd.f32 %v7548_v3, %v7540_v29 }
0x1afe   :  { %8823 = vtanh.f32 %v7550_v53 }
0x1aff   :  { %8825 = vpow2.f32 %v7819_v16 }
0x1b04   :  { %v8822_v57 = vpop.eup %8821 }
0x1b05   :  { %7569 = vrot.lane.b32.xlu1 %v8822_v57, %s8854_s5 }
0x1b08   :  { %v8824_v51 = vpop.eup %8823 }
0x1b09   :  { %7553 = vrot.lane.b32.xlu0 %v8824_v51, %s8854_s5 }
0x1b0d   :  { %7590 = vrot.lane.b32.xlu0 %v12004_v42, %s8855_s24  ;;  %v8826_v42 = vpop.eup %8825 }
0x1b0e   :  { %v7560_v22 = vadd.f32 1.0, %v8826_v42 }
0x1b10   :  { %8827 = vrcp.f32 %v7560_v22 }
0x1b11   :  { %7597 = vrot.lane.b32.xlu0 %v12042_v31, %s8855_s24 }
0x1b15   :  { %7612 = vrot.lane.b32.xlu0 %v12096_v33, %s8854_s5 }
0x1b19   :  { %7619 = vrot.lane.b32.xlu0 %v12058_v37, %s8854_s5  ;;  %v7565_v37 = vrot.slane %v7366_v19, 2 }
0x1b1a   :  { %v8828_v31 = vpop.eup %8827 }
0x1b1b   :  { %v7567_v34 = vmul.f32 %v8828_v31, %v7565_v37 }
0x1b1d   :  { %7607 = vrot.lane.b32.xlu0 %v12142_v50, %s8854_s5 }
0x1b21   :  { %7626 = vrot.lane.b32.xlu0 %v12020_v24, %s8854_s5  ;;  %v7648_v24 = vld [vmem:[%s12297_s8 + $0x8] sm:$0xff] }
0x1b25   :  { %7634 = vrot.lane.b32.xlu0 %v11982_v28, %s8854_s5  ;;  %v7647_v28 = vld [vmem:[%s12297_s8] sm:$0xff] }
0x1b26   :  { %v8476_v59 = vpack.c.bf16 %v7648_v24, %v7647_v28 }
0x1b28   :  { %8477 = vmatprep.subr.bf16.mxu0 %v8476_v59 }
0x1b29   :  { %8479 = vmatpush3.bf16.msra.mxu0 %v8476_v59 }
0x1b2a   :  { %8481 = vmatprep.subr.bf16.mxu0 %v8480_v43 }
0x1b2d   :  { %8483 = vmatpush3.bf16.msra.mxu0 %v8480_v43 }
0x1b77   :  { %v7570_v32 = vpop.permute.xlu1 %7569 }
0x1b78   :  { %v7572_v33 = vmul.f32 %v8828_v31, %v7570_v32 }
0x1b7a   :  { %7574 = vrot.lane.b32.xlu1 %v7572_v33, %s8855_s24 }
0x1bec   :  { %v7575_v17 = vpop.permute.xlu1 %7574 }
0x1bed   :  { %v7577_v50 = vadd.f32 %v7575_v17, %v7567_v34 }
0x1bef   :  { %8829 = vtanh.f32 %v7577_v50 }
0x1bf9   :  { %v8830_v11 = vpop.eup %8829 }
0x1bfa   :  { %7580 = vrot.lane.b32.xlu1 %v8830_v11, %s8854_s5 }
0x1bfe   :  { %7593 = vrot.lane.b32.xlu1 %v7372_v36, %s8854_s5 }
0x1c02   :  { %7600 = vrot.lane.b32.xlu1 %v12179_v47, %s8854_s5  ;;  %v7651_v47 = vld [vmem:[%s12297_s8 + $0x20] sm:$0xff] }
0x1c03   :  { %v8484_v60 = vpack.c.bf16 %v7652_v62, %v7651_v47 }
0x1c05   :  { %8485 = vmatprep.subr.bf16.mxu0 %v8484_v60 }
0x1c06   :  { %7616 = vrot.lane.b32.xlu1 %v12164_v54, %s8855_s24  ;;  %8487 = vmatpush3.bf16.msra.mxu0 %v8484_v60  ;;  %v7654_v54 = vld [vmem:[%s12297_s8 + $0x38] sm:$0xff] }
0x1c07   :  { %v8488_v4 = vpack.c.bf16 %v7654_v54, %v7653_v18 }
0x1c09   :  { %8489 = vmatprep.subr.bf16.mxu0 %v8488_v4 }
0x1c0a   :  { %7604 = vrot.lane.b32.xlu1 %v12080_v6, %s8855_s24  ;;  %8491 = vmatpush3.bf16.msra.mxu0 %v8488_v4  ;;  %v7554_v6 = vpop.permute.xlu0 %7553 }
0x1c0b   :  { %v7556_v10 = vmul.f32 %v12208_v49, %v7554_v6 }
0x1c0e   :  { %7623 = vrot.lane.b32.xlu1 %v12197_v23, %s8855_s24  ;;  %v7591_v30 = vpop.permute.xlu0 %7590 }
0x1c12   :  { %v7598_v27 = vpop.permute.xlu0 %7597 }
0x1c16   :  { %v7613_v61 = vpop.permute.xlu0 %7612 }
0x1c17   :  { %v7615_v56 = vsel %vm5901_vm11, %v12131_v7, %v7613_v61 }
0x1c1a   :  { %v7620_v40 = vpop.permute.xlu0 %7619 }
0x1c1e   :  { %v7608_v19 = vpop.permute.xlu0 %7607 }
0x1c22   :  { %v7627_v38 = vpop.permute.xlu0 %7626 }
0x1c26   :  { %v7635_v35 = vpop.permute.xlu0 %7634 }
0x1c6c   :  { %v7581_v2 = vpop.permute.xlu1 %7580 }
0x1c6d   :  { %v7583_v20 = vmul.f32 %v8828_v31, %v7581_v2 }
0x1c6f   :  { %7586 = vrot.lane.b32.xlu1 %v7583_v20, %s8854_s5 }
0x1c70   :  { %v7594_v41 = vpop.permute.xlu1 %7593 }
0x1c71   :  { %v7596_v36 = vsel %vm5901_vm11, %v7591_v30, %v7594_v41 }
0x1c73   :  { %7631 = vrot.lane.b32.xlu1 %v7556_v10, %s8855_s24 }
0x1c74   :  { %v7601_v23 = vpop.permute.xlu1 %7600 }
0x1c75   :  { %v7603_v13 = vsel %vm5901_vm11, %v7598_v27, %v7601_v23 }
0x1c78   :  { %v7617_v15 = vpop.permute.xlu1 %7616 }
0x1c79   :  { %v7622_v39 = vsel %vm5901_vm11, %v7617_v15, %v7620_v40 }
0x1c7a   :  { %v7644_v44 = vsel %vm7638_vm12, %v7615_v56, %v7622_v39 }
0x1c7c   :  { %v7605_v1 = vpop.permute.xlu1 %7604 }
0x1c7d   :  { %v7610_v63 = vsel %vm5901_vm11, %v7605_v1, %v7608_v19 }
0x1c80   :  { %v7624_v45 = vpop.permute.xlu1 %7623 }
0x1c81   :  { %v7629_v5 = vsel %vm5901_vm11, %v7624_v45, %v7627_v38 }
0x1c82   :  { %v7645_v12 = vsel %vm7640_vm14, %v7644_v44, %v7629_v5 }
0x1ce1   :  { %v7587_v48 = vpop.permute.xlu1 %7586 }
0x1ce2   :  { %v7589_v25 = vsel %vm5901_vm11, %v11971_v14, %v7587_v48 }
0x1ce3   :  { %v7639_v21 = vsel %vm7638_vm12, %v7589_v25, %v7596_v36 }
0x1ce4   :  { %v7641_v58 = vsel %vm7640_vm14, %v7639_v21, %v7603_v13 }
0x1ce5   :  { %v7632_v49 = vpop.permute.xlu1 %7631  ;;  %v7643_v55 = vsel %vm7642_vm13, %v7641_v58, %v7610_v63 }
0x1ce6   :  { %v7637_v14 = vsel %vm5901_vm11, %v7632_v49, %v7635_v35  ;;  %8105 = vmatprep.mubr.msk.f32.mxu0 %vm5809_vm9, %v7643_v55 }
0x1ce7   :  { %v7646_v52 = vsel %vm7642_vm13, %v7645_v12, %v7637_v14 }
0x1ce8   :  { %8106 = vmatmul.mubr.msk.f32.vlgmr.msra.gmra.mrb[32].mxu0 %vm5809_vm9, %v7646_v52 }
0x1dbb   :  { %v8107_v7 = vpop.f32.mrb[32].mxu0 }
0x1dbc   :  { %v7740_v46 = vadd.f32 %v8107_v7, %v7820_v8  ;;  %v7734_v0 = vpop.f32.mrb[33].mxu0 }
0x1dbd   :  { %v7735_v29 = vadd.f32 %v7820_v8, %v7734_v0 }
0x1dbe   :  { %7744 = vst [vmem:[%s12299_s10 + $0x8] sm:$0xff] %v7740_v46 }
0x1dbf   :  { %7743 = vst [vmem:[%s12299_s10] sm:$0xff] %v7735_v29 }

</bundles_post_ra>
